<compile_context>
chip_gen: v6e
topology: v6e:2x2x1
jax: 0.10.0
libtpu: 0.0.40
codegen_flags: <defaults>
</compile_context>

<pallas_src>
import functools

import jax
import jax.numpy as jnp
from jax import lax
from jax.experimental import pallas as pl
from jax.experimental.pallas import tpu as pltpu


def _round_up(x, m):
    return (x + m - 1) // m * m


def _pick_tk(kp, cap=1536):
    """Largest multiple of 128 that divides kp and is <= cap."""
    best = 128
    d = 128
    while d <= min(cap, kp):
        if kp % d == 0:
            best = d
        d += 128
    return best


# --------------------------------------------------------------------------
# Pallas kernel 1: tiled bf16 matmul + bias (+ optional fused ReLU)
# --------------------------------------------------------------------------
def _mm_kernel(a_ref, b_ref, bias_ref, o_ref, acc_ref, *, apply_relu):
    k = pl.program_id(2)

    @pl.when(k == 0)
    def _():
        acc_ref[...] = jnp.zeros_like(acc_ref)

    acc_ref[...] += jnp.dot(a_ref[...], b_ref[...],
                            preferred_element_type=jnp.float32)

    @pl.when(k == pl.num_programs(2) - 1)
    def _():
        out = acc_ref[...] + bias_ref[...]
        if apply_relu:
            out = jnp.maximum(out, 0.0)
        o_ref[...] = out.astype(o_ref.dtype)


def matmul_bias(a, b, bias, *, relu=False, out_dtype=jnp.bfloat16):
    """a: [M, K]; b: [Kp, Np] bf16 (pre-padded, rows beyond K are zero);
    bias: [1, Np] f32.  Returns [M, Np]."""
    M, K = a.shape
    Kp, Np = b.shape
    assert Kp % 128 == 0 and Np % 128 == 0 and Kp >= K

    a = a.astype(jnp.bfloat16)
    if M > 128:
        Mp, tm = _round_up(M, 128), 128
    else:
        Mp = _round_up(M, 16)
        tm = Mp
    if Mp != M or Kp != K:
        a = jnp.pad(a, ((0, Mp - M), (0, Kp - K)))

    tn = 256 if (Np % 256 == 0 and Np >= 512) else 128
    tk = _pick_tk(Kp)

    grid = (Mp // tm, Np // tn, Kp // tk)
    out = pl.pallas_call(
        functools.partial(_mm_kernel, apply_relu=relu),
        out_shape=jax.ShapeDtypeStruct((Mp, Np), out_dtype),
        grid_spec=pltpu.PrefetchScalarGridSpec(
            num_scalar_prefetch=0,
            grid=grid,
            in_specs=[
                pl.BlockSpec((tm, tk), lambda i, j, k: (i, k)),
                pl.BlockSpec((tk, tn), lambda i, j, k: (k, j)),
                pl.BlockSpec((1, tn), lambda i, j, k: (0, j)),
            ],
            out_specs=pl.BlockSpec((tm, tn), lambda i, j, k: (i, j)),
            scratch_shapes=[pltpu.VMEM((tm, tn), jnp.float32)],
        ),
        compiler_params=pltpu.CompilerParams(
            dimension_semantics=("parallel", "parallel", "arbitrary")),
    )(a, b, bias)
    if Mp != M:
        out = out[:M]
    return out


# --------------------------------------------------------------------------
# Pallas kernel 2: MaxPool2d((3,3), stride=2) — gridded over batch, taps
# computed in-kernel (no 9x HBM stack), single lane-dense store per image.
# --------------------------------------------------------------------------
def _maxpool_kernel(x_ref, o_ref, *, oh, ow):
    x = x_ref[0]                                            # (H, W, C)
    rows = []
    for i in range(oh):
        r = jnp.maximum(jnp.maximum(x[2 * i], x[2 * i + 1]), x[2 * i + 2])
        rows.append(r)                                      # (W, C)
    rm = jnp.stack(rows, axis=0)                            # (OH, W, C)
    cols = []
    for j in range(ow):
        c = jnp.maximum(
            jnp.maximum(rm[:, 2 * j:2 * j + 1], rm[:, 2 * j + 1:2 * j + 2]),
            rm[:, 2 * j + 2:2 * j + 3])                     # (OH, 1, C)
        cols.append(c)
    o_ref[0] = jnp.concatenate(cols, axis=1)                # (OH, OW, C)


def maxpool3s2(x):
    N, H, W, C = x.shape
    OH = (H - 3) // 2 + 1
    OW = (W - 3) // 2 + 1
    return pl.pallas_call(
        functools.partial(_maxpool_kernel, oh=OH, ow=OW),
        out_shape=jax.ShapeDtypeStruct((N, OH, OW, C), x.dtype),
        grid=(N,),
        in_specs=[pl.BlockSpec((1, H, W, C), lambda n: (n, 0, 0, 0))],
        out_specs=pl.BlockSpec((1, OH, OW, C), lambda n: (n, 0, 0, 0)),
        compiler_params=pltpu.CompilerParams(
            dimension_semantics=("parallel",)),
    )(x)


# --------------------------------------------------------------------------
# Pallas kernel 3: AdaptiveAvgPool2d((6,6)) — gridded over batch, vectorized
# (single lane-dense output store per image), PyTorch window semantics.
# --------------------------------------------------------------------------
def _adaptive_avgpool_kernel(x_ref, o_ref, *, oh, ow):
    x = x_ref[0].astype(jnp.float32)                        # (H, W, C)
    H, W, _ = x.shape
    rows = []
    for i in range(oh):
        h0 = (i * H) // oh
        h1 = -(((-(i + 1)) * H) // oh)
        cols = []
        for j in range(ow):
            w0 = (j * W) // ow
            w1 = -(((-(j + 1)) * W) // ow)
            win = x[h0:h1, w0:w1, :]
            m = jnp.sum(win, axis=(0, 1), keepdims=True) * (
                1.0 / float((h1 - h0) * (w1 - w0)))         # (1, 1, C)
            cols.append(m)
        rows.append(jnp.concatenate(cols, axis=1))          # (1, OW, C)
    o_ref[0] = jnp.concatenate(rows, axis=0).astype(o_ref.dtype)


def adaptive_avgpool(x, oh=6, ow=6):
    N, H, W, C = x.shape
    return pl.pallas_call(
        functools.partial(_adaptive_avgpool_kernel, oh=oh, ow=ow),
        out_shape=jax.ShapeDtypeStruct((N, oh, ow, C), x.dtype),
        grid=(N,),
        in_specs=[pl.BlockSpec((1, H, W, C), lambda n: (n, 0, 0, 0))],
        out_specs=pl.BlockSpec((1, oh, ow, C), lambda n: (n, 0, 0, 0)),
        compiler_params=pltpu.CompilerParams(
            dimension_semantics=("parallel",)),
    )(x)


# --------------------------------------------------------------------------
# Conv2dAuto + BatchNorm2d (eval, pre-folded) + ReLU via im2col + matmul kernel
# --------------------------------------------------------------------------
def conv2d_bn_relu(x, layer):
    """x: NHWC bf16 (channels lane-padded); layer: prepared dict."""
    kh, kw, stride, pad = layer['kh'], layer['kw'], layer['stride'], layer['pad']
    bmat, bias = layer['bmat'], layer['bias']
    N, H, W, C = x.shape
    OH = (H + 2 * pad - kh) // stride + 1
    OW = (W + 2 * pad - kw) // stride + 1
    xp = jnp.pad(x, ((0, 0), (pad, pad), (pad, pad), (0, 0)))

    cols = []
    for i in range(kh):
        for j in range(kw):
            cols.append(lax.slice(
                xp, (0, i, j, 0),
                (N, i + (OH - 1) * stride + 1, j + (OW - 1) * stride + 1, C),
                (1, stride, stride, 1)))
    patches = jnp.stack(cols, axis=3)                       # N, OH, OW, KH*KW, C
    a = patches.reshape(N * OH * OW, kh * kw * C)
    # TODO(synk): im2col is still materialized in XLA (bf16); fusing the tap
    # gather into the matmul K grid axis would remove this round trip at large
    # resolutions.
    y = matmul_bias(a, bmat, bias, relu=True)
    return y.reshape(N, OH, OW, bmat.shape[1])


# --------------------------------------------------------------------------
# Parameter initialization (deterministic, synthetic — mirrors nn.Module state)
# --------------------------------------------------------------------------
def init_params(key, num_classes):
    eps = 1e-5

    def conv_params(k, oc, ic, kh, kw):
        k1, k2, k3, k4, k5, k6 = jax.random.split(k, 6)
        w = jax.random.normal(k1, (oc, ic, kh, kw), jnp.float32) * 0.05
        b = jax.random.normal(k2, (oc,), jnp.float32) * 0.05
        gamma = 1.0 + 0.1 * jax.random.normal(k3, (oc,), jnp.float32)
        beta = 0.1 * jax.random.normal(k4, (oc,), jnp.float32)
        rmean = 0.1 * jax.random.normal(k5, (oc,), jnp.float32)
        rvar = 0.5 + 0.1 * jnp.abs(jax.random.normal(k6, (oc,), jnp.float32))
        scale = gamma / jnp.sqrt(rvar + eps)
        shift = beta - rmean * scale
        return dict(w=w, b=b, scale=scale, shift=shift)

    def linear_params(k, out_f, in_f):
        k1, k2 = jax.random.split(k)
        w = jax.random.normal(k1, (out_f, in_f), jnp.float32) * 0.02
        b = jax.random.normal(k2, (out_f,), jnp.float32) * 0.02
        return dict(w=w, b=b)

    ks = jax.random.split(key, 8)
    return dict(
        conv1=conv_params(ks[0], 96, 3, 11, 11),
        conv2=conv_params(ks[1], 256, 96, 5, 5),
        conv3=conv_params(ks[2], 384, 256, 3, 3),
        conv4=conv_params(ks[3], 384, 384, 3, 3),
        conv5=conv_params(ks[4], 256, 384, 3, 3),
        fc1=linear_params(ks[5], 4096, 256 * 6 * 6),
        fc2=linear_params(ks[6], 4096, 4096),
        fc3=linear_params(ks[7], num_classes, 4096),
    )


# --------------------------------------------------------------------------
# One-time parameter preparation: fold BN, pad to 128-lane channels,
# transpose to matmul [K, N] layout, pad K, cast weights to bf16.
# --------------------------------------------------------------------------
def prepare_params(params, num_classes):
    def prep_conv(cp, kh, kw, stride, pad, ic_pad=None):
        w, b = cp['w'], cp['b']
        scale, shift = cp['scale'], cp['shift']
        oc, ic = w.shape[0], w.shape[1]
        w_f = w * scale[:, None, None, None]
        b_f = b * scale + shift
        icp = ic if ic_pad is None else ic_pad
        if icp != ic:
            w_f = jnp.pad(w_f, ((0, 0), (0, icp - ic), (0, 0), (0, 0)))
        ocp = _round_up(oc, 128)
        # (OC, ICp, KH, KW) -> (KH, KW, ICp, OC) -> (KH*KW*ICp, OC)
        bmat = jnp.transpose(w_f, (2, 3, 1, 0)).reshape(kh * kw * icp, oc)
        if ocp != oc:
            bmat = jnp.pad(bmat, ((0, 0), (0, ocp - oc)))
        kp = _round_up(bmat.shape[0], 128)
        if kp != bmat.shape[0]:
            bmat = jnp.pad(bmat, ((0, kp - bmat.shape[0]), (0, 0)))
        bias = jnp.pad(b_f, (0, ocp - oc)).reshape(1, ocp).astype(jnp.float32)
        return dict(bmat=bmat.astype(jnp.bfloat16), bias=bias,
                    kh=kh, kw=kw, stride=stride, pad=pad)

    def prep_fc(fp):
        w, b = fp['w'], fp['b']                     # (out, in)
        out_f, in_f = w.shape
        np_ = _round_up(out_f, 128)
        kp = _round_up(in_f, 128)
        bmat = jnp.pad(w.T, ((0, kp - in_f), (0, np_ - out_f)))
        bias = jnp.pad(b, (0, np_ - out_f)).reshape(1, np_).astype(jnp.float32)
        return dict(bmat=bmat.astype(jnp.bfloat16), bias=bias)

    return dict(
        conv1=prep_conv(params['conv1'], 11, 11, 4, 5),
        conv2=prep_conv(params['conv2'], 5, 5, 1, 2, ic_pad=128),  # conv1 OC 96->128
        conv3=prep_conv(params['conv3'], 3, 3, 1, 1),
        conv4=prep_conv(params['conv4'], 3, 3, 1, 1),
        conv5=prep_conv(params['conv5'], 3, 3, 1, 1),
        fc1=prep_fc(params['fc1']),
        fc2=prep_fc(params['fc2']),
        fc3=prep_fc(params['fc3']),
        num_classes=num_classes,
    )


# --------------------------------------------------------------------------
# Full AlexNet forward (eval-mode semantics)
# --------------------------------------------------------------------------
def alexnet_forward(prep, x_nchw):
    # NCHW f32 (PyTorch) -> NHWC bf16 (kernel layout)
    x = jnp.transpose(x_nchw, (0, 2, 3, 1)).astype(jnp.bfloat16)

    # features
    x = conv2d_bn_relu(x, prep['conv1'])      # channels carried 96 -> 128 lanes
    x = maxpool3s2(x)
    x = conv2d_bn_relu(x, prep['conv2'])
    x = maxpool3s2(x)
    x = conv2d_bn_relu(x, prep['conv3'])
    x = conv2d_bn_relu(x, prep['conv4'])
    x = conv2d_bn_relu(x, prep['conv5'])      # 256 channels, no padding left
    x = maxpool3s2(x)

    # AdaptiveAvgPool2d((6, 6))
    x = adaptive_avgpool(x, 6, 6)

    # torch.flatten(x, 1) flattens in (C, H, W) order -> go back to NCHW first
    n = x.shape[0]
    x = jnp.transpose(x, (0, 3, 1, 2)).reshape(n, -1)

    # classifier
    # TODO(synk): nn.Dropout layers are identity here (eval-mode semantics);
    # training-mode stochastic dropout / batch-stat BatchNorm are not reproduced.
    x = matmul_bias(x, prep['fc1']['bmat'], prep['fc1']['bias'], relu=True)
    x = matmul_bias(x, prep['fc2']['bmat'], prep['fc2']['bias'], relu=True)
    x = matmul_bias(x, prep['fc3']['bmat'], prep['fc3']['bias'], relu=False,
                    out_dtype=jnp.float32)
    return x[:, :prep['num_classes']]


if __name__ == "__main__":
    key = jax.random.PRNGKey(0)
    pkey, xkey = jax.random.split(key)

    num_classes = 16
    raw_params = init_params(pkey, num_classes)
    prep = prepare_params(raw_params, num_classes)   # one-time, outside jit

    # Small input consistent with the module's conv/pool pipeline:
    # 64 -> conv1(s4,p5) 16 -> pool 7 -> conv2 7 -> pool 3 -> conv3/4/5 3
    #    -> pool 1 -> adaptive-avg-pool 6x6 -> flatten 9216 -> 4096 -> 4096 -> 16
    x = jax.random.normal(xkey, (2, 3, 64, 64), jnp.float32)

    fwd = jax.jit(lambda inp: alexnet_forward(prep, inp))
    out = jax.block_until_ready(fwd(x))
    assert out.shape == (2, num_classes)
    assert jnp.all(jnp.isfinite(out))
    print("KERNEL_OK")
</pallas_src>

<mosaic_0001>
module attributes {stable_mosaic.version = 11 : i64} {
  func.func @_mm_kernel(%arg0: i32, %arg1: i32, %arg2: i32, %arg3: memref<128x384xbf16, #tpu.memory_space<vmem>>, %arg4: memref<384x128xbf16, #tpu.memory_space<vmem>>, %arg5: memref<1x128xf32, #tpu.memory_space<vmem>>, %arg6: memref<128x128xbf16, #tpu.memory_space<vmem>>, %arg7: memref<128x128xf32, #tpu.memory_space<vmem>>) attributes {dimension_semantics = [#tpu.dimension_semantics<parallel>, #tpu.dimension_semantics<parallel>, #tpu.dimension_semantics<arbitrary>], iteration_bounds = array<i64: 4, 1, 1>, scalar_prefetch = 0 : i64, scratch_operands = 1 : i64, tpu.core_type = #tpu.core_type<tc>, window_params = [{transform_indices = @transform_0, window_bounds = array<i64: 128, 384>}, {transform_indices = @transform_1, window_bounds = array<i64: 384, 128>}, {transform_indices = @transform_2, window_bounds = array<i64: 1, 128>}, {transform_indices = @transform_3, window_bounds = array<i64: 128, 128>}]} {
    %c0_i32 = arith.constant 0 : i32
    %0 = arith.cmpi eq, %arg2, %c0_i32 : i32
    %1 = arith.extui %0 : i1 to i32
    %c0_i32_0 = arith.constant 0 : i32
    %2 = arith.cmpi ne, %1, %c0_i32_0 : i32
    scf.if %2 {
      %cst_10 = arith.constant 0.000000e+00 : f32
      %12 = vector.broadcast %cst_10 : f32 to vector<128x128xf32>
      %c0_11 = arith.constant 0 : index
      %c0_12 = arith.constant 0 : index
      %13 = vector.load %arg7[%c0_11, %c0_12] : memref<128x128xf32, #tpu.memory_space<vmem>>, vector<128x128xf32>
      tpu.vector_store %arg7[%c0_11, %c0_12], %12 {strides = array<i32>} : memref<128x128xf32, #tpu.memory_space<vmem>>, vector<128x128xf32>,
    } else {
    }
    %c0 = arith.constant 0 : index
    %c0_1 = arith.constant 0 : index
    %3 = vector.load %arg7[%c0, %c0_1] : memref<128x128xf32, #tpu.memory_space<vmem>>, vector<128x128xf32>
    %c0_2 = arith.constant 0 : index
    %c0_3 = arith.constant 0 : index
    %4 = vector.load %arg3[%c0_2, %c0_3] : memref<128x384xbf16, #tpu.memory_space<vmem>>, vector<128x384xbf16>
    %c0_4 = arith.constant 0 : index
    %c0_5 = arith.constant 0 : index
    %5 = vector.load %arg4[%c0_4, %c0_5] : memref<384x128xbf16, #tpu.memory_space<vmem>>, vector<384x128xbf16>
    %cst = arith.constant dense<0.000000e+00> : vector<128x128xf32>
    %6 = tpu.matmul %4, %5, %cst {dimension_numbers = #tpu.dot_dimension_numbers<[1], [0], [0], [1], [0, 0, 1, 1], [], []>} : vector<128x384xbf16>, vector<384x128xbf16>, vector<128x128xf32> -> vector<128x128xf32>
    %7 = arith.addf %3, %6 : vector<128x128xf32>
    %c0_6 = arith.constant 0 : index
    %c0_7 = arith.constant 0 : index
    %8 = vector.load %arg7[%c0_6, %c0_7] : memref<128x128xf32, #tpu.memory_space<vmem>>, vector<128x128xf32>
    tpu.vector_store %arg7[%c0_6, %c0_7], %7 {strides = array<i32>} : memref<128x128xf32, #tpu.memory_space<vmem>>, vector<128x128xf32>,
    %c0_i32_8 = arith.constant 0 : i32
    %9 = arith.cmpi eq, %arg2, %c0_i32_8 : i32
    %10 = arith.extui %9 : i1 to i32
    %c0_i32_9 = arith.constant 0 : i32
    %11 = arith.cmpi ne, %10, %c0_i32_9 : i32
    scf.if %11 {
      %c0_10 = arith.constant 0 : index
      %c0_11 = arith.constant 0 : index
      %12 = vector.load %arg7[%c0_10, %c0_11] : memref<128x128xf32, #tpu.memory_space<vmem>>, vector<128x128xf32>
      %c0_12 = arith.constant 0 : index
      %c0_13 = arith.constant 0 : index
      %13 = vector.load %arg5[%c0_12, %c0_13] : memref<1x128xf32, #tpu.memory_space<vmem>>, vector<1x128xf32>
      %14 = vector.broadcast %13 : vector<1x128xf32> to vector<128x128xf32>
      %15 = arith.addf %12, %14 : vector<128x128xf32>
      %cst_14 = arith.constant 0.000000e+00 : f32
      %16 = vector.broadcast %cst_14 : f32 to vector<128x128xf32>
      %17 = arith.maximumf %15, %16 : vector<128x128xf32>
      %18 = arith.truncf %17 : vector<128x128xf32> to vector<128x128xbf16>
      %c0_15 = arith.constant 0 : index
      %c0_16 = arith.constant 0 : index
      %19 = vector.load %arg6[%c0_15, %c0_16] : memref<128x128xbf16, #tpu.memory_space<vmem>>, vector<128x128xbf16>
      tpu.vector_store %arg6[%c0_15, %c0_16], %18 {strides = array<i32>} : memref<128x128xbf16, #tpu.memory_space<vmem>>, vector<128x128xbf16>,
    } else {
    }
    return
  }
  func.func @transform_0(%arg0: i32, %arg1: i32, %arg2: i32) -> (i32, i32) {
    %c0_i32 = arith.constant 0 : i32
    return %arg0, %arg2 : i32, i32
  }
  func.func @transform_1(%arg0: i32, %arg1: i32, %arg2: i32) -> (i32, i32) {
    %c0_i32 = arith.constant 0 : i32
    return %arg2, %arg1 : i32, i32
  }
  func.func @transform_2(%arg0: i32, %arg1: i32, %arg2: i32) -> (i32, i32) {
    %c0_i32 = arith.constant 0 : i32
    %c0_i32_0 = arith.constant 0 : i32
    return %c0_i32, %arg1 : i32, i32
  }
  func.func @transform_3(%arg0: i32, %arg1: i32, %arg2: i32) -> (i32, i32) {
    %c0_i32 = arith.constant 0 : i32
    return %arg0, %arg1 : i32, i32
  }
}

module attributes {stable_mosaic.version = 11 : i64} {
  func.func @_maxpool_kernel(%arg0: i32, %arg1: memref<1x16x16x128xbf16, #tpu.memory_space<vmem>>, %arg2: memref<1x7x7x128xbf16, #tpu.memory_space<vmem>>) attributes {dimension_semantics = [#tpu.dimension_semantics<parallel>], iteration_bounds = array<i64: 2>, scalar_prefetch = 0 : i64, scratch_operands = 0 : i64, tpu.core_type = #tpu.core_type<tc>, window_params = [{transform_indices = @transform_0, window_bounds = array<i64: 1, 16, 16, 128>}, {transform_indices = @transform_1, window_bounds = array<i64: 1, 7, 7, 128>}]} {
    %c0 = arith.constant 0 : index
    %c0_0 = arith.constant 0 : index
    %c0_1 = arith.constant 0 : index
    %c0_2 = arith.constant 0 : index
    %0 = vector.load %arg1[%c0, %c0_0, %c0_1, %c0_2] : memref<1x16x16x128xbf16, #tpu.memory_space<vmem>>, vector<1x16x16x128xbf16>
    %1 = vector.shape_cast %0 : vector<1x16x16x128xbf16> to vector<16x16x128xbf16>
    %2 = vector.extract_strided_slice %1 {offsets = [0, 0, 0], sizes = [1, 16, 128], strides = [1, 1, 1]} : vector<16x16x128xbf16> to vector<1x16x128xbf16>
    %3 = vector.shape_cast %2 : vector<1x16x128xbf16> to vector<16x128xbf16>
    %4 = vector.extract_strided_slice %1 {offsets = [1, 0, 0], sizes = [1, 16, 128], strides = [1, 1, 1]} : vector<16x16x128xbf16> to vector<1x16x128xbf16>
    %5 = vector.shape_cast %4 : vector<1x16x128xbf16> to vector<16x128xbf16>
    %6 = arith.maximumf %3, %5 : vector<16x128xbf16>
    %7 = vector.extract_strided_slice %1 {offsets = [2, 0, 0], sizes = [1, 16, 128], strides = [1, 1, 1]} : vector<16x16x128xbf16> to vector<1x16x128xbf16>
    %8 = vector.shape_cast %7 : vector<1x16x128xbf16> to vector<16x128xbf16>
    %9 = arith.maximumf %6, %8 : vector<16x128xbf16>
    %10 = vector.extract_strided_slice %1 {offsets = [2, 0, 0], sizes = [1, 16, 128], strides = [1, 1, 1]} : vector<16x16x128xbf16> to vector<1x16x128xbf16>
    %11 = vector.shape_cast %10 : vector<1x16x128xbf16> to vector<16x128xbf16>
    %12 = vector.extract_strided_slice %1 {offsets = [3, 0, 0], sizes = [1, 16, 128], strides = [1, 1, 1]} : vector<16x16x128xbf16> to vector<1x16x128xbf16>
    %13 = vector.shape_cast %12 : vector<1x16x128xbf16> to vector<16x128xbf16>
    %14 = arith.maximumf %11, %13 : vector<16x128xbf16>
    %15 = vector.extract_strided_slice %1 {offsets = [4, 0, 0], sizes = [1, 16, 128], strides = [1, 1, 1]} : vector<16x16x128xbf16> to vector<1x16x128xbf16>
    %16 = vector.shape_cast %15 : vector<1x16x128xbf16> to vector<16x128xbf16>
    %17 = arith.maximumf %14, %16 : vector<16x128xbf16>
    %18 = vector.extract_strided_slice %1 {offsets = [4, 0, 0], sizes = [1, 16, 128], strides = [1, 1, 1]} : vector<16x16x128xbf16> to vector<1x16x128xbf16>
    %19 = vector.shape_cast %18 : vector<1x16x128xbf16> to vector<16x128xbf16>
    %20 = vector.extract_strided_slice %1 {offsets = [5, 0, 0], sizes = [1, 16, 128], strides = [1, 1, 1]} : vector<16x16x128xbf16> to vector<1x16x128xbf16>
    %21 = vector.shape_cast %20 : vector<1x16x128xbf16> to vector<16x128xbf16>
    %22 = arith.maximumf %19, %21 : vector<16x128xbf16>
    %23 = vector.extract_strided_slice %1 {offsets = [6, 0, 0], sizes = [1, 16, 128], strides = [1, 1, 1]} : vector<16x16x128xbf16> to vector<1x16x128xbf16>
    %24 = vector.shape_cast %23 : vector<1x16x128xbf16> to vector<16x128xbf16>
    %25 = arith.maximumf %22, %24 : vector<16x128xbf16>
    %26 = vector.extract_strided_slice %1 {offsets = [6, 0, 0], sizes = [1, 16, 128], strides = [1, 1, 1]} : vector<16x16x128xbf16> to vector<1x16x128xbf16>
    %27 = vector.shape_cast %26 : vector<1x16x128xbf16> to vector<16x128xbf16>
    %28 = vector.extract_strided_slice %1 {offsets = [7, 0, 0], sizes = [1, 16, 128], strides = [1, 1, 1]} : vector<16x16x128xbf16> to vector<1x16x128xbf16>
    %29 = vector.shape_cast %28 : vector<1x16x128xbf16> to vector<16x128xbf16>
    %30 = arith.maximumf %27, %29 : vector<16x128xbf16>
    %31 = vector.extract_strided_slice %1 {offsets = [8, 0, 0], sizes = [1, 16, 128], strides = [1, 1, 1]} : vector<16x16x128xbf16> to vector<1x16x128xbf16>
    %32 = vector.shape_cast %31 : vector<1x16x128xbf16> to vector<16x128xbf16>
    %33 = arith.maximumf %30, %32 : vector<16x128xbf16>
    %34 = vector.extract_strided_slice %1 {offsets = [8, 0, 0], sizes = [1, 16, 128], strides = [1, 1, 1]} : vector<16x16x128xbf16> to vector<1x16x128xbf16>
    %35 = vector.shape_cast %34 : vector<1x16x128xbf16> to vector<16x128xbf16>
    %36 = vector.extract_strided_slice %1 {offsets = [9, 0, 0], sizes = [1, 16, 128], strides = [1, 1, 1]} : vector<16x16x128xbf16> to vector<1x16x128xbf16>
    %37 = vector.shape_cast %36 : vector<1x16x128xbf16> to vector<16x128xbf16>
    %38 = arith.maximumf %35, %37 : vector<16x128xbf16>
    %39 = vector.extract_strided_slice %1 {offsets = [10, 0, 0], sizes = [1, 16, 128], strides = [1, 1, 1]} : vector<16x16x128xbf16> to vector<1x16x128xbf16>
    %40 = vector.shape_cast %39 : vector<1x16x128xbf16> to vector<16x128xbf16>
    %41 = arith.maximumf %38, %40 : vector<16x128xbf16>
    %42 = vector.extract_strided_slice %1 {offsets = [10, 0, 0], sizes = [1, 16, 128], strides = [1, 1, 1]} : vector<16x16x128xbf16> to vector<1x16x128xbf16>
    %43 = vector.shape_cast %42 : vector<1x16x128xbf16> to vector<16x128xbf16>
    %44 = vector.extract_strided_slice %1 {offsets = [11, 0, 0], sizes = [1, 16, 128], strides = [1, 1, 1]} : vector<16x16x128xbf16> to vector<1x16x128xbf16>
    %45 = vector.shape_cast %44 : vector<1x16x128xbf16> to vector<16x128xbf16>
    %46 = arith.maximumf %43, %45 : vector<16x128xbf16>
    %47 = vector.extract_strided_slice %1 {offsets = [12, 0, 0], sizes = [1, 16, 128], strides = [1, 1, 1]} : vector<16x16x128xbf16> to vector<1x16x128xbf16>
    %48 = vector.shape_cast %47 : vector<1x16x128xbf16> to vector<16x128xbf16>
    %49 = arith.maximumf %46, %48 : vector<16x128xbf16>
    %50 = vector.extract_strided_slice %1 {offsets = [12, 0, 0], sizes = [1, 16, 128], strides = [1, 1, 1]} : vector<16x16x128xbf16> to vector<1x16x128xbf16>
    %51 = vector.shape_cast %50 : vector<1x16x128xbf16> to vector<16x128xbf16>
    %52 = vector.extract_strided_slice %1 {offsets = [13, 0, 0], sizes = [1, 16, 128], strides = [1, 1, 1]} : vector<16x16x128xbf16> to vector<1x16x128xbf16>
    %53 = vector.shape_cast %52 : vector<1x16x128xbf16> to vector<16x128xbf16>
    %54 = arith.maximumf %51, %53 : vector<16x128xbf16>
    %55 = vector.extract_strided_slice %1 {offsets = [14, 0, 0], sizes = [1, 16, 128], strides = [1, 1, 1]} : vector<16x16x128xbf16> to vector<1x16x128xbf16>
    %56 = vector.shape_cast %55 : vector<1x16x128xbf16> to vector<16x128xbf16>
    %57 = arith.maximumf %54, %56 : vector<16x128xbf16>
    %58 = vector.shape_cast %9 : vector<16x128xbf16> to vector<1x16x128xbf16>
    %59 = vector.shape_cast %17 : vector<16x128xbf16> to vector<1x16x128xbf16>
    %60 = vector.shape_cast %25 : vector<16x128xbf16> to vector<1x16x128xbf16>
    %61 = vector.shape_cast %33 : vector<16x128xbf16> to vector<1x16x128xbf16>
    %62 = vector.shape_cast %41 : vector<16x128xbf16> to vector<1x16x128xbf16>
    %63 = vector.shape_cast %49 : vector<16x128xbf16> to vector<1x16x128xbf16>
    %64 = vector.shape_cast %57 : vector<16x128xbf16> to vector<1x16x128xbf16>
    %65 = tpu.concatenate %58, %59, %60, %61, %62, %63, %64 in 0 : vector<1x16x128xbf16>, vector<1x16x128xbf16>, vector<1x16x128xbf16>, vector<1x16x128xbf16>, vector<1x16x128xbf16>, vector<1x16x128xbf16>, vector<1x16x128xbf16> -> vector<7x16x128xbf16>
    %66 = vector.extract_strided_slice %65 {offsets = [0, 0, 0], sizes = [7, 1, 128], strides = [1, 1, 1]} : vector<7x16x128xbf16> to vector<7x1x128xbf16>
    %67 = vector.extract_strided_slice %65 {offsets = [0, 1, 0], sizes = [7, 1, 128], strides = [1, 1, 1]} : vector<7x16x128xbf16> to vector<7x1x128xbf16>
    %68 = arith.maximumf %66, %67 : vector<7x1x128xbf16>
    %69 = vector.extract_strided_slice %65 {offsets = [0, 2, 0], sizes = [7, 1, 128], strides = [1, 1, 1]} : vector<7x16x128xbf16> to vector<7x1x128xbf16>
    %70 = arith.maximumf %68, %69 : vector<7x1x128xbf16>
    %71 = vector.extract_strided_slice %65 {offsets = [0, 2, 0], sizes = [7, 1, 128], strides = [1, 1, 1]} : vector<7x16x128xbf16> to vector<7x1x128xbf16>
    %72 = vector.extract_strided_slice %65 {offsets = [0, 3, 0], sizes = [7, 1, 128], strides = [1, 1, 1]} : vector<7x16x128xbf16> to vector<7x1x128xbf16>
    %73 = arith.maximumf %71, %72 : vector<7x1x128xbf16>
    %74 = vector.extract_strided_slice %65 {offsets = [0, 4, 0], sizes = [7, 1, 128], strides = [1, 1, 1]} : vector<7x16x128xbf16> to vector<7x1x128xbf16>
    %75 = arith.maximumf %73, %74 : vector<7x1x128xbf16>
    %76 = vector.extract_strided_slice %65 {offsets = [0, 4, 0], sizes = [7, 1, 128], strides = [1, 1, 1]} : vector<7x16x128xbf16> to vector<7x1x128xbf16>
    %77 = vector.extract_strided_slice %65 {offsets = [0, 5, 0], sizes = [7, 1, 128], strides = [1, 1, 1]} : vector<7x16x128xbf16> to vector<7x1x128xbf16>
    %78 = arith.maximumf %76, %77 : vector<7x1x128xbf16>
    %79 = vector.extract_strided_slice %65 {offsets = [0, 6, 0], sizes = [7, 1, 128], strides = [1, 1, 1]} : vector<7x16x128xbf16> to vector<7x1x128xbf16>
    %80 = arith.maximumf %78, %79 : vector<7x1x128xbf16>
    %81 = vector.extract_strided_slice %65 {offsets = [0, 6, 0], sizes = [7, 1, 128], strides = [1, 1, 1]} : vector<7x16x128xbf16> to vector<7x1x128xbf16>
    %82 = vector.extract_strided_slice %65 {offsets = [0, 7, 0], sizes = [7, 1, 128], strides = [1, 1, 1]} : vector<7x16x128xbf16> to vector<7x1x128xbf16>
    %83 = arith.maximumf %81, %82 : vector<7x1x128xbf16>
    %84 = vector.extract_strided_slice %65 {offsets = [0, 8, 0], sizes = [7, 1, 128], strides = [1, 1, 1]} : vector<7x16x128xbf16> to vector<7x1x128xbf16>
    %85 = arith.maximumf %83, %84 : vector<7x1x128xbf16>
    %86 = vector.extract_strided_slice %65 {offsets = [0, 8, 0], sizes = [7, 1, 128], strides = [1, 1, 1]} : vector<7x16x128xbf16> to vector<7x1x128xbf16>
    %87 = vector.extract_strided_slice %65 {offsets = [0, 9, 0], sizes = [7, 1, 128], strides = [1, 1, 1]} : vector<7x16x128xbf16> to vector<7x1x128xbf16>
    %88 = arith.maximumf %86, %87 : vector<7x1x128xbf16>
    %89 = vector.extract_strided_slice %65 {offsets = [0, 10, 0], sizes = [7, 1, 128], strides = [1, 1, 1]} : vector<7x16x128xbf16> to vector<7x1x128xbf16>
    %90 = arith.maximumf %88, %89 : vector<7x1x128xbf16>
    %91 = vector.extract_strided_slice %65 {offsets = [0, 10, 0], sizes = [7, 1, 128], strides = [1, 1, 1]} : vector<7x16x128xbf16> to vector<7x1x128xbf16>
    %92 = vector.extract_strided_slice %65 {offsets = [0, 11, 0], sizes = [7, 1, 128], strides = [1, 1, 1]} : vector<7x16x128xbf16> to vector<7x1x128xbf16>
    %93 = arith.maximumf %91, %92 : vector<7x1x128xbf16>
    %94 = vector.extract_strided_slice %65 {offsets = [0, 12, 0], sizes = [7, 1, 128], strides = [1, 1, 1]} : vector<7x16x128xbf16> to vector<7x1x128xbf16>
    %95 = arith.maximumf %93, %94 : vector<7x1x128xbf16>
    %96 = vector.extract_strided_slice %65 {offsets = [0, 12, 0], sizes = [7, 1, 128], strides = [1, 1, 1]} : vector<7x16x128xbf16> to vector<7x1x128xbf16>
    %97 = vector.extract_strided_slice %65 {offsets = [0, 13, 0], sizes = [7, 1, 128], strides = [1, 1, 1]} : vector<7x16x128xbf16> to vector<7x1x128xbf16>
    %98 = arith.maximumf %96, %97 : vector<7x1x128xbf16>
    %99 = vector.extract_strided_slice %65 {offsets = [0, 14, 0], sizes = [7, 1, 128], strides = [1, 1, 1]} : vector<7x16x128xbf16> to vector<7x1x128xbf16>
    %100 = arith.maximumf %98, %99 : vector<7x1x128xbf16>
    %101 = tpu.concatenate %70, %75, %80, %85, %90, %95, %100 in 1 : vector<7x1x128xbf16>, vector<7x1x128xbf16>, vector<7x1x128xbf16>, vector<7x1x128xbf16>, vector<7x1x128xbf16>, vector<7x1x128xbf16>, vector<7x1x128xbf16> -> vector<7x7x128xbf16>
    %c0_3 = arith.constant 0 : index
    %c0_4 = arith.constant 0 : index
    %c0_5 = arith.constant 0 : index
    %c0_6 = arith.constant 0 : index
    %102 = vector.load %arg2[%c0_3, %c0_4, %c0_5, %c0_6] : memref<1x7x7x128xbf16, #tpu.memory_space<vmem>>, vector<1x7x7x128xbf16>
    %103 = vector.shape_cast %102 : vector<1x7x7x128xbf16> to vector<7x7x128xbf16>
    %104 = vector.shape_cast %101 : vector<7x7x128xbf16> to vector<1x7x7x128xbf16>
    tpu.vector_store %arg2[%c0_3, %c0_4, %c0_5, %c0_6], %104 {strides = array<i32>} : memref<1x7x7x128xbf16, #tpu.memory_space<vmem>>, vector<1x7x7x128xbf16>,
    return
  }
  func.func @transform_0(%arg0: i32) -> (i32, i32, i32, i32) {
    %c0_i32 = arith.constant 0 : i32
    %c0_i32_0 = arith.constant 0 : i32
    %c0_i32_1 = arith.constant 0 : i32
    %c0_i32_2 = arith.constant 0 : i32
    return %arg0, %c0_i32, %c0_i32_0, %c0_i32_1 : i32, i32, i32, i32
  }
  func.func @transform_1(%arg0: i32) -> (i32, i32, i32, i32) {
    %c0_i32 = arith.constant 0 : i32
    %c0_i32_0 = arith.constant 0 : i32
    %c0_i32_1 = arith.constant 0 : i32
    %c0_i32_2 = arith.constant 0 : i32
    return %arg0, %c0_i32, %c0_i32_0, %c0_i32_1 : i32, i32, i32, i32
  }
}

module attributes {stable_mosaic.version = 11 : i64} {
  func.func @_mm_kernel(%arg0: i32, %arg1: i32, %arg2: i32, %arg3: memref<112x640xbf16, #tpu.memory_space<vmem>>, %arg4: memref<640x128xbf16, #tpu.memory_space<vmem>>, %arg5: memref<1x128xf32, #tpu.memory_space<vmem>>, %arg6: memref<112x128xbf16, #tpu.memory_space<vmem>>, %arg7: memref<112x128xf32, #tpu.memory_space<vmem>>) attributes {dimension_semantics = [#tpu.dimension_semantics<parallel>, #tpu.dimension_semantics<parallel>, #tpu.dimension_semantics<arbitrary>], iteration_bounds = array<i64: 1, 2, 5>, scalar_prefetch = 0 : i64, scratch_operands = 1 : i64, tpu.core_type = #tpu.core_type<tc>, window_params = [{transform_indices = @transform_0, window_bounds = array<i64: 112, 640>}, {transform_indices = @transform_1, window_bounds = array<i64: 640, 128>}, {transform_indices = @transform_2, window_bounds = array<i64: 1, 128>}, {transform_indices = @transform_3, window_bounds = array<i64: 112, 128>}]} {
    %c0_i32 = arith.constant 0 : i32
    %0 = arith.cmpi eq, %arg2, %c0_i32 : i32
    %1 = arith.extui %0 : i1 to i32
    %c0_i32_0 = arith.constant 0 : i32
    %2 = arith.cmpi ne, %1, %c0_i32_0 : i32
    scf.if %2 {
      %cst_9 = arith.constant 0.000000e+00 : f32
      %12 = vector.broadcast %cst_9 : f32 to vector<112x128xf32>
      %c0_10 = arith.constant 0 : index
      %c0_11 = arith.constant 0 : index
      %13 = vector.load %arg7[%c0_10, %c0_11] : memref<112x128xf32, #tpu.memory_space<vmem>>, vector<112x128xf32>
      tpu.vector_store %arg7[%c0_10, %c0_11], %12 {strides = array<i32>} : memref<112x128xf32, #tpu.memory_space<vmem>>, vector<112x128xf32>,
    } else {
    }
    %c0 = arith.constant 0 : index
    %c0_1 = arith.constant 0 : index
    %3 = vector.load %arg7[%c0, %c0_1] : memref<112x128xf32, #tpu.memory_space<vmem>>, vector<112x128xf32>
    %c0_2 = arith.constant 0 : index
    %c0_3 = arith.constant 0 : index
    %4 = vector.load %arg3[%c0_2, %c0_3] : memref<112x640xbf16, #tpu.memory_space<vmem>>, vector<112x640xbf16>
    %c0_4 = arith.constant 0 : index
    %c0_5 = arith.constant 0 : index
    %5 = vector.load %arg4[%c0_4, %c0_5] : memref<640x128xbf16, #tpu.memory_space<vmem>>, vector<640x128xbf16>
    %cst = arith.constant dense<0.000000e+00> : vector<112x128xf32>
    %6 = tpu.matmul %4, %5, %cst {dimension_numbers = #tpu.dot_dimension_numbers<[1], [0], [0], [1], [0, 0, 1, 1], [], []>} : vector<112x640xbf16>, vector<640x128xbf16>, vector<112x128xf32> -> vector<112x128xf32>
    %7 = arith.addf %3, %6 : vector<112x128xf32>
    %c0_6 = arith.constant 0 : index
    %c0_7 = arith.constant 0 : index
    %8 = vector.load %arg7[%c0_6, %c0_7] : memref<112x128xf32, #tpu.memory_space<vmem>>, vector<112x128xf32>
    tpu.vector_store %arg7[%c0_6, %c0_7], %7 {strides = array<i32>} : memref<112x128xf32, #tpu.memory_space<vmem>>, vector<112x128xf32>,
    %c4_i32 = arith.constant 4 : i32
    %9 = arith.cmpi eq, %arg2, %c4_i32 : i32
    %10 = arith.extui %9 : i1 to i32
    %c0_i32_8 = arith.constant 0 : i32
    %11 = arith.cmpi ne, %10, %c0_i32_8 : i32
    scf.if %11 {
      %c0_9 = arith.constant 0 : index
      %c0_10 = arith.constant 0 : index
      %12 = vector.load %arg7[%c0_9, %c0_10] : memref<112x128xf32, #tpu.memory_space<vmem>>, vector<112x128xf32>
      %c0_11 = arith.constant 0 : index
      %c0_12 = arith.constant 0 : index
      %13 = vector.load %arg5[%c0_11, %c0_12] : memref<1x128xf32, #tpu.memory_space<vmem>>, vector<1x128xf32>
      %14 = vector.broadcast %13 : vector<1x128xf32> to vector<112x128xf32>
      %15 = arith.addf %12, %14 : vector<112x128xf32>
      %cst_13 = arith.constant 0.000000e+00 : f32
      %16 = vector.broadcast %cst_13 : f32 to vector<112x128xf32>
      %17 = arith.maximumf %15, %16 : vector<112x128xf32>
      %18 = arith.truncf %17 : vector<112x128xf32> to vector<112x128xbf16>
      %c0_14 = arith.constant 0 : index
      %c0_15 = arith.constant 0 : index
      %19 = vector.load %arg6[%c0_14, %c0_15] : memref<112x128xbf16, #tpu.memory_space<vmem>>, vector<112x128xbf16>
      tpu.vector_store %arg6[%c0_14, %c0_15], %18 {strides = array<i32>} : memref<112x128xbf16, #tpu.memory_space<vmem>>, vector<112x128xbf16>,
    } else {
    }
    return
  }
  func.func @transform_0(%arg0: i32, %arg1: i32, %arg2: i32) -> (i32, i32) {
    %c0_i32 = arith.constant 0 : i32
    return %arg0, %arg2 : i32, i32
  }
  func.func @transform_1(%arg0: i32, %arg1: i32, %arg2: i32) -> (i32, i32) {
    %c0_i32 = arith.constant 0 : i32
    return %arg2, %arg1 : i32, i32
  }
  func.func @transform_2(%arg0: i32, %arg1: i32, %arg2: i32) -> (i32, i32) {
    %c0_i32 = arith.constant 0 : i32
    %c0_i32_0 = arith.constant 0 : i32
    return %c0_i32, %arg1 : i32, i32
  }
  func.func @transform_3(%arg0: i32, %arg1: i32, %arg2: i32) -> (i32, i32) {
    %c0_i32 = arith.constant 0 : i32
    return %arg0, %arg1 : i32, i32
  }
}

module attributes {stable_mosaic.version = 11 : i64} {
  func.func @_maxpool_kernel(%arg0: i32, %arg1: memref<1x7x7x256xbf16, #tpu.memory_space<vmem>>, %arg2: memref<1x3x3x256xbf16, #tpu.memory_space<vmem>>) attributes {dimension_semantics = [#tpu.dimension_semantics<parallel>], iteration_bounds = array<i64: 2>, scalar_prefetch = 0 : i64, scratch_operands = 0 : i64, tpu.core_type = #tpu.core_type<tc>, window_params = [{transform_indices = @transform_0, window_bounds = array<i64: 1, 7, 7, 256>}, {transform_indices = @transform_1, window_bounds = array<i64: 1, 3, 3, 256>}]} {
    %c0 = arith.constant 0 : index
    %c0_0 = arith.constant 0 : index
    %c0_1 = arith.constant 0 : index
    %c0_2 = arith.constant 0 : index
    %0 = vector.load %arg1[%c0, %c0_0, %c0_1, %c0_2] : memref<1x7x7x256xbf16, #tpu.memory_space<vmem>>, vector<1x7x7x256xbf16>
    %1 = vector.shape_cast %0 : vector<1x7x7x256xbf16> to vector<7x7x256xbf16>
    %2 = vector.extract_strided_slice %1 {offsets = [0, 0, 0], sizes = [1, 7, 256], strides = [1, 1, 1]} : vector<7x7x256xbf16> to vector<1x7x256xbf16>
    %3 = vector.shape_cast %2 : vector<1x7x256xbf16> to vector<7x256xbf16>
    %4 = vector.extract_strided_slice %1 {offsets = [1, 0, 0], sizes = [1, 7, 256], strides = [1, 1, 1]} : vector<7x7x256xbf16> to vector<1x7x256xbf16>
    %5 = vector.shape_cast %4 : vector<1x7x256xbf16> to vector<7x256xbf16>
    %6 = arith.maximumf %3, %5 : vector<7x256xbf16>
    %7 = vector.extract_strided_slice %1 {offsets = [2, 0, 0], sizes = [1, 7, 256], strides = [1, 1, 1]} : vector<7x7x256xbf16> to vector<1x7x256xbf16>
    %8 = vector.shape_cast %7 : vector<1x7x256xbf16> to vector<7x256xbf16>
    %9 = arith.maximumf %6, %8 : vector<7x256xbf16>
    %10 = vector.extract_strided_slice %1 {offsets = [2, 0, 0], sizes = [1, 7, 256], strides = [1, 1, 1]} : vector<7x7x256xbf16> to vector<1x7x256xbf16>
    %11 = vector.shape_cast %10 : vector<1x7x256xbf16> to vector<7x256xbf16>
    %12 = vector.extract_strided_slice %1 {offsets = [3, 0, 0], sizes = [1, 7, 256], strides = [1, 1, 1]} : vector<7x7x256xbf16> to vector<1x7x256xbf16>
    %13 = vector.shape_cast %12 : vector<1x7x256xbf16> to vector<7x256xbf16>
    %14 = arith.maximumf %11, %13 : vector<7x256xbf16>
    %15 = vector.extract_strided_slice %1 {offsets = [4, 0, 0], sizes = [1, 7, 256], strides = [1, 1, 1]} : vector<7x7x256xbf16> to vector<1x7x256xbf16>
    %16 = vector.shape_cast %15 : vector<1x7x256xbf16> to vector<7x256xbf16>
    %17 = arith.maximumf %14, %16 : vector<7x256xbf16>
    %18 = vector.extract_strided_slice %1 {offsets = [4, 0, 0], sizes = [1, 7, 256], strides = [1, 1, 1]} : vector<7x7x256xbf16> to vector<1x7x256xbf16>
    %19 = vector.shape_cast %18 : vector<1x7x256xbf16> to vector<7x256xbf16>
    %20 = vector.extract_strided_slice %1 {offsets = [5, 0, 0], sizes = [1, 7, 256], strides = [1, 1, 1]} : vector<7x7x256xbf16> to vector<1x7x256xbf16>
    %21 = vector.shape_cast %20 : vector<1x7x256xbf16> to vector<7x256xbf16>
    %22 = arith.maximumf %19, %21 : vector<7x256xbf16>
    %23 = vector.extract_strided_slice %1 {offsets = [6, 0, 0], sizes = [1, 7, 256], strides = [1, 1, 1]} : vector<7x7x256xbf16> to vector<1x7x256xbf16>
    %24 = vector.shape_cast %23 : vector<1x7x256xbf16> to vector<7x256xbf16>
    %25 = arith.maximumf %22, %24 : vector<7x256xbf16>
    %26 = vector.shape_cast %9 : vector<7x256xbf16> to vector<1x7x256xbf16>
    %27 = vector.shape_cast %17 : vector<7x256xbf16> to vector<1x7x256xbf16>
    %28 = vector.shape_cast %25 : vector<7x256xbf16> to vector<1x7x256xbf16>
    %29 = tpu.concatenate %26, %27, %28 in 0 : vector<1x7x256xbf16>, vector<1x7x256xbf16>, vector<1x7x256xbf16> -> vector<3x7x256xbf16>
    %30 = vector.extract_strided_slice %29 {offsets = [0, 0, 0], sizes = [3, 1, 256], strides = [1, 1, 1]} : vector<3x7x256xbf16> to vector<3x1x256xbf16>
    %31 = vector.extract_strided_slice %29 {offsets = [0, 1, 0], sizes = [3, 1, 256], strides = [1, 1, 1]} : vector<3x7x256xbf16> to vector<3x1x256xbf16>
    %32 = arith.maximumf %30, %31 : vector<3x1x256xbf16>
    %33 = vector.extract_strided_slice %29 {offsets = [0, 2, 0], sizes = [3, 1, 256], strides = [1, 1, 1]} : vector<3x7x256xbf16> to vector<3x1x256xbf16>
    %34 = arith.maximumf %32, %33 : vector<3x1x256xbf16>
    %35 = vector.extract_strided_slice %29 {offsets = [0, 2, 0], sizes = [3, 1, 256], strides = [1, 1, 1]} : vector<3x7x256xbf16> to vector<3x1x256xbf16>
    %36 = vector.extract_strided_slice %29 {offsets = [0, 3, 0], sizes = [3, 1, 256], strides = [1, 1, 1]} : vector<3x7x256xbf16> to vector<3x1x256xbf16>
    %37 = arith.maximumf %35, %36 : vector<3x1x256xbf16>
    %38 = vector.extract_strided_slice %29 {offsets = [0, 4, 0], sizes = [3, 1, 256], strides = [1, 1, 1]} : vector<3x7x256xbf16> to vector<3x1x256xbf16>
    %39 = arith.maximumf %37, %38 : vector<3x1x256xbf16>
    %40 = vector.extract_strided_slice %29 {offsets = [0, 4, 0], sizes = [3, 1, 256], strides = [1, 1, 1]} : vector<3x7x256xbf16> to vector<3x1x256xbf16>
    %41 = vector.extract_strided_slice %29 {offsets = [0, 5, 0], sizes = [3, 1, 256], strides = [1, 1, 1]} : vector<3x7x256xbf16> to vector<3x1x256xbf16>
    %42 = arith.maximumf %40, %41 : vector<3x1x256xbf16>
    %43 = vector.extract_strided_slice %29 {offsets = [0, 6, 0], sizes = [3, 1, 256], strides = [1, 1, 1]} : vector<3x7x256xbf16> to vector<3x1x256xbf16>
    %44 = arith.maximumf %42, %43 : vector<3x1x256xbf16>
    %45 = tpu.concatenate %34, %39, %44 in 1 : vector<3x1x256xbf16>, vector<3x1x256xbf16>, vector<3x1x256xbf16> -> vector<3x3x256xbf16>
    %c0_3 = arith.constant 0 : index
    %c0_4 = arith.constant 0 : index
    %c0_5 = arith.constant 0 : index
    %c0_6 = arith.constant 0 : index
    %46 = vector.load %arg2[%c0_3, %c0_4, %c0_5, %c0_6] : memref<1x3x3x256xbf16, #tpu.memory_space<vmem>>, vector<1x3x3x256xbf16>
    %47 = vector.shape_cast %46 : vector<1x3x3x256xbf16> to vector<3x3x256xbf16>
    %48 = vector.shape_cast %45 : vector<3x3x256xbf16> to vector<1x3x3x256xbf16>
    tpu.vector_store %arg2[%c0_3, %c0_4, %c0_5, %c0_6], %48 {strides = array<i32>} : memref<1x3x3x256xbf16, #tpu.memory_space<vmem>>, vector<1x3x3x256xbf16>,
    return
  }
  func.func @transform_0(%arg0: i32) -> (i32, i32, i32, i32) {
    %c0_i32 = arith.constant 0 : i32
    %c0_i32_0 = arith.constant 0 : i32
    %c0_i32_1 = arith.constant 0 : i32
    %c0_i32_2 = arith.constant 0 : i32
    return %arg0, %c0_i32, %c0_i32_0, %c0_i32_1 : i32, i32, i32, i32
  }
  func.func @transform_1(%arg0: i32) -> (i32, i32, i32, i32) {
    %c0_i32 = arith.constant 0 : i32
    %c0_i32_0 = arith.constant 0 : i32
    %c0_i32_1 = arith.constant 0 : i32
    %c0_i32_2 = arith.constant 0 : i32
    return %arg0, %c0_i32, %c0_i32_0, %c0_i32_1 : i32, i32, i32, i32
  }
}

module attributes {stable_mosaic.version = 11 : i64} {
  func.func @_mm_kernel(%arg0: i32, %arg1: i32, %arg2: i32, %arg3: memref<32x1152xbf16, #tpu.memory_space<vmem>>, %arg4: memref<1152x128xbf16, #tpu.memory_space<vmem>>, %arg5: memref<1x128xf32, #tpu.memory_space<vmem>>, %arg6: memref<32x128xbf16, #tpu.memory_space<vmem>>, %arg7: memref<32x128xf32, #tpu.memory_space<vmem>>) attributes {dimension_semantics = [#tpu.dimension_semantics<parallel>, #tpu.dimension_semantics<parallel>, #tpu.dimension_semantics<arbitrary>], iteration_bounds = array<i64: 1, 3, 2>, scalar_prefetch = 0 : i64, scratch_operands = 1 : i64, tpu.core_type = #tpu.core_type<tc>, window_params = [{transform_indices = @transform_0, window_bounds = array<i64: 32, 1152>}, {transform_indices = @transform_1, window_bounds = array<i64: 1152, 128>}, {transform_indices = @transform_2, window_bounds = array<i64: 1, 128>}, {transform_indices = @transform_3, window_bounds = array<i64: 32, 128>}]} {
    %c0_i32 = arith.constant 0 : i32
    %0 = arith.cmpi eq, %arg2, %c0_i32 : i32
    %1 = arith.extui %0 : i1 to i32
    %c0_i32_0 = arith.constant 0 : i32
    %2 = arith.cmpi ne, %1, %c0_i32_0 : i32
    scf.if %2 {
      %cst_9 = arith.constant 0.000000e+00 : f32
      %12 = vector.broadcast %cst_9 : f32 to vector<32x128xf32>
      %c0_10 = arith.constant 0 : index
      %c0_11 = arith.constant 0 : index
      %13 = vector.load %arg7[%c0_10, %c0_11] : memref<32x128xf32, #tpu.memory_space<vmem>>, vector<32x128xf32>
      tpu.vector_store %arg7[%c0_10, %c0_11], %12 {strides = array<i32>} : memref<32x128xf32, #tpu.memory_space<vmem>>, vector<32x128xf32>,
    } else {
    }
    %c0 = arith.constant 0 : index
    %c0_1 = arith.constant 0 : index
    %3 = vector.load %arg7[%c0, %c0_1] : memref<32x128xf32, #tpu.memory_space<vmem>>, vector<32x128xf32>
    %c0_2 = arith.constant 0 : index
    %c0_3 = arith.constant 0 : index
    %4 = vector.load %arg3[%c0_2, %c0_3] : memref<32x1152xbf16, #tpu.memory_space<vmem>>, vector<32x1152xbf16>
    %c0_4 = arith.constant 0 : index
    %c0_5 = arith.constant 0 : index
    %5 = vector.load %arg4[%c0_4, %c0_5] : memref<1152x128xbf16, #tpu.memory_space<vmem>>, vector<1152x128xbf16>
    %cst = arith.constant dense<0.000000e+00> : vector<32x128xf32>
    %6 = tpu.matmul %4, %5, %cst {dimension_numbers = #tpu.dot_dimension_numbers<[1], [0], [0], [1], [0, 0, 1, 1], [], []>} : vector<32x1152xbf16>, vector<1152x128xbf16>, vector<32x128xf32> -> vector<32x128xf32>
    %7 = arith.addf %3, %6 : vector<32x128xf32>
    %c0_6 = arith.constant 0 : index
    %c0_7 = arith.constant 0 : index
    %8 = vector.load %arg7[%c0_6, %c0_7] : memref<32x128xf32, #tpu.memory_space<vmem>>, vector<32x128xf32>
    tpu.vector_store %arg7[%c0_6, %c0_7], %7 {strides = array<i32>} : memref<32x128xf32, #tpu.memory_space<vmem>>, vector<32x128xf32>,
    %c1_i32 = arith.constant 1 : i32
    %9 = arith.cmpi eq, %arg2, %c1_i32 : i32
    %10 = arith.extui %9 : i1 to i32
    %c0_i32_8 = arith.constant 0 : i32
    %11 = arith.cmpi ne, %10, %c0_i32_8 : i32
    scf.if %11 {
      %c0_9 = arith.constant 0 : index
      %c0_10 = arith.constant 0 : index
      %12 = vector.load %arg7[%c0_9, %c0_10] : memref<32x128xf32, #tpu.memory_space<vmem>>, vector<32x128xf32>
      %c0_11 = arith.constant 0 : index
      %c0_12 = arith.constant 0 : index
      %13 = vector.load %arg5[%c0_11, %c0_12] : memref<1x128xf32, #tpu.memory_space<vmem>>, vector<1x128xf32>
      %14 = vector.broadcast %13 : vector<1x128xf32> to vector<32x128xf32>
      %15 = arith.addf %12, %14 : vector<32x128xf32>
      %cst_13 = arith.constant 0.000000e+00 : f32
      %16 = vector.broadcast %cst_13 : f32 to vector<32x128xf32>
      %17 = arith.maximumf %15, %16 : vector<32x128xf32>
      %18 = arith.truncf %17 : vector<32x128xf32> to vector<32x128xbf16>
      %c0_14 = arith.constant 0 : index
      %c0_15 = arith.constant 0 : index
      %19 = vector.load %arg6[%c0_14, %c0_15] : memref<32x128xbf16, #tpu.memory_space<vmem>>, vector<32x128xbf16>
      tpu.vector_store %arg6[%c0_14, %c0_15], %18 {strides = array<i32>} : memref<32x128xbf16, #tpu.memory_space<vmem>>, vector<32x128xbf16>,
    } else {
    }
    return
  }
  func.func @transform_0(%arg0: i32, %arg1: i32, %arg2: i32) -> (i32, i32) {
    %c0_i32 = arith.constant 0 : i32
    return %arg0, %arg2 : i32, i32
  }
  func.func @transform_1(%arg0: i32, %arg1: i32, %arg2: i32) -> (i32, i32) {
    %c0_i32 = arith.constant 0 : i32
    return %arg2, %arg1 : i32, i32
  }
  func.func @transform_2(%arg0: i32, %arg1: i32, %arg2: i32) -> (i32, i32) {
    %c0_i32 = arith.constant 0 : i32
    %c0_i32_0 = arith.constant 0 : i32
    return %c0_i32, %arg1 : i32, i32
  }
  func.func @transform_3(%arg0: i32, %arg1: i32, %arg2: i32) -> (i32, i32) {
    %c0_i32 = arith.constant 0 : i32
    return %arg0, %arg1 : i32, i32
  }
}

module attributes {stable_mosaic.version = 11 : i64} {
  func.func @_mm_kernel(%arg0: i32, %arg1: i32, %arg2: i32, %arg3: memref<32x1152xbf16, #tpu.memory_space<vmem>>, %arg4: memref<1152x128xbf16, #tpu.memory_space<vmem>>, %arg5: memref<1x128xf32, #tpu.memory_space<vmem>>, %arg6: memref<32x128xbf16, #tpu.memory_space<vmem>>, %arg7: memref<32x128xf32, #tpu.memory_space<vmem>>) attributes {dimension_semantics = [#tpu.dimension_semantics<parallel>, #tpu.dimension_semantics<parallel>, #tpu.dimension_semantics<arbitrary>], iteration_bounds = array<i64: 1, 3, 3>, scalar_prefetch = 0 : i64, scratch_operands = 1 : i64, tpu.core_type = #tpu.core_type<tc>, window_params = [{transform_indices = @transform_0, window_bounds = array<i64: 32, 1152>}, {transform_indices = @transform_1, window_bounds = array<i64: 1152, 128>}, {transform_indices = @transform_2, window_bounds = array<i64: 1, 128>}, {transform_indices = @transform_3, window_bounds = array<i64: 32, 128>}]} {
    %c0_i32 = arith.constant 0 : i32
    %0 = arith.cmpi eq, %arg2, %c0_i32 : i32
    %1 = arith.extui %0 : i1 to i32
    %c0_i32_0 = arith.constant 0 : i32
    %2 = arith.cmpi ne, %1, %c0_i32_0 : i32
    scf.if %2 {
      %cst_9 = arith.constant 0.000000e+00 : f32
      %12 = vector.broadcast %cst_9 : f32 to vector<32x128xf32>
      %c0_10 = arith.constant 0 : index
      %c0_11 = arith.constant 0 : index
      %13 = vector.load %arg7[%c0_10, %c0_11] : memref<32x128xf32, #tpu.memory_space<vmem>>, vector<32x128xf32>
      tpu.vector_store %arg7[%c0_10, %c0_11], %12 {strides = array<i32>} : memref<32x128xf32, #tpu.memory_space<vmem>>, vector<32x128xf32>,
    } else {
    }
    %c0 = arith.constant 0 : index
    %c0_1 = arith.constant 0 : index
    %3 = vector.load %arg7[%c0, %c0_1] : memref<32x128xf32, #tpu.memory_space<vmem>>, vector<32x128xf32>
    %c0_2 = arith.constant 0 : index
    %c0_3 = arith.constant 0 : index
    %4 = vector.load %arg3[%c0_2, %c0_3] : memref<32x1152xbf16, #tpu.memory_space<vmem>>, vector<32x1152xbf16>
    %c0_4 = arith.constant 0 : index
    %c0_5 = arith.constant 0 : index
    %5 = vector.load %arg4[%c0_4, %c0_5] : memref<1152x128xbf16, #tpu.memory_space<vmem>>, vector<1152x128xbf16>
    %cst = arith.constant dense<0.000000e+00> : vector<32x128xf32>
    %6 = tpu.matmul %4, %5, %cst {dimension_numbers = #tpu.dot_dimension_numbers<[1], [0], [0], [1], [0, 0, 1, 1], [], []>} : vector<32x1152xbf16>, vector<1152x128xbf16>, vector<32x128xf32> -> vector<32x128xf32>
    %7 = arith.addf %3, %6 : vector<32x128xf32>
    %c0_6 = arith.constant 0 : index
    %c0_7 = arith.constant 0 : index
    %8 = vector.load %arg7[%c0_6, %c0_7] : memref<32x128xf32, #tpu.memory_space<vmem>>, vector<32x128xf32>
    tpu.vector_store %arg7[%c0_6, %c0_7], %7 {strides = array<i32>} : memref<32x128xf32, #tpu.memory_space<vmem>>, vector<32x128xf32>,
    %c2_i32 = arith.constant 2 : i32
    %9 = arith.cmpi eq, %arg2, %c2_i32 : i32
    %10 = arith.extui %9 : i1 to i32
    %c0_i32_8 = arith.constant 0 : i32
    %11 = arith.cmpi ne, %10, %c0_i32_8 : i32
    scf.if %11 {
      %c0_9 = arith.constant 0 : index
      %c0_10 = arith.constant 0 : index
      %12 = vector.load %arg7[%c0_9, %c0_10] : memref<32x128xf32, #tpu.memory_space<vmem>>, vector<32x128xf32>
      %c0_11 = arith.constant 0 : index
      %c0_12 = arith.constant 0 : index
      %13 = vector.load %arg5[%c0_11, %c0_12] : memref<1x128xf32, #tpu.memory_space<vmem>>, vector<1x128xf32>
      %14 = vector.broadcast %13 : vector<1x128xf32> to vector<32x128xf32>
      %15 = arith.addf %12, %14 : vector<32x128xf32>
      %cst_13 = arith.constant 0.000000e+00 : f32
      %16 = vector.broadcast %cst_13 : f32 to vector<32x128xf32>
      %17 = arith.maximumf %15, %16 : vector<32x128xf32>
      %18 = arith.truncf %17 : vector<32x128xf32> to vector<32x128xbf16>
      %c0_14 = arith.constant 0 : index
      %c0_15 = arith.constant 0 : index
      %19 = vector.load %arg6[%c0_14, %c0_15] : memref<32x128xbf16, #tpu.memory_space<vmem>>, vector<32x128xbf16>
      tpu.vector_store %arg6[%c0_14, %c0_15], %18 {strides = array<i32>} : memref<32x128xbf16, #tpu.memory_space<vmem>>, vector<32x128xbf16>,
    } else {
    }
    return
  }
  func.func @transform_0(%arg0: i32, %arg1: i32, %arg2: i32) -> (i32, i32) {
    %c0_i32 = arith.constant 0 : i32
    return %arg0, %arg2 : i32, i32
  }
  func.func @transform_1(%arg0: i32, %arg1: i32, %arg2: i32) -> (i32, i32) {
    %c0_i32 = arith.constant 0 : i32
    return %arg2, %arg1 : i32, i32
  }
  func.func @transform_2(%arg0: i32, %arg1: i32, %arg2: i32) -> (i32, i32) {
    %c0_i32 = arith.constant 0 : i32
    %c0_i32_0 = arith.constant 0 : i32
    return %c0_i32, %arg1 : i32, i32
  }
  func.func @transform_3(%arg0: i32, %arg1: i32, %arg2: i32) -> (i32, i32) {
    %c0_i32 = arith.constant 0 : i32
    return %arg0, %arg1 : i32, i32
  }
}

module attributes {stable_mosaic.version = 11 : i64} {
  func.func @_mm_kernel(%arg0: i32, %arg1: i32, %arg2: i32, %arg3: memref<32x1152xbf16, #tpu.memory_space<vmem>>, %arg4: memref<1152x128xbf16, #tpu.memory_space<vmem>>, %arg5: memref<1x128xf32, #tpu.memory_space<vmem>>, %arg6: memref<32x128xbf16, #tpu.memory_space<vmem>>, %arg7: memref<32x128xf32, #tpu.memory_space<vmem>>) attributes {dimension_semantics = [#tpu.dimension_semantics<parallel>, #tpu.dimension_semantics<parallel>, #tpu.dimension_semantics<arbitrary>], iteration_bounds = array<i64: 1, 2, 3>, scalar_prefetch = 0 : i64, scratch_operands = 1 : i64, tpu.core_type = #tpu.core_type<tc>, window_params = [{transform_indices = @transform_0, window_bounds = array<i64: 32, 1152>}, {transform_indices = @transform_1, window_bounds = array<i64: 1152, 128>}, {transform_indices = @transform_2, window_bounds = array<i64: 1, 128>}, {transform_indices = @transform_3, window_bounds = array<i64: 32, 128>}]} {
    %c0_i32 = arith.constant 0 : i32
    %0 = arith.cmpi eq, %arg2, %c0_i32 : i32
    %1 = arith.extui %0 : i1 to i32
    %c0_i32_0 = arith.constant 0 : i32
    %2 = arith.cmpi ne, %1, %c0_i32_0 : i32
    scf.if %2 {
      %cst_9 = arith.constant 0.000000e+00 : f32
      %12 = vector.broadcast %cst_9 : f32 to vector<32x128xf32>
      %c0_10 = arith.constant 0 : index
      %c0_11 = arith.constant 0 : index
      %13 = vector.load %arg7[%c0_10, %c0_11] : memref<32x128xf32, #tpu.memory_space<vmem>>, vector<32x128xf32>
      tpu.vector_store %arg7[%c0_10, %c0_11], %12 {strides = array<i32>} : memref<32x128xf32, #tpu.memory_space<vmem>>, vector<32x128xf32>,
    } else {
    }
    %c0 = arith.constant 0 : index
    %c0_1 = arith.constant 0 : index
    %3 = vector.load %arg7[%c0, %c0_1] : memref<32x128xf32, #tpu.memory_space<vmem>>, vector<32x128xf32>
    %c0_2 = arith.constant 0 : index
    %c0_3 = arith.constant 0 : index
    %4 = vector.load %arg3[%c0_2, %c0_3] : memref<32x1152xbf16, #tpu.memory_space<vmem>>, vector<32x1152xbf16>
    %c0_4 = arith.constant 0 : index
    %c0_5 = arith.constant 0 : index
    %5 = vector.load %arg4[%c0_4, %c0_5] : memref<1152x128xbf16, #tpu.memory_space<vmem>>, vector<1152x128xbf16>
    %cst = arith.constant dense<0.000000e+00> : vector<32x128xf32>
    %6 = tpu.matmul %4, %5, %cst {dimension_numbers = #tpu.dot_dimension_numbers<[1], [0], [0], [1], [0, 0, 1, 1], [], []>} : vector<32x1152xbf16>, vector<1152x128xbf16>, vector<32x128xf32> -> vector<32x128xf32>
    %7 = arith.addf %3, %6 : vector<32x128xf32>
    %c0_6 = arith.constant 0 : index
    %c0_7 = arith.constant 0 : index
    %8 = vector.load %arg7[%c0_6, %c0_7] : memref<32x128xf32, #tpu.memory_space<vmem>>, vector<32x128xf32>
    tpu.vector_store %arg7[%c0_6, %c0_7], %7 {strides = array<i32>} : memref<32x128xf32, #tpu.memory_space<vmem>>, vector<32x128xf32>,
    %c2_i32 = arith.constant 2 : i32
    %9 = arith.cmpi eq, %arg2, %c2_i32 : i32
    %10 = arith.extui %9 : i1 to i32
    %c0_i32_8 = arith.constant 0 : i32
    %11 = arith.cmpi ne, %10, %c0_i32_8 : i32
    scf.if %11 {
      %c0_9 = arith.constant 0 : index
      %c0_10 = arith.constant 0 : index
      %12 = vector.load %arg7[%c0_9, %c0_10] : memref<32x128xf32, #tpu.memory_space<vmem>>, vector<32x128xf32>
      %c0_11 = arith.constant 0 : index
      %c0_12 = arith.constant 0 : index
      %13 = vector.load %arg5[%c0_11, %c0_12] : memref<1x128xf32, #tpu.memory_space<vmem>>, vector<1x128xf32>
      %14 = vector.broadcast %13 : vector<1x128xf32> to vector<32x128xf32>
      %15 = arith.addf %12, %14 : vector<32x128xf32>
      %cst_13 = arith.constant 0.000000e+00 : f32
      %16 = vector.broadcast %cst_13 : f32 to vector<32x128xf32>
      %17 = arith.maximumf %15, %16 : vector<32x128xf32>
      %18 = arith.truncf %17 : vector<32x128xf32> to vector<32x128xbf16>
      %c0_14 = arith.constant 0 : index
      %c0_15 = arith.constant 0 : index
      %19 = vector.load %arg6[%c0_14, %c0_15] : memref<32x128xbf16, #tpu.memory_space<vmem>>, vector<32x128xbf16>
      tpu.vector_store %arg6[%c0_14, %c0_15], %18 {strides = array<i32>} : memref<32x128xbf16, #tpu.memory_space<vmem>>, vector<32x128xbf16>,
    } else {
    }
    return
  }
  func.func @transform_0(%arg0: i32, %arg1: i32, %arg2: i32) -> (i32, i32) {
    %c0_i32 = arith.constant 0 : i32
    return %arg0, %arg2 : i32, i32
  }
  func.func @transform_1(%arg0: i32, %arg1: i32, %arg2: i32) -> (i32, i32) {
    %c0_i32 = arith.constant 0 : i32
    return %arg2, %arg1 : i32, i32
  }
  func.func @transform_2(%arg0: i32, %arg1: i32, %arg2: i32) -> (i32, i32) {
    %c0_i32 = arith.constant 0 : i32
    %c0_i32_0 = arith.constant 0 : i32
    return %c0_i32, %arg1 : i32, i32
  }
  func.func @transform_3(%arg0: i32, %arg1: i32, %arg2: i32) -> (i32, i32) {
    %c0_i32 = arith.constant 0 : i32
    return %arg0, %arg1 : i32, i32
  }
}

module attributes {stable_mosaic.version = 11 : i64} {
  func.func @_maxpool_kernel(%arg0: i32, %arg1: memref<1x3x3x256xbf16, #tpu.memory_space<vmem>>, %arg2: memref<1x1x1x256xbf16, #tpu.memory_space<vmem>>) attributes {dimension_semantics = [#tpu.dimension_semantics<parallel>], iteration_bounds = array<i64: 2>, scalar_prefetch = 0 : i64, scratch_operands = 0 : i64, tpu.core_type = #tpu.core_type<tc>, window_params = [{transform_indices = @transform_0, window_bounds = array<i64: 1, 3, 3, 256>}, {transform_indices = @transform_1, window_bounds = array<i64: 1, 1, 1, 256>}]} {
    %c0 = arith.constant 0 : index
    %c0_0 = arith.constant 0 : index
    %c0_1 = arith.constant 0 : index
    %c0_2 = arith.constant 0 : index
    %0 = vector.load %arg1[%c0, %c0_0, %c0_1, %c0_2] : memref<1x3x3x256xbf16, #tpu.memory_space<vmem>>, vector<1x3x3x256xbf16>
    %1 = vector.shape_cast %0 : vector<1x3x3x256xbf16> to vector<3x3x256xbf16>
    %2 = vector.extract_strided_slice %1 {offsets = [0, 0, 0], sizes = [1, 3, 256], strides = [1, 1, 1]} : vector<3x3x256xbf16> to vector<1x3x256xbf16>
    %3 = vector.shape_cast %2 : vector<1x3x256xbf16> to vector<3x256xbf16>
    %4 = vector.extract_strided_slice %1 {offsets = [1, 0, 0], sizes = [1, 3, 256], strides = [1, 1, 1]} : vector<3x3x256xbf16> to vector<1x3x256xbf16>
    %5 = vector.shape_cast %4 : vector<1x3x256xbf16> to vector<3x256xbf16>
    %6 = arith.maximumf %3, %5 : vector<3x256xbf16>
    %7 = vector.extract_strided_slice %1 {offsets = [2, 0, 0], sizes = [1, 3, 256], strides = [1, 1, 1]} : vector<3x3x256xbf16> to vector<1x3x256xbf16>
    %8 = vector.shape_cast %7 : vector<1x3x256xbf16> to vector<3x256xbf16>
    %9 = arith.maximumf %6, %8 : vector<3x256xbf16>
    %10 = vector.shape_cast %9 : vector<3x256xbf16> to vector<1x3x256xbf16>
    %11 = vector.extract_strided_slice %10 {offsets = [0, 0, 0], sizes = [1, 1, 256], strides = [1, 1, 1]} : vector<1x3x256xbf16> to vector<1x1x256xbf16>
    %12 = vector.extract_strided_slice %10 {offsets = [0, 1, 0], sizes = [1, 1, 256], strides = [1, 1, 1]} : vector<1x3x256xbf16> to vector<1x1x256xbf16>
    %13 = arith.maximumf %11, %12 : vector<1x1x256xbf16>
    %14 = vector.extract_strided_slice %10 {offsets = [0, 2, 0], sizes = [1, 1, 256], strides = [1, 1, 1]} : vector<1x3x256xbf16> to vector<1x1x256xbf16>
    %15 = arith.maximumf %13, %14 : vector<1x1x256xbf16>
    %c0_3 = arith.constant 0 : index
    %c0_4 = arith.constant 0 : index
    %c0_5 = arith.constant 0 : index
    %c0_6 = arith.constant 0 : index
    %16 = vector.load %arg2[%c0_3, %c0_4, %c0_5, %c0_6] : memref<1x1x1x256xbf16, #tpu.memory_space<vmem>>, vector<1x1x1x256xbf16>
    %17 = vector.shape_cast %16 : vector<1x1x1x256xbf16> to vector<1x1x256xbf16>
    %18 = vector.shape_cast %15 : vector<1x1x256xbf16> to vector<1x1x1x256xbf16>
    tpu.vector_store %arg2[%c0_3, %c0_4, %c0_5, %c0_6], %18 {strides = array<i32>} : memref<1x1x1x256xbf16, #tpu.memory_space<vmem>>, vector<1x1x1x256xbf16>,
    return
  }
  func.func @transform_0(%arg0: i32) -> (i32, i32, i32, i32) {
    %c0_i32 = arith.constant 0 : i32
    %c0_i32_0 = arith.constant 0 : i32
    %c0_i32_1 = arith.constant 0 : i32
    %c0_i32_2 = arith.constant 0 : i32
    return %arg0, %c0_i32, %c0_i32_0, %c0_i32_1 : i32, i32, i32, i32
  }
  func.func @transform_1(%arg0: i32) -> (i32, i32, i32, i32) {
    %c0_i32 = arith.constant 0 : i32
    %c0_i32_0 = arith.constant 0 : i32
    %c0_i32_1 = arith.constant 0 : i32
    %c0_i32_2 = arith.constant 0 : i32
    return %arg0, %c0_i32, %c0_i32_0, %c0_i32_1 : i32, i32, i32, i32
  }
}

module attributes {stable_mosaic.version = 11 : i64} {
  func.func @_adaptive_avgpool_kernel(%arg0: i32, %arg1: memref<1x1x1x256xbf16, #tpu.memory_space<vmem>>, %arg2: memref<1x6x6x256xbf16, #tpu.memory_space<vmem>>) attributes {dimension_semantics = [#tpu.dimension_semantics<parallel>], iteration_bounds = array<i64: 2>, scalar_prefetch = 0 : i64, scratch_operands = 0 : i64, tpu.core_type = #tpu.core_type<tc>, window_params = [{transform_indices = @transform_0, window_bounds = array<i64: 1, 1, 1, 256>}, {transform_indices = @transform_1, window_bounds = array<i64: 1, 6, 6, 256>}]} {
    %c0 = arith.constant 0 : index
    %c0_0 = arith.constant 0 : index
    %c0_1 = arith.constant 0 : index
    %c0_2 = arith.constant 0 : index
    %0 = vector.load %arg1[%c0, %c0_0, %c0_1, %c0_2] : memref<1x1x1x256xbf16, #tpu.memory_space<vmem>>, vector<1x1x1x256xbf16>
    %1 = vector.shape_cast %0 : vector<1x1x1x256xbf16> to vector<1x1x256xbf16>
    %2 = arith.extf %1 : vector<1x1x256xbf16> to vector<1x1x256xf32>
    %cst = arith.constant dense<0.000000e+00> : vector<256xf32>
    %3 = vector.multi_reduction <add>, %2, %cst [0, 1] : vector<1x1x256xf32> to vector<256xf32>
    %4 = vector.shape_cast %3 : vector<256xf32> to vector<1x1x256xf32>
    %cst_3 = arith.constant 1.000000e+00 : f32
    %5 = vector.broadcast %cst_3 : f32 to vector<1x1x256xf32>
    %6 = arith.mulf %4, %5 : vector<1x1x256xf32>
    %cst_4 = arith.constant dense<0.000000e+00> : vector<256xf32>
    %7 = vector.multi_reduction <add>, %2, %cst_4 [0, 1] : vector<1x1x256xf32> to vector<256xf32>
    %8 = vector.shape_cast %7 : vector<256xf32> to vector<1x1x256xf32>
    %cst_5 = arith.constant 1.000000e+00 : f32
    %9 = vector.broadcast %cst_5 : f32 to vector<1x1x256xf32>
    %10 = arith.mulf %8, %9 : vector<1x1x256xf32>
    %cst_6 = arith.constant dense<0.000000e+00> : vector<256xf32>
    %11 = vector.multi_reduction <add>, %2, %cst_6 [0, 1] : vector<1x1x256xf32> to vector<256xf32>
    %12 = vector.shape_cast %11 : vector<256xf32> to vector<1x1x256xf32>
    %cst_7 = arith.constant 1.000000e+00 : f32
    %13 = vector.broadcast %cst_7 : f32 to vector<1x1x256xf32>
    %14 = arith.mulf %12, %13 : vector<1x1x256xf32>
    %cst_8 = arith.constant dense<0.000000e+00> : vector<256xf32>
    %15 = vector.multi_reduction <add>, %2, %cst_8 [0, 1] : vector<1x1x256xf32> to vector<256xf32>
    %16 = vector.shape_cast %15 : vector<256xf32> to vector<1x1x256xf32>
    %cst_9 = arith.constant 1.000000e+00 : f32
    %17 = vector.broadcast %cst_9 : f32 to vector<1x1x256xf32>
    %18 = arith.mulf %16, %17 : vector<1x1x256xf32>
    %cst_10 = arith.constant dense<0.000000e+00> : vector<256xf32>
    %19 = vector.multi_reduction <add>, %2, %cst_10 [0, 1] : vector<1x1x256xf32> to vector<256xf32>
    %20 = vector.shape_cast %19 : vector<256xf32> to vector<1x1x256xf32>
    %cst_11 = arith.constant 1.000000e+00 : f32
    %21 = vector.broadcast %cst_11 : f32 to vector<1x1x256xf32>
    %22 = arith.mulf %20, %21 : vector<1x1x256xf32>
    %cst_12 = arith.constant dense<0.000000e+00> : vector<256xf32>
    %23 = vector.multi_reduction <add>, %2, %cst_12 [0, 1] : vector<1x1x256xf32> to vector<256xf32>
    %24 = vector.shape_cast %23 : vector<256xf32> to vector<1x1x256xf32>
    %cst_13 = arith.constant 1.000000e+00 : f32
    %25 = vector.broadcast %cst_13 : f32 to vector<1x1x256xf32>
    %26 = arith.mulf %24, %25 : vector<1x1x256xf32>
    %27 = tpu.concatenate %6, %10, %14, %18, %22, %26 in 1 : vector<1x1x256xf32>, vector<1x1x256xf32>, vector<1x1x256xf32>, vector<1x1x256xf32>, vector<1x1x256xf32>, vector<1x1x256xf32> -> vector<1x6x256xf32>
    %cst_14 = arith.constant dense<0.000000e+00> : vector<256xf32>
    %28 = vector.multi_reduction <add>, %2, %cst_14 [0, 1] : vector<1x1x256xf32> to vector<256xf32>
    %29 = vector.shape_cast %28 : vector<256xf32> to vector<1x1x256xf32>
    %cst_15 = arith.constant 1.000000e+00 : f32
    %30 = vector.broadcast %cst_15 : f32 to vector<1x1x256xf32>
    %31 = arith.mulf %29, %30 : vector<1x1x256xf32>
    %cst_16 = arith.constant dense<0.000000e+00> : vector<256xf32>
    %32 = vector.multi_reduction <add>, %2, %cst_16 [0, 1] : vector<1x1x256xf32> to vector<256xf32>
    %33 = vector.shape_cast %32 : vector<256xf32> to vector<1x1x256xf32>
    %cst_17 = arith.constant 1.000000e+00 : f32
    %34 = vector.broadcast %cst_17 : f32 to vector<1x1x256xf32>
    %35 = arith.mulf %33, %34 : vector<1x1x256xf32>
    %cst_18 = arith.constant dense<0.000000e+00> : vector<256xf32>
    %36 = vector.multi_reduction <add>, %2, %cst_18 [0, 1] : vector<1x1x256xf32> to vector<256xf32>
    %37 = vector.shape_cast %36 : vector<256xf32> to vector<1x1x256xf32>
    %cst_19 = arith.constant 1.000000e+00 : f32
    %38 = vector.broadcast %cst_19 : f32 to vector<1x1x256xf32>
    %39 = arith.mulf %37, %38 : vector<1x1x256xf32>
    %cst_20 = arith.constant dense<0.000000e+00> : vector<256xf32>
    %40 = vector.multi_reduction <add>, %2, %cst_20 [0, 1] : vector<1x1x256xf32> to vector<256xf32>
    %41 = vector.shape_cast %40 : vector<256xf32> to vector<1x1x256xf32>
    %cst_21 = arith.constant 1.000000e+00 : f32
    %42 = vector.broadcast %cst_21 : f32 to vector<1x1x256xf32>
    %43 = arith.mulf %41, %42 : vector<1x1x256xf32>
    %cst_22 = arith.constant dense<0.000000e+00> : vector<256xf32>
    %44 = vector.multi_reduction <add>, %2, %cst_22 [0, 1] : vector<1x1x256xf32> to vector<256xf32>
    %45 = vector.shape_cast %44 : vector<256xf32> to vector<1x1x256xf32>
    %cst_23 = arith.constant 1.000000e+00 : f32
    %46 = vector.broadcast %cst_23 : f32 to vector<1x1x256xf32>
    %47 = arith.mulf %45, %46 : vector<1x1x256xf32>
    %cst_24 = arith.constant dense<0.000000e+00> : vector<256xf32>
    %48 = vector.multi_reduction <add>, %2, %cst_24 [0, 1] : vector<1x1x256xf32> to vector<256xf32>
    %49 = vector.shape_cast %48 : vector<256xf32> to vector<1x1x256xf32>
    %cst_25 = arith.constant 1.000000e+00 : f32
    %50 = vector.broadcast %cst_25 : f32 to vector<1x1x256xf32>
    %51 = arith.mulf %49, %50 : vector<1x1x256xf32>
    %52 = tpu.concatenate %31, %35, %39, %43, %47, %51 in 1 : vector<1x1x256xf32>, vector<1x1x256xf32>, vector<1x1x256xf32>, vector<1x1x256xf32>, vector<1x1x256xf32>, vector<1x1x256xf32> -> vector<1x6x256xf32>
    %cst_26 = arith.constant dense<0.000000e+00> : vector<256xf32>
    %53 = vector.multi_reduction <add>, %2, %cst_26 [0, 1] : vector<1x1x256xf32> to vector<256xf32>
    %54 = vector.shape_cast %53 : vector<256xf32> to vector<1x1x256xf32>
    %cst_27 = arith.constant 1.000000e+00 : f32
    %55 = vector.broadcast %cst_27 : f32 to vector<1x1x256xf32>
    %56 = arith.mulf %54, %55 : vector<1x1x256xf32>
    %cst_28 = arith.constant dense<0.000000e+00> : vector<256xf32>
    %57 = vector.multi_reduction <add>, %2, %cst_28 [0, 1] : vector<1x1x256xf32> to vector<256xf32>
    %58 = vector.shape_cast %57 : vector<256xf32> to vector<1x1x256xf32>
    %cst_29 = arith.constant 1.000000e+00 : f32
    %59 = vector.broadcast %cst_29 : f32 to vector<1x1x256xf32>
    %60 = arith.mulf %58, %59 : vector<1x1x256xf32>
    %cst_30 = arith.constant dense<0.000000e+00> : vector<256xf32>
    %61 = vector.multi_reduction <add>, %2, %cst_30 [0, 1] : vector<1x1x256xf32> to vector<256xf32>
    %62 = vector.shape_cast %61 : vector<256xf32> to vector<1x1x256xf32>
    %cst_31 = arith.constant 1.000000e+00 : f32
    %63 = vector.broadcast %cst_31 : f32 to vector<1x1x256xf32>
    %64 = arith.mulf %62, %63 : vector<1x1x256xf32>
    %cst_32 = arith.constant dense<0.000000e+00> : vector<256xf32>
    %65 = vector.multi_reduction <add>, %2, %cst_32 [0, 1] : vector<1x1x256xf32> to vector<256xf32>
    %66 = vector.shape_cast %65 : vector<256xf32> to vector<1x1x256xf32>
    %cst_33 = arith.constant 1.000000e+00 : f32
    %67 = vector.broadcast %cst_33 : f32 to vector<1x1x256xf32>
    %68 = arith.mulf %66, %67 : vector<1x1x256xf32>
    %cst_34 = arith.constant dense<0.000000e+00> : vector<256xf32>
    %69 = vector.multi_reduction <add>, %2, %cst_34 [0, 1] : vector<1x1x256xf32> to vector<256xf32>
    %70 = vector.shape_cast %69 : vector<256xf32> to vector<1x1x256xf32>
    %cst_35 = arith.constant 1.000000e+00 : f32
    %71 = vector.broadcast %cst_35 : f32 to vector<1x1x256xf32>
    %72 = arith.mulf %70, %71 : vector<1x1x256xf32>
    %cst_36 = arith.constant dense<0.000000e+00> : vector<256xf32>
    %73 = vector.multi_reduction <add>, %2, %cst_36 [0, 1] : vector<1x1x256xf32> to vector<256xf32>
    %74 = vector.shape_cast %73 : vector<256xf32> to vector<1x1x256xf32>
    %cst_37 = arith.constant 1.000000e+00 : f32
    %75 = vector.broadcast %cst_37 : f32 to vector<1x1x256xf32>
    %76 = arith.mulf %74, %75 : vector<1x1x256xf32>
    %77 = tpu.concatenate %56, %60, %64, %68, %72, %76 in 1 : vector<1x1x256xf32>, vector<1x1x256xf32>, vector<1x1x256xf32>, vector<1x1x256xf32>, vector<1x1x256xf32>, vector<1x1x256xf32> -> vector<1x6x256xf32>
    %cst_38 = arith.constant dense<0.000000e+00> : vector<256xf32>
    %78 = vector.multi_reduction <add>, %2, %cst_38 [0, 1] : vector<1x1x256xf32> to vector<256xf32>
    %79 = vector.shape_cast %78 : vector<256xf32> to vector<1x1x256xf32>
    %cst_39 = arith.constant 1.000000e+00 : f32
    %80 = vector.broadcast %cst_39 : f32 to vector<1x1x256xf32>
    %81 = arith.mulf %79, %80 : vector<1x1x256xf32>
    %cst_40 = arith.constant dense<0.000000e+00> : vector<256xf32>
    %82 = vector.multi_reduction <add>, %2, %cst_40 [0, 1] : vector<1x1x256xf32> to vector<256xf32>
    %83 = vector.shape_cast %82 : vector<256xf32> to vector<1x1x256xf32>
    %cst_41 = arith.constant 1.000000e+00 : f32
    %84 = vector.broadcast %cst_41 : f32 to vector<1x1x256xf32>
    %85 = arith.mulf %83, %84 : vector<1x1x256xf32>
    %cst_42 = arith.constant dense<0.000000e+00> : vector<256xf32>
    %86 = vector.multi_reduction <add>, %2, %cst_42 [0, 1] : vector<1x1x256xf32> to vector<256xf32>
    %87 = vector.shape_cast %86 : vector<256xf32> to vector<1x1x256xf32>
    %cst_43 = arith.constant 1.000000e+00 : f32
    %88 = vector.broadcast %cst_43 : f32 to vector<1x1x256xf32>
    %89 = arith.mulf %87, %88 : vector<1x1x256xf32>
    %cst_44 = arith.constant dense<0.000000e+00> : vector<256xf32>
    %90 = vector.multi_reduction <add>, %2, %cst_44 [0, 1] : vector<1x1x256xf32> to vector<256xf32>
    %91 = vector.shape_cast %90 : vector<256xf32> to vector<1x1x256xf32>
    %cst_45 = arith.constant 1.000000e+00 : f32
    %92 = vector.broadcast %cst_45 : f32 to vector<1x1x256xf32>
    %93 = arith.mulf %91, %92 : vector<1x1x256xf32>
    %cst_46 = arith.constant dense<0.000000e+00> : vector<256xf32>
    %94 = vector.multi_reduction <add>, %2, %cst_46 [0, 1] : vector<1x1x256xf32> to vector<256xf32>
    %95 = vector.shape_cast %94 : vector<256xf32> to vector<1x1x256xf32>
    %cst_47 = arith.constant 1.000000e+00 : f32
    %96 = vector.broadcast %cst_47 : f32 to vector<1x1x256xf32>
    %97 = arith.mulf %95, %96 : vector<1x1x256xf32>
    %cst_48 = arith.constant dense<0.000000e+00> : vector<256xf32>
    %98 = vector.multi_reduction <add>, %2, %cst_48 [0, 1] : vector<1x1x256xf32> to vector<256xf32>
    %99 = vector.shape_cast %98 : vector<256xf32> to vector<1x1x256xf32>
    %cst_49 = arith.constant 1.000000e+00 : f32
    %100 = vector.broadcast %cst_49 : f32 to vector<1x1x256xf32>
    %101 = arith.mulf %99, %100 : vector<1x1x256xf32>
    %102 = tpu.concatenate %81, %85, %89, %93, %97, %101 in 1 : vector<1x1x256xf32>, vector<1x1x256xf32>, vector<1x1x256xf32>, vector<1x1x256xf32>, vector<1x1x256xf32>, vector<1x1x256xf32> -> vector<1x6x256xf32>
    %cst_50 = arith.constant dense<0.000000e+00> : vector<256xf32>
    %103 = vector.multi_reduction <add>, %2, %cst_50 [0, 1] : vector<1x1x256xf32> to vector<256xf32>
    %104 = vector.shape_cast %103 : vector<256xf32> to vector<1x1x256xf32>
    %cst_51 = arith.constant 1.000000e+00 : f32
    %105 = vector.broadcast %cst_51 : f32 to vector<1x1x256xf32>
    %106 = arith.mulf %104, %105 : vector<1x1x256xf32>
    %cst_52 = arith.constant dense<0.000000e+00> : vector<256xf32>
    %107 = vector.multi_reduction <add>, %2, %cst_52 [0, 1] : vector<1x1x256xf32> to vector<256xf32>
    %108 = vector.shape_cast %107 : vector<256xf32> to vector<1x1x256xf32>
    %cst_53 = arith.constant 1.000000e+00 : f32
    %109 = vector.broadcast %cst_53 : f32 to vector<1x1x256xf32>
    %110 = arith.mulf %108, %109 : vector<1x1x256xf32>
    %cst_54 = arith.constant dense<0.000000e+00> : vector<256xf32>
    %111 = vector.multi_reduction <add>, %2, %cst_54 [0, 1] : vector<1x1x256xf32> to vector<256xf32>
    %112 = vector.shape_cast %111 : vector<256xf32> to vector<1x1x256xf32>
    %cst_55 = arith.constant 1.000000e+00 : f32
    %113 = vector.broadcast %cst_55 : f32 to vector<1x1x256xf32>
    %114 = arith.mulf %112, %113 : vector<1x1x256xf32>
    %cst_56 = arith.constant dense<0.000000e+00> : vector<256xf32>
    %115 = vector.multi_reduction <add>, %2, %cst_56 [0, 1] : vector<1x1x256xf32> to vector<256xf32>
    %116 = vector.shape_cast %115 : vector<256xf32> to vector<1x1x256xf32>
    %cst_57 = arith.constant 1.000000e+00 : f32
    %117 = vector.broadcast %cst_57 : f32 to vector<1x1x256xf32>
    %118 = arith.mulf %116, %117 : vector<1x1x256xf32>
    %cst_58 = arith.constant dense<0.000000e+00> : vector<256xf32>
    %119 = vector.multi_reduction <add>, %2, %cst_58 [0, 1] : vector<1x1x256xf32> to vector<256xf32>
    %120 = vector.shape_cast %119 : vector<256xf32> to vector<1x1x256xf32>
    %cst_59 = arith.constant 1.000000e+00 : f32
    %121 = vector.broadcast %cst_59 : f32 to vector<1x1x256xf32>
    %122 = arith.mulf %120, %121 : vector<1x1x256xf32>
    %cst_60 = arith.constant dense<0.000000e+00> : vector<256xf32>
    %123 = vector.multi_reduction <add>, %2, %cst_60 [0, 1] : vector<1x1x256xf32> to vector<256xf32>
    %124 = vector.shape_cast %123 : vector<256xf32> to vector<1x1x256xf32>
    %cst_61 = arith.constant 1.000000e+00 : f32
    %125 = vector.broadcast %cst_61 : f32 to vector<1x1x256xf32>
    %126 = arith.mulf %124, %125 : vector<1x1x256xf32>
    %127 = tpu.concatenate %106, %110, %114, %118, %122, %126 in 1 : vector<1x1x256xf32>, vector<1x1x256xf32>, vector<1x1x256xf32>, vector<1x1x256xf32>, vector<1x1x256xf32>, vector<1x1x256xf32> -> vector<1x6x256xf32>
    %cst_62 = arith.constant dense<0.000000e+00> : vector<256xf32>
    %128 = vector.multi_reduction <add>, %2, %cst_62 [0, 1] : vector<1x1x256xf32> to vector<256xf32>
    %129 = vector.shape_cast %128 : vector<256xf32> to vector<1x1x256xf32>
    %cst_63 = arith.constant 1.000000e+00 : f32
    %130 = vector.broadcast %cst_63 : f32 to vector<1x1x256xf32>
    %131 = arith.mulf %129, %130 : vector<1x1x256xf32>
    %cst_64 = arith.constant dense<0.000000e+00> : vector<256xf32>
    %132 = vector.multi_reduction <add>, %2, %cst_64 [0, 1] : vector<1x1x256xf32> to vector<256xf32>
    %133 = vector.shape_cast %132 : vector<256xf32> to vector<1x1x256xf32>
    %cst_65 = arith.constant 1.000000e+00 : f32
    %134 = vector.broadcast %cst_65 : f32 to vector<1x1x256xf32>
    %135 = arith.mulf %133, %134 : vector<1x1x256xf32>
    %cst_66 = arith.constant dense<0.000000e+00> : vector<256xf32>
    %136 = vector.multi_reduction <add>, %2, %cst_66 [0, 1] : vector<1x1x256xf32> to vector<256xf32>
    %137 = vector.shape_cast %136 : vector<256xf32> to vector<1x1x256xf32>
    %cst_67 = arith.constant 1.000000e+00 : f32
    %138 = vector.broadcast %cst_67 : f32 to vector<1x1x256xf32>
    %139 = arith.mulf %137, %138 : vector<1x1x256xf32>
    %cst_68 = arith.constant dense<0.000000e+00> : vector<256xf32>
    %140 = vector.multi_reduction <add>, %2, %cst_68 [0, 1] : vector<1x1x256xf32> to vector<256xf32>
    %141 = vector.shape_cast %140 : vector<256xf32> to vector<1x1x256xf32>
    %cst_69 = arith.constant 1.000000e+00 : f32
    %142 = vector.broadcast %cst_69 : f32 to vector<1x1x256xf32>
    %143 = arith.mulf %141, %142 : vector<1x1x256xf32>
    %cst_70 = arith.constant dense<0.000000e+00> : vector<256xf32>
    %144 = vector.multi_reduction <add>, %2, %cst_70 [0, 1] : vector<1x1x256xf32> to vector<256xf32>
    %145 = vector.shape_cast %144 : vector<256xf32> to vector<1x1x256xf32>
    %cst_71 = arith.constant 1.000000e+00 : f32
    %146 = vector.broadcast %cst_71 : f32 to vector<1x1x256xf32>
    %147 = arith.mulf %145, %146 : vector<1x1x256xf32>
    %cst_72 = arith.constant dense<0.000000e+00> : vector<256xf32>
    %148 = vector.multi_reduction <add>, %2, %cst_72 [0, 1] : vector<1x1x256xf32> to vector<256xf32>
    %149 = vector.shape_cast %148 : vector<256xf32> to vector<1x1x256xf32>
    %cst_73 = arith.constant 1.000000e+00 : f32
    %150 = vector.broadcast %cst_73 : f32 to vector<1x1x256xf32>
    %151 = arith.mulf %149, %150 : vector<1x1x256xf32>
    %152 = tpu.concatenate %131, %135, %139, %143, %147, %151 in 1 : vector<1x1x256xf32>, vector<1x1x256xf32>, vector<1x1x256xf32>, vector<1x1x256xf32>, vector<1x1x256xf32>, vector<1x1x256xf32> -> vector<1x6x256xf32>
    %153 = tpu.concatenate %27, %52, %77, %102, %127, %152 in 0 : vector<1x6x256xf32>, vector<1x6x256xf32>, vector<1x6x256xf32>, vector<1x6x256xf32>, vector<1x6x256xf32>, vector<1x6x256xf32> -> vector<6x6x256xf32>
    %154 = arith.truncf %153 : vector<6x6x256xf32> to vector<6x6x256xbf16>
    %c0_74 = arith.constant 0 : index
    %c0_75 = arith.constant 0 : index
    %c0_76 = arith.constant 0 : index
    %c0_77 = arith.constant 0 : index
    %155 = vector.load %arg2[%c0_74, %c0_75, %c0_76, %c0_77] : memref<1x6x6x256xbf16, #tpu.memory_space<vmem>>, vector<1x6x6x256xbf16>
    %156 = vector.shape_cast %155 : vector<1x6x6x256xbf16> to vector<6x6x256xbf16>
    %157 = vector.shape_cast %154 : vector<6x6x256xbf16> to vector<1x6x6x256xbf16>
    tpu.vector_store %arg2[%c0_74, %c0_75, %c0_76, %c0_77], %157 {strides = array<i32>} : memref<1x6x6x256xbf16, #tpu.memory_space<vmem>>, vector<1x6x6x256xbf16>,
    return
  }
  func.func @transform_0(%arg0: i32) -> (i32, i32, i32, i32) {
    %c0_i32 = arith.constant 0 : i32
    %c0_i32_0 = arith.constant 0 : i32
    %c0_i32_1 = arith.constant 0 : i32
    %c0_i32_2 = arith.constant 0 : i32
    return %arg0, %c0_i32, %c0_i32_0, %c0_i32_1 : i32, i32, i32, i32
  }
  func.func @transform_1(%arg0: i32) -> (i32, i32, i32, i32) {
    %c0_i32 = arith.constant 0 : i32
    %c0_i32_0 = arith.constant 0 : i32
    %c0_i32_1 = arith.constant 0 : i32
    %c0_i32_2 = arith.constant 0 : i32
    return %arg0, %c0_i32, %c0_i32_0, %c0_i32_1 : i32, i32, i32, i32
  }
}

module attributes {stable_mosaic.version = 11 : i64} {
  func.func @_mm_kernel(%arg0: i32, %arg1: i32, %arg2: i32, %arg3: memref<16x1536xbf16, #tpu.memory_space<vmem>>, %arg4: memref<1536x256xbf16, #tpu.memory_space<vmem>>, %arg5: memref<1x256xf32, #tpu.memory_space<vmem>>, %arg6: memref<16x256xbf16, #tpu.memory_space<vmem>>, %arg7: memref<16x256xf32, #tpu.memory_space<vmem>>) attributes {dimension_semantics = [#tpu.dimension_semantics<parallel>, #tpu.dimension_semantics<parallel>, #tpu.dimension_semantics<arbitrary>], iteration_bounds = array<i64: 1, 16, 6>, scalar_prefetch = 0 : i64, scratch_operands = 1 : i64, tpu.core_type = #tpu.core_type<tc>, window_params = [{transform_indices = @transform_0, window_bounds = array<i64: 16, 1536>}, {transform_indices = @transform_1, window_bounds = array<i64: 1536, 256>}, {transform_indices = @transform_2, window_bounds = array<i64: 1, 256>}, {transform_indices = @transform_3, window_bounds = array<i64: 16, 256>}]} {
    %c0_i32 = arith.constant 0 : i32
    %0 = arith.cmpi eq, %arg2, %c0_i32 : i32
    %1 = arith.extui %0 : i1 to i32
    %c0_i32_0 = arith.constant 0 : i32
    %2 = arith.cmpi ne, %1, %c0_i32_0 : i32
    scf.if %2 {
      %cst_9 = arith.constant 0.000000e+00 : f32
      %12 = vector.broadcast %cst_9 : f32 to vector<16x256xf32>
      %c0_10 = arith.constant 0 : index
      %c0_11 = arith.constant 0 : index
      %13 = vector.load %arg7[%c0_10, %c0_11] : memref<16x256xf32, #tpu.memory_space<vmem>>, vector<16x256xf32>
      tpu.vector_store %arg7[%c0_10, %c0_11], %12 {strides = array<i32>} : memref<16x256xf32, #tpu.memory_space<vmem>>, vector<16x256xf32>,
    } else {
    }
    %c0 = arith.constant 0 : index
    %c0_1 = arith.constant 0 : index
    %3 = vector.load %arg7[%c0, %c0_1] : memref<16x256xf32, #tpu.memory_space<vmem>>, vector<16x256xf32>
    %c0_2 = arith.constant 0 : index
    %c0_3 = arith.constant 0 : index
    %4 = vector.load %arg3[%c0_2, %c0_3] : memref<16x1536xbf16, #tpu.memory_space<vmem>>, vector<16x1536xbf16>
    %c0_4 = arith.constant 0 : index
    %c0_5 = arith.constant 0 : index
    %5 = vector.load %arg4[%c0_4, %c0_5] : memref<1536x256xbf16, #tpu.memory_space<vmem>>, vector<1536x256xbf16>
    %cst = arith.constant dense<0.000000e+00> : vector<16x256xf32>
    %6 = tpu.matmul %4, %5, %cst {dimension_numbers = #tpu.dot_dimension_numbers<[1], [0], [0], [1], [0, 0, 1, 1], [], []>} : vector<16x1536xbf16>, vector<1536x256xbf16>, vector<16x256xf32> -> vector<16x256xf32>
    %7 = arith.addf %3, %6 : vector<16x256xf32>
    %c0_6 = arith.constant 0 : index
    %c0_7 = arith.constant 0 : index
    %8 = vector.load %arg7[%c0_6, %c0_7] : memref<16x256xf32, #tpu.memory_space<vmem>>, vector<16x256xf32>
    tpu.vector_store %arg7[%c0_6, %c0_7], %7 {strides = array<i32>} : memref<16x256xf32, #tpu.memory_space<vmem>>, vector<16x256xf32>,
    %c5_i32 = arith.constant 5 : i32
    %9 = arith.cmpi eq, %arg2, %c5_i32 : i32
    %10 = arith.extui %9 : i1 to i32
    %c0_i32_8 = arith.constant 0 : i32
    %11 = arith.cmpi ne, %10, %c0_i32_8 : i32
    scf.if %11 {
      %c0_9 = arith.constant 0 : index
      %c0_10 = arith.constant 0 : index
      %12 = vector.load %arg7[%c0_9, %c0_10] : memref<16x256xf32, #tpu.memory_space<vmem>>, vector<16x256xf32>
      %c0_11 = arith.constant 0 : index
      %c0_12 = arith.constant 0 : index
      %13 = vector.load %arg5[%c0_11, %c0_12] : memref<1x256xf32, #tpu.memory_space<vmem>>, vector<1x256xf32>
      %14 = vector.broadcast %13 : vector<1x256xf32> to vector<16x256xf32>
      %15 = arith.addf %12, %14 : vector<16x256xf32>
      %cst_13 = arith.constant 0.000000e+00 : f32
      %16 = vector.broadcast %cst_13 : f32 to vector<16x256xf32>
      %17 = arith.maximumf %15, %16 : vector<16x256xf32>
      %18 = arith.truncf %17 : vector<16x256xf32> to vector<16x256xbf16>
      %c0_14 = arith.constant 0 : index
      %c0_15 = arith.constant 0 : index
      %19 = vector.load %arg6[%c0_14, %c0_15] : memref<16x256xbf16, #tpu.memory_space<vmem>>, vector<16x256xbf16>
      tpu.vector_store %arg6[%c0_14, %c0_15], %18 {strides = array<i32>} : memref<16x256xbf16, #tpu.memory_space<vmem>>, vector<16x256xbf16>,
    } else {
    }
    return
  }
  func.func @transform_0(%arg0: i32, %arg1: i32, %arg2: i32) -> (i32, i32) {
    %c0_i32 = arith.constant 0 : i32
    return %arg0, %arg2 : i32, i32
  }
  func.func @transform_1(%arg0: i32, %arg1: i32, %arg2: i32) -> (i32, i32) {
    %c0_i32 = arith.constant 0 : i32
    return %arg2, %arg1 : i32, i32
  }
  func.func @transform_2(%arg0: i32, %arg1: i32, %arg2: i32) -> (i32, i32) {
    %c0_i32 = arith.constant 0 : i32
    %c0_i32_0 = arith.constant 0 : i32
    return %c0_i32, %arg1 : i32, i32
  }
  func.func @transform_3(%arg0: i32, %arg1: i32, %arg2: i32) -> (i32, i32) {
    %c0_i32 = arith.constant 0 : i32
    return %arg0, %arg1 : i32, i32
  }
}

module attributes {stable_mosaic.version = 11 : i64} {
  func.func @_mm_kernel(%arg0: i32, %arg1: i32, %arg2: i32, %arg3: memref<16x1024xbf16, #tpu.memory_space<vmem>>, %arg4: memref<1024x256xbf16, #tpu.memory_space<vmem>>, %arg5: memref<1x256xf32, #tpu.memory_space<vmem>>, %arg6: memref<16x256xbf16, #tpu.memory_space<vmem>>, %arg7: memref<16x256xf32, #tpu.memory_space<vmem>>) attributes {dimension_semantics = [#tpu.dimension_semantics<parallel>, #tpu.dimension_semantics<parallel>, #tpu.dimension_semantics<arbitrary>], iteration_bounds = array<i64: 1, 16, 4>, scalar_prefetch = 0 : i64, scratch_operands = 1 : i64, tpu.core_type = #tpu.core_type<tc>, window_params = [{transform_indices = @transform_0, window_bounds = array<i64: 16, 1024>}, {transform_indices = @transform_1, window_bounds = array<i64: 1024, 256>}, {transform_indices = @transform_2, window_bounds = array<i64: 1, 256>}, {transform_indices = @transform_3, window_bounds = array<i64: 16, 256>}]} {
    %c0_i32 = arith.constant 0 : i32
    %0 = arith.cmpi eq, %arg2, %c0_i32 : i32
    %1 = arith.extui %0 : i1 to i32
    %c0_i32_0 = arith.constant 0 : i32
    %2 = arith.cmpi ne, %1, %c0_i32_0 : i32
    scf.if %2 {
      %cst_9 = arith.constant 0.000000e+00 : f32
      %12 = vector.broadcast %cst_9 : f32 to vector<16x256xf32>
      %c0_10 = arith.constant 0 : index
      %c0_11 = arith.constant 0 : index
      %13 = vector.load %arg7[%c0_10, %c0_11] : memref<16x256xf32, #tpu.memory_space<vmem>>, vector<16x256xf32>
      tpu.vector_store %arg7[%c0_10, %c0_11], %12 {strides = array<i32>} : memref<16x256xf32, #tpu.memory_space<vmem>>, vector<16x256xf32>,
    } else {
    }
    %c0 = arith.constant 0 : index
    %c0_1 = arith.constant 0 : index
    %3 = vector.load %arg7[%c0, %c0_1] : memref<16x256xf32, #tpu.memory_space<vmem>>, vector<16x256xf32>
    %c0_2 = arith.constant 0 : index
    %c0_3 = arith.constant 0 : index
    %4 = vector.load %arg3[%c0_2, %c0_3] : memref<16x1024xbf16, #tpu.memory_space<vmem>>, vector<16x1024xbf16>
    %c0_4 = arith.constant 0 : index
    %c0_5 = arith.constant 0 : index
    %5 = vector.load %arg4[%c0_4, %c0_5] : memref<1024x256xbf16, #tpu.memory_space<vmem>>, vector<1024x256xbf16>
    %cst = arith.constant dense<0.000000e+00> : vector<16x256xf32>
    %6 = tpu.matmul %4, %5, %cst {dimension_numbers = #tpu.dot_dimension_numbers<[1], [0], [0], [1], [0, 0, 1, 1], [], []>} : vector<16x1024xbf16>, vector<1024x256xbf16>, vector<16x256xf32> -> vector<16x256xf32>
    %7 = arith.addf %3, %6 : vector<16x256xf32>
    %c0_6 = arith.constant 0 : index
    %c0_7 = arith.constant 0 : index
    %8 = vector.load %arg7[%c0_6, %c0_7] : memref<16x256xf32, #tpu.memory_space<vmem>>, vector<16x256xf32>
    tpu.vector_store %arg7[%c0_6, %c0_7], %7 {strides = array<i32>} : memref<16x256xf32, #tpu.memory_space<vmem>>, vector<16x256xf32>,
    %c3_i32 = arith.constant 3 : i32
    %9 = arith.cmpi eq, %arg2, %c3_i32 : i32
    %10 = arith.extui %9 : i1 to i32
    %c0_i32_8 = arith.constant 0 : i32
    %11 = arith.cmpi ne, %10, %c0_i32_8 : i32
    scf.if %11 {
      %c0_9 = arith.constant 0 : index
      %c0_10 = arith.constant 0 : index
      %12 = vector.load %arg7[%c0_9, %c0_10] : memref<16x256xf32, #tpu.memory_space<vmem>>, vector<16x256xf32>
      %c0_11 = arith.constant 0 : index
      %c0_12 = arith.constant 0 : index
      %13 = vector.load %arg5[%c0_11, %c0_12] : memref<1x256xf32, #tpu.memory_space<vmem>>, vector<1x256xf32>
      %14 = vector.broadcast %13 : vector<1x256xf32> to vector<16x256xf32>
      %15 = arith.addf %12, %14 : vector<16x256xf32>
      %cst_13 = arith.constant 0.000000e+00 : f32
      %16 = vector.broadcast %cst_13 : f32 to vector<16x256xf32>
      %17 = arith.maximumf %15, %16 : vector<16x256xf32>
      %18 = arith.truncf %17 : vector<16x256xf32> to vector<16x256xbf16>
      %c0_14 = arith.constant 0 : index
      %c0_15 = arith.constant 0 : index
      %19 = vector.load %arg6[%c0_14, %c0_15] : memref<16x256xbf16, #tpu.memory_space<vmem>>, vector<16x256xbf16>
      tpu.vector_store %arg6[%c0_14, %c0_15], %18 {strides = array<i32>} : memref<16x256xbf16, #tpu.memory_space<vmem>>, vector<16x256xbf16>,
    } else {
    }
    return
  }
  func.func @transform_0(%arg0: i32, %arg1: i32, %arg2: i32) -> (i32, i32) {
    %c0_i32 = arith.constant 0 : i32
    return %arg0, %arg2 : i32, i32
  }
  func.func @transform_1(%arg0: i32, %arg1: i32, %arg2: i32) -> (i32, i32) {
    %c0_i32 = arith.constant 0 : i32
    return %arg2, %arg1 : i32, i32
  }
  func.func @transform_2(%arg0: i32, %arg1: i32, %arg2: i32) -> (i32, i32) {
    %c0_i32 = arith.constant 0 : i32
    %c0_i32_0 = arith.constant 0 : i32
    return %c0_i32, %arg1 : i32, i32
  }
  func.func @transform_3(%arg0: i32, %arg1: i32, %arg2: i32) -> (i32, i32) {
    %c0_i32 = arith.constant 0 : i32
    return %arg0, %arg1 : i32, i32
  }
}

module attributes {stable_mosaic.version = 11 : i64} {
  func.func @_mm_kernel(%arg0: i32, %arg1: i32, %arg2: i32, %arg3: memref<16x1024xbf16, #tpu.memory_space<vmem>>, %arg4: memref<1024x128xbf16, #tpu.memory_space<vmem>>, %arg5: memref<1x128xf32, #tpu.memory_space<vmem>>, %arg6: memref<16x128xf32, #tpu.memory_space<vmem>>, %arg7: memref<16x128xf32, #tpu.memory_space<vmem>>) attributes {dimension_semantics = [#tpu.dimension_semantics<parallel>, #tpu.dimension_semantics<parallel>, #tpu.dimension_semantics<arbitrary>], iteration_bounds = array<i64: 1, 1, 4>, scalar_prefetch = 0 : i64, scratch_operands = 1 : i64, tpu.core_type = #tpu.core_type<tc>, window_params = [{transform_indices = @transform_0, window_bounds = array<i64: 16, 1024>}, {transform_indices = @transform_1, window_bounds = array<i64: 1024, 128>}, {transform_indices = @transform_2, window_bounds = array<i64: 1, 128>}, {transform_indices = @transform_3, window_bounds = array<i64: 16, 128>}]} {
    %c0_i32 = arith.constant 0 : i32
    %0 = arith.cmpi eq, %arg2, %c0_i32 : i32
    %1 = arith.extui %0 : i1 to i32
    %c0_i32_0 = arith.constant 0 : i32
    %2 = arith.cmpi ne, %1, %c0_i32_0 : i32
    scf.if %2 {
      %cst_9 = arith.constant 0.000000e+00 : f32
      %12 = vector.broadcast %cst_9 : f32 to vector<16x128xf32>
      %c0_10 = arith.constant 0 : index
      %c0_11 = arith.constant 0 : index
      %13 = vector.load %arg7[%c0_10, %c0_11] : memref<16x128xf32, #tpu.memory_space<vmem>>, vector<16x128xf32>
      tpu.vector_store %arg7[%c0_10, %c0_11], %12 {strides = array<i32>} : memref<16x128xf32, #tpu.memory_space<vmem>>, vector<16x128xf32>,
    } else {
    }
    %c0 = arith.constant 0 : index
    %c0_1 = arith.constant 0 : index
    %3 = vector.load %arg7[%c0, %c0_1] : memref<16x128xf32, #tpu.memory_space<vmem>>, vector<16x128xf32>
    %c0_2 = arith.constant 0 : index
    %c0_3 = arith.constant 0 : index
    %4 = vector.load %arg3[%c0_2, %c0_3] : memref<16x1024xbf16, #tpu.memory_space<vmem>>, vector<16x1024xbf16>
    %c0_4 = arith.constant 0 : index
    %c0_5 = arith.constant 0 : index
    %5 = vector.load %arg4[%c0_4, %c0_5] : memref<1024x128xbf16, #tpu.memory_space<vmem>>, vector<1024x128xbf16>
    %cst = arith.constant dense<0.000000e+00> : vector<16x128xf32>
    %6 = tpu.matmul %4, %5, %cst {dimension_numbers = #tpu.dot_dimension_numbers<[1], [0], [0], [1], [0, 0, 1, 1], [], []>} : vector<16x1024xbf16>, vector<1024x128xbf16>, vector<16x128xf32> -> vector<16x128xf32>
    %7 = arith.addf %3, %6 : vector<16x128xf32>
    %c0_6 = arith.constant 0 : index
    %c0_7 = arith.constant 0 : index
    %8 = vector.load %arg7[%c0_6, %c0_7] : memref<16x128xf32, #tpu.memory_space<vmem>>, vector<16x128xf32>
    tpu.vector_store %arg7[%c0_6, %c0_7], %7 {strides = array<i32>} : memref<16x128xf32, #tpu.memory_space<vmem>>, vector<16x128xf32>,
    %c3_i32 = arith.constant 3 : i32
    %9 = arith.cmpi eq, %arg2, %c3_i32 : i32
    %10 = arith.extui %9 : i1 to i32
    %c0_i32_8 = arith.constant 0 : i32
    %11 = arith.cmpi ne, %10, %c0_i32_8 : i32
    scf.if %11 {
      %c0_9 = arith.constant 0 : index
      %c0_10 = arith.constant 0 : index
      %12 = vector.load %arg7[%c0_9, %c0_10] : memref<16x128xf32, #tpu.memory_space<vmem>>, vector<16x128xf32>
      %c0_11 = arith.constant 0 : index
      %c0_12 = arith.constant 0 : index
      %13 = vector.load %arg5[%c0_11, %c0_12] : memref<1x128xf32, #tpu.memory_space<vmem>>, vector<1x128xf32>
      %14 = vector.broadcast %13 : vector<1x128xf32> to vector<16x128xf32>
      %15 = arith.addf %12, %14 : vector<16x128xf32>
      %c0_13 = arith.constant 0 : index
      %c0_14 = arith.constant 0 : index
      %16 = vector.load %arg6[%c0_13, %c0_14] : memref<16x128xf32, #tpu.memory_space<vmem>>, vector<16x128xf32>
      tpu.vector_store %arg6[%c0_13, %c0_14], %15 {strides = array<i32>} : memref<16x128xf32, #tpu.memory_space<vmem>>, vector<16x128xf32>,
    } else {
    }
    return
  }
  func.func @transform_0(%arg0: i32, %arg1: i32, %arg2: i32) -> (i32, i32) {
    %c0_i32 = arith.constant 0 : i32
    return %arg0, %arg2 : i32, i32
  }
  func.func @transform_1(%arg0: i32, %arg1: i32, %arg2: i32) -> (i32, i32) {
    %c0_i32 = arith.constant 0 : i32
    return %arg2, %arg1 : i32, i32
  }
  func.func @transform_2(%arg0: i32, %arg1: i32, %arg2: i32) -> (i32, i32) {
    %c0_i32 = arith.constant 0 : i32
    %c0_i32_0 = arith.constant 0 : i32
    return %c0_i32, %arg1 : i32, i32
  }
  func.func @transform_3(%arg0: i32, %arg1: i32, %arg2: i32) -> (i32, i32) {
    %c0_i32 = arith.constant 0 : i32
    return %arg0, %arg1 : i32, i32
  }
}

</mosaic_0001>

<bundles_post_ra>
// kernel: _lambda_.13
= control target key start
LH: loop header
LB: loop body
LE: loop exit
PB: predicated region body
PF: predicated region fallthrough
CT: control target
= control target key end

     0   :  { %s822_s6 = smov 0   ;;  %s1000_s0 = inlined_call_operand.vmem [shape: bf16[2,16,16,128], index: 0, kind: input, shape index: {}]   ;;  %s1001_s1 = inlined_call_operand.vmem [shape: bf16[2,7,7,128], index: 1, kind: output, shape index: {}]  }
   0x1 LB: > { %s742_s7 = sadd.s32 4294967295, %s810_s6   ;;  %p746_p0 = scmp.ge.s32.totalorder %s810_s6, 1  ;;  %s810_s6 = sphi %s822_s6, %s11_s6  }
   0x2   : > { %p87_p1 = scmp.lt.s32.totalorder %s810_s6, 3 }
   0x4   : > { %p88_p2 = pnand %p746_p0, %p87_p1 }
   0x5   : > { %p107_p3 = scmp.lt.s32.totalorder (!%p88_p2), %s742_s7, 1 }
   0x6   : > { %91 = sbr.rel (%p88_p2) target bundleno = 83 (0x53), region = 24 }
   0xb   : > { %s1011_s7 = smov (!%p107_p3, %s742_s7), 1  ;;  %vm546_vm0 = vcmask 1040384   ;;  %vm547_vm1 = vsmask.f32 256  ;;  %vm585_vm2 = vcmask 1041408   ;;  %vm624_vm4 = vcmask 1042432  }
   0xc   : > { %s794_s8 = sshll.u32 %s1011_s7, 7  ;;  %vm586_vm3 = vsmask.f32 1280  ;;  %vm625_vm5 = vsmask.f32 2304  ;;  %vm663_vm6 = vcmask 1043456   ;;  %vm861_vm8 = vmand %vm546_vm0, %vm547_vm1 }
   0xd   : > { %s836_s11 = scalar_lea.vmem %s1000_s0, %s794_s8  ;;  %vm664_vm7 = vsmask.f32 3328  ;;  %s795_s12 = smul.u32 28, %s1011_s7  ;;  %vm867_vm9 = vmand %vm585_vm2, %vm586_vm3 }
   0xe   : > { %v117_v0 = vld [vmem:[%s836_s11] sm:$0xf]  ;;  %v118_v1 = vld [vmem:[%s836_s11 + $0x4] sm:$0xf]  ;;  %v119_v2 = vld [vmem:[%s836_s11 + $0x8] sm:$0xf] }
   0xf   : > { %v120_v3 = vld [vmem:[%s836_s11 + $0xc] sm:$0xf]  ;;  %v121_v4 = vld [vmem:[%s836_s11 + $0x10] sm:$0xf]  ;;  %v122_v5 = vld [vmem:[%s836_s11 + $0x14] sm:$0xf]  ;;  %v147_v6 = vmax.bf16 %v119_v2, %v117_v0  ;;  %s874_s15 = scalar_lea.vmem %s1001_s1, %s795_s12 }
  0x10   : > { %v148_v7 = vmax.bf16 %v120_v3, %v118_v1  ;;  %v123_v8 = vld [vmem:[%s836_s11 + $0x18] sm:$0xf]  ;;  %v124_v9 = vld [vmem:[%s836_s11 + $0x1c] sm:$0xf]  ;;  %v125_v11 = vld [vmem:[%s836_s11 + $0x20] sm:$0xf] }
  0x11   : > { %v149_v10 = vmax.bf16 %v147_v6, %v121_v4  ;;  %v126_v12 = vld [vmem:[%s836_s11 + $0x24] sm:$0xf]  ;;  %v151_v13 = vmax.bf16 %v123_v8, %v121_v4  ;;  %v152_v14 = vmax.bf16 %v124_v9, %v122_v5  ;;  %v127_v16 = vld [vmem:[%s836_s11 + $0x28] sm:$0xf]  ;;  %v128_v17 = vld [vmem:[%s836_s11 + $0x2c] sm:$0xf] }
  0x12   : > { %v150_v15 = vmax.bf16 %v148_v7, %v122_v5  ;;  %v155_v24 = vmax.bf16 %v127_v16, %v125_v11  ;;  %v156_v25 = vmax.bf16 %v128_v17, %v126_v12  ;;  %v851_v30 = vld [vmem:[%s836_s11 + $0x30] sm:$0xf]  ;;  %v855_v39 = vld [vmem:[%s836_s11 + $0x34] sm:$0xf]  ;;  %vm881_vm10 = vmand %vm624_vm4, %vm625_vm5 }
  0x13   : > { %v176_v18 = vshrl.u32 %v149_v10, 16  ;;  %v757_v19 = vrot.slane %v149_v10, 9  ;;  %v153_v20 = vmax.bf16 %v151_v13, %v125_v11  ;;  %v154_v21 = vmax.bf16 %v152_v14, %v126_v12  ;;  %vm893_vm11 = vmand %vm663_vm6, %vm664_vm7 }
  0x14   : > { %v266_v22 = vrot.slane %v150_v15, 5  ;;  %v288_v23 = vshrl.u32 %v150_v15, 16  ;;  %v157_v34 = vmax.bf16 %v155_v24, %v851_v30  ;;  %v158_v42 = vmax.bf16 %v156_v25, %v855_v39 }
  0x15   : > { %v217_v26 = vmax.bf16 %v176_v18, %v149_v10  ;;  %v181_v27 = vshrl.u32 %v153_v20, 16  ;;  %v758_v28 = vrot.slane %v153_v20, 9  ;;  %v267_v29 = vrot.slane %v154_v21, 5 }
  0x16   : > { %v329_v31 = vmax.bf16 %v288_v23, %v150_v15  ;;  %v336_v32 = vrot.slane %v266_v22, 4  ;;  %v293_v33 = vshrl.u32 %v154_v21, 16  ;;  %v186_v43 = vshrl.u32 %v157_v34, 16 }
  0x17   : > { %v252_v35 = vmax.bf16 %v757_v19, %v217_v26  ;;  %v280_v36 = vmax.bf16 %v266_v22, %v217_v26  ;;  %v218_v37 = vmax.bf16 %v181_v27, %v153_v20  ;;  %v337_v38 = vrot.slane %v267_v29, 4  ;;  %v131_v19 = vld [vmem:[%s836_s11 + $0x38] sm:$0xf]  ;;  %v666_v22 = vld [vmem:[%s874_s15] sm:$0xf] }
  0x18   : > { %v350_v40 = vmax.bf16 %v336_v32, %v329_v31  ;;  %v330_v41 = vmax.bf16 %v293_v33, %v154_v21  ;;  %v219_v50 = vmax.bf16 %v186_v43, %v157_v34  ;;  %v759_v51 = vrot.slane %v157_v34, 9  ;;  %v132_v31 = vld [vmem:[%s836_s11 + $0x3c] sm:$0xf]  ;;  %v669_v34 = vld [vmem:[%s874_s15 + $0x4] sm:$0xf] }
  0x19   : > { %v771_v44 = vcombine.low %v252_v35, %v252_v35  ;;  %v778_v45 = vcombine.low %v280_v36, %v280_v36  ;;  %v253_v46 = vmax.bf16 %v758_v28, %v218_v37  ;;  %v281_v47 = vmax.bf16 %v267_v29, %v218_v37  ;;  %v133_v36 = vld [vmem:[%s836_s11 + $0x40] sm:$0xf]  ;;  %v134_v37 = vld [vmem:[%s836_s11 + $0x44] sm:$0xf] }
  0x1a   : > { %v785_v48 = vcombine.low %v350_v40, %v350_v40  ;;  %v351_v49 = vmax.bf16 %v337_v38, %v330_v41  ;;  %v254_v5 = vmax.bf16 %v759_v51, %v219_v50  ;;  %v268_v8 = vrot.slane %v158_v42, 5 }
  0x1b   : > { %v379_v52 = vshll.u32 %v771_v44, 16  ;;  %v413_v53 = vrot.slane %v771_v44, 1  ;;  %v442_v54 = vshll.u32 %v778_v45, 16  ;;  %v772_v55 = vcombine.low %v253_v46, %v253_v46  ;;  %v135_v44 = vld [vmem:[%s836_s11 + $0x48] sm:$0xf] }
  0x1c   : > { %v497_v56 = vrot.slane %v785_v48, 6  ;;  %v505_v57 = vshll.u32 %v785_v48, 16  ;;  %v539_v58 = vrot.slane %v785_v48, 7  ;;  %v779_v60 = vcombine.low %v281_v47, %v281_v47  ;;  %v136_v45 = vld [vmem:[%s836_s11 + $0x4c] sm:$0xf] }
  0x1d   : > { %v381_v61 = vrot.slane %v379_v52, 1  ;;  %v444_v62 = vrot.slane %v442_v54, 2  ;;  %v383_v63 = vshll.u32 %v772_v55, 16  ;;  %v414_v0 = vrot.slane %v772_v55, 1 }
  0x1e   : > { %v507_v1 = vrot.slane %v505_v57, 7  ;;  %v446_v3 = vshll.u32 %v779_v60, 16  ;;  %v786_v4 = vcombine.low %v351_v49, %v351_v49  ;;  %v298_v9 = vshrl.u32 %v158_v42, 16 }
  0x1f   : > { %v549_v6 = vsel %vm861_vm8, %v252_v35, %v381_v61  ;;  %v385_v7 = vrot.slane %v383_v63, 1  ;;  %v282_v18 = vmax.bf16 %v268_v8, %v219_v50  ;;  %v338_v28 = vrot.slane %v268_v8, 4 }
  0x20   : > { %v559_v10 = vsel %vm546_vm0, %v549_v6, %v413_v53  ;;  %v448_v12 = vrot.slane %v446_v3, 2  ;;  %v498_v13 = vrot.slane %v786_v4, 6  ;;  %v509_v14 = vshll.u32 %v786_v4, 16 }
  0x21   : > { %v588_v15 = vsel %vm867_vm9, %v559_v10, %v444_v62  ;;  %v540_v16 = vrot.slane %v786_v4, 7  ;;  %v550_v17 = vsel %vm861_vm8, %v253_v46, %v385_v7  ;;  %v331_v25 = vmax.bf16 %v298_v9, %v158_v42  ;;  %v138_v7 = vld [vmem:[%s836_s11 + $0x54] sm:$0xf]  ;;  %v672_v10 = vld [vmem:[%s874_s15 + $0x8] sm:$0xf] }
  0x22   : > { %v598_v20 = vsel %vm585_vm2, %v588_v15, %v497_v56  ;;  %v511_v23 = vrot.slane %v509_v14, 7  ;;  %v563_v24 = vsel %vm546_vm0, %v550_v17, %v414_v0  ;;  %v773_v29 = vcombine.low %v254_v5, %v254_v5 }
  0x23   : > { %v627_v26 = vsel %vm881_vm10, %v598_v20, %v507_v1  ;;  %v589_v27 = vsel %vm867_vm9, %v563_v24, %v448_v12  ;;  %v780_v35 = vcombine.low %v282_v18, %v282_v18  ;;  %v159_v38 = vmax.bf16 %v131_v19, %v851_v30  ;;  %v137_v1 = vld [vmem:[%s836_s11 + $0x50] sm:$0xf]  ;;  %v139_v18 = vld [vmem:[%s836_s11 + $0x58] sm:$0xf] }
  0x24   : > { %v637_v32 = vsel %vm624_vm4, %v627_v26, %v539_v58  ;;  %v602_v33 = vsel %vm585_vm2, %v589_v27, %v498_v13  ;;  %v352_v42 = vmax.bf16 %v338_v28, %v331_v25  ;;  %v387_v43 = vshll.u32 %v773_v29, 16  ;;  %v140_v28 = vld [vmem:[%s836_s11 + $0x5c] sm:$0xf] }
  0x25   : > { %v667_v40 = vsel %vm893_vm11, %v637_v32, %v666_v22  ;;  %v628_v41 = vsel %vm881_vm10, %v602_v33, %v511_v23  ;;  %v415_v47 = vrot.slane %v773_v29, 1  ;;  %v450_v48 = vshll.u32 %v780_v35, 16 }
  0x26   : > { %668 = vst [vmem:[%s874_s15] sm:$0xf] %v667_v40  ;;  %v641_v46 = vsel %vm624_vm4, %v628_v41, %v540_v16  ;;  %v160_v49 = vmax.bf16 %v132_v31, %v855_v39  ;;  %v389_v50 = vrot.slane %v387_v43, 1  ;;  %v787_v51 = vcombine.low %v352_v42, %v352_v42 }
  0x27   : > { %v670_v30 = vsel %vm893_vm11, %v641_v46, %v669_v34  ;;  %v161_v52 = vmax.bf16 %v159_v38, %v133_v36  ;;  %v452_v53 = vrot.slane %v450_v48, 2  ;;  %v163_v55 = vmax.bf16 %v135_v44, %v133_v36 }
  0x28   : > { %671 = vst [vmem:[%s874_s15 + $0x4] sm:$0xf] %v670_v30  ;;  %v162_v54 = vmax.bf16 %v160_v49, %v134_v37  ;;  %v164_v56 = vmax.bf16 %v136_v45, %v134_v37  ;;  %v499_v57 = vrot.slane %v787_v51, 6  ;;  %v513_v58 = vshll.u32 %v787_v51, 16 }
  0x29   : > { %v541_v60 = vrot.slane %v787_v51, 7  ;;  %v551_v39 = vsel %vm861_vm8, %v254_v5, %v389_v50  ;;  %v191_v62 = vshrl.u32 %v161_v52, 16  ;;  %v760_v63 = vrot.slane %v161_v52, 9  ;;  %v141_v50 = vld [vmem:[%s836_s11 + $0x60] sm:$0xf] }
  0x2a   : > { %v567_v61 = vsel %vm546_vm0, %v551_v39, %v415_v47  ;;  %v269_v0 = vrot.slane %v162_v54, 5  ;;  %v515_v3 = vrot.slane %v513_v58, 7  ;;  %v303_v6 = vshrl.u32 %v162_v54, 16  ;;  %v142_v51 = vld [vmem:[%s836_s11 + $0x64] sm:$0xf] }
  0x2b   : > { %v590_v4 = vsel %vm867_vm9, %v567_v61, %v452_v53  ;;  %v165_v8 = vmax.bf16 %v163_v55, %v137_v1  ;;  %v220_v12 = vmax.bf16 %v191_v62, %v161_v52  ;;  %v166_v13 = vmax.bf16 %v164_v56, %v138_v7 }
  0x2c   : > { %v606_v9 = vsel %vm585_vm2, %v590_v4, %v499_v57  ;;  %v339_v5 = vrot.slane %v269_v0, 4  ;;  %v332_v15 = vmax.bf16 %v303_v6, %v162_v54  ;;  %v167_v33 = vmax.bf16 %v139_v18, %v137_v1  ;;  %v143_v6 = vld [vmem:[%s836_s11 + $0x68] sm:$0xf] }
  0x2d   : > { %v629_v14 = vsel %vm881_vm10, %v606_v9, %v515_v3  ;;  %v196_v16 = vshrl.u32 %v165_v8, 16  ;;  %v761_v17 = vrot.slane %v165_v8, 9  ;;  %v255_v20 = vmax.bf16 %v760_v63, %v220_v12 }
  0x2e   : > { %v645_v19 = vsel %vm624_vm4, %v629_v14, %v541_v60  ;;  %v283_v22 = vmax.bf16 %v269_v0, %v220_v12  ;;  %v270_v23 = vrot.slane %v166_v13, 5  ;;  %v353_v25 = vmax.bf16 %v339_v5, %v332_v15 }
  0x2f   : > { %v673_v24 = vsel %vm893_vm11, %v645_v19, %v672_v10  ;;  %v221_v26 = vmax.bf16 %v196_v16, %v165_v8  ;;  %v308_v27 = vshrl.u32 %v166_v13, 16  ;;  %v774_v29 = vcombine.low %v255_v20, %v255_v20  ;;  %v675_v8 = vld [vmem:[%s874_s15 + $0xc] sm:$0xf] }
  0x30   : > { %674 = vst [vmem:[%s874_s15 + $0x8] sm:$0xf] %v673_v24  ;;  %v781_v31 = vcombine.low %v283_v22, %v283_v22  ;;  %v340_v32 = vrot.slane %v270_v23, 4  ;;  %v788_v34 = vcombine.low %v353_v25, %v353_v25  ;;  %v168_v42 = vmax.bf16 %v140_v28, %v138_v7  ;;  %v144_v16 = vld [vmem:[%s836_s11 + $0x6c] sm:$0xf] }
  0x31   : > { %v256_v35 = vmax.bf16 %v761_v17, %v221_v26  ;;  %v284_v36 = vmax.bf16 %v270_v23, %v221_v26  ;;  %v333_v37 = vmax.bf16 %v308_v27, %v166_v13  ;;  %v391_v38 = vshll.u32 %v774_v29, 16  ;;  %v145_v17 = vld [vmem:[%s836_s11 + $0x70] sm:$0xf]  ;;  %v146_v27 = vld [vmem:[%s836_s11 + $0x74] sm:$0xf] }
  0x32   : > { %v416_v40 = vrot.slane %v774_v29, 1  ;;  %v454_v41 = vshll.u32 %v781_v31, 16  ;;  %v500_v43 = vrot.slane %v788_v34, 6  ;;  %v517_v44 = vshll.u32 %v788_v34, 16  ;;  %v678_v29 = vld [vmem:[%s874_s15 + $0x10] sm:$0xf] }
  0x33   : > { %v542_v45 = vrot.slane %v788_v34, 7  ;;  %v354_v46 = vmax.bf16 %v340_v32, %v333_v37  ;;  %v393_v47 = vrot.slane %v391_v38, 1  ;;  %v775_v49 = vcombine.low %v256_v35, %v256_v35 }
  0x34   : > { %v456_v48 = vrot.slane %v454_v41, 2  ;;  %v782_v30 = vcombine.low %v284_v36, %v284_v36  ;;  %v519_v52 = vrot.slane %v517_v44, 7  ;;  %v169_v54 = vmax.bf16 %v167_v33, %v141_v50 }
  0x35   : > { %v789_v53 = vcombine.low %v354_v46, %v354_v46  ;;  %v170_v55 = vmax.bf16 %v168_v42, %v142_v51  ;;  %v552_v56 = vsel %vm861_vm8, %v255_v20, %v393_v47  ;;  %v395_v57 = vshll.u32 %v775_v49, 16 }
  0x36   : > { %v417_v58 = vrot.slane %v775_v49, 1  ;;  %v458_v60 = vshll.u32 %v782_v30, 16  ;;  %v571_v39 = vsel %vm546_vm0, %v552_v56, %v416_v40  ;;  %v201_v4 = vshrl.u32 %v169_v54, 16 }
  0x37   : > { %v501_v61 = vrot.slane %v789_v53, 6  ;;  %v521_v62 = vshll.u32 %v789_v53, 16  ;;  %v543_v63 = vrot.slane %v789_v53, 7  ;;  %v591_v0 = vsel %vm867_vm9, %v571_v39, %v456_v48 }
  0x38   : > { %v397_v1 = vrot.slane %v395_v57, 1  ;;  %v460_v3 = vrot.slane %v458_v60, 2  ;;  %v610_v7 = vsel %vm585_vm2, %v591_v0, %v500_v43  ;;  %v762_v10 = vrot.slane %v169_v54, 9 }
  0x39   : > { %v523_v9 = vrot.slane %v521_v62, 7  ;;  %v271_v12 = vrot.slane %v170_v55, 5  ;;  %v630_v5 = vsel %vm881_vm10, %v610_v7, %v519_v52  ;;  %v222_v14 = vmax.bf16 %v201_v4, %v169_v54  ;;  %v681_v4 = vld [vmem:[%s874_s15 + $0x14] sm:$0xf] }
  0x3a   : > { %v553_v13 = vsel %vm861_vm8, %v256_v35, %v397_v1  ;;  %v313_v15 = vshrl.u32 %v170_v55, 16  ;;  %v649_v18 = vsel %vm624_vm4, %v630_v5, %v542_v45  ;;  %v171_v22 = vmax.bf16 %v143_v6, %v141_v50 }
  0x3b   : > { %v575_v19 = vsel %vm546_vm0, %v553_v13, %v417_v58  ;;  %v341_v20 = vrot.slane %v271_v12, 4  ;;  %v676_v23 = vsel %vm893_vm11, %v649_v18, %v675_v8  ;;  %v257_v25 = vmax.bf16 %v762_v10, %v222_v14 }
  0x3c   : > { %v592_v24 = vsel %vm867_vm9, %v575_v19, %v460_v3  ;;  %v285_v26 = vmax.bf16 %v271_v12, %v222_v14  ;;  %677 = vst [vmem:[%s874_s15 + $0xc] sm:$0xf] %v676_v23  ;;  %v334_v31 = vmax.bf16 %v313_v15, %v170_v55  ;;  %v172_v32 = vmax.bf16 %v144_v16, %v142_v51 }
  0x3d   : > { %v614_v28 = vsel %vm585_vm2, %v592_v24, %v501_v61  ;;  %v173_v33 = vmax.bf16 %v171_v22, %v145_v17  ;;  %v776_v35 = vcombine.low %v257_v25, %v257_v25  ;;  %v684_v24 = vld [vmem:[%s874_s15 + $0x18] sm:$0xf] }
  0x3e   : > { %v631_v34 = vsel %vm881_vm10, %v614_v28, %v523_v9  ;;  %v783_v36 = vcombine.low %v285_v26, %v285_v26  ;;  %v355_v38 = vmax.bf16 %v341_v20, %v334_v31  ;;  %v174_v40 = vmax.bf16 %v172_v32, %v146_v27 }
  0x3f   : > { %v653_v37 = vsel %vm624_vm4, %v631_v34, %v543_v63  ;;  %v206_v41 = vshrl.u32 %v173_v33, 16  ;;  %v399_v43 = vshll.u32 %v776_v35, 16  ;;  %v418_v44 = vrot.slane %v776_v35, 1 }
  0x40   : > { %v679_v42 = vsel %vm893_vm11, %v653_v37, %v678_v29  ;;  %v462_v45 = vshll.u32 %v783_v36, 16  ;;  %v790_v46 = vcombine.low %v355_v38, %v355_v38  ;;  %v763_v48 = vrot.slane %v173_v33, 9 }
  0x41   : > { %680 = vst [vmem:[%s874_s15 + $0x10] sm:$0xf] %v679_v42  ;;  %v223_v47 = vmax.bf16 %v206_v41, %v173_v33  ;;  %v272_v49 = vrot.slane %v174_v40, 5  ;;  %v401_v30 = vrot.slane %v399_v43, 1  ;;  %v318_v51 = vshrl.u32 %v174_v40, 16 }
  0x42   : > { %v464_v50 = vrot.slane %v462_v45, 2  ;;  %v502_v52 = vrot.slane %v790_v46, 6  ;;  %v525_v53 = vshll.u32 %v790_v46, 16  ;;  %v544_v39 = vrot.slane %v790_v46, 7 }
  0x43   : > { %v258_v54 = vmax.bf16 %v763_v48, %v223_v47  ;;  %v554_v55 = vsel %vm861_vm8, %v257_v25, %v401_v30  ;;  %v286_v56 = vmax.bf16 %v272_v49, %v223_v47  ;;  %v335_v57 = vmax.bf16 %v318_v51, %v174_v40 }
  0x44   : > { %v342_v58 = vrot.slane %v272_v49, 4  ;;  %v527_v60 = vrot.slane %v525_v53, 7  ;;  %v579_v61 = vsel %vm546_vm0, %v554_v55, %v418_v44 }
  0x45   : > { %v777_v62 = vcombine.low %v258_v54, %v258_v54  ;;  %v593_v63 = vsel %vm867_vm9, %v579_v61, %v464_v50  ;;  %v784_v1 = vcombine.low %v286_v56, %v286_v56 }
  0x46   : > { %v356_v0 = vmax.bf16 %v342_v58, %v335_v57  ;;  %v618_v3 = vsel %vm585_vm2, %v593_v63, %v502_v52 }
  0x47   : > { %v403_v6 = vshll.u32 %v777_v62, 16  ;;  %v632_v7 = vsel %vm881_vm10, %v618_v3, %v527_v60  ;;  %v419_v8 = vrot.slane %v777_v62, 1  ;;  %v466_v9 = vshll.u32 %v784_v1, 16 }
  0x48   : > { %v791_v10 = vcombine.low %v356_v0, %v356_v0  ;;  %v657_v12 = vsel %vm624_vm4, %v632_v7, %v544_v39 }
  0x49   : > { %v405_v5 = vrot.slane %v403_v6, 1  ;;  %v682_v13 = vsel %vm893_vm11, %v657_v12, %v681_v4  ;;  %v468_v14 = vrot.slane %v466_v9, 2 }
  0x4a   : > { %v503_v15 = vrot.slane %v791_v10, 6  ;;  %v529_v16 = vshll.u32 %v791_v10, 16  ;;  %683 = vst [vmem:[%s874_s15 + $0x14] sm:$0xf] %v682_v13  ;;  %v545_v19 = vrot.slane %v791_v10, 7 }
  0x4b   : > { %v555_v17 = vsel %vm861_vm8, %v258_v54, %v405_v5 }
  0x4c   : > { %v531_v18 = vrot.slane %v529_v16, 7  ;;  %v583_v20 = vsel %vm546_vm0, %v555_v17, %v419_v8 }
  0x4d   : > { %v594_v22 = vsel %vm867_vm9, %v583_v20, %v468_v14 }
  0x4e   : > { %v622_v23 = vsel %vm585_vm2, %v594_v22, %v503_v15 }
  0x4f   : > { %v633_v25 = vsel %vm881_vm10, %v622_v23, %v531_v18 }
  0x50   : > { %v661_v26 = vsel %vm624_vm4, %v633_v25, %v545_v19 }
  0x51   : > { %v685_v27 = vsel %vm893_vm11, %v661_v26, %v684_v24 }
  0x52   : > { %686 = vst [vmem:[%s874_s15 + $0x18] sm:$0xf] %v685_v27 }
  0x53 PF: > { %s11_s6 = sadd.s32 1, %s810_s6  }
  0x54   : > { %p8_p4 = scmp.ge.s32.totalorder %s11_s6, 4  }
  0x56   :  { %10 = sbr.rel (!%p8_p4) target bundleno = 1 (0x1), region = 54 }

// kernel: _lambda_.12
= control target key start
LH: loop header
LB: loop body
LE: loop exit
PB: predicated region body
PF: predicated region fallthrough
CT: control target
= control target key end

     0   :  { %s1512_s12 = smov 0   ;;  %s1514_s13 = smov 0   ;;  %s1681_s0 = inlined_call_operand.vmem [shape: bf16[512,384], index: 0, kind: input, shape index: {}]   ;;  %s1682_s1 = inlined_call_operand.vmem [shape: bf16[384,128], index: 1, kind: input, shape index: {}]   ;;  %s1683_s2 = inlined_call_operand.vmem [shape: f32[1,128], index: 2, kind: input, shape index: {}]   ;;  %s1684_s3 = inlined_call_operand.vmem [shape: bf16[512,128], index: 3, kind: output, shape index: {}]  }
   0x1   :  { %s1516_s14 = smov 0  }
   0x2 LB: > { %s32_s15 = sadd.s32 1, %s1486_s13  ;;  %p1140_p0 = scmp.ge.s32.totalorder %s1490_s14, 1  ;;  %s1490_s14 = sphi %s1516_s14, %s13_s14   ;;  %s1486_s13 = sphi %s1514_s13, %s1686_s13   ;;  %s1482_s12 = sphi %s1512_s12, %s1685_s12  }
   0x3   : > { %p34_p1 = scmp.ge.s32.totalorder %s32_s15, 4  ;;  %p191_p2 = scmp.lt.s32.totalorder %s1490_s14, 5 }
   0x5   : > { %s1688_s15 = smov (%p34_p1, %s32_s15), 0  ;;  %p192_p3 = pnand %p1140_p0, %p191_p2 }
   0x6   : > { %s1141_s5 = sshll.u32 (!%p192_p3), %s1482_s12, 4 }
   0x7   : > { %195 = sbr.rel (%p192_p3) target bundleno = 311 (0x137), region = 32  ;;  %p236_p4 = scmp.lt.s32.totalorder (!%p192_p3), %s1141_s5, 63 }
   0xc   : > { %v1412_v0 = vld [vmem:[%s1682_s1 + $0x78] sm:$0xff]   ;;  %v1415_v3 = vld [vmem:[%s1682_s1 + $0x70] sm:$0xff]   ;;  %v1418_v6 = vld [vmem:[%s1682_s1 + $0x68] sm:$0xff]   ;;  %s1690_s5 = smov (!%p236_p4, %s1141_s5), 63 }
   0xd   : > { %v1413_v1 = vld [vmem:[%s1682_s1 + $0x38] sm:$0xff]   ;;  %1275 = vmatprep.subr.bf16.mxu0 %v1412_v0  ;;  %v1416_v4 = vld [vmem:[%s1682_s1 + $0x30] sm:$0xff]   ;;  %v1419_v7 = vld [vmem:[%s1682_s1 + $0x28] sm:$0xff]   ;;  %s1387_s27 = smul.u32 12, %s1690_s5  ;;  %s1144_s24 = sshll.u32 %s1690_s5, 2 }
   0xe   : > { %v1414_v2 = vld [vmem:[%s1682_s1 + $0xb8] sm:$0xff]   ;;  %1276 = vmatpush3.bf16.msra.mxu0 %v1413_v1  ;;  %v1417_v5 = vld [vmem:[%s1682_s1 + $0xb0] sm:$0xff]   ;;  %v1420_v8 = vld [vmem:[%s1682_s1 + $0xa8] sm:$0xff]  }
   0xf   : > { %1355 = vmatprep.subr.bf16.mxu1 %v1414_v2  ;;  %1277 = vmatprep.subr.bf16.mxu0 %v1415_v3  ;;  %v1421_v9 = vld [vmem:[%s1682_s1 + $0x60] sm:$0xff]   ;;  %v1424_v12 = vld [vmem:[%s1682_s1 + $0x58] sm:$0xff]   ;;  %v1427_v15 = vld [vmem:[%s1682_s1 + $0x50] sm:$0xff]   ;;  %s1602_s16 = scalar_lea.vmem %s1681_s0, %s1387_s27  ;;  %s1648_s27 = scalar_lea.vmem %s1684_s3, %s1144_s24 }
  0x10   : > { %1356 = vmatpush3.bf16.msra.mxu1 %v1414_v2  ;;  %v1422_v10 = vld [vmem:[%s1682_s1 + $0x20] sm:$0xff]   ;;  %v1426_v13 = vld [vmem:[%s1682_s1 + $0x98] sm:$0xff]   ;;  %v1429_v16 = vld [vmem:[%s1682_s1 + $0x90] sm:$0xff]  }
  0x11   : > { %1357 = vmatprep.subr.bf16.mxu1 %v1417_v5  ;;  %v1423_v11 = vld [vmem:[%s1682_s1 + $0xa0] sm:$0xff]   ;;  %v1425_v14 = vld [vmem:[%s1682_s1 + $0x18] sm:$0xff]   ;;  %v1428_v17 = vld [vmem:[%s1682_s1 + $0x10] sm:$0xff]  }
  0x12   : > { %1278 = vmatpush3.bf16.msra.mxu0 %v1416_v4  ;;  %v1430_v18 = vld [vmem:[%s1682_s1 + $0x48] sm:$0xff]   ;;  %v1433_v21 = vld [vmem:[%s1682_s1 + $0x40] sm:$0xff]   ;;  %v1448_v32 = vld [vmem:[%s1602_s16 + $0x50] ss:$12 sps:$4 sm:$0xff]  }
  0x13   : > { %1279 = vmatprep.subr.bf16.mxu0 %v1418_v6  ;;  %v1431_v19 = vld [vmem:[%s1682_s1 + $0x8] sm:$0xff]   ;;  %v1435_v22 = vld [vmem:[%s1682_s1 + $0x80] sm:$0xff]   ;;  %v1446_v34 = vld [vmem:[%s1602_s16 + $0x30] ss:$12 sps:$4 sm:$0xff]  }
  0x14   : > { %1358 = vmatpush3.bf16.msra.mxu1 %v1417_v5  ;;  %v1432_v20 = vld [vmem:[%s1682_s1 + $0x88] sm:$0xff]   ;;  %v1438_v23 = vld [vmem:[%s1602_s16 + $0x4] ss:$12 sps:$4 sm:$0xff]   ;;  %v1444_v31 = vld [vmem:[%s1602_s16 + $0x34] ss:$12 sps:$4 sm:$0xff]  }
  0x15   : > { %1359 = vmatprep.subr.bf16.mxu1 %v1420_v8  ;;  %v1439_v24 = vld [vmem:[%s1602_s16 + $0x8] ss:$12 sps:$4 sm:$0xff]   ;;  %v1434_v25 = vld [vmem:[%s1682_s1] sm:$0xff]   ;;  %688 = vmatprep.mubr.bf16.mxu0 %v1438_v23  ;;  %v1449_v35 = vld [vmem:[%s1602_s16 + $0x4c] ss:$12 sps:$4 sm:$0xff]  }
  0x16   : > { %1280 = vmatpush3.bf16.msra.mxu0 %v1419_v7  ;;  %1371 = vmatprep.mubr.bf16.mxu1 %v1439_v24  ;;  %v1436_v26 = vld [vmem:[%s1602_s16] ss:$12 sps:$4 sm:$0xff]   ;;  %v1441_v27 = vld [vmem:[%s1602_s16 + $0x1c] ss:$12 sps:$4 sm:$0xff]   ;;  %v1447_v29 = vld [vmem:[%s1602_s16 + $0x38] ss:$12 sps:$4 sm:$0xff]  }
  0x17   : > { %1281 = vmatprep.subr.bf16.mxu0 %v1421_v9  ;;  %v1440_v28 = vld [vmem:[%s1602_s16 + $0x20] ss:$12 sps:$4 sm:$0xff]   ;;  %v1443_v30 = vld [vmem:[%s1602_s16 + $0x18] ss:$12 sps:$4 sm:$0xff]   ;;  %v1455_v33 = vld [vmem:[%s1602_s16 + $0x68] ss:$12 sps:$4 sm:$0xff]  }
  0x18   : > { %1360 = vmatpush3.bf16.msra.mxu1 %v1420_v8  ;;  %v1456_v36 = vld [vmem:[%s1602_s16 + $0x80] ss:$12 sps:$4 sm:$0xff]   ;;  %v1463_v37 = vld [vmem:[%s1602_s16 + $0x98] ss:$12 sps:$4 sm:$0xff]   ;;  %v1451_v38 = vld [vmem:[%s1602_s16 + $0x48] ss:$12 sps:$4 sm:$0xff]  }
  0x19   : > { %1361 = vmatprep.subr.bf16.mxu1 %v1423_v11  ;;  %v1452_v39 = vld [vmem:[%s1602_s16 + $0x64] ss:$12 sps:$4 sm:$0xff]   ;;  %v1454_v41 = vld [vmem:[%s1602_s16 + $0x60] ss:$12 sps:$4 sm:$0xff]   ;;  %v1457_v42 = vld [vmem:[%s1602_s16 + $0x7c] ss:$12 sps:$4 sm:$0xff]  }
  0x1a   : > { %1282 = vmatpush3.bf16.msra.mxu0 %v1422_v10  ;;  %v1464_v40 = vld [vmem:[%s1602_s16 + $0xb0] ss:$12 sps:$4 sm:$0xff]   ;;  %v1459_v43 = vld [vmem:[%s1602_s16 + $0x78] ss:$12 sps:$4 sm:$0xff]   ;;  %v1460_v44 = vld [vmem:[%s1602_s16 + $0x94] ss:$12 sps:$4 sm:$0xff]  }
  0x1b   : > { %1283 = vmatprep.subr.bf16.mxu0 %v1424_v12  ;;  %v1462_v45 = vld [vmem:[%s1602_s16 + $0x90] ss:$12 sps:$4 sm:$0xff]   ;;  %v1465_v46 = vld [vmem:[%s1602_s16 + $0xac] ss:$12 sps:$4 sm:$0xff]   ;;  %v1467_v47 = vld [vmem:[%s1602_s16 + $0xa8] ss:$12 sps:$4 sm:$0xff]  }
  0x1c   : > { %1362 = vmatpush3.bf16.msra.mxu1 %v1423_v11  ;;  %v1640_v55 = vld [vmem:[%s1683_s2] ss:$0 sm:$0xff] }
  0x1d   : > { %1363 = vmatprep.subr.bf16.mxu1 %v1426_v13 }
  0x1e   : > { %1284 = vmatpush3.bf16.msra.mxu0 %v1425_v14 }
  0x1f   : > { %1285 = vmatprep.subr.bf16.mxu0 %v1427_v15 }
  0x20   : > { %1364 = vmatpush3.bf16.msra.mxu1 %v1426_v13 }
  0x21   : > { %1365 = vmatprep.subr.bf16.mxu1 %v1429_v16 }
  0x22   : > { %1286 = vmatpush3.bf16.msra.mxu0 %v1428_v17 }
  0x23   : > { %1287 = vmatprep.subr.bf16.mxu0 %v1430_v18 }
  0x24   : > { %1366 = vmatpush3.bf16.msra.mxu1 %v1429_v16 }
  0x25   : > { %1367 = vmatprep.subr.bf16.mxu1 %v1432_v20 }
  0x26   : > { %1288 = vmatpush3.bf16.msra.mxu0 %v1431_v19 }
  0x27   : > { %1289 = vmatprep.subr.bf16.mxu0 %v1433_v21 }
  0x28   : > { %1368 = vmatpush3.bf16.msra.mxu1 %v1432_v20 }
  0x29   : > { %1369 = vmatprep.subr.bf16.mxu1 %v1435_v22 }
  0x2a   : > { %1290 = vmatpush3.bf16.msra.mxu0 %v1434_v25 }
  0x2c   : > { %1370 = vmatpush3.bf16.msra.mxu1 %v1435_v22 }
  0x2d   : > { %689 = vmatmul.mubr.bf16.vlgmr.msra.gmra.mxu0 %v1436_v26 }
  0x2e   : > { %696 = vmatprep.mubr.bf16.mxu0 %v1441_v27 }
  0x2f   : > { %1372 = vmatmul.mubr.bf16.vlgmr.msra.gmra.mxu1 %v1440_v28 }
  0x30   : > { %1375 = vmatprep.mubr.bf16.mxu1 %v1447_v29 }
  0x35   : > { %697 = vmatmul.mubr.bf16.gmra.mxu0 %v1443_v30 }
  0x36   : > { %704 = vmatprep.mubr.bf16.mxu0 %v1444_v31 }
  0x37   : > { %1376 = vmatmul.mubr.bf16.gmra.mxu1 %v1448_v32 }
  0x38   : > { %1379 = vmatprep.mubr.bf16.mxu1 %v1455_v33 }
  0x3d   : > { %705 = vmatmul.mubr.bf16.gmra.mxu0 %v1446_v34 }
  0x3e   : > { %712 = vmatprep.mubr.bf16.mxu0 %v1449_v35 }
  0x3f   : > { %1380 = vmatmul.mubr.bf16.gmra.mxu1 %v1456_v36 }
  0x40   : > { %1383 = vmatprep.mubr.bf16.mxu1 %v1463_v37 }
  0x45   : > { %713 = vmatmul.mubr.bf16.gmra.mxu0 %v1451_v38 }
  0x46   : > { %720 = vmatprep.mubr.bf16.mxu0 %v1452_v39 }
  0x47   : > { %1384 = vmatmul.mubr.bf16.gmra.mxu1 %v1464_v40 }
  0x4d   : > { %721 = vmatmul.mubr.bf16.gmra.mxu0 %v1454_v41 }
  0x4e   : > { %728 = vmatprep.mubr.bf16.mxu0 %v1457_v42 }
  0x55   : > { %729 = vmatmul.mubr.bf16.gmra.mxu0 %v1459_v43 }
  0x56   : > { %736 = vmatprep.mubr.bf16.mxu0 %v1460_v44 }
  0x5d   : > { %737 = vmatmul.mubr.bf16.gmra.mxu0 %v1462_v45 }
  0x5e   : > { %744 = vmatprep.mubr.bf16.mxu0 %v1465_v46 }
  0x65   : > { %745 = vmatmul.mubr.bf16.gmra.mxu0 %v1467_v47 }
  0xed   : > { %v1291_v48 = vpop.f32.mrf.mxu0 }
  0xef   : > { %v1292_v49 = vpop.f32.mrf.mxu0  ;;  %v1373_v50 = vpop.f32.mrf.mxu1 }
  0xf0   : > { %v1293_v51 = vadd.f32 %v1292_v49, %v1291_v48 }
  0xf1   : > { %v1294_v52 = vpop.f32.mrf.mxu0  ;;  %v787_v53 = vpop.f32.mrf.mxu1 }
  0xf2   : > { %v788_v54 = vadd.f32 %v1293_v51, %v787_v53 }
  0xf3   : > { %v1295_v56 = vpop.f32.mrf.mxu0  ;;  %v1374_v57 = vpop.f32.mrf.mxu1 }
  0xf4   : > { %v1296_v58 = vadd.f32 %v1295_v56, %v1294_v52  ;;  %v908_v61 = vadd.f32 %v1640_v55, %v788_v54 }
  0xf5   : > { %v1297_v59 = vpop.f32.mrf.mxu0  ;;  %v790_v60 = vpop.f32.mrf.mxu1 }
  0xf6   : > { %v791_v62 = vadd.f32 %v1296_v58, %v790_v60  ;;  %v924_v4 = vmax.f32 %v908_v61, 0.0 }
  0xf7   : > { %v1298_v63 = vpop.f32.mrf.mxu0  ;;  %v1377_v0 = vpop.f32.mrf.mxu1 }
  0xf8   : > { %v909_v1 = vadd.f32 %v1640_v55, %v791_v62  ;;  %v1299_v2 = vadd.f32 %v1298_v63, %v1297_v59 }
  0xf9   : > { %v1300_v3 = vpop.f32.mrf.mxu0  ;;  %v803_v8 = vpop.f32.mrf.mxu1 }
  0xfa   : > { %v925_v5 = vmax.f32 %v909_v1, 0.0  ;;  %v796_v6 = vadd.f32 %v1373_v50, %v1299_v2 }
  0xfb   : > { %v1301_v7 = vpop.f32.mrf.mxu0  ;;  %v1378_v15 = vpop.f32.mrf.mxu1 }
  0xfc   : > { %v1231_v9 = vpack.c.bf16 %v925_v5, %v924_v4  ;;  %v1302_v10 = vadd.f32 %v1301_v7, %v1300_v3  ;;  %v910_v12 = vadd.f32 %v1640_v55, %v796_v6 }
  0xfd   : > { %v1303_v11 = vpop.f32.mrf.mxu0  ;;  %v806_v23 = vpop.f32.mrf.mxu1 }
  0xfe   : > { %1232 = vst [vmem:[%s1648_s27] sm:$0xff] %v1231_v9   ;;  %v799_v13 = vadd.f32 %v1374_v57, %v1302_v10  ;;  %v926_v19 = vmax.f32 %v910_v12, 0.0 }
  0xff   : > { %v1304_v14 = vpop.f32.mrf.mxu0  ;;  %v1381_v30 = vpop.f32.mrf.mxu1 }
 0x100   : > { %v911_v16 = vadd.f32 %v1640_v55, %v799_v13  ;;  %v1305_v17 = vadd.f32 %v1304_v14, %v1303_v11 }
 0x101   : > { %v1306_v18 = vpop.f32.mrf.mxu0  ;;  %v819_v38 = vpop.f32.mrf.mxu1 }
 0x102   : > { %v927_v20 = vmax.f32 %v911_v16, 0.0  ;;  %v804_v21 = vadd.f32 %v1305_v17, %v803_v8 }
 0x103   : > { %v1307_v22 = vpop.f32.mrf.mxu0  ;;  %v1382_v45 = vpop.f32.mrf.mxu1 }
 0x104   : > { %v1236_v24 = vpack.c.bf16 %v927_v20, %v926_v19  ;;  %v1308_v25 = vadd.f32 %v1307_v22, %v1306_v18  ;;  %v912_v27 = vadd.f32 %v1640_v55, %v804_v21 }
 0x105   : > { %v1309_v26 = vpop.f32.mrf.mxu0  ;;  %v822_v53 = vpop.f32.mrf.mxu1 }
 0x106   : > { %1268 = vst [vmem:[%s1648_s27 + $0x8] sm:$0xff] %v1236_v24   ;;  %v807_v28 = vadd.f32 %v1308_v25, %v806_v23  ;;  %v928_v34 = vmax.f32 %v912_v27, 0.0 }
 0x107   : > { %v1310_v29 = vpop.f32.mrf.mxu0  ;;  %v1385_v61 = vpop.f32.mrf.mxu1 }
 0x108   : > { %v913_v31 = vadd.f32 %v1640_v55, %v807_v28  ;;  %v1311_v32 = vadd.f32 %v1310_v29, %v1309_v26 }
 0x109   : > { %v1312_v33 = vpop.f32.mrf.mxu0  ;;  %v835_v5 = vpop.f32.mrf.mxu1 }
 0x10a   : > { %v929_v35 = vmax.f32 %v913_v31, 0.0  ;;  %v812_v36 = vadd.f32 %v1377_v0, %v1311_v32 }
 0x10b   : > { %v1313_v37 = vpop.f32.mrf.mxu0  ;;  %v1386_v12 = vpop.f32.mrf.mxu1 }
 0x10c   : > { %v1241_v39 = vpack.c.bf16 %v929_v35, %v928_v34  ;;  %v1314_v40 = vadd.f32 %v1313_v37, %v1312_v33  ;;  %v914_v42 = vadd.f32 %v1640_v55, %v812_v36 }
 0x10d   : > { %v1315_v41 = vpop.f32.mrf.mxu0  ;;  %v838_v20 = vpop.f32.mrf.mxu1 }
 0x10e   : > { %1269 = vst [vmem:[%s1648_s27 + $0x10] sm:$0xff] %v1241_v39   ;;  %v815_v43 = vadd.f32 %v1378_v15, %v1314_v40  ;;  %v930_v49 = vmax.f32 %v914_v42, 0.0 }
 0x10f   : > { %v1316_v44 = vpop.f32.mrf.mxu0 }
 0x110   : > { %v915_v46 = vadd.f32 %v1640_v55, %v815_v43  ;;  %v1317_v47 = vadd.f32 %v1316_v44, %v1315_v41 }
 0x111   : > { %v1318_v48 = vpop.f32.mrf.mxu0 }
 0x112   : > { %v931_v50 = vmax.f32 %v915_v46, 0.0  ;;  %v820_v51 = vadd.f32 %v1317_v47, %v819_v38 }
 0x113   : > { %v1319_v52 = vpop.f32.mrf.mxu0 }
 0x114   : > { %v1246_v54 = vpack.c.bf16 %v931_v50, %v930_v49  ;;  %v1320_v56 = vadd.f32 %v1319_v52, %v1318_v48  ;;  %v916_v58 = vadd.f32 %v1640_v55, %v820_v51 }
 0x115   : > { %v1321_v57 = vpop.f32.mrf.mxu0 }
 0x116   : > { %1270 = vst [vmem:[%s1648_s27 + $0x18] sm:$0xff] %v1246_v54   ;;  %v823_v59 = vadd.f32 %v1320_v56, %v822_v53  ;;  %v932_v1 = vmax.f32 %v916_v58, 0.0 }
 0x117   : > { %v1322_v60 = vpop.f32.mrf.mxu0 }
 0x118   : > { %v917_v62 = vadd.f32 %v1640_v55, %v823_v59  ;;  %v1323_v63 = vadd.f32 %v1322_v60, %v1321_v57 }
 0x119   : > { %v1324_v0 = vpop.f32.mrf.mxu0 }
 0x11a   : > { %v933_v2 = vmax.f32 %v917_v62, 0.0  ;;  %v828_v3 = vadd.f32 %v1381_v30, %v1323_v63 }
 0x11b   : > { %v1325_v4 = vpop.f32.mrf.mxu0 }
 0x11c   : > { %v1251_v6 = vpack.c.bf16 %v933_v2, %v932_v1  ;;  %v1326_v7 = vadd.f32 %v1325_v4, %v1324_v0  ;;  %v918_v9 = vadd.f32 %v1640_v55, %v828_v3 }
 0x11d   : > { %v1327_v8 = vpop.f32.mrf.mxu0 }
 0x11e   : > { %1271 = vst [vmem:[%s1648_s27 + $0x20] sm:$0xff] %v1251_v6   ;;  %v831_v10 = vadd.f32 %v1382_v45, %v1326_v7  ;;  %v934_v16 = vmax.f32 %v918_v9, 0.0 }
 0x11f   : > { %v1328_v11 = vpop.f32.mrf.mxu0 }
 0x120   : > { %v919_v13 = vadd.f32 %v1640_v55, %v831_v10  ;;  %v1329_v14 = vadd.f32 %v1328_v11, %v1327_v8 }
 0x121   : > { %v1330_v15 = vpop.f32.mrf.mxu0 }
 0x122   : > { %v935_v17 = vmax.f32 %v919_v13, 0.0  ;;  %v836_v18 = vadd.f32 %v1329_v14, %v835_v5 }
 0x123   : > { %v1331_v19 = vpop.f32.mrf.mxu0 }
 0x124   : > { %v1256_v21 = vpack.c.bf16 %v935_v17, %v934_v16  ;;  %v1332_v22 = vadd.f32 %v1331_v19, %v1330_v15  ;;  %v920_v24 = vadd.f32 %v1640_v55, %v836_v18 }
 0x125   : > { %v1333_v23 = vpop.f32.mrf.mxu0 }
 0x126   : > { %1272 = vst [vmem:[%s1648_s27 + $0x28] sm:$0xff] %v1256_v21   ;;  %v839_v25 = vadd.f32 %v1332_v22, %v838_v20  ;;  %v936_v30 = vmax.f32 %v920_v24, 0.0 }
 0x127   : > { %v1334_v26 = vpop.f32.mrf.mxu0 }
 0x128   : > { %v921_v27 = vadd.f32 %v1640_v55, %v839_v25  ;;  %v1335_v28 = vadd.f32 %v1334_v26, %v1333_v23 }
 0x129   : > { %v1336_v29 = vpop.f32.mrf.mxu0 }
 0x12a   : > { %v937_v31 = vmax.f32 %v921_v27, 0.0  ;;  %v844_v32 = vadd.f32 %v1385_v61, %v1335_v28 }
 0x12b   : > { %v1337_v33 = vpop.f32.mrf.mxu0 }
 0x12c   : > { %v1261_v34 = vpack.c.bf16 %v937_v31, %v936_v30  ;;  %v1338_v35 = vadd.f32 %v1337_v33, %v1336_v29  ;;  %v922_v36 = vadd.f32 %v1640_v55, %v844_v32 }
 0x12e   : > { %1273 = vst [vmem:[%s1648_s27 + $0x30] sm:$0xff] %v1261_v34   ;;  %v847_v37 = vadd.f32 %v1386_v12, %v1338_v35  ;;  %v938_v39 = vmax.f32 %v922_v36, 0.0 }
 0x130   : > { %v923_v38 = vadd.f32 %v1640_v55, %v847_v37 }
 0x132   : > { %v939_v40 = vmax.f32 %v923_v38, 0.0 }
 0x134   : > { %v1266_v41 = vpack.c.bf16 %v939_v40, %v938_v39 }
 0x136   : > { %1274 = vst [vmem:[%s1648_s27 + $0x38] sm:$0xff] %v1266_v41  }
 0x137 PF: > { %s13_s14 = sadd.s32 1, %s1490_s14   ;;  %s1685_s12 = smov %s1486_s13 }
 0x138   : > { %p10_p5 = scmp.ge.s32.totalorder %s13_s14, 6   ;;  %s1686_s13 = smov %s1688_s15 }
 0x13a   :  { %12 = sbr.rel (!%p10_p5) target bundleno = 2 (0x2), region = 76 }

// kernel: _lambda_.14
= control target key start
LH: loop header
LB: loop body
LE: loop exit
PB: predicated region body
PF: predicated region fallthrough
CT: control target
= control target key end

     0   :  { %s3189_s0 = inlined_call_operand.vmem [shape: bf16[112,3200], index: 0, kind: input, shape index: {}]   ;;  %s3190_s1 = inlined_call_operand.vmem [shape: bf16[3200,256], index: 1, kind: input, shape index: {}]   ;;  %s3191_s2 = inlined_call_operand.vmem [shape: f32[1,256], index: 2, kind: input, shape index: {}]   ;;  %s3192_s3 = inlined_call_operand.vmem [shape: bf16[112,256], index: 3, kind: output, shape index: {}]  }
   0x1   :  { %3194 = sst [smem:[#allocation7_spill]] %s3189_s0 }
   0x2   :  { %3195 = sst [smem:[#allocation8_spill]] %s3190_s1 }
   0x3   :  { %s2589_s12 = smov 0   ;;  %s2591_s13 = smov 0  }
   0x4   :  { %s2593_s14 = smov 0   ;;  %s2595_s15 = smov 0  }
   0x5   :  { %s2597_s16 = smov 0   ;;  %s2599_s17 = smov 0  }
   0x6   :  { %s2601_s18 = smov 0   ;;  %s2603_s19 = smov 0  }
   0x7   :  { %s2605_s20 = smov 0   ;;  %s2607_s21 = smov 0  }
   0x8   :  { %s2609_s22 = smov 0  }
   0x9 LB: > { %s1914_s23 = sadd.s32 4294967295, %s2564_s22   ;;  %s25_s24 = sadd.s32 1, %s2556_s20  ;;  %s2564_s22 = sphi %s2609_s22, %s13_s22   ;;  %s2560_s21 = sphi %s2607_s21, %s3212_s21   ;;  %s2556_s20 = sphi %s2605_s20, %s3211_s20   ;;  %s2552_s19 = sphi %s2603_s19, %s3210_s19   ;;  %s2548_s18 = sphi %s2601_s18, %s3209_s18   ;;  %s2544_s17 = sphi %s2599_s17, %s3208_s17   ;;  %s2540_s16 = sphi %s2597_s16, %s3207_s16   ;;  %s2536_s15 = sphi %s2595_s15, %s3206_s15   ;;  %s2532_s14 = sphi %s2593_s14, %s3205_s14   ;;  %s2528_s13 = sphi %s2591_s13, %s3204_s13   ;;  %s2524_s12 = sphi %s2589_s12, %s3203_s12  }
   0xa   : > { %p26_p0 = scmp.ge.s32.totalorder %s25_s24, 5  ;;  %s28_s25 = sadd.s32 1, %s2560_s21 }
   0xb   : > { %s41_s26 = sadd.s32 1, %s2544_s17  ;;  %p48_p1 = scmp.ne.s32.totalorder %s2544_s17, %s2540_s16 }
   0xc   : > { %s3214_s24 = smov (%p26_p0, %s25_s24), 0  ;;  %s3216_s25 = smov (!%p26_p0, %s28_s25), %s2560_s21 }
   0xd   : > { %s37_s27 = ssub.s32 %s2556_s20, %s3214_s24  ;;  %p49_p2 = scmp.eq.s32.totalorder %s2564_s22, 0 }
   0xe   : > { %p30_p3 = scmp.ge.s32.totalorder %s3216_s25, 2  ;;  %p39_p4 = scmp.eq.s32.totalorder %s37_s27, 0 }
   0xf   : > { %p2656_p5 = por %p49_p2, %p48_p1  ;;  %s69_s29 = sadd.s32 1, %s2536_s15 }
  0x10   : > { %s3218_s25 = smov (%p30_p3, %s3216_s25), 0  ;;  %p76_p6 = scmp.ne.s32.totalorder %s2536_s15, %s2532_s14 }
  0x11   : > { %3197 = sst [smem:[#allocation6_spill]] %s3218_s25  ;;  %s65_s4 = ssub.s32 %s2560_s21, %s3218_s25 }
  0x12   : > { %s2664_s30 = scalar_select %p39_p4, %s2544_s17, %s41_s26  }
  0x13   : > { %s66_s5 = sor.u32 %s65_s4, %s37_s27  ;;  %p121_p7 = scmp.eq.s32.totalorder %s65_s4, 0 }
  0x14   : > { %p67_p8 = scmp.eq.s32.totalorder %s66_s5, 0  ;;  %p2670_p9 = por %p76_p6, %p49_p2 }
  0x15   : > { %s123_s7 = sadd.s32 1, %s2528_s13  ;;  %p133_p10 = scmp.ne.s32.totalorder %s2528_s13, %s2524_s12 }
  0x16   : > { %s2678_s8 = scalar_select %p67_p8, %s2536_s15, %s69_s29  }
  0x17   : > { %s2681_s9 = scalar_select %p121_p7, %s2528_s13, %s123_s7  }
  0x18   : > { %p134_p11 = scmp.eq.s32.totalorder %s1914_s23, 9  ;;  %p1917_p13 = scmp.ge.s32.totalorder %s2564_s22, 10 }
  0x1a   : > { %p2683_p12 = por %p134_p11, %p133_p10  ;;  %156 = sbr.rel (%p1917_p13) target bundleno = 125 (0x7d), region = 16 }
  0x1f   : > { %159 = sbr.rel (!%p2656_p5) target bundleno = 63 (0x3f), region = 20  ;;  %s161_s11 = sand.u32 (%p2656_p5), 1, %s2544_s17  }
  0x20   : > { %s2045_s26 = smul.u32 (%p2656_p5), 20, %s2556_s20  ;;  %s3200_s0 = sld [smem:[#allocation7_spill]] (%p2656_p5) }
  0x21   : > { %s2293_s27 = smul.u32 (%p2656_p5), 280, %s161_s11 }
  0x23   : > { %s2700_s23 = scalar_lea.vmem (%p2656_p5), [#allocation3], %s2293_s27 }
  0x26   : > { %s2695_s5 = scalar_lea.vmem %s3200_s0, %s2045_s26 }
  0x27   : > { %v184_v0 = vld [vmem:[%s2695_s5] sm:$0xff]  ;;  %v186_v1 = vld [vmem:[%s2695_s5 + $0x8] sm:$0xff]  ;;  %v194_v5 = vld [vmem:[%s2695_s5 + $0xd0] sm:$0xff] }
  0x28   : > { %v188_v2 = vld [vmem:[%s2695_s5 + $0x64] sm:$0xff]  ;;  %185 = vst [vmem:[%s2700_s23] sm:$0xff] %v184_v0  ;;  %187 = vst [vmem:[%s2700_s23 + $0x8] sm:$0xff] %v186_v1  ;;  %v190_v3 = vld [vmem:[%s2695_s5 + $0x6c] sm:$0xff] }
  0x29   : > { %189 = vst [vmem:[%s2700_s23 + $0x14] sm:$0xff] %v188_v2  ;;  %v192_v4 = vld [vmem:[%s2695_s5 + $0xc8] sm:$0xff]  ;;  %191 = vst [vmem:[%s2700_s23 + $0x1c] sm:$0xff] %v190_v3  ;;  %v198_v7 = vld [vmem:[%s2695_s5 + $0x134] sm:$0xff] }
  0x2a   : > { %193 = vst [vmem:[%s2700_s23 + $0x28] sm:$0xff] %v192_v4  ;;  %195 = vst [vmem:[%s2700_s23 + $0x30] sm:$0xff] %v194_v5  ;;  %v196_v6 = vld [vmem:[%s2695_s5 + $0x12c] sm:$0xff]  ;;  %v202_v9 = vld [vmem:[%s2695_s5 + $0x198] sm:$0xff] }
  0x2b   : > { %v200_v8 = vld [vmem:[%s2695_s5 + $0x190] sm:$0xff]  ;;  %197 = vst [vmem:[%s2700_s23 + $0x3c] sm:$0xff] %v196_v6  ;;  %199 = vst [vmem:[%s2700_s23 + $0x44] sm:$0xff] %v198_v7  ;;  %v206_v11 = vld [vmem:[%s2695_s5 + $0x1fc] sm:$0xff] }
  0x2c   : > { %201 = vst [vmem:[%s2700_s23 + $0x50] sm:$0xff] %v200_v8  ;;  %v204_v10 = vld [vmem:[%s2695_s5 + $0x1f4] sm:$0xff]  ;;  %203 = vst [vmem:[%s2700_s23 + $0x58] sm:$0xff] %v202_v9  ;;  %v210_v13 = vld [vmem:[%s2695_s5 + $0x260] sm:$0xff] }
  0x2d   : > { %205 = vst [vmem:[%s2700_s23 + $0x64] sm:$0xff] %v204_v10  ;;  %207 = vst [vmem:[%s2700_s23 + $0x6c] sm:$0xff] %v206_v11  ;;  %v208_v12 = vld [vmem:[%s2695_s5 + $0x258] sm:$0xff]  ;;  %v214_v15 = vld [vmem:[%s2695_s5 + $0x2c4] sm:$0xff] }
  0x2e   : > { %v212_v14 = vld [vmem:[%s2695_s5 + $0x2bc] sm:$0xff]  ;;  %209 = vst [vmem:[%s2700_s23 + $0x78] sm:$0xff] %v208_v12  ;;  %211 = vst [vmem:[%s2700_s23 + $0x80] sm:$0xff] %v210_v13  ;;  %v218_v17 = vld [vmem:[%s2695_s5 + $0x328] sm:$0xff] }
  0x2f   : > { %213 = vst [vmem:[%s2700_s23 + $0x8c] sm:$0xff] %v212_v14  ;;  %v216_v16 = vld [vmem:[%s2695_s5 + $0x320] sm:$0xff]  ;;  %215 = vst [vmem:[%s2700_s23 + $0x94] sm:$0xff] %v214_v15  ;;  %v222_v19 = vld [vmem:[%s2695_s5 + $0x38c] sm:$0xff] }
  0x30   : > { %217 = vst [vmem:[%s2700_s23 + $0xa0] sm:$0xff] %v216_v16  ;;  %219 = vst [vmem:[%s2700_s23 + $0xa8] sm:$0xff] %v218_v17  ;;  %v220_v18 = vld [vmem:[%s2695_s5 + $0x384] sm:$0xff]  ;;  %v226_v21 = vld [vmem:[%s2695_s5 + $0x3f0] sm:$0xff] }
  0x31   : > { %v224_v20 = vld [vmem:[%s2695_s5 + $0x3e8] sm:$0xff]  ;;  %221 = vst [vmem:[%s2700_s23 + $0xb4] sm:$0xff] %v220_v18  ;;  %223 = vst [vmem:[%s2700_s23 + $0xbc] sm:$0xff] %v222_v19  ;;  %v230_v23 = vld [vmem:[%s2695_s5 + $0x454] sm:$0xff] }
  0x32   : > { %225 = vst [vmem:[%s2700_s23 + $0xc8] sm:$0xff] %v224_v20  ;;  %v228_v22 = vld [vmem:[%s2695_s5 + $0x44c] sm:$0xff]  ;;  %227 = vst [vmem:[%s2700_s23 + $0xd0] sm:$0xff] %v226_v21  ;;  %v234_v25 = vld [vmem:[%s2695_s5 + $0x4b8] sm:$0xff] }
  0x33   : > { %229 = vst [vmem:[%s2700_s23 + $0xdc] sm:$0xff] %v228_v22  ;;  %231 = vst [vmem:[%s2700_s23 + $0xe4] sm:$0xff] %v230_v23  ;;  %v232_v24 = vld [vmem:[%s2695_s5 + $0x4b0] sm:$0xff]  ;;  %v238_v27 = vld [vmem:[%s2695_s5 + $0x51c] sm:$0xff] }
  0x34   : > { %v236_v26 = vld [vmem:[%s2695_s5 + $0x514] sm:$0xff]  ;;  %233 = vst [vmem:[%s2700_s23 + $0xf0] sm:$0xff] %v232_v24  ;;  %235 = vst [vmem:[%s2700_s23 + $0xf8] sm:$0xff] %v234_v25  ;;  %v1919_v28 = vld [vmem:[%s2695_s5 + $0x10] sm:$0xf] }
  0x35   : > { %237 = vst [vmem:[%s2700_s23 + $0x104] sm:$0xff] %v236_v26  ;;  %v1921_v29 = vld [vmem:[%s2695_s5 + $0x74] sm:$0xf]  ;;  %239 = vst [vmem:[%s2700_s23 + $0x10c] sm:$0xff] %v238_v27  ;;  %v1923_v30 = vld [vmem:[%s2695_s5 + $0xd8] sm:$0xf] }
  0x36   : > { %1920 = vst [vmem:[%s2700_s23 + $0x10] sm:$0xf] %v1919_v28  ;;  %1922 = vst [vmem:[%s2700_s23 + $0x24] sm:$0xf] %v1921_v29  ;;  %v1925_v31 = vld [vmem:[%s2695_s5 + $0x13c] sm:$0xf] }
  0x37   : > { %v1927_v32 = vld [vmem:[%s2695_s5 + $0x1a0] sm:$0xf]  ;;  %1924 = vst [vmem:[%s2700_s23 + $0x38] sm:$0xf] %v1923_v30  ;;  %1926 = vst [vmem:[%s2700_s23 + $0x4c] sm:$0xf] %v1925_v31 }
  0x38   : > { %1928 = vst [vmem:[%s2700_s23 + $0x60] sm:$0xf] %v1927_v32  ;;  %v1929_v33 = vld [vmem:[%s2695_s5 + $0x204] sm:$0xf]  ;;  %v1931_v34 = vld [vmem:[%s2695_s5 + $0x268] sm:$0xf] }
  0x39   : > { %v1933_v35 = vld [vmem:[%s2695_s5 + $0x2cc] sm:$0xf]  ;;  %1930 = vst [vmem:[%s2700_s23 + $0x74] sm:$0xf] %v1929_v33  ;;  %1932 = vst [vmem:[%s2700_s23 + $0x88] sm:$0xf] %v1931_v34 }
  0x3a   : > { %1934 = vst [vmem:[%s2700_s23 + $0x9c] sm:$0xf] %v1933_v35  ;;  %v1935_v36 = vld [vmem:[%s2695_s5 + $0x330] sm:$0xf]  ;;  %v1937_v37 = vld [vmem:[%s2695_s5 + $0x394] sm:$0xf] }
  0x3b   : > { %v1939_v38 = vld [vmem:[%s2695_s5 + $0x3f8] sm:$0xf]  ;;  %1936 = vst [vmem:[%s2700_s23 + $0xb0] sm:$0xf] %v1935_v36  ;;  %1938 = vst [vmem:[%s2700_s23 + $0xc4] sm:$0xf] %v1937_v37 }
  0x3c   : > { %1940 = vst [vmem:[%s2700_s23 + $0xd8] sm:$0xf] %v1939_v38  ;;  %v1941_v39 = vld [vmem:[%s2695_s5 + $0x45c] sm:$0xf]  ;;  %v1943_v40 = vld [vmem:[%s2695_s5 + $0x4c0] sm:$0xf] }
  0x3d   : > { %v1945_v41 = vld [vmem:[%s2695_s5 + $0x524] sm:$0xf]  ;;  %1942 = vst [vmem:[%s2700_s23 + $0xec] sm:$0xf] %v1941_v39  ;;  %1944 = vst [vmem:[%s2700_s23 + $0x100] sm:$0xf] %v1943_v40 }
  0x3e   : > { %1946 = vst [vmem:[%s2700_s23 + $0x114] sm:$0xf] %v1945_v41 }
  0x3f PF: > { %281 = sbr.rel (!%p2670_p9) target bundleno = 125 (0x7d), region = 46  ;;  %s283_s28 = sand.u32 (%p2670_p9), 1, %s2536_s15  }
  0x40   : > { %s2046_s7 = smul.u32 (%p2670_p9), 160, %s2556_s20  ;;  %s3201_s1 = sld [smem:[#allocation8_spill]] (%p2670_p9) }
  0x41   : > { %s2294_s11 = smul.u32 (%p2670_p9), 320, %s283_s28 }
  0x42   : > { %s288_s26 = sadd.s32 (%p2670_p9), %s2560_s21, %s2046_s7 }
  0x43   : > { %s1948_s27 = sshll.u32 (%p2670_p9), %s288_s26, 2  ;;  %s2796_s6 = scalar_lea.vmem (%p2670_p9), [#allocation4], %s2294_s11 }
  0x46   : > { %s2791_s0 = scalar_lea.vmem %s3201_s1, %s1948_s27 }
  0x47   : > { %v307_v42 = vld [vmem:[%s2791_s0] sm:$0xf]  ;;  %v309_v43 = vld [vmem:[%s2791_s0 + $0x8] sm:$0xf]  ;;  %v311_v44 = vld [vmem:[%s2791_s0 + $0x10] sm:$0xf] }
  0x48   : > { %308 = vst [vmem:[%s2796_s6] sm:$0xf] %v307_v42  ;;  %310 = vst [vmem:[%s2796_s6 + $0x4] sm:$0xf] %v309_v43  ;;  %v313_v45 = vld [vmem:[%s2791_s0 + $0x18] sm:$0xf] }
  0x49   : > { %312 = vst [vmem:[%s2796_s6 + $0x8] sm:$0xf] %v311_v44  ;;  %v315_v46 = vld [vmem:[%s2791_s0 + $0x20] sm:$0xf]  ;;  %v317_v47 = vld [vmem:[%s2791_s0 + $0x28] sm:$0xf] }
  0x4a   : > { %314 = vst [vmem:[%s2796_s6 + $0xc] sm:$0xf] %v313_v45  ;;  %316 = vst [vmem:[%s2796_s6 + $0x10] sm:$0xf] %v315_v46  ;;  %v319_v48 = vld [vmem:[%s2791_s0 + $0x30] sm:$0xf] }
  0x4b   : > { %318 = vst [vmem:[%s2796_s6 + $0x14] sm:$0xf] %v317_v47  ;;  %v321_v49 = vld [vmem:[%s2791_s0 + $0x38] sm:$0xf]  ;;  %v323_v50 = vld [vmem:[%s2791_s0 + $0x40] sm:$0xf] }
  0x4c   : > { %320 = vst [vmem:[%s2796_s6 + $0x18] sm:$0xf] %v319_v48  ;;  %322 = vst [vmem:[%s2796_s6 + $0x1c] sm:$0xf] %v321_v49  ;;  %v325_v51 = vld [vmem:[%s2791_s0 + $0x48] sm:$0xf] }
  0x4d   : > { %324 = vst [vmem:[%s2796_s6 + $0x20] sm:$0xf] %v323_v50  ;;  %v327_v52 = vld [vmem:[%s2791_s0 + $0x50] sm:$0xf]  ;;  %v329_v53 = vld [vmem:[%s2791_s0 + $0x58] sm:$0xf] }
  0x4e   : > { %326 = vst [vmem:[%s2796_s6 + $0x24] sm:$0xf] %v325_v51  ;;  %328 = vst [vmem:[%s2796_s6 + $0x28] sm:$0xf] %v327_v52  ;;  %v331_v54 = vld [vmem:[%s2791_s0 + $0x60] sm:$0xf] }
  0x4f   : > { %330 = vst [vmem:[%s2796_s6 + $0x2c] sm:$0xf] %v329_v53  ;;  %v333_v55 = vld [vmem:[%s2791_s0 + $0x68] sm:$0xf]  ;;  %v335_v56 = vld [vmem:[%s2791_s0 + $0x70] sm:$0xf] }
  0x50   : > { %332 = vst [vmem:[%s2796_s6 + $0x30] sm:$0xf] %v331_v54  ;;  %334 = vst [vmem:[%s2796_s6 + $0x34] sm:$0xf] %v333_v55  ;;  %v337_v57 = vld [vmem:[%s2791_s0 + $0x78] sm:$0xf] }
  0x51   : > { %336 = vst [vmem:[%s2796_s6 + $0x38] sm:$0xf] %v335_v56  ;;  %v339_v58 = vld [vmem:[%s2791_s0 + $0x80] sm:$0xf]  ;;  %v341_v59 = vld [vmem:[%s2791_s0 + $0x88] sm:$0xf] }
  0x52   : > { %338 = vst [vmem:[%s2796_s6 + $0x3c] sm:$0xf] %v337_v57  ;;  %340 = vst [vmem:[%s2796_s6 + $0x40] sm:$0xf] %v339_v58  ;;  %v343_v60 = vld [vmem:[%s2791_s0 + $0x90] sm:$0xf] }
  0x53   : > { %342 = vst [vmem:[%s2796_s6 + $0x44] sm:$0xf] %v341_v59  ;;  %v345_v61 = vld [vmem:[%s2791_s0 + $0x98] sm:$0xf]  ;;  %v347_v62 = vld [vmem:[%s2791_s0 + $0xa0] sm:$0xf] }
  0x54   : > { %344 = vst [vmem:[%s2796_s6 + $0x48] sm:$0xf] %v343_v60  ;;  %346 = vst [vmem:[%s2796_s6 + $0x4c] sm:$0xf] %v345_v61  ;;  %v349_v63 = vld [vmem:[%s2791_s0 + $0xa8] sm:$0xf] }
  0x55   : > { %348 = vst [vmem:[%s2796_s6 + $0x50] sm:$0xf] %v347_v62  ;;  %v351_v0 = vld [vmem:[%s2791_s0 + $0xb0] sm:$0xf]  ;;  %v353_v1 = vld [vmem:[%s2791_s0 + $0xb8] sm:$0xf] }
  0x56   : > { %350 = vst [vmem:[%s2796_s6 + $0x54] sm:$0xf] %v349_v63  ;;  %352 = vst [vmem:[%s2796_s6 + $0x58] sm:$0xf] %v351_v0  ;;  %v355_v2 = vld [vmem:[%s2791_s0 + $0xc0] sm:$0xf] }
  0x57   : > { %354 = vst [vmem:[%s2796_s6 + $0x5c] sm:$0xf] %v353_v1  ;;  %v357_v3 = vld [vmem:[%s2791_s0 + $0xc8] sm:$0xf]  ;;  %v359_v4 = vld [vmem:[%s2791_s0 + $0xd0] sm:$0xf] }
  0x58   : > { %356 = vst [vmem:[%s2796_s6 + $0x60] sm:$0xf] %v355_v2  ;;  %358 = vst [vmem:[%s2796_s6 + $0x64] sm:$0xf] %v357_v3  ;;  %v361_v5 = vld [vmem:[%s2791_s0 + $0xd8] sm:$0xf] }
  0x59   : > { %360 = vst [vmem:[%s2796_s6 + $0x68] sm:$0xf] %v359_v4  ;;  %v363_v6 = vld [vmem:[%s2791_s0 + $0xe0] sm:$0xf]  ;;  %v365_v7 = vld [vmem:[%s2791_s0 + $0xe8] sm:$0xf] }
  0x5a   : > { %362 = vst [vmem:[%s2796_s6 + $0x6c] sm:$0xf] %v361_v5  ;;  %364 = vst [vmem:[%s2796_s6 + $0x70] sm:$0xf] %v363_v6  ;;  %v367_v8 = vld [vmem:[%s2791_s0 + $0xf0] sm:$0xf] }
  0x5b   : > { %366 = vst [vmem:[%s2796_s6 + $0x74] sm:$0xf] %v365_v7  ;;  %v369_v9 = vld [vmem:[%s2791_s0 + $0xf8] sm:$0xf]  ;;  %v371_v10 = vld [vmem:[%s2791_s0 + $0x100] sm:$0xf] }
  0x5c   : > { %368 = vst [vmem:[%s2796_s6 + $0x78] sm:$0xf] %v367_v8  ;;  %370 = vst [vmem:[%s2796_s6 + $0x7c] sm:$0xf] %v369_v9  ;;  %v373_v11 = vld [vmem:[%s2791_s0 + $0x108] sm:$0xf] }
  0x5d   : > { %372 = vst [vmem:[%s2796_s6 + $0x80] sm:$0xf] %v371_v10  ;;  %v375_v12 = vld [vmem:[%s2791_s0 + $0x110] sm:$0xf]  ;;  %v377_v13 = vld [vmem:[%s2791_s0 + $0x118] sm:$0xf] }
  0x5e   : > { %374 = vst [vmem:[%s2796_s6 + $0x84] sm:$0xf] %v373_v11  ;;  %376 = vst [vmem:[%s2796_s6 + $0x88] sm:$0xf] %v375_v12  ;;  %v379_v14 = vld [vmem:[%s2791_s0 + $0x120] sm:$0xf] }
  0x5f   : > { %378 = vst [vmem:[%s2796_s6 + $0x8c] sm:$0xf] %v377_v13  ;;  %v381_v15 = vld [vmem:[%s2791_s0 + $0x128] sm:$0xf]  ;;  %v383_v16 = vld [vmem:[%s2791_s0 + $0x130] sm:$0xf] }
  0x60   : > { %380 = vst [vmem:[%s2796_s6 + $0x90] sm:$0xf] %v379_v14  ;;  %382 = vst [vmem:[%s2796_s6 + $0x94] sm:$0xf] %v381_v15  ;;  %v385_v17 = vld [vmem:[%s2791_s0 + $0x138] sm:$0xf] }
  0x61   : > { %384 = vst [vmem:[%s2796_s6 + $0x98] sm:$0xf] %v383_v16  ;;  %v387_v18 = vld [vmem:[%s2791_s0 + $0x140] sm:$0xf]  ;;  %v389_v19 = vld [vmem:[%s2791_s0 + $0x148] sm:$0xf] }
  0x62   : > { %386 = vst [vmem:[%s2796_s6 + $0x9c] sm:$0xf] %v385_v17  ;;  %388 = vst [vmem:[%s2796_s6 + $0xa0] sm:$0xf] %v387_v18  ;;  %v391_v20 = vld [vmem:[%s2791_s0 + $0x150] sm:$0xf] }
  0x63   : > { %390 = vst [vmem:[%s2796_s6 + $0xa4] sm:$0xf] %v389_v19  ;;  %v393_v21 = vld [vmem:[%s2791_s0 + $0x158] sm:$0xf]  ;;  %v395_v22 = vld [vmem:[%s2791_s0 + $0x160] sm:$0xf] }
  0x64   : > { %392 = vst [vmem:[%s2796_s6 + $0xa8] sm:$0xf] %v391_v20  ;;  %394 = vst [vmem:[%s2796_s6 + $0xac] sm:$0xf] %v393_v21  ;;  %v397_v23 = vld [vmem:[%s2791_s0 + $0x168] sm:$0xf] }
  0x65   : > { %396 = vst [vmem:[%s2796_s6 + $0xb0] sm:$0xf] %v395_v22  ;;  %v399_v24 = vld [vmem:[%s2791_s0 + $0x170] sm:$0xf]  ;;  %v401_v25 = vld [vmem:[%s2791_s0 + $0x178] sm:$0xf] }
  0x66   : > { %398 = vst [vmem:[%s2796_s6 + $0xb4] sm:$0xf] %v397_v23  ;;  %400 = vst [vmem:[%s2796_s6 + $0xb8] sm:$0xf] %v399_v24  ;;  %v403_v26 = vld [vmem:[%s2791_s0 + $0x180] sm:$0xf] }
  0x67   : > { %402 = vst [vmem:[%s2796_s6 + $0xbc] sm:$0xf] %v401_v25  ;;  %v405_v27 = vld [vmem:[%s2791_s0 + $0x188] sm:$0xf]  ;;  %v407_v28 = vld [vmem:[%s2791_s0 + $0x190] sm:$0xf] }
  0x68   : > { %404 = vst [vmem:[%s2796_s6 + $0xc0] sm:$0xf] %v403_v26  ;;  %406 = vst [vmem:[%s2796_s6 + $0xc4] sm:$0xf] %v405_v27  ;;  %v409_v29 = vld [vmem:[%s2791_s0 + $0x198] sm:$0xf] }
  0x69   : > { %408 = vst [vmem:[%s2796_s6 + $0xc8] sm:$0xf] %v407_v28  ;;  %v411_v30 = vld [vmem:[%s2791_s0 + $0x1a0] sm:$0xf]  ;;  %v413_v31 = vld [vmem:[%s2791_s0 + $0x1a8] sm:$0xf] }
  0x6a   : > { %410 = vst [vmem:[%s2796_s6 + $0xcc] sm:$0xf] %v409_v29  ;;  %412 = vst [vmem:[%s2796_s6 + $0xd0] sm:$0xf] %v411_v30  ;;  %v415_v32 = vld [vmem:[%s2791_s0 + $0x1b0] sm:$0xf] }
  0x6b   : > { %414 = vst [vmem:[%s2796_s6 + $0xd4] sm:$0xf] %v413_v31  ;;  %v417_v33 = vld [vmem:[%s2791_s0 + $0x1b8] sm:$0xf]  ;;  %v419_v34 = vld [vmem:[%s2791_s0 + $0x1c0] sm:$0xf] }
  0x6c   : > { %416 = vst [vmem:[%s2796_s6 + $0xd8] sm:$0xf] %v415_v32  ;;  %418 = vst [vmem:[%s2796_s6 + $0xdc] sm:$0xf] %v417_v33  ;;  %v421_v35 = vld [vmem:[%s2791_s0 + $0x1c8] sm:$0xf] }
  0x6d   : > { %420 = vst [vmem:[%s2796_s6 + $0xe0] sm:$0xf] %v419_v34  ;;  %v423_v36 = vld [vmem:[%s2791_s0 + $0x1d0] sm:$0xf]  ;;  %v425_v37 = vld [vmem:[%s2791_s0 + $0x1d8] sm:$0xf] }
  0x6e   : > { %422 = vst [vmem:[%s2796_s6 + $0xe4] sm:$0xf] %v421_v35  ;;  %424 = vst [vmem:[%s2796_s6 + $0xe8] sm:$0xf] %v423_v36  ;;  %v427_v38 = vld [vmem:[%s2791_s0 + $0x1e0] sm:$0xf] }
  0x6f   : > { %426 = vst [vmem:[%s2796_s6 + $0xec] sm:$0xf] %v425_v37  ;;  %v429_v39 = vld [vmem:[%s2791_s0 + $0x1e8] sm:$0xf]  ;;  %v431_v40 = vld [vmem:[%s2791_s0 + $0x1f0] sm:$0xf] }
  0x70   : > { %428 = vst [vmem:[%s2796_s6 + $0xf0] sm:$0xf] %v427_v38  ;;  %430 = vst [vmem:[%s2796_s6 + $0xf4] sm:$0xf] %v429_v39  ;;  %v433_v41 = vld [vmem:[%s2791_s0 + $0x1f8] sm:$0xf] }
  0x71   : > { %432 = vst [vmem:[%s2796_s6 + $0xf8] sm:$0xf] %v431_v40  ;;  %v435_v42 = vld [vmem:[%s2791_s0 + $0x200] sm:$0xf]  ;;  %v437_v43 = vld [vmem:[%s2791_s0 + $0x208] sm:$0xf] }
  0x72   : > { %434 = vst [vmem:[%s2796_s6 + $0xfc] sm:$0xf] %v433_v41  ;;  %436 = vst [vmem:[%s2796_s6 + $0x100] sm:$0xf] %v435_v42  ;;  %v439_v44 = vld [vmem:[%s2791_s0 + $0x210] sm:$0xf] }
  0x73   : > { %438 = vst [vmem:[%s2796_s6 + $0x104] sm:$0xf] %v437_v43  ;;  %v441_v45 = vld [vmem:[%s2791_s0 + $0x218] sm:$0xf]  ;;  %v443_v46 = vld [vmem:[%s2791_s0 + $0x220] sm:$0xf] }
  0x74   : > { %440 = vst [vmem:[%s2796_s6 + $0x108] sm:$0xf] %v439_v44  ;;  %442 = vst [vmem:[%s2796_s6 + $0x10c] sm:$0xf] %v441_v45  ;;  %v445_v47 = vld [vmem:[%s2791_s0 + $0x228] sm:$0xf] }
  0x75   : > { %444 = vst [vmem:[%s2796_s6 + $0x110] sm:$0xf] %v443_v46  ;;  %v447_v48 = vld [vmem:[%s2791_s0 + $0x230] sm:$0xf]  ;;  %v449_v49 = vld [vmem:[%s2791_s0 + $0x238] sm:$0xf] }
  0x76   : > { %446 = vst [vmem:[%s2796_s6 + $0x114] sm:$0xf] %v445_v47  ;;  %448 = vst [vmem:[%s2796_s6 + $0x118] sm:$0xf] %v447_v48  ;;  %v451_v50 = vld [vmem:[%s2791_s0 + $0x240] sm:$0xf] }
  0x77   : > { %450 = vst [vmem:[%s2796_s6 + $0x11c] sm:$0xf] %v449_v49  ;;  %v453_v51 = vld [vmem:[%s2791_s0 + $0x248] sm:$0xf]  ;;  %v455_v52 = vld [vmem:[%s2791_s0 + $0x250] sm:$0xf] }
  0x78   : > { %452 = vst [vmem:[%s2796_s6 + $0x120] sm:$0xf] %v451_v50  ;;  %454 = vst [vmem:[%s2796_s6 + $0x124] sm:$0xf] %v453_v51  ;;  %v457_v53 = vld [vmem:[%s2791_s0 + $0x258] sm:$0xf] }
  0x79   : > { %456 = vst [vmem:[%s2796_s6 + $0x128] sm:$0xf] %v455_v52  ;;  %v459_v54 = vld [vmem:[%s2791_s0 + $0x260] sm:$0xf]  ;;  %v461_v55 = vld [vmem:[%s2791_s0 + $0x268] sm:$0xf] }
  0x7a   : > { %458 = vst [vmem:[%s2796_s6 + $0x12c] sm:$0xf] %v457_v53  ;;  %460 = vst [vmem:[%s2796_s6 + $0x130] sm:$0xf] %v459_v54  ;;  %v463_v56 = vld [vmem:[%s2791_s0 + $0x270] sm:$0xf] }
  0x7b   : > { %462 = vst [vmem:[%s2796_s6 + $0x134] sm:$0xf] %v461_v55  ;;  %v465_v57 = vld [vmem:[%s2791_s0 + $0x278] sm:$0xf]  ;;  %464 = vst [vmem:[%s2796_s6 + $0x138] sm:$0xf] %v463_v56 }
  0x7c   : > { %466 = vst [vmem:[%s2796_s6 + $0x13c] sm:$0xf] %v465_v57 }
  0x7d PF: > { %p1949_p0 = scmp.ge.s32.totalorder %s2564_s22, 1  ;;  %p655_p1 = scmp.lt.s32.totalorder %s2564_s22, 11 }
  0x7f   : > { %p656_p2 = pnand %p1949_p0, %p655_p1 }
  0x80   : > { %s662_s5 = sand.u32 (!%p656_p2), 1, %s2540_s16   ;;  %s669_s23 = sand.u32 (!%p656_p2), 1, %s2532_s14  }
  0x81   : > { %659 = sbr.rel (%p656_p2) target bundleno = 494 (0x1ee), region = 91  ;;  %s695_s7 = sand.u32 (!%p656_p2), 1, %s2524_s12  }
  0x82   : > { %s2295_s28 = smul.u32 (!%p656_p2), 280, %s662_s5  ;;  %p701_p3 = scmp.lt.s32.totalorder (!%p656_p2), %s2552_s19, 1 }
  0x83   : > { %s2296_s0 = smul.u32 (!%p656_p2), 320, %s669_s23  ;;  %p1950_p4 = scmp.ne.s32.totalorder (!%p656_p2), %s2548_s18, 0 }
  0x84   : > { %s2297_s11 = smul.u32 (!%p656_p2), 56, %s695_s7  ;;  %s2968_s6 = scalar_lea.vmem (!%p656_p2), [#allocation3], %s2295_s28 }
  0x85   : > { %s2970_s1 = scalar_lea.vmem (!%p656_p2), [#allocation4], %s2296_s0 }
  0x86   : > { %s2962_s26 = scalar_select %p701_p3, %s2552_s19, 1 }
  0x87   : > { %s2972_s25 = scalar_lea.vmem [#allocation5], %s2297_s11  ;;  %709 = sbr.rel (%p1950_p4) target bundleno = 148 (0x94), region = 103 }
  0x88   : > { %s703_s4 = scalar_lea.vmem %s3191_s2, %s2962_s26 }
  0x8c   : > { %v2566_v58 = vmov 0.0  }
  0x8d   : > { %710 = vst [vmem:[#allocation2 + $0x30] sm:$0xff] %v2566_v58  ;;  %711 = vst [vmem:[#allocation2] sm:$0xff] %v2566_v58 }
  0x8e   : > { %712 = vst [vmem:[#allocation2 + $0x58] sm:$0xff] %v2566_v58  ;;  %713 = vst [vmem:[#allocation2 + $0x18] sm:$0xff] %v2566_v58 }
  0x8f   : > { %714 = vst [vmem:[#allocation2 + $0x50] sm:$0xff] %v2566_v58  ;;  %715 = vst [vmem:[#allocation2 + $0x68] sm:$0xff] %v2566_v58 }
  0x90   : > { %716 = vst [vmem:[#allocation2 + $0x8] sm:$0xff] %v2566_v58  ;;  %717 = vst [vmem:[#allocation2 + $0x48] sm:$0xff] %v2566_v58 }
  0x91   : > { %718 = vst [vmem:[#allocation2 + $0x40] sm:$0xff] %v2566_v58  ;;  %719 = vst [vmem:[#allocation2 + $0x20] sm:$0xff] %v2566_v58 }
  0x92   : > { %720 = vst [vmem:[#allocation2 + $0x10] sm:$0xff] %v2566_v58  ;;  %721 = vst [vmem:[#allocation2 + $0x38] sm:$0xff] %v2566_v58 }
  0x93   : > { %722 = vst [vmem:[#allocation2 + $0x60] sm:$0xff] %v2566_v58  ;;  %723 = vst [vmem:[#allocation2 + $0x28] sm:$0xff] %v2566_v58 }
  0x94 PF: > { %v2389_v59 = vld [vmem:[%s2970_s1 + $0x78] sm:$0xff]   ;;  %v2391_v61 = vld [vmem:[%s2970_s1 + $0x70] sm:$0xff]   ;;  %v2393_v63 = vld [vmem:[%s2970_s1 + $0x68] sm:$0xff]   ;;  %v2567_v19 = vmov 0.0   ;;  %vm2568_vm0 = vmmov 0   ;;  %p2026_p5 = scmp.ne.s32.totalorder %s2548_s18, 4 }
  0x95   : > { %v2390_v60 = vld [vmem:[%s2970_s1 + $0x38] sm:$0xff]   ;;  %2102 = vmatprep.subr.bf16.mxu0 %v2389_v59  ;;  %2277 = vmatprep.subr.bf16.mxu1 %v2389_v59  ;;  %v2392_v62 = vld [vmem:[%s2970_s1 + $0x30] sm:$0xff]   ;;  %v2394_v0 = vld [vmem:[%s2970_s1 + $0x28] sm:$0xff]  }
  0x96   : > { %2103 = vmatpush3.bf16.msra.mxu0 %v2390_v60  ;;  %2285 = vmatpush3.bf16.msra.mxu1 %v2390_v60  ;;  %v2395_v1 = vld [vmem:[%s2970_s1 + $0x60] sm:$0xff]   ;;  %v2397_v3 = vld [vmem:[%s2970_s1 + $0x58] sm:$0xff]   ;;  %v2399_v5 = vld [vmem:[%s2970_s1 + $0x50] sm:$0xff]  }
  0x97   : > { %2104 = vmatprep.subr.bf16.mxu0 %v2391_v61  ;;  %2278 = vmatprep.subr.bf16.mxu1 %v2391_v61  ;;  %v2396_v2 = vld [vmem:[%s2970_s1 + $0x20] sm:$0xff]   ;;  %v2398_v4 = vld [vmem:[%s2970_s1 + $0x18] sm:$0xff]   ;;  %v2400_v8 = vld [vmem:[%s2970_s1 + $0x10] sm:$0xff]  }
  0x98   : > { %v2407_v6 = vld [vmem:[%s2968_s6 + $0x4] ss:$20 sps:$4 sm:$0xff]   ;;  %v2405_v13 = vld [vmem:[%s2968_s6] ss:$20 sps:$4 sm:$0xff]   ;;  %v2419_v24 = vld [vmem:[%s2968_s6 + $0x28] ss:$20 sps:$4 sm:$0xff]  }
  0x99   : > { %v2410_v7 = vld [vmem:[%s2968_s6 + $0xa4] ss:$20 sps:$4 sm:$0xff]   ;;  %1314 = vmatprep.mubr.bf16.mxu0 %v2407_v6  ;;  %v2408_v14 = vld [vmem:[%s2968_s6 + $0xa0] ss:$20 sps:$4 sm:$0xff]   ;;  %v2425_v28 = vld [vmem:[%s2968_s6 + $0xc8] ss:$20 sps:$4 sm:$0xff]  }
  0x9a   : > { %2105 = vmatpush3.bf16.msra.mxu0 %v2392_v62  ;;  %2286 = vmatpush3.bf16.msra.mxu1 %v2392_v62  ;;  %v2401_v9 = vld [vmem:[%s2970_s1 + $0x48] sm:$0xff]   ;;  %v2403_v11 = vld [vmem:[%s2970_s1 + $0x40] sm:$0xff]   ;;  %v2411_v15 = vld [vmem:[%s2970_s1 + $0xf8] sm:$0xff]  }
  0x9b   : > { %2106 = vmatprep.subr.bf16.mxu0 %v2393_v63  ;;  %2279 = vmatprep.subr.bf16.mxu1 %v2393_v63  ;;  %v2402_v10 = vld [vmem:[%s2970_s1 + $0x8] sm:$0xff]   ;;  %v2404_v12 = vld [vmem:[%s2970_s1] sm:$0xff]   ;;  %v2412_v16 = vld [vmem:[%s2970_s1 + $0xb8] sm:$0xff]  }
  0x9c   : > { %1346 = vmatprep.mubr.bf16.mxu1 %v2410_v7  ;;  %v2413_v17 = vld [vmem:[%s2970_s1 + $0x138] sm:$0xff]   ;;  %v2414_v18 = vld [vmem:[%s2970_s1 + $0xf0] sm:$0xff]   ;;  %v2420_v25 = vld [vmem:[%s2970_s1 + $0xe8] sm:$0xff]  }
  0x9d   : > { %v2417_v20 = vld [vmem:[%s2968_s6 + $0x2c] ss:$20 sps:$4 sm:$0xff]   ;;  %v2426_v29 = vld [vmem:[%s2970_s1 + $0xe0] sm:$0xff]  }
  0x9e   : > { %2107 = vmatpush3.bf16.msra.mxu0 %v2394_v0  ;;  %2287 = vmatpush3.bf16.msra.mxu1 %v2394_v0  ;;  %v2421_v21 = vld [vmem:[%s2968_s6 + $0xcc] ss:$20 sps:$4 sm:$0xff]   ;;  %v2429_v30 = vld [vmem:[%s2968_s6 + $0x54] ss:$20 sps:$4 sm:$0xff]   ;;  %v2431_v34 = vld [vmem:[%s2968_s6 + $0x50] ss:$20 sps:$4 sm:$0xff]  }
  0x9f   : > { %2108 = vmatprep.subr.bf16.mxu0 %v2395_v1  ;;  %2280 = vmatprep.subr.bf16.mxu1 %v2395_v1  ;;  %v2415_v22 = vld [vmem:[%s2970_s1 + $0xb0] sm:$0xff]   ;;  %v2423_v26 = vld [vmem:[%s2970_s1 + $0xa8] sm:$0xff]   ;;  %v2427_v32 = vld [vmem:[%s2970_s1 + $0xa0] sm:$0xff]  }
  0xa0   : > { %v2416_v23 = vld [vmem:[%s2970_s1 + $0x130] sm:$0xff]   ;;  %v2424_v27 = vld [vmem:[%s2970_s1 + $0x128] sm:$0xff]   ;;  %v2428_v33 = vld [vmem:[%s2970_s1 + $0x120] sm:$0xff]  }
  0xa1   : > { %v2433_v31 = vld [vmem:[%s2968_s6 + $0xf4] ss:$20 sps:$4 sm:$0xff]   ;;  %v2437_v37 = vld [vmem:[%s2968_s6 + $0xf0] ss:$20 sps:$4 sm:$0xff]   ;;  %v2452_v42 = vld [vmem:[%s2968_s6 + $0xc] ss:$20 sps:$4 sm:$0xff]  }
  0xa2   : > { %2109 = vmatpush3.bf16.msra.mxu0 %v2396_v2  ;;  %2288 = vmatpush3.bf16.msra.mxu1 %v2396_v2  ;;  %v2432_v35 = vld [vmem:[%s2970_s1 + $0xd8] sm:$0xff]   ;;  %v2438_v39 = vld [vmem:[%s2970_s1 + $0xd0] sm:$0xff]   ;;  %v2444_v44 = vld [vmem:[%s2970_s1 + $0xc8] sm:$0xff]  }
  0xa3   : > { %2110 = vmatprep.subr.bf16.mxu0 %v2397_v3  ;;  %2281 = vmatprep.subr.bf16.mxu1 %v2397_v3  ;;  %v2435_v36 = vld [vmem:[%s2970_s1 + $0x98] sm:$0xff]   ;;  %v2439_v41 = vld [vmem:[%s2970_s1 + $0x90] sm:$0xff]   ;;  %v2445_v46 = vld [vmem:[%s2970_s1 + $0x88] sm:$0xff]  }
  0xa4   : > { %v2436_v38 = vld [vmem:[%s2970_s1 + $0x118] sm:$0xff]   ;;  %v2440_v43 = vld [vmem:[%s2970_s1 + $0x110] sm:$0xff]   ;;  %v2446_v47 = vld [vmem:[%s2970_s1 + $0x108] sm:$0xff]  }
  0xa5   : > { %v2441_v40 = vld [vmem:[%s2968_s6 + $0x7c] ss:$20 sps:$4 sm:$0xff]   ;;  %v2443_v45 = vld [vmem:[%s2968_s6 + $0x78] ss:$20 sps:$4 sm:$0xff]   ;;  %v2454_v53 = vld [vmem:[%s2968_s6 + $0x34] ss:$20 sps:$4 sm:$0xff]  }
  0xa6   : > { %2111 = vmatpush3.bf16.msra.mxu0 %v2398_v4  ;;  %2289 = vmatpush3.bf16.msra.mxu1 %v2398_v4  ;;  %v2447_v48 = vld [vmem:[%s2970_s1 + $0xc0] sm:$0xff]   ;;  %v2466_v62 = vld [vmem:[%s2968_s6 + $0xac] ss:$20 sps:$4 sm:$0xff]  }
  0xa7   : > { %2112 = vmatprep.subr.bf16.mxu0 %v2399_v5  ;;  %2282 = vmatprep.subr.bf16.mxu1 %v2399_v5  ;;  %v2448_v49 = vld [vmem:[%s2970_s1 + $0x80] sm:$0xff]  }
  0xa8   : > { %v2449_v50 = vld [vmem:[%s2970_s1 + $0x100] sm:$0xff]  }
  0xa9   : > { %v2450_v51 = vld [vmem:[%s2968_s6 + $0x8] ss:$20 sps:$4 sm:$0xff]   ;;  %v2453_v52 = vld [vmem:[%s2968_s6 + $0x10] ss:$20 sps:$4 sm:$0xff]   ;;  %v2457_v55 = vld [vmem:[%s2968_s6 + $0x38] ss:$20 sps:$4 sm:$0xff]  }
  0xaa   : > { %2113 = vmatpush3.bf16.msra.mxu0 %v2400_v8  ;;  %2290 = vmatpush3.bf16.msra.mxu1 %v2400_v8  ;;  %v2456_v54 = vld [vmem:[%s2968_s6 + $0x30] ss:$20 sps:$4 sm:$0xff]   ;;  %v2460_v57 = vld [vmem:[%s2968_s6 + $0x58] ss:$20 sps:$4 sm:$0xff]   ;;  %v2461_v58 = vld [vmem:[%s2968_s6 + $0x60] ss:$20 sps:$4 sm:$0xff]  }
  0xab   : > { %2114 = vmatprep.subr.bf16.mxu0 %v2401_v9  ;;  %2283 = vmatprep.subr.bf16.mxu1 %v2401_v9  ;;  %v2458_v56 = vld [vmem:[%s2968_s6 + $0x5c] ss:$20 sps:$4 sm:$0xff]   ;;  %v2462_v59 = vld [vmem:[%s2968_s6 + $0x84] ss:$20 sps:$4 sm:$0xff]   ;;  %v2464_v60 = vld [vmem:[%s2968_s6 + $0x80] ss:$20 sps:$4 sm:$0xff]  }
  0xac   : > { %v2465_v61 = vld [vmem:[%s2968_s6 + $0x88] ss:$20 sps:$4 sm:$0xff]   ;;  %v2469_v0 = vld [vmem:[%s2968_s6 + $0xb0] ss:$20 sps:$4 sm:$0xff]   ;;  %v2473_v3 = vld [vmem:[%s2968_s6 + $0xd8] ss:$20 sps:$4 sm:$0xff]  }
  0xad   : > { %v2468_v63 = vld [vmem:[%s2968_s6 + $0xa8] ss:$20 sps:$4 sm:$0xff]   ;;  %v2472_v2 = vld [vmem:[%s2968_s6 + $0xd0] ss:$20 sps:$4 sm:$0xff]   ;;  %v2476_v5 = vld [vmem:[%s2968_s6 + $0xf8] ss:$20 sps:$4 sm:$0xff]  }
  0xae   : > { %2115 = vmatpush3.bf16.msra.mxu0 %v2402_v10  ;;  %2291 = vmatpush3.bf16.msra.mxu1 %v2402_v10  ;;  %v2470_v1 = vld [vmem:[%s2968_s6 + $0xd4] ss:$20 sps:$4 sm:$0xff]   ;;  %v2474_v4 = vld [vmem:[%s2968_s6 + $0xfc] ss:$20 sps:$4 sm:$0xff]  }
  0xaf   : > { %2116 = vmatprep.subr.bf16.mxu0 %v2403_v11  ;;  %2284 = vmatprep.subr.bf16.mxu1 %v2403_v11  ;;  %v2477_v6 = vld [vmem:[%s2968_s6 + $0x100] ss:$20 sps:$4 sm:$0xff]  }
  0xb2   : > { %2117 = vmatpush3.bf16.msra.mxu0 %v2404_v12  ;;  %2292 = vmatpush3.bf16.msra.mxu1 %v2404_v12 }
  0xb3   : > { %2160 = vmatprep.subr.bf16.mxu1 %v2411_v15  ;;  %2233 = vmatprep.subr.bf16.mxu0 %v2567_v19 }
  0xb5   : > { %1315 = vmatmul.mubr.bf16.vlgmr.msra.gmra.mxu0 %v2405_v13  ;;  %1347 = vmatmul.mubr.bf16.vlgmr.msra.gmra.mxu1 %v2408_v14 }
  0xb6   : > { %2161 = vmatpush3.bf16.msra.mxu1 %v2412_v16  ;;  %2234 = vmatpush3.bf16.msra.mxu0 %v2413_v17 }
  0xb7   : > { %2162 = vmatprep.subr.bf16.mxu1 %v2414_v18  ;;  %2235 = vmatprep.subr.bf16.mxu0 %v2567_v19 }
  0xb8   : > { %1322 = vmatprep.mubr.bf16.mxu0 %v2417_v20  ;;  %1354 = vmatprep.mubr.bf16.mxu1 %v2421_v21 }
  0xba   : > { %2163 = vmatpush3.bf16.msra.mxu1 %v2415_v22  ;;  %2236 = vmatpush3.bf16.msra.mxu0 %v2416_v23 }
  0xbb   : > { %2164 = vmatprep.subr.bf16.mxu1 %v2420_v25  ;;  %2237 = vmatprep.subr.bf16.mxu0 %v2567_v19 }
  0xbd   : > { %1323 = vmatmul.mubr.bf16.gmra.mxu0 %v2419_v24  ;;  %1355 = vmatmul.mubr.bf16.gmra.mxu1 %v2425_v28 }
  0xbe   : > { %2165 = vmatpush3.bf16.msra.mxu1 %v2423_v26  ;;  %2238 = vmatpush3.bf16.msra.mxu0 %v2424_v27 }
  0xbf   : > { %2166 = vmatprep.subr.bf16.mxu1 %v2426_v29  ;;  %2239 = vmatprep.subr.bf16.mxu0 %v2567_v19 }
  0xc0   : > { %1330 = vmatprep.mubr.bf16.mxu0 %v2429_v30  ;;  %1362 = vmatprep.mubr.bf16.mxu1 %v2433_v31 }
  0xc2   : > { %2167 = vmatpush3.bf16.msra.mxu1 %v2427_v32  ;;  %2240 = vmatpush3.bf16.msra.mxu0 %v2428_v33 }
  0xc3   : > { %2168 = vmatprep.subr.bf16.mxu1 %v2432_v35  ;;  %2241 = vmatprep.subr.bf16.mxu0 %v2567_v19 }
  0xc5   : > { %1331 = vmatmul.mubr.bf16.gmra.mxu0 %v2431_v34  ;;  %1363 = vmatmul.mubr.bf16.gmra.mxu1 %v2437_v37 }
  0xc6   : > { %2169 = vmatpush3.bf16.msra.mxu1 %v2435_v36  ;;  %2242 = vmatpush3.bf16.msra.mxu0 %v2436_v38 }
  0xc7   : > { %2170 = vmatprep.subr.bf16.mxu1 %v2438_v39  ;;  %2243 = vmatprep.subr.bf16.mxu0 %v2567_v19 }
  0xc8   : > { %1338 = vmatprep.mubr.bf16.mxu0 %v2441_v40  ;;  %1403 = vmatprep.mubr.bf16.mxu1 %v2452_v42 }
  0xca   : > { %2171 = vmatpush3.bf16.msra.mxu1 %v2439_v41  ;;  %2244 = vmatpush3.bf16.msra.mxu0 %v2440_v43 }
  0xcb   : > { %2172 = vmatprep.subr.bf16.mxu1 %v2444_v44  ;;  %2245 = vmatprep.subr.bf16.mxu0 %v2567_v19  ;;  %v724_v44 = vld [vmem:[#allocation2 + $0x30] sm:$0xff] }
  0xcd   : > { %1339 = vmatmul.mubr.bf16.gmra.mxu0 %v2443_v45 }
  0xce   : > { %2173 = vmatpush3.bf16.msra.mxu1 %v2445_v46  ;;  %2246 = vmatpush3.bf16.msra.mxu0 %v2446_v47 }
  0xcf   : > { %2174 = vmatprep.subr.bf16.mxu1 %v2447_v48  ;;  %2247 = vmatprep.subr.bf16.mxu0 %v2567_v19 }
  0xd0   : > { %2249 = vmatprep.mubr.msk.bf16.mxu0 %vm2568_vm0, %v2567_v19 }
  0xd2   : > { %2175 = vmatpush3.bf16.msra.mxu1 %v2448_v49  ;;  %2248 = vmatpush3.bf16.msra.mxu0 %v2449_v50 }
  0xd5   : > { %1404 = vmatmul.mubr.bf16.vlgmr.msra.gmra.mxu1 %v2450_v51  ;;  %2250 = vmatmul.mubr.bf16.vlgmr.msra.gmra.mxu0 %v2453_v52 }
  0xd6   : > { %1411 = vmatprep.mubr.bf16.mxu1 %v2454_v53  ;;  %2253 = vmatprep.mubr.msk.bf16.mxu0 %vm2568_vm0, %v2567_v19 }
  0xdd   : > { %1412 = vmatmul.mubr.bf16.gmra.mxu1 %v2456_v54  ;;  %2254 = vmatmul.mubr.bf16.gmra.mxu0 %v2457_v55  ;;  %v725_v54 = vld [vmem:[#allocation2] sm:$0xff] }
  0xde   : > { %1419 = vmatprep.mubr.bf16.mxu1 %v2458_v56  ;;  %2257 = vmatprep.mubr.msk.bf16.mxu0 %vm2568_vm0, %v2567_v19 }
  0xe5   : > { %1420 = vmatmul.mubr.bf16.gmra.mxu1 %v2460_v57  ;;  %2258 = vmatmul.mubr.bf16.gmra.mxu0 %v2461_v58 }
  0xe6   : > { %1427 = vmatprep.mubr.bf16.mxu1 %v2462_v59  ;;  %2261 = vmatprep.mubr.msk.bf16.mxu0 %vm2568_vm0, %v2567_v19 }
  0xed   : > { %1428 = vmatmul.mubr.bf16.gmra.mxu1 %v2464_v60  ;;  %2262 = vmatmul.mubr.bf16.gmra.mxu0 %v2465_v61 }
  0xee   : > { %1435 = vmatprep.mubr.bf16.mxu1 %v2466_v62  ;;  %2265 = vmatprep.mubr.msk.bf16.mxu0 %vm2568_vm0, %v2567_v19 }
  0xf5   : > { %1436 = vmatmul.mubr.bf16.gmra.mxu1 %v2468_v63  ;;  %2266 = vmatmul.mubr.bf16.gmra.mxu0 %v2469_v0  ;;  %v726_v0 = vld [vmem:[#allocation2 + $0x58] sm:$0xff] }
  0xf6   : > { %1443 = vmatprep.mubr.bf16.mxu1 %v2470_v1  ;;  %2269 = vmatprep.mubr.msk.bf16.mxu0 %vm2568_vm0, %v2567_v19 }
  0xfd   : > { %1444 = vmatmul.mubr.bf16.gmra.mxu1 %v2472_v2  ;;  %2270 = vmatmul.mubr.bf16.gmra.mxu0 %v2473_v3 }
  0xfe   : > { %1451 = vmatprep.mubr.bf16.mxu1 %v2474_v4  ;;  %2273 = vmatprep.mubr.msk.bf16.mxu0 %vm2568_vm0, %v2567_v19 }
 0x105   : > { %1452 = vmatmul.mubr.bf16.gmra.mxu1 %v2476_v5  ;;  %2274 = vmatmul.mubr.bf16.gmra.mxu0 %v2477_v6 }
 0x175   : > { %v2118_v7 = vpop.f32.mrf.mxu0  ;;  %v3072_v8 = vpop.f32.mrf.mxu1 }
 0x177   : > { %v2119_v9 = vpop.f32.mrf.mxu0  ;;  %v3074_v10 = vpop.f32.mrf.mxu1 }
 0x178   : > { %v2120_v39 = vadd.f32 %v2119_v9, %v2118_v7 }
 0x179   : > { %v2121_v11 = vpop.f32.mrf.mxu0  ;;  %v3076_v12 = vpop.f32.mrf.mxu1 }
 0x17b   : > { %v2122_v13 = vpop.f32.mrf.mxu0  ;;  %v3078_v14 = vpop.f32.mrf.mxu1 }
 0x17c   : > { %v2123_v47 = vadd.f32 %v2122_v13, %v2121_v11  ;;  %v727_v13 = vld [vmem:[#allocation2 + $0x18] sm:$0xff] }
 0x17d   : > { %v2124_v15 = vpop.f32.mrf.mxu0  ;;  %v3080_v16 = vpop.f32.mrf.mxu1 }
 0x17f   : > { %v2125_v17 = vpop.f32.mrf.mxu0  ;;  %v3082_v18 = vpop.f32.mrf.mxu1 }
 0x180   : > { %v2126_v57 = vadd.f32 %v2125_v17, %v2124_v15 }
 0x181   : > { %v2127_v19 = vpop.f32.mrf.mxu0  ;;  %v3084_v20 = vpop.f32.mrf.mxu1 }
 0x183   : > { %v2128_v21 = vpop.f32.mrf.mxu0  ;;  %v3086_v22 = vpop.f32.mrf.mxu1 }
 0x184   : > { %v2129_v3 = vadd.f32 %v2128_v21, %v2127_v19 }
 0x185   : > { %v2130_v23 = vpop.f32.mrf.mxu0  ;;  %v3088_v25 = vpop.f32.mrf.mxu1 }
 0x187   : > { %v2131_v24 = vpop.f32.mrf.mxu0  ;;  %v3092_v27 = vpop.f32.mrf.mxu1 }
 0x189   : > { %v3090_v26 = vpop.f32.mrf.mxu0  ;;  %v3096_v30 = vpop.f32.mrf.mxu1 }
 0x18b   : > { %v2134_v28 = vpop.f32.mrf.mxu0  ;;  %v3102_v33 = vpop.f32.mrf.mxu1 }
 0x18d   : > { %v3094_v29 = vpop.f32.mrf.mxu0 }
 0x18f   : > { %v3098_v31 = vpop.f32.mrf.mxu0 }
 0x191   : > { %v3100_v32 = vpop.f32.mrf.mxu0 }
 0x193   : > { %v3104_v34 = vpop.f32.mrf.mxu0 }
 0x195   : > { %v2176_v35 = vpop.f32.mrf.mxu1  ;;  %v1494_v36 = vpop.f32.mrf.mxu0 }
 0x197   : > { %v2177_v37 = vpop.f32.mrf.mxu1  ;;  %v2251_v38 = vpop.f32.mrf.mxu0 }
 0x198   : > { %v2178_v40 = vadd.f32 %v2177_v37, %v2176_v35  ;;  %v2132_v35 = vadd.f32 %v2131_v24, %v2130_v23  ;;  %v729_v23 = vld [vmem:[#allocation2 + $0x68] sm:$0xff] }
 0x199   : > { %v2179_v41 = vpop.f32.mrf.mxu1  ;;  %v1497_v42 = vpop.f32.mrf.mxu0 }
 0x19a   : > { %v1406_v43 = vadd.f32 %v2178_v40, %v2120_v39 }
 0x19b   : > { %v2180_v45 = vpop.f32.mrf.mxu1  ;;  %v2252_v46 = vpop.f32.mrf.mxu0 }
 0x19c   : > { %v1495_v48 = vadd.f32 %v1494_v36, %v1406_v43  ;;  %v2181_v49 = vadd.f32 %v2180_v45, %v2179_v41  ;;  %v2135_v43 = vadd.f32 %v2134_v28, %v3090_v26  ;;  %v730_v28 = vld [vmem:[#allocation2 + $0x8] sm:$0xff] }
 0x19d   : > { %v2182_v50 = vpop.f32.mrf.mxu1  ;;  %v1502_v51 = vpop.f32.mrf.mxu0 }
 0x19e   : > { %v1549_v52 = vadd.f32 %v1495_v48, %v724_v44  ;;  %v1409_v53 = vadd.f32 %v2181_v49, %v2123_v47 }
 0x19f   : > { %v2183_v55 = vpop.f32.mrf.mxu1  ;;  %v2255_v56 = vpop.f32.mrf.mxu0 }
 0x1a0   : > { %1563 = vst [vmem:[#allocation2 + $0x30] sm:$0xff] %v1549_v52  ;;  %v1498_v58 = vadd.f32 %v1497_v42, %v1409_v53  ;;  %v2184_v59 = vadd.f32 %v2183_v55, %v2182_v50  ;;  %v728_v42 = vld [vmem:[#allocation2 + $0x50] sm:$0xff] }
 0x1a1   : > { %v2185_v60 = vpop.f32.mrf.mxu1  ;;  %v1505_v61 = vpop.f32.mrf.mxu0 }
 0x1a2   : > { %v1550_v62 = vadd.f32 %v1498_v58, %v725_v54  ;;  %v1414_v63 = vadd.f32 %v2184_v59, %v2126_v57  ;;  %v2141_v59 = vadd.f32 %v3104_v34, %v3100_v32  ;;  %v732_v34 = vld [vmem:[#allocation2 + $0x40] sm:$0xff] }
 0x1a3   : > { %v2186_v1 = vpop.f32.mrf.mxu1  ;;  %v2256_v2 = vpop.f32.mrf.mxu0 }
 0x1a4   : > { %1564 = vst [vmem:[#allocation2] sm:$0xff] %v1550_v62  ;;  %v1503_v4 = vadd.f32 %v1502_v51, %v1414_v63  ;;  %v2187_v5 = vadd.f32 %v2186_v1, %v2185_v60  ;;  %v2138_v51 = vadd.f32 %v3098_v31, %v3094_v29  ;;  %v731_v31 = vld [vmem:[#allocation2 + $0x48] sm:$0xff] }
 0x1a5   : > { %v2188_v6 = vpop.f32.mrf.mxu1  ;;  %v1510_v7 = vpop.f32.mrf.mxu0 }
 0x1a6   : > { %v1551_v9 = vadd.f32 %v1503_v4, %v726_v0  ;;  %v1417_v11 = vadd.f32 %v2187_v5, %v2129_v3  ;;  %v2144_v3 = vadd.f32 %v3074_v10, %v3072_v8  ;;  %v733_v10 = vld [vmem:[#allocation2 + $0x20] sm:$0xff] }
 0x1a7   : > { %v2189_v15 = vpop.f32.mrf.mxu1  ;;  %v2259_v17 = vpop.f32.mrf.mxu0 }
 0x1a8   : > { %1565 = vst [vmem:[#allocation2 + $0x58] sm:$0xff] %v1551_v9  ;;  %v1506_v36 = vadd.f32 %v1505_v61, %v1417_v11  ;;  %v2190_v37 = vadd.f32 %v2189_v15, %v2188_v6  ;;  %v2147_v15 = vadd.f32 %v3078_v14, %v3076_v12  ;;  %v734_v14 = vld [vmem:[#allocation2 + $0x10] sm:$0xff] }
 0x1a9   : > { %v2191_v38 = vpop.f32.mrf.mxu1  ;;  %v1513_v39 = vpop.f32.mrf.mxu0 }
 0x1aa   : > { %v1552_v40 = vadd.f32 %v1506_v36, %v727_v13  ;;  %v1422_v41 = vadd.f32 %v2190_v37, %v2132_v35 }
 0x1ab   : > { %v2192_v19 = vpop.f32.mrf.mxu1  ;;  %v2260_v21 = vpop.f32.mrf.mxu0 }
 0x1ac   : > { %1566 = vst [vmem:[#allocation2 + $0x18] sm:$0xff] %v1552_v40  ;;  %v1511_v44 = vadd.f32 %v1510_v7, %v1422_v41  ;;  %v2193_v45 = vadd.f32 %v2192_v19, %v2191_v38  ;;  %v2150_v41 = vadd.f32 %v3082_v18, %v3080_v16  ;;  %v735_v18 = vld [vmem:[#allocation2 + $0x38] sm:$0xff] }
 0x1ad   : > { %v2194_v46 = vpop.f32.mrf.mxu1  ;;  %v1518_v47 = vpop.f32.mrf.mxu0 }
 0x1ae   : > { %v1553_v48 = vadd.f32 %v1511_v44, %v728_v42  ;;  %v1425_v49 = vadd.f32 %v2193_v45, %v2135_v43 }
 0x1af   : > { %v2195_v24 = vpop.f32.mrf.mxu1  ;;  %v2263_v50 = vpop.f32.mrf.mxu0 }
 0x1b0   : > { %1567 = vst [vmem:[#allocation2 + $0x50] sm:$0xff] %v1553_v48  ;;  %v1514_v52 = vadd.f32 %v1513_v39, %v1425_v49  ;;  %v2196_v53 = vadd.f32 %v2195_v24, %v2194_v46 }
 0x1b1   : > { %v2197_v54 = vpop.f32.mrf.mxu1  ;;  %v1521_v55 = vpop.f32.mrf.mxu0 }
 0x1b2   : > { %v1554_v56 = vadd.f32 %v1514_v52, %v729_v23  ;;  %v1430_v26 = vadd.f32 %v2196_v53, %v2138_v51  ;;  %v2156_v53 = vadd.f32 %v3092_v27, %v3088_v25 }
 0x1b3   : > { %v2198_v57 = vpop.f32.mrf.mxu1  ;;  %v2264_v58 = vpop.f32.mrf.mxu0 }
 0x1b4   : > { %1568 = vst [vmem:[#allocation2 + $0x68] sm:$0xff] %v1554_v56  ;;  %v1519_v60 = vadd.f32 %v1518_v47, %v1430_v26  ;;  %v2199_v61 = vadd.f32 %v2198_v57, %v2197_v54  ;;  %v2153_v47 = vadd.f32 %v3086_v22, %v3084_v20  ;;  %v736_v22 = vld [vmem:[#allocation2 + $0x60] sm:$0xff] }
 0x1b5   : > { %v2200_v62 = vpop.f32.mrf.mxu1  ;;  %v1526_v63 = vpop.f32.mrf.mxu0 }
 0x1b6   : > { %v1555_v0 = vadd.f32 %v1519_v60, %v730_v28  ;;  %v1433_v29 = vadd.f32 %v2199_v61, %v2141_v59  ;;  %v2159_v59 = vadd.f32 %v3102_v33, %v3096_v30 }
 0x1b7   : > { %v2201_v1 = vpop.f32.mrf.mxu1  ;;  %v2267_v2 = vpop.f32.mrf.mxu0 }
 0x1b8   : > { %1569 = vst [vmem:[#allocation2 + $0x8] sm:$0xff] %v1555_v0  ;;  %v1522_v4 = vadd.f32 %v1521_v55, %v1433_v29  ;;  %v2202_v5 = vadd.f32 %v2201_v1, %v2200_v62  ;;  %v737_v0 = vld [vmem:[#allocation2 + $0x28] sm:$0xff] }
 0x1b9   : > { %v2203_v6 = vpop.f32.mrf.mxu1  ;;  %v1529_v7 = vpop.f32.mrf.mxu0 }
 0x1ba   : > { %v1556_v9 = vadd.f32 %v1522_v4, %v731_v31  ;;  %v1438_v32 = vadd.f32 %v2202_v5, %v2144_v3 }
 0x1bb   : > { %v2204_v11 = vpop.f32.mrf.mxu1  ;;  %v2268_v13 = vpop.f32.mrf.mxu0 }
 0x1bc   : > { %1570 = vst [vmem:[#allocation2 + $0x48] sm:$0xff] %v1556_v9  ;;  %v1527_v17 = vadd.f32 %v1526_v63, %v1438_v32  ;;  %v2205_v35 = vadd.f32 %v2204_v11, %v2203_v6 }
 0x1bd   : > { %v2206_v36 = vpop.f32.mrf.mxu1  ;;  %v1534_v37 = vpop.f32.mrf.mxu0 }
 0x1be   : > { %v1557_v38 = vadd.f32 %v1527_v17, %v732_v34  ;;  %v1441_v8 = vadd.f32 %v2205_v35, %v2147_v15 }
 0x1bf   : > { %v2207_v39 = vpop.f32.mrf.mxu1  ;;  %v2271_v40 = vpop.f32.mrf.mxu0 }
 0x1c0   : > { %1571 = vst [vmem:[#allocation2 + $0x40] sm:$0xff] %v1557_v38  ;;  %v1530_v42 = vadd.f32 %v1529_v7, %v1441_v8  ;;  %v2208_v19 = vadd.f32 %v2207_v39, %v2206_v36 }
 0x1c1   : > { %v2209_v21 = vpop.f32.mrf.mxu1  ;;  %v1537_v43 = vpop.f32.mrf.mxu0 }
 0x1c2   : > { %v1558_v44 = vadd.f32 %v1530_v42, %v733_v10  ;;  %v1446_v12 = vadd.f32 %v2208_v19, %v2150_v41 }
 0x1c3   : > { %v2210_v45 = vpop.f32.mrf.mxu1  ;;  %v2272_v46 = vpop.f32.mrf.mxu0 }
 0x1c4   : > { %1572 = vst [vmem:[#allocation2 + $0x20] sm:$0xff] %v1558_v44  ;;  %v1535_v48 = vadd.f32 %v1534_v37, %v1446_v12  ;;  %v2211_v49 = vadd.f32 %v2210_v45, %v2209_v21 }
 0x1c5   : > { %v2212_v23 = vpop.f32.mrf.mxu1  ;;  %v1542_v24 = vpop.f32.mrf.mxu0 }
 0x1c6   : > { %v1559_v50 = vadd.f32 %v1535_v48, %v734_v14  ;;  %v1449_v16 = vadd.f32 %v2211_v49, %v2153_v47 }
 0x1c7   : > { %v2213_v51 = vpop.f32.mrf.mxu1  ;;  %v2275_v52 = vpop.f32.mrf.mxu0 }
 0x1c8   : > { %1573 = vst [vmem:[#allocation2 + $0x10] sm:$0xff] %v1559_v50  ;;  %v1538_v54 = vadd.f32 %v1537_v43, %v1449_v16  ;;  %v2214_v55 = vadd.f32 %v2213_v51, %v2212_v23 }
 0x1c9   : > { %v2215_v56 = vpop.f32.mrf.mxu1  ;;  %v1545_v26 = vpop.f32.mrf.mxu0 }
 0x1ca   : > { %v1560_v28 = vadd.f32 %v1538_v54, %v735_v18  ;;  %v1454_v20 = vadd.f32 %v2214_v55, %v2156_v53 }
 0x1cb   : > { %v2216_v57 = vpop.f32.mrf.mxu1  ;;  %v2276_v58 = vpop.f32.mrf.mxu0 }
 0x1cc   : > { %1574 = vst [vmem:[#allocation2 + $0x38] sm:$0xff] %v1560_v28  ;;  %v1543_v60 = vadd.f32 %v1542_v24, %v1454_v20  ;;  %v2217_v61 = vadd.f32 %v2216_v57, %v2215_v56 }
 0x1ce   : > { %v1561_v62 = vadd.f32 %v1543_v60, %v736_v22  ;;  %v1457_v63 = vadd.f32 %v2217_v61, %v2159_v59 }
 0x1d0   : > { %1575 = vst [vmem:[#allocation2 + $0x60] sm:$0xff] %v1561_v62  ;;  %v1546_v25 = vadd.f32 %v1545_v26, %v1457_v63  ;;  %1580 = sbr.rel (%p2026_p5) target bundleno = 484 (0x1e4), region = 107 }
 0x1d2   : > { %v1562_v27 = vadd.f32 %v1546_v25, %v737_v0 }
 0x1d4   : > { %1576 = vst [vmem:[#allocation2 + $0x28] sm:$0xff] %v1562_v27 }
 0x1d5   : > { %v1581_v29 = vld [vmem:[#allocation2 + $0x30] sm:$0xff]  ;;  %v1582_v31 = vld [vmem:[#allocation2] sm:$0xff]  ;;  %v1583_v2 = vld [vmem:[#allocation2 + $0x58] sm:$0xff] }
 0x1d6   : > { %v2027_v30 = vld [vmem:[%s703_s4] ss:$0 sm:$0xff]  ;;  %v1584_v3 = vld [vmem:[#allocation2 + $0x18] sm:$0xff]  ;;  %v1585_v4 = vld [vmem:[#allocation2 + $0x50] sm:$0xff] }
 0x1d7   : > { %v1602_v33 = vadd.f32 %v2027_v30, %v1581_v29  ;;  %v1603_v1 = vadd.f32 %v2027_v30, %v1582_v31  ;;  %v1604_v5 = vadd.f32 %v2027_v30, %v1583_v2  ;;  %v1605_v6 = vadd.f32 %v2027_v30, %v1584_v3  ;;  %v1586_v7 = vld [vmem:[#allocation2 + $0x68] sm:$0xff]  ;;  %v1589_v35 = vld [vmem:[#allocation2 + $0x40] sm:$0xff]  ;;  %v1591_v37 = vld [vmem:[#allocation2 + $0x10] sm:$0xff] }
 0x1d8   : > { %v1606_v9 = vadd.f32 %v2027_v30, %v1585_v4  ;;  %v1587_v32 = vld [vmem:[#allocation2 + $0x8] sm:$0xff]  ;;  %v1607_v15 = vadd.f32 %v2027_v30, %v1586_v7  ;;  %v1590_v36 = vld [vmem:[#allocation2 + $0x20] sm:$0xff]  ;;  %v1592_v40 = vld [vmem:[#allocation2 + $0x38] sm:$0xff]  ;;  %v1610_v43 = vadd.f32 %v2027_v30, %v1589_v35  ;;  %v1612_v46 = vadd.f32 %v2027_v30, %v1591_v37 }
 0x1d9   : > { %v1588_v34 = vld [vmem:[#allocation2 + $0x48] sm:$0xff]  ;;  %v1616_v11 = vmax.f32 %v1602_v33, 0.0  ;;  %v1617_v13 = vmax.f32 %v1603_v1, 0.0  ;;  %v1608_v17 = vadd.f32 %v2027_v30, %v1587_v32  ;;  %v1618_v38 = vmax.f32 %v1604_v5, 0.0  ;;  %v1593_v41 = vld [vmem:[#allocation2 + $0x60] sm:$0xff] }
 0x1da   : > { %v1619_v8 = vmax.f32 %v1605_v6, 0.0  ;;  %v1620_v10 = vmax.f32 %v1606_v9, 0.0  ;;  %v1609_v39 = vadd.f32 %v2027_v30, %v1588_v34  ;;  %v1621_v19 = vmax.f32 %v1607_v15, 0.0 }
 0x1db   : > { %v2064_v42 = vpack.c.bf16 %v1617_v13, %v1616_v11  ;;  %v1622_v21 = vmax.f32 %v1608_v17, 0.0  ;;  %v1594_v44 = vld [vmem:[#allocation2 + $0x28] sm:$0xff]  ;;  %v1611_v45 = vadd.f32 %v2027_v30, %v1590_v36  ;;  %v1624_v48 = vmax.f32 %v1610_v43, 0.0 }
 0x1dc   : > { %v2069_v12 = vpack.c.bf16 %v1619_v8, %v1618_v38  ;;  %v1623_v14 = vmax.f32 %v1609_v39, 0.0  ;;  %v2074_v47 = vpack.c.bf16 %v1621_v19, %v1620_v10  ;;  %v1613_v49 = vadd.f32 %v2027_v30, %v1592_v40 }
 0x1dd   : > { %2065 = vst [vmem:[%s2972_s25] sm:$0xff] %v2064_v42   ;;  %v1614_v23 = vadd.f32 %v2027_v30, %v1593_v41  ;;  %v1625_v50 = vmax.f32 %v1611_v45, 0.0  ;;  %v1626_v16 = vmax.f32 %v1612_v46, 0.0  ;;  %v1615_v18 = vadd.f32 %v2027_v30, %v1594_v44 }
 0x1de   : > { %2096 = vst [vmem:[%s2972_s25 + $0x8] sm:$0xff] %v2069_v12   ;;  %v2079_v24 = vpack.c.bf16 %v1623_v14, %v1622_v21  ;;  %2097 = vst [vmem:[%s2972_s25 + $0x10] sm:$0xff] %v2074_v47   ;;  %v1627_v51 = vmax.f32 %v1613_v49, 0.0 }
 0x1df   : > { %v1628_v52 = vmax.f32 %v1614_v23, 0.0  ;;  %v2084_v53 = vpack.c.bf16 %v1625_v50, %v1624_v48  ;;  %v1629_v54 = vmax.f32 %v1615_v18, 0.0 }
 0x1e0   : > { %2098 = vst [vmem:[%s2972_s25 + $0x18] sm:$0xff] %v2079_v24   ;;  %v2089_v55 = vpack.c.bf16 %v1627_v51, %v1626_v16 }
 0x1e1   : > { %2099 = vst [vmem:[%s2972_s25 + $0x20] sm:$0xff] %v2084_v53   ;;  %v2094_v56 = vpack.c.bf16 %v1629_v54, %v1628_v52 }
 0x1e2   : > { %2100 = vst [vmem:[%s2972_s25 + $0x28] sm:$0xff] %v2089_v55  }
 0x1e3   : > { %2101 = vst [vmem:[%s2972_s25 + $0x30] sm:$0xff] %v2094_v56  }
 0x1e4 PF: > { %1706 = sbr.rel (!%p2683_p12) target bundleno = 494 (0x1ee), region = 111  ;;  %s2042_s14 = sshll.u32 (%p2683_p12), %s2552_s19, 2  ;;  %v1728_v26 = vld [vmem:[%s2972_s25] sm:$0xf] (%p2683_p12)  ;;  %v1730_v28 = vld [vmem:[%s2972_s25 + $0x4] sm:$0xf] (%p2683_p12) }
 0x1e5   : > { %s1711_s5 = scalar_lea.vmem (%p2683_p12), %s3192_s3, %s2042_s14  ;;  %v1732_v20 = vld [vmem:[%s2972_s25 + $0x8] sm:$0xf] (%p2683_p12)  ;;  %v1734_v22 = vld [vmem:[%s2972_s25 + $0xc] sm:$0xf] (%p2683_p12)  ;;  %v1736_v57 = vld [vmem:[%s2972_s25 + $0x10] sm:$0xf] (%p2683_p12) }
 0x1e6   : > { %1729 = vst [vmem:[%s1711_s5] sm:$0xf] (%p2683_p12), %v1728_v26  ;;  %1731 = vst [vmem:[%s1711_s5 + $0x8] sm:$0xf] (%p2683_p12), %v1730_v28  ;;  %v1738_v58 = vld [vmem:[%s2972_s25 + $0x14] sm:$0xf] (%p2683_p12) }
 0x1e7   : > { %1733 = vst [vmem:[%s1711_s5 + $0x10] sm:$0xf] (%p2683_p12), %v1732_v20  ;;  %1735 = vst [vmem:[%s1711_s5 + $0x18] sm:$0xf] (%p2683_p12), %v1734_v22  ;;  %v1740_v59 = vld [vmem:[%s2972_s25 + $0x18] sm:$0xf] (%p2683_p12) }
 0x1e8   : > { %1737 = vst [vmem:[%s1711_s5 + $0x20] sm:$0xf] (%p2683_p12), %v1736_v57  ;;  %v1742_v60 = vld [vmem:[%s2972_s25 + $0x1c] sm:$0xf] (%p2683_p12)  ;;  %1739 = vst [vmem:[%s1711_s5 + $0x28] sm:$0xf] (%p2683_p12), %v1738_v58 }
 0x1e9   : > { %1741 = vst [vmem:[%s1711_s5 + $0x30] sm:$0xf] %v1740_v59  ;;  %1743 = vst [vmem:[%s1711_s5 + $0x38] sm:$0xf] %v1742_v60  ;;  %v1744_v61 = vld [vmem:[%s2972_s25 + $0x20] sm:$0xf] }
 0x1ea   : > { %v1746_v62 = vld [vmem:[%s2972_s25 + $0x24] sm:$0xf]  ;;  %v1748_v63 = vld [vmem:[%s2972_s25 + $0x28] sm:$0xf]  ;;  %1745 = vst [vmem:[%s1711_s5 + $0x40] sm:$0xf] %v1744_v61 }
 0x1eb   : > { %1747 = vst [vmem:[%s1711_s5 + $0x48] sm:$0xf] %v1746_v62  ;;  %1749 = vst [vmem:[%s1711_s5 + $0x50] sm:$0xf] %v1748_v63  ;;  %v1750_v0 = vld [vmem:[%s2972_s25 + $0x2c] sm:$0xf] }
 0x1ec   : > { %v1752_v25 = vld [vmem:[%s2972_s25 + $0x30] sm:$0xf]  ;;  %v1754_v27 = vld [vmem:[%s2972_s25 + $0x34] sm:$0xf]  ;;  %1751 = vst [vmem:[%s1711_s5 + $0x58] sm:$0xf] %v1750_v0 }
 0x1ed   : > { %1753 = vst [vmem:[%s1711_s5 + $0x60] sm:$0xf] %v1752_v25  ;;  %1755 = vst [vmem:[%s1711_s5 + $0x68] sm:$0xf] %v1754_v27 }
 0x1ee PF: > { %s13_s22 = sadd.s32 1, %s2564_s22   ;;  %s3202_s10 = sld [smem:[#allocation6_spill]] }
 0x1ef   : > { %p10_p6 = scmp.ge.s32.totalorder %s13_s22, 12   ;;  %s3203_s12 = smov %s2528_s13 }
 0x1f0   : > { %s3204_s13 = smov %s2681_s9  ;;  %s3205_s14 = smov %s2536_s15 }
 0x1f1   : > { %s3206_s15 = smov %s2678_s8  ;;  %s3207_s16 = smov %s2544_s17 }
 0x1f2   : > { %s3208_s17 = smov %s2664_s30  ;;  %s3209_s18 = smov %s2556_s20 }
 0x1f3   : > { %s3210_s19 = smov %s2560_s21  ;;  %s3211_s20 = smov %s3214_s24 }
 0x1f4   : > { %s3212_s21 = smov %s3202_s10  ;;  %12 = sbr.rel (!%p10_p6) target bundleno = 9 (0x9), region = 200 }

// kernel: _lambda_.15
= control target key start
LH: loop header
LB: loop body
LE: loop exit
PB: predicated region body
PF: predicated region fallthrough
CT: control target
= control target key end

     0   :  { %s406_s6 = smov 0   ;;  %s479_s0 = inlined_call_operand.vmem [shape: bf16[2,7,7,256], index: 0, kind: input, shape index: {}]   ;;  %s480_s1 = inlined_call_operand.vmem [shape: bf16[2,3,3,256], index: 1, kind: output, shape index: {}]  }
   0x1 LB: > { %s355_s7 = sadd.s32 4294967295, %s393_s6   ;;  %p359_p0 = scmp.ge.s32.totalorder %s393_s6, 1  ;;  %s393_s6 = sphi %s406_s6, %s11_s6  }
   0x2   : > { %p87_p1 = scmp.lt.s32.totalorder %s393_s6, 3 }
   0x4   : > { %p88_p2 = pnand %p359_p0, %p87_p1 }
   0x5   : > { %p107_p3 = scmp.lt.s32.totalorder (!%p88_p2), %s355_s7, 1 }
   0x6   : > { %91 = sbr.rel (%p88_p2) target bundleno = 43 (0x2b), region = 24 }
   0xb   : > { %s488_s7 = smov (!%p107_p3, %s355_s7), 1  ;;  %v261_v18 = vlaneseq  ;;  %v395_v21 = vmov 1983009808   ;;  %vm223_vm0 = vcmask 1040384   ;;  %vm224_vm1 = vsmask.f32 256 }
   0xc   : > { %s376_s8 = smul.u32 56, %s488_s7  ;;  %v259_v22 = vunpack.c.l.s4 %v395_v21  ;;  %vm284_vm2 = vcmask 1041408   ;;  %vm285_vm3 = vsmask.f32 1280  ;;  %vm287_vm4 = vcmask 1043458   ;;  %vm423_vm6 = vmand %vm223_vm0, %vm224_vm1 }
   0xd   : > { %v262_v29 = vshrl.u32 %v261_v18, 7  ;;  %vm288_vm5 = vsmask.f32 3328  ;;  %s377_s12 = smul.u32 12, %s488_s7  ;;  %vm429_vm7 = vmand %vm284_vm2, %vm285_vm3 }
   0xe   : > { %s111_s11 = scalar_lea.vmem %s479_s0, %s376_s8  ;;  %v260_v31 = vunpack.c.0.s8 %v259_v22  ;;  %vm289_vm8 = vmand %vm287_vm4, %vm288_vm5 }
   0xf   : > { %v117_v0 = vld [vmem:[%s111_s11] sm:$0xff]  ;;  %v118_v1 = vld [vmem:[%s111_s11 + $0x8] sm:$0xff]  ;;  %v119_v2 = vld [vmem:[%s111_s11 + $0x10] sm:$0xff]  ;;  %s436_s15 = scalar_lea.vmem %s480_s1, %s377_s12 }
  0x10   : > { %v120_v3 = vld [vmem:[%s111_s11 + $0x18] sm:$0xff]  ;;  %v122_v4 = vld [vmem:[%s111_s11 + $0x28] sm:$0xff]  ;;  %v124_v5 = vmax.bf16 %v118_v1, %v117_v0  ;;  %v121_v6 = vld [vmem:[%s111_s11 + $0x20] sm:$0xff]  ;;  %v263_v47 = vsub.s32 %v260_v31, %v262_v29 }
  0x11   : > { %v126_v7 = vmax.bf16 %v120_v3, %v119_v2  ;;  %v123_v8 = vld [vmem:[%s111_s11 + $0x30] sm:$0xff]  ;;  %v128_v10 = vmax.bf16 %v122_v4, %v121_v6  ;;  %vm454_vm9 = vmor %vm289_vm8, %vm429_vm7  ;;  %v291_v0 = vld [vmem:[%s436_s15] sm:$0xf] }
  0x12   : > { %v125_v9 = vmax.bf16 %v124_v5, %v119_v2 }
  0x13   : > { %v127_v11 = vmax.bf16 %v126_v7, %v121_v6  ;;  %v129_v14 = vmax.bf16 %v128_v10, %v123_v8  ;;  %v294_v6 = vld [vmem:[%s436_s15 + $0x4] sm:$0xf] }
  0x14   : > { %v131_v12 = vshrl.u32 %v125_v9, 16  ;;  %v365_v13 = vrot.slane %v125_v9, 9 }
  0x15   : > { %v136_v15 = vshrl.u32 %v127_v11, 16  ;;  %v366_v16 = vrot.slane %v127_v11, 9  ;;  %v141_v19 = vshrl.u32 %v129_v14, 16  ;;  %v367_v20 = vrot.slane %v129_v14, 9 }
  0x16   : > { %v148_v17 = vmax.bf16 %v131_v12, %v125_v9 }
  0x17   : > { %v149_v23 = vmax.bf16 %v136_v15, %v127_v11  ;;  %v150_v25 = vmax.bf16 %v141_v19, %v129_v14  ;;  %v297_v15 = vld [vmem:[%s436_s15 + $0x8] sm:$0xf] }
  0x18   : > { %v163_v24 = vmax.bf16 %v365_v13, %v148_v17 }
  0x19   : > { %v164_v26 = vmax.bf16 %v366_v16, %v149_v23  ;;  %v165_v30 = vmax.bf16 %v367_v20, %v150_v25 }
  0x1a   : > { %v368_v27 = vcombine.low %v163_v24, %v163_v24  ;;  %v369_v28 = vcombine.high %v163_v24, %v163_v24 }
  0x1b   : > { %v370_v32 = vcombine.low %v164_v26, %v164_v26  ;;  %v371_v33 = vcombine.high %v164_v26, %v164_v26  ;;  %v372_v45 = vcombine.low %v165_v30, %v165_v30  ;;  %v373_v46 = vcombine.high %v165_v30, %v165_v30 }
  0x1c   : > { %v188_v34 = vshll.u32 %v368_v27, 16  ;;  %v192_v35 = vshll.u32 %v369_v28, 16  ;;  %v217_v36 = vrot.slane %v368_v27, 1  ;;  %v218_v37 = vrot.slane %v369_v28, 1 }
  0x1d   : > { %v196_v39 = vshll.u32 %v370_v32, 16  ;;  %v200_v40 = vshll.u32 %v371_v33, 16  ;;  %v219_v41 = vrot.slane %v370_v32, 1  ;;  %v220_v42 = vrot.slane %v371_v33, 1 }
  0x1e   : > { %v190_v43 = vrot.slane %v188_v34, 1  ;;  %v194_v44 = vrot.slane %v192_v35, 1  ;;  %v204_v53 = vshll.u32 %v372_v45, 16  ;;  %v208_v54 = vshll.u32 %v373_v46, 16 }
  0x1f   : > { %v198_v49 = vrot.slane %v196_v39, 1  ;;  %v202_v50 = vrot.slane %v200_v40, 1  ;;  %v221_v3 = vrot.slane %v372_v45, 1  ;;  %v222_v4 = vrot.slane %v373_v46, 1 }
  0x20   : > { %v226_v51 = vsel %vm423_vm6, %v368_v27, %v190_v43  ;;  %v227_v52 = vsel %vm423_vm6, %v369_v28, %v194_v44  ;;  %v206_v62 = vrot.slane %v204_v53, 1  ;;  %v210_v2 = vrot.slane %v208_v54, 1 }
  0x21   : > { %v235_v55 = vsel %vm223_vm0, %v226_v51, %v217_v36  ;;  %v238_v56 = vsel %vm223_vm0, %v227_v52, %v218_v37  ;;  %v228_v57 = vsel %vm423_vm6, %v370_v32, %v198_v49  ;;  %v229_v58 = vsel %vm423_vm6, %v371_v33, %v202_v50 }
  0x22   : > { %v257_v59 = vcombine.low %v235_v55, %v238_v56  ;;  %v241_v60 = vsel %vm223_vm0, %v228_v57, %v219_v41  ;;  %v244_v61 = vsel %vm223_vm0, %v229_v58, %v220_v42  ;;  %v230_v7 = vsel %vm423_vm6, %v372_v45, %v206_v62 }
  0x23   : > { %v265_v1 = vcombine.low %v241_v60, %v244_v61  ;;  %v231_v9 = vsel %vm423_vm6, %v373_v46, %v210_v2  ;;  %v247_v10 = vsel %vm223_vm0, %v230_v7, %v221_v3 }
  0x24   : > { %v264_v5 = vrot.slane %v257_v59, %v263_v47  ;;  %v250_v12 = vsel %vm223_vm0, %v231_v9, %v222_v4 }
  0x25   : > { %v272_v8 = vrot.slane %v265_v1, %v263_v47  ;;  %v273_v14 = vcombine.low %v247_v10, %v250_v12 }
  0x26   : > { %v292_v11 = vsel %vm454_vm9, %v264_v5, %v291_v0 }
  0x27   : > { %293 = vst [vmem:[%s436_s15] sm:$0xf] %v292_v11  ;;  %v295_v13 = vsel %vm454_vm9, %v272_v8, %v294_v6  ;;  %v280_v16 = vrot.slane %v273_v14, %v263_v47 }
  0x28   : > { %296 = vst [vmem:[%s436_s15 + $0x4] sm:$0xf] %v295_v13 }
  0x29   : > { %v298_v17 = vsel %vm454_vm9, %v280_v16, %v297_v15 }
  0x2a   : > { %299 = vst [vmem:[%s436_s15 + $0x8] sm:$0xf] %v298_v17 }
  0x2b PF: > { %s11_s6 = sadd.s32 1, %s393_s6  }
  0x2c   : > { %p8_p4 = scmp.ge.s32.totalorder %s11_s6, 4  }
  0x2e   :  { %10 = sbr.rel (!%p8_p4) target bundleno = 1 (0x1), region = 54 }

// kernel: _lambda_.16
= control target key start
LH: loop header
LB: loop body
LE: loop exit
PB: predicated region body
PF: predicated region fallthrough
CT: control target
= control target key end

     0   :  { %s3276_s0 = inlined_call_operand.vmem [shape: bf16[32,2304], index: 0, kind: input, shape index: {}]   ;;  %s3277_s1 = inlined_call_operand.vmem [shape: bf16[2304,384], index: 1, kind: input, shape index: {}]   ;;  %s3278_s2 = inlined_call_operand.vmem [shape: f32[1,384], index: 2, kind: input, shape index: {}]   ;;  %s3279_s3 = inlined_call_operand.vmem [shape: bf16[32,384], index: 3, kind: output, shape index: {}]  }
   0x1   :  { %3281 = sst [smem:[#allocation7_spill]] %s3276_s0 }
   0x2   :  { %3282 = sst [smem:[#allocation8_spill]] %s3277_s1 }
   0x3   :  { %s2665_s12 = smov 0   ;;  %s2667_s13 = smov 0  }
   0x4   :  { %s2669_s14 = smov 0   ;;  %s2671_s15 = smov 0  }
   0x5   :  { %s2673_s16 = smov 0   ;;  %s2675_s17 = smov 0  }
   0x6   :  { %s2677_s18 = smov 0   ;;  %s2679_s19 = smov 0  }
   0x7   :  { %s2681_s20 = smov 0   ;;  %s2683_s21 = smov 0  }
   0x8   :  { %s2685_s22 = smov 0  }
   0x9 LB: > { %s2088_s23 = sadd.s32 4294967295, %s2642_s22   ;;  %s25_s24 = sadd.s32 1, %s2634_s20  ;;  %s2642_s22 = sphi %s2685_s22, %s13_s22   ;;  %s2638_s21 = sphi %s2683_s21, %s3299_s21   ;;  %s2634_s20 = sphi %s2681_s20, %s3298_s20   ;;  %s2630_s19 = sphi %s2679_s19, %s3297_s19   ;;  %s2626_s18 = sphi %s2677_s18, %s3296_s18   ;;  %s2622_s17 = sphi %s2675_s17, %s3295_s17   ;;  %s2618_s16 = sphi %s2673_s16, %s3294_s16   ;;  %s2614_s15 = sphi %s2671_s15, %s3293_s15   ;;  %s2610_s14 = sphi %s2669_s14, %s3292_s14   ;;  %s2606_s13 = sphi %s2667_s13, %s3291_s13   ;;  %s2602_s12 = sphi %s2665_s12, %s3290_s12  }
   0xa   : > { %p26_p0 = scmp.ge.s32.totalorder %s25_s24, 2  ;;  %s28_s25 = sadd.s32 1, %s2638_s21 }
   0xb   : > { %s41_s26 = sadd.s32 1, %s2622_s17  ;;  %p48_p1 = scmp.ne.s32.totalorder %s2622_s17, %s2618_s16 }
   0xc   : > { %s3301_s24 = smov (%p26_p0, %s25_s24), 0  ;;  %s3303_s25 = smov (!%p26_p0, %s28_s25), %s2638_s21 }
   0xd   : > { %s37_s27 = ssub.s32 %s2634_s20, %s3301_s24  ;;  %p49_p2 = scmp.eq.s32.totalorder %s2642_s22, 0 }
   0xe   : > { %p30_p3 = scmp.ge.s32.totalorder %s3303_s25, 3  ;;  %p39_p4 = scmp.eq.s32.totalorder %s37_s27, 0 }
   0xf   : > { %p2732_p5 = por %p49_p2, %p48_p1  ;;  %s69_s29 = sadd.s32 1, %s2614_s15 }
  0x10   : > { %s3305_s25 = smov (%p30_p3, %s3303_s25), 0  ;;  %p76_p6 = scmp.ne.s32.totalorder %s2614_s15, %s2610_s14 }
  0x11   : > { %3284 = sst [smem:[#allocation6_spill]] %s3305_s25  ;;  %s65_s4 = ssub.s32 %s2638_s21, %s3305_s25 }
  0x12   : > { %s2740_s30 = scalar_select %p39_p4, %s2622_s17, %s41_s26  }
  0x13   : > { %s66_s5 = sor.u32 %s65_s4, %s37_s27  ;;  %p121_p7 = scmp.eq.s32.totalorder %s65_s4, 0 }
  0x14   : > { %p67_p8 = scmp.eq.s32.totalorder %s66_s5, 0  ;;  %p2746_p9 = por %p76_p6, %p49_p2 }
  0x15   : > { %s123_s7 = sadd.s32 1, %s2606_s13  ;;  %p133_p10 = scmp.ne.s32.totalorder %s2606_s13, %s2602_s12 }
  0x16   : > { %s2754_s8 = scalar_select %p67_p8, %s2614_s15, %s69_s29  }
  0x17   : > { %s2757_s9 = scalar_select %p121_p7, %s2606_s13, %s123_s7  }
  0x18   : > { %p134_p11 = scmp.eq.s32.totalorder %s2088_s23, 5  ;;  %p2091_p13 = scmp.ge.s32.totalorder %s2642_s22, 6 }
  0x1a   : > { %p2759_p12 = por %p134_p11, %p133_p10  ;;  %156 = sbr.rel (%p2091_p13) target bundleno = 155 (0x9b), region = 16 }
  0x1f   : > { %159 = sbr.rel (!%p2732_p5) target bundleno = 50 (0x32), region = 20  ;;  %s161_s11 = sand.u32 (%p2732_p5), 1, %s2622_s17  }
  0x20   : > { %s2205_s26 = smul.u32 (%p2732_p5), 36, %s2634_s20  ;;  %s3287_s0 = sld [smem:[#allocation7_spill]] (%p2732_p5) }
  0x21   : > { %s2363_s27 = smul.u32 (%p2732_p5), 144, %s161_s11 }
  0x23   : > { %s2776_s23 = scalar_lea.vmem (%p2732_p5), [#allocation3], %s2363_s27 }
  0x26   : > { %s2771_s5 = scalar_lea.vmem %s3287_s0, %s2205_s26 }
  0x27   : > { %v184_v0 = vld [vmem:[%s2771_s5] sm:$0xff]  ;;  %v186_v1 = vld [vmem:[%s2771_s5 + $0x8] sm:$0xff]  ;;  %v188_v2 = vld [vmem:[%s2771_s5 + $0x10] sm:$0xff] }
  0x28   : > { %185 = vst [vmem:[%s2776_s23] sm:$0xff] %v184_v0  ;;  %187 = vst [vmem:[%s2776_s23 + $0x8] sm:$0xff] %v186_v1  ;;  %v190_v3 = vld [vmem:[%s2771_s5 + $0x18] sm:$0xff]  ;;  %v192_v4 = vld [vmem:[%s2771_s5 + $0x48] sm:$0xff] }
  0x29   : > { %189 = vst [vmem:[%s2776_s23 + $0x10] sm:$0xff] %v188_v2  ;;  %v194_v5 = vld [vmem:[%s2771_s5 + $0x50] sm:$0xff]  ;;  %191 = vst [vmem:[%s2776_s23 + $0x18] sm:$0xff] %v190_v3  ;;  %v196_v6 = vld [vmem:[%s2771_s5 + $0x58] sm:$0xff] }
  0x2a   : > { %193 = vst [vmem:[%s2776_s23 + $0x24] sm:$0xff] %v192_v4  ;;  %195 = vst [vmem:[%s2776_s23 + $0x2c] sm:$0xff] %v194_v5  ;;  %v198_v7 = vld [vmem:[%s2771_s5 + $0x60] sm:$0xff]  ;;  %v200_v8 = vld [vmem:[%s2771_s5 + $0x90] sm:$0xff] }
  0x2b   : > { %197 = vst [vmem:[%s2776_s23 + $0x34] sm:$0xff] %v196_v6  ;;  %199 = vst [vmem:[%s2776_s23 + $0x3c] sm:$0xff] %v198_v7  ;;  %v202_v9 = vld [vmem:[%s2771_s5 + $0x98] sm:$0xff]  ;;  %v204_v10 = vld [vmem:[%s2771_s5 + $0xa0] sm:$0xff] }
  0x2c   : > { %201 = vst [vmem:[%s2776_s23 + $0x48] sm:$0xff] %v200_v8  ;;  %v206_v11 = vld [vmem:[%s2771_s5 + $0xa8] sm:$0xff]  ;;  %203 = vst [vmem:[%s2776_s23 + $0x50] sm:$0xff] %v202_v9  ;;  %v208_v12 = vld [vmem:[%s2771_s5 + $0xd8] sm:$0xff] }
  0x2d   : > { %205 = vst [vmem:[%s2776_s23 + $0x58] sm:$0xff] %v204_v10  ;;  %207 = vst [vmem:[%s2776_s23 + $0x60] sm:$0xff] %v206_v11  ;;  %v210_v13 = vld [vmem:[%s2771_s5 + $0xe0] sm:$0xff]  ;;  %v212_v14 = vld [vmem:[%s2771_s5 + $0xe8] sm:$0xff] }
  0x2e   : > { %209 = vst [vmem:[%s2776_s23 + $0x6c] sm:$0xff] %v208_v12  ;;  %211 = vst [vmem:[%s2776_s23 + $0x74] sm:$0xff] %v210_v13  ;;  %v214_v15 = vld [vmem:[%s2771_s5 + $0xf0] sm:$0xff]  ;;  %v2093_v16 = vld [vmem:[%s2771_s5 + $0x20] sm:$0xf] }
  0x2f   : > { %213 = vst [vmem:[%s2776_s23 + $0x7c] sm:$0xff] %v212_v14  ;;  %v2095_v17 = vld [vmem:[%s2771_s5 + $0x68] sm:$0xf]  ;;  %215 = vst [vmem:[%s2776_s23 + $0x84] sm:$0xff] %v214_v15  ;;  %v2097_v18 = vld [vmem:[%s2771_s5 + $0xb0] sm:$0xf] }
  0x30   : > { %2094 = vst [vmem:[%s2776_s23 + $0x20] sm:$0xf] %v2093_v16  ;;  %2096 = vst [vmem:[%s2776_s23 + $0x44] sm:$0xf] %v2095_v17  ;;  %v2099_v19 = vld [vmem:[%s2771_s5 + $0xf8] sm:$0xf] }
  0x31   : > { %2098 = vst [vmem:[%s2776_s23 + $0x68] sm:$0xf] %v2097_v18  ;;  %2100 = vst [vmem:[%s2776_s23 + $0x8c] sm:$0xf] %v2099_v19 }
  0x32 PF: > { %237 = sbr.rel (!%p2746_p9) target bundleno = 155 (0x9b), region = 46  ;;  %s239_s28 = sand.u32 (%p2746_p9), 1, %s2614_s15  }
  0x33   : > { %s2364_s7 = smul.u32 (%p2746_p9), 576, %s239_s28  ;;  %s3288_s1 = sld [smem:[#allocation8_spill]] (%p2746_p9) }
  0x34   : > { %s2368_s11 = smul.u32 (%p2746_p9), 432, %s2634_s20 }
  0x35   : > { %s2828_s6 = scalar_lea.vmem (%p2746_p9), [#allocation4], %s2364_s7 }
  0x36   : > { %s244_s26 = sadd.s32 (%p2746_p9), %s2638_s21, %s2368_s11 }
  0x37   : > { %s2101_s27 = sshll.u32 %s244_s26, 2 }
  0x39   : > { %s2823_s0 = scalar_lea.vmem %s3288_s1, %s2101_s27 }
  0x3a   : > { %v263_v20 = vld [vmem:[%s2823_s0] sm:$0xf]  ;;  %v265_v21 = vld [vmem:[%s2823_s0 + $0xc] sm:$0xf]  ;;  %v267_v22 = vld [vmem:[%s2823_s0 + $0x18] sm:$0xf] }
  0x3b   : > { %264 = vst [vmem:[%s2828_s6] sm:$0xf] %v263_v20  ;;  %266 = vst [vmem:[%s2828_s6 + $0x4] sm:$0xf] %v265_v21  ;;  %v269_v23 = vld [vmem:[%s2823_s0 + $0x24] sm:$0xf] }
  0x3c   : > { %268 = vst [vmem:[%s2828_s6 + $0x8] sm:$0xf] %v267_v22  ;;  %v271_v24 = vld [vmem:[%s2823_s0 + $0x30] sm:$0xf]  ;;  %v273_v25 = vld [vmem:[%s2823_s0 + $0x3c] sm:$0xf] }
  0x3d   : > { %270 = vst [vmem:[%s2828_s6 + $0xc] sm:$0xf] %v269_v23  ;;  %272 = vst [vmem:[%s2828_s6 + $0x10] sm:$0xf] %v271_v24  ;;  %v275_v26 = vld [vmem:[%s2823_s0 + $0x48] sm:$0xf] }
  0x3e   : > { %274 = vst [vmem:[%s2828_s6 + $0x14] sm:$0xf] %v273_v25  ;;  %v277_v27 = vld [vmem:[%s2823_s0 + $0x54] sm:$0xf]  ;;  %v279_v28 = vld [vmem:[%s2823_s0 + $0x60] sm:$0xf] }
  0x3f   : > { %276 = vst [vmem:[%s2828_s6 + $0x18] sm:$0xf] %v275_v26  ;;  %278 = vst [vmem:[%s2828_s6 + $0x1c] sm:$0xf] %v277_v27  ;;  %v281_v29 = vld [vmem:[%s2823_s0 + $0x6c] sm:$0xf] }
  0x40   : > { %280 = vst [vmem:[%s2828_s6 + $0x20] sm:$0xf] %v279_v28  ;;  %v283_v30 = vld [vmem:[%s2823_s0 + $0x78] sm:$0xf]  ;;  %v285_v31 = vld [vmem:[%s2823_s0 + $0x84] sm:$0xf] }
  0x41   : > { %282 = vst [vmem:[%s2828_s6 + $0x24] sm:$0xf] %v281_v29  ;;  %284 = vst [vmem:[%s2828_s6 + $0x28] sm:$0xf] %v283_v30  ;;  %v287_v32 = vld [vmem:[%s2823_s0 + $0x90] sm:$0xf] }
  0x42   : > { %286 = vst [vmem:[%s2828_s6 + $0x2c] sm:$0xf] %v285_v31  ;;  %v289_v33 = vld [vmem:[%s2823_s0 + $0x9c] sm:$0xf]  ;;  %v291_v34 = vld [vmem:[%s2823_s0 + $0xa8] sm:$0xf] }
  0x43   : > { %288 = vst [vmem:[%s2828_s6 + $0x30] sm:$0xf] %v287_v32  ;;  %290 = vst [vmem:[%s2828_s6 + $0x34] sm:$0xf] %v289_v33  ;;  %v293_v35 = vld [vmem:[%s2823_s0 + $0xb4] sm:$0xf] }
  0x44   : > { %292 = vst [vmem:[%s2828_s6 + $0x38] sm:$0xf] %v291_v34  ;;  %v295_v36 = vld [vmem:[%s2823_s0 + $0xc0] sm:$0xf]  ;;  %v297_v37 = vld [vmem:[%s2823_s0 + $0xcc] sm:$0xf] }
  0x45   : > { %294 = vst [vmem:[%s2828_s6 + $0x3c] sm:$0xf] %v293_v35  ;;  %296 = vst [vmem:[%s2828_s6 + $0x40] sm:$0xf] %v295_v36  ;;  %v299_v38 = vld [vmem:[%s2823_s0 + $0xd8] sm:$0xf] }
  0x46   : > { %298 = vst [vmem:[%s2828_s6 + $0x44] sm:$0xf] %v297_v37  ;;  %v301_v39 = vld [vmem:[%s2823_s0 + $0xe4] sm:$0xf]  ;;  %v303_v40 = vld [vmem:[%s2823_s0 + $0xf0] sm:$0xf] }
  0x47   : > { %300 = vst [vmem:[%s2828_s6 + $0x48] sm:$0xf] %v299_v38  ;;  %302 = vst [vmem:[%s2828_s6 + $0x4c] sm:$0xf] %v301_v39  ;;  %v305_v41 = vld [vmem:[%s2823_s0 + $0xfc] sm:$0xf] }
  0x48   : > { %304 = vst [vmem:[%s2828_s6 + $0x50] sm:$0xf] %v303_v40  ;;  %v307_v42 = vld [vmem:[%s2823_s0 + $0x108] sm:$0xf]  ;;  %v309_v43 = vld [vmem:[%s2823_s0 + $0x114] sm:$0xf] }
  0x49   : > { %306 = vst [vmem:[%s2828_s6 + $0x54] sm:$0xf] %v305_v41  ;;  %308 = vst [vmem:[%s2828_s6 + $0x58] sm:$0xf] %v307_v42  ;;  %v311_v44 = vld [vmem:[%s2823_s0 + $0x120] sm:$0xf] }
  0x4a   : > { %310 = vst [vmem:[%s2828_s6 + $0x5c] sm:$0xf] %v309_v43  ;;  %v313_v45 = vld [vmem:[%s2823_s0 + $0x12c] sm:$0xf]  ;;  %v315_v46 = vld [vmem:[%s2823_s0 + $0x138] sm:$0xf] }
  0x4b   : > { %312 = vst [vmem:[%s2828_s6 + $0x60] sm:$0xf] %v311_v44  ;;  %314 = vst [vmem:[%s2828_s6 + $0x64] sm:$0xf] %v313_v45  ;;  %v317_v47 = vld [vmem:[%s2823_s0 + $0x144] sm:$0xf] }
  0x4c   : > { %316 = vst [vmem:[%s2828_s6 + $0x68] sm:$0xf] %v315_v46  ;;  %v319_v48 = vld [vmem:[%s2823_s0 + $0x150] sm:$0xf]  ;;  %v321_v49 = vld [vmem:[%s2823_s0 + $0x15c] sm:$0xf] }
  0x4d   : > { %318 = vst [vmem:[%s2828_s6 + $0x6c] sm:$0xf] %v317_v47  ;;  %320 = vst [vmem:[%s2828_s6 + $0x70] sm:$0xf] %v319_v48  ;;  %v323_v50 = vld [vmem:[%s2823_s0 + $0x168] sm:$0xf] }
  0x4e   : > { %322 = vst [vmem:[%s2828_s6 + $0x74] sm:$0xf] %v321_v49  ;;  %v325_v51 = vld [vmem:[%s2823_s0 + $0x174] sm:$0xf]  ;;  %v327_v52 = vld [vmem:[%s2823_s0 + $0x180] sm:$0xf] }
  0x4f   : > { %324 = vst [vmem:[%s2828_s6 + $0x78] sm:$0xf] %v323_v50  ;;  %326 = vst [vmem:[%s2828_s6 + $0x7c] sm:$0xf] %v325_v51  ;;  %v329_v53 = vld [vmem:[%s2823_s0 + $0x18c] sm:$0xf] }
  0x50   : > { %328 = vst [vmem:[%s2828_s6 + $0x80] sm:$0xf] %v327_v52  ;;  %v331_v54 = vld [vmem:[%s2823_s0 + $0x198] sm:$0xf]  ;;  %v333_v55 = vld [vmem:[%s2823_s0 + $0x1a4] sm:$0xf] }
  0x51   : > { %330 = vst [vmem:[%s2828_s6 + $0x84] sm:$0xf] %v329_v53  ;;  %332 = vst [vmem:[%s2828_s6 + $0x88] sm:$0xf] %v331_v54  ;;  %v335_v56 = vld [vmem:[%s2823_s0 + $0x1b0] sm:$0xf] }
  0x52   : > { %334 = vst [vmem:[%s2828_s6 + $0x8c] sm:$0xf] %v333_v55  ;;  %v337_v57 = vld [vmem:[%s2823_s0 + $0x1bc] sm:$0xf]  ;;  %v339_v58 = vld [vmem:[%s2823_s0 + $0x1c8] sm:$0xf] }
  0x53   : > { %336 = vst [vmem:[%s2828_s6 + $0x90] sm:$0xf] %v335_v56  ;;  %338 = vst [vmem:[%s2828_s6 + $0x94] sm:$0xf] %v337_v57  ;;  %v341_v59 = vld [vmem:[%s2823_s0 + $0x1d4] sm:$0xf] }
  0x54   : > { %340 = vst [vmem:[%s2828_s6 + $0x98] sm:$0xf] %v339_v58  ;;  %v343_v60 = vld [vmem:[%s2823_s0 + $0x1e0] sm:$0xf]  ;;  %v345_v61 = vld [vmem:[%s2823_s0 + $0x1ec] sm:$0xf] }
  0x55   : > { %342 = vst [vmem:[%s2828_s6 + $0x9c] sm:$0xf] %v341_v59  ;;  %344 = vst [vmem:[%s2828_s6 + $0xa0] sm:$0xf] %v343_v60  ;;  %v347_v62 = vld [vmem:[%s2823_s0 + $0x1f8] sm:$0xf] }
  0x56   : > { %346 = vst [vmem:[%s2828_s6 + $0xa4] sm:$0xf] %v345_v61  ;;  %v349_v63 = vld [vmem:[%s2823_s0 + $0x204] sm:$0xf]  ;;  %v351_v0 = vld [vmem:[%s2823_s0 + $0x210] sm:$0xf] }
  0x57   : > { %348 = vst [vmem:[%s2828_s6 + $0xa8] sm:$0xf] %v347_v62  ;;  %350 = vst [vmem:[%s2828_s6 + $0xac] sm:$0xf] %v349_v63  ;;  %v353_v1 = vld [vmem:[%s2823_s0 + $0x21c] sm:$0xf] }
  0x58   : > { %352 = vst [vmem:[%s2828_s6 + $0xb0] sm:$0xf] %v351_v0  ;;  %v355_v2 = vld [vmem:[%s2823_s0 + $0x228] sm:$0xf]  ;;  %v357_v3 = vld [vmem:[%s2823_s0 + $0x234] sm:$0xf] }
  0x59   : > { %354 = vst [vmem:[%s2828_s6 + $0xb4] sm:$0xf] %v353_v1  ;;  %356 = vst [vmem:[%s2828_s6 + $0xb8] sm:$0xf] %v355_v2  ;;  %v359_v4 = vld [vmem:[%s2823_s0 + $0x240] sm:$0xf] }
  0x5a   : > { %358 = vst [vmem:[%s2828_s6 + $0xbc] sm:$0xf] %v357_v3  ;;  %v361_v5 = vld [vmem:[%s2823_s0 + $0x24c] sm:$0xf]  ;;  %v363_v6 = vld [vmem:[%s2823_s0 + $0x258] sm:$0xf] }
  0x5b   : > { %360 = vst [vmem:[%s2828_s6 + $0xc0] sm:$0xf] %v359_v4  ;;  %362 = vst [vmem:[%s2828_s6 + $0xc4] sm:$0xf] %v361_v5  ;;  %v365_v7 = vld [vmem:[%s2823_s0 + $0x264] sm:$0xf] }
  0x5c   : > { %364 = vst [vmem:[%s2828_s6 + $0xc8] sm:$0xf] %v363_v6  ;;  %v367_v8 = vld [vmem:[%s2823_s0 + $0x270] sm:$0xf]  ;;  %v369_v9 = vld [vmem:[%s2823_s0 + $0x27c] sm:$0xf] }
  0x5d   : > { %366 = vst [vmem:[%s2828_s6 + $0xcc] sm:$0xf] %v365_v7  ;;  %368 = vst [vmem:[%s2828_s6 + $0xd0] sm:$0xf] %v367_v8  ;;  %v371_v10 = vld [vmem:[%s2823_s0 + $0x288] sm:$0xf] }
  0x5e   : > { %370 = vst [vmem:[%s2828_s6 + $0xd4] sm:$0xf] %v369_v9  ;;  %v373_v11 = vld [vmem:[%s2823_s0 + $0x294] sm:$0xf]  ;;  %v375_v12 = vld [vmem:[%s2823_s0 + $0x2a0] sm:$0xf] }
  0x5f   : > { %372 = vst [vmem:[%s2828_s6 + $0xd8] sm:$0xf] %v371_v10  ;;  %374 = vst [vmem:[%s2828_s6 + $0xdc] sm:$0xf] %v373_v11  ;;  %v377_v13 = vld [vmem:[%s2823_s0 + $0x2ac] sm:$0xf] }
  0x60   : > { %376 = vst [vmem:[%s2828_s6 + $0xe0] sm:$0xf] %v375_v12  ;;  %v379_v14 = vld [vmem:[%s2823_s0 + $0x2b8] sm:$0xf]  ;;  %v381_v15 = vld [vmem:[%s2823_s0 + $0x2c4] sm:$0xf] }
  0x61   : > { %378 = vst [vmem:[%s2828_s6 + $0xe4] sm:$0xf] %v377_v13  ;;  %380 = vst [vmem:[%s2828_s6 + $0xe8] sm:$0xf] %v379_v14  ;;  %v383_v16 = vld [vmem:[%s2823_s0 + $0x2d0] sm:$0xf] }
  0x62   : > { %382 = vst [vmem:[%s2828_s6 + $0xec] sm:$0xf] %v381_v15  ;;  %v385_v17 = vld [vmem:[%s2823_s0 + $0x2dc] sm:$0xf]  ;;  %v387_v18 = vld [vmem:[%s2823_s0 + $0x2e8] sm:$0xf] }
  0x63   : > { %384 = vst [vmem:[%s2828_s6 + $0xf0] sm:$0xf] %v383_v16  ;;  %386 = vst [vmem:[%s2828_s6 + $0xf4] sm:$0xf] %v385_v17  ;;  %v389_v19 = vld [vmem:[%s2823_s0 + $0x2f4] sm:$0xf] }
  0x64   : > { %388 = vst [vmem:[%s2828_s6 + $0xf8] sm:$0xf] %v387_v18  ;;  %v391_v20 = vld [vmem:[%s2823_s0 + $0x300] sm:$0xf]  ;;  %v393_v21 = vld [vmem:[%s2823_s0 + $0x30c] sm:$0xf] }
  0x65   : > { %390 = vst [vmem:[%s2828_s6 + $0xfc] sm:$0xf] %v389_v19  ;;  %392 = vst [vmem:[%s2828_s6 + $0x100] sm:$0xf] %v391_v20  ;;  %v395_v22 = vld [vmem:[%s2823_s0 + $0x318] sm:$0xf] }
  0x66   : > { %394 = vst [vmem:[%s2828_s6 + $0x104] sm:$0xf] %v393_v21  ;;  %v397_v23 = vld [vmem:[%s2823_s0 + $0x324] sm:$0xf]  ;;  %v399_v24 = vld [vmem:[%s2823_s0 + $0x330] sm:$0xf] }
  0x67   : > { %396 = vst [vmem:[%s2828_s6 + $0x108] sm:$0xf] %v395_v22  ;;  %398 = vst [vmem:[%s2828_s6 + $0x10c] sm:$0xf] %v397_v23  ;;  %v401_v25 = vld [vmem:[%s2823_s0 + $0x33c] sm:$0xf] }
  0x68   : > { %400 = vst [vmem:[%s2828_s6 + $0x110] sm:$0xf] %v399_v24  ;;  %v403_v26 = vld [vmem:[%s2823_s0 + $0x348] sm:$0xf]  ;;  %v405_v27 = vld [vmem:[%s2823_s0 + $0x354] sm:$0xf] }
  0x69   : > { %402 = vst [vmem:[%s2828_s6 + $0x114] sm:$0xf] %v401_v25  ;;  %404 = vst [vmem:[%s2828_s6 + $0x118] sm:$0xf] %v403_v26  ;;  %v407_v28 = vld [vmem:[%s2823_s0 + $0x360] sm:$0xf] }
  0x6a   : > { %406 = vst [vmem:[%s2828_s6 + $0x11c] sm:$0xf] %v405_v27  ;;  %v409_v29 = vld [vmem:[%s2823_s0 + $0x36c] sm:$0xf]  ;;  %v411_v30 = vld [vmem:[%s2823_s0 + $0x378] sm:$0xf] }
  0x6b   : > { %408 = vst [vmem:[%s2828_s6 + $0x120] sm:$0xf] %v407_v28  ;;  %410 = vst [vmem:[%s2828_s6 + $0x124] sm:$0xf] %v409_v29  ;;  %v413_v31 = vld [vmem:[%s2823_s0 + $0x384] sm:$0xf] }
  0x6c   : > { %412 = vst [vmem:[%s2828_s6 + $0x128] sm:$0xf] %v411_v30  ;;  %v415_v32 = vld [vmem:[%s2823_s0 + $0x390] sm:$0xf]  ;;  %v417_v33 = vld [vmem:[%s2823_s0 + $0x39c] sm:$0xf] }
  0x6d   : > { %414 = vst [vmem:[%s2828_s6 + $0x12c] sm:$0xf] %v413_v31  ;;  %416 = vst [vmem:[%s2828_s6 + $0x130] sm:$0xf] %v415_v32  ;;  %v419_v34 = vld [vmem:[%s2823_s0 + $0x3a8] sm:$0xf] }
  0x6e   : > { %418 = vst [vmem:[%s2828_s6 + $0x134] sm:$0xf] %v417_v33  ;;  %v421_v35 = vld [vmem:[%s2823_s0 + $0x3b4] sm:$0xf]  ;;  %v423_v36 = vld [vmem:[%s2823_s0 + $0x3c0] sm:$0xf] }
  0x6f   : > { %420 = vst [vmem:[%s2828_s6 + $0x138] sm:$0xf] %v419_v34  ;;  %422 = vst [vmem:[%s2828_s6 + $0x13c] sm:$0xf] %v421_v35  ;;  %v425_v37 = vld [vmem:[%s2823_s0 + $0x3cc] sm:$0xf] }
  0x70   : > { %424 = vst [vmem:[%s2828_s6 + $0x140] sm:$0xf] %v423_v36  ;;  %v427_v38 = vld [vmem:[%s2823_s0 + $0x3d8] sm:$0xf]  ;;  %v429_v39 = vld [vmem:[%s2823_s0 + $0x3e4] sm:$0xf] }
  0x71   : > { %426 = vst [vmem:[%s2828_s6 + $0x144] sm:$0xf] %v425_v37  ;;  %428 = vst [vmem:[%s2828_s6 + $0x148] sm:$0xf] %v427_v38  ;;  %v431_v40 = vld [vmem:[%s2823_s0 + $0x3f0] sm:$0xf] }
  0x72   : > { %430 = vst [vmem:[%s2828_s6 + $0x14c] sm:$0xf] %v429_v39  ;;  %v433_v41 = vld [vmem:[%s2823_s0 + $0x3fc] sm:$0xf]  ;;  %v435_v42 = vld [vmem:[%s2823_s0 + $0x408] sm:$0xf] }
  0x73   : > { %432 = vst [vmem:[%s2828_s6 + $0x150] sm:$0xf] %v431_v40  ;;  %434 = vst [vmem:[%s2828_s6 + $0x154] sm:$0xf] %v433_v41  ;;  %v437_v43 = vld [vmem:[%s2823_s0 + $0x414] sm:$0xf] }
  0x74   : > { %436 = vst [vmem:[%s2828_s6 + $0x158] sm:$0xf] %v435_v42  ;;  %v439_v44 = vld [vmem:[%s2823_s0 + $0x420] sm:$0xf]  ;;  %v441_v45 = vld [vmem:[%s2823_s0 + $0x42c] sm:$0xf] }
  0x75   : > { %438 = vst [vmem:[%s2828_s6 + $0x15c] sm:$0xf] %v437_v43  ;;  %440 = vst [vmem:[%s2828_s6 + $0x160] sm:$0xf] %v439_v44  ;;  %v443_v46 = vld [vmem:[%s2823_s0 + $0x438] sm:$0xf] }
  0x76   : > { %442 = vst [vmem:[%s2828_s6 + $0x164] sm:$0xf] %v441_v45  ;;  %v445_v47 = vld [vmem:[%s2823_s0 + $0x444] sm:$0xf]  ;;  %v447_v48 = vld [vmem:[%s2823_s0 + $0x450] sm:$0xf] }
  0x77   : > { %444 = vst [vmem:[%s2828_s6 + $0x168] sm:$0xf] %v443_v46  ;;  %446 = vst [vmem:[%s2828_s6 + $0x16c] sm:$0xf] %v445_v47  ;;  %v449_v49 = vld [vmem:[%s2823_s0 + $0x45c] sm:$0xf] }
  0x78   : > { %448 = vst [vmem:[%s2828_s6 + $0x170] sm:$0xf] %v447_v48  ;;  %v451_v50 = vld [vmem:[%s2823_s0 + $0x468] sm:$0xf]  ;;  %v453_v51 = vld [vmem:[%s2823_s0 + $0x474] sm:$0xf] }
  0x79   : > { %450 = vst [vmem:[%s2828_s6 + $0x174] sm:$0xf] %v449_v49  ;;  %452 = vst [vmem:[%s2828_s6 + $0x178] sm:$0xf] %v451_v50  ;;  %v455_v52 = vld [vmem:[%s2823_s0 + $0x480] sm:$0xf] }
  0x7a   : > { %454 = vst [vmem:[%s2828_s6 + $0x17c] sm:$0xf] %v453_v51  ;;  %v457_v53 = vld [vmem:[%s2823_s0 + $0x48c] sm:$0xf]  ;;  %v459_v54 = vld [vmem:[%s2823_s0 + $0x498] sm:$0xf] }
  0x7b   : > { %456 = vst [vmem:[%s2828_s6 + $0x180] sm:$0xf] %v455_v52  ;;  %458 = vst [vmem:[%s2828_s6 + $0x184] sm:$0xf] %v457_v53  ;;  %v461_v55 = vld [vmem:[%s2823_s0 + $0x4a4] sm:$0xf] }
  0x7c   : > { %460 = vst [vmem:[%s2828_s6 + $0x188] sm:$0xf] %v459_v54  ;;  %v463_v56 = vld [vmem:[%s2823_s0 + $0x4b0] sm:$0xf]  ;;  %v465_v57 = vld [vmem:[%s2823_s0 + $0x4bc] sm:$0xf] }
  0x7d   : > { %462 = vst [vmem:[%s2828_s6 + $0x18c] sm:$0xf] %v461_v55  ;;  %464 = vst [vmem:[%s2828_s6 + $0x190] sm:$0xf] %v463_v56  ;;  %v467_v58 = vld [vmem:[%s2823_s0 + $0x4c8] sm:$0xf] }
  0x7e   : > { %466 = vst [vmem:[%s2828_s6 + $0x194] sm:$0xf] %v465_v57  ;;  %v469_v59 = vld [vmem:[%s2823_s0 + $0x4d4] sm:$0xf]  ;;  %v471_v60 = vld [vmem:[%s2823_s0 + $0x4e0] sm:$0xf] }
  0x7f   : > { %468 = vst [vmem:[%s2828_s6 + $0x198] sm:$0xf] %v467_v58  ;;  %470 = vst [vmem:[%s2828_s6 + $0x19c] sm:$0xf] %v469_v59  ;;  %v473_v61 = vld [vmem:[%s2823_s0 + $0x4ec] sm:$0xf] }
  0x80   : > { %472 = vst [vmem:[%s2828_s6 + $0x1a0] sm:$0xf] %v471_v60  ;;  %v475_v62 = vld [vmem:[%s2823_s0 + $0x4f8] sm:$0xf]  ;;  %v477_v63 = vld [vmem:[%s2823_s0 + $0x504] sm:$0xf] }
  0x81   : > { %474 = vst [vmem:[%s2828_s6 + $0x1a4] sm:$0xf] %v473_v61  ;;  %476 = vst [vmem:[%s2828_s6 + $0x1a8] sm:$0xf] %v475_v62  ;;  %v479_v0 = vld [vmem:[%s2823_s0 + $0x510] sm:$0xf] }
  0x82   : > { %478 = vst [vmem:[%s2828_s6 + $0x1ac] sm:$0xf] %v477_v63  ;;  %v481_v1 = vld [vmem:[%s2823_s0 + $0x51c] sm:$0xf]  ;;  %v483_v2 = vld [vmem:[%s2823_s0 + $0x528] sm:$0xf] }
  0x83   : > { %480 = vst [vmem:[%s2828_s6 + $0x1b0] sm:$0xf] %v479_v0  ;;  %482 = vst [vmem:[%s2828_s6 + $0x1b4] sm:$0xf] %v481_v1  ;;  %v485_v3 = vld [vmem:[%s2823_s0 + $0x534] sm:$0xf] }
  0x84   : > { %484 = vst [vmem:[%s2828_s6 + $0x1b8] sm:$0xf] %v483_v2  ;;  %v487_v4 = vld [vmem:[%s2823_s0 + $0x540] sm:$0xf]  ;;  %v489_v5 = vld [vmem:[%s2823_s0 + $0x54c] sm:$0xf] }
  0x85   : > { %486 = vst [vmem:[%s2828_s6 + $0x1bc] sm:$0xf] %v485_v3  ;;  %488 = vst [vmem:[%s2828_s6 + $0x1c0] sm:$0xf] %v487_v4  ;;  %v491_v6 = vld [vmem:[%s2823_s0 + $0x558] sm:$0xf] }
  0x86   : > { %490 = vst [vmem:[%s2828_s6 + $0x1c4] sm:$0xf] %v489_v5  ;;  %v493_v7 = vld [vmem:[%s2823_s0 + $0x564] sm:$0xf]  ;;  %v495_v8 = vld [vmem:[%s2823_s0 + $0x570] sm:$0xf] }
  0x87   : > { %492 = vst [vmem:[%s2828_s6 + $0x1c8] sm:$0xf] %v491_v6  ;;  %494 = vst [vmem:[%s2828_s6 + $0x1cc] sm:$0xf] %v493_v7  ;;  %v497_v9 = vld [vmem:[%s2823_s0 + $0x57c] sm:$0xf] }
  0x88   : > { %496 = vst [vmem:[%s2828_s6 + $0x1d0] sm:$0xf] %v495_v8  ;;  %v499_v10 = vld [vmem:[%s2823_s0 + $0x588] sm:$0xf]  ;;  %v501_v11 = vld [vmem:[%s2823_s0 + $0x594] sm:$0xf] }
  0x89   : > { %498 = vst [vmem:[%s2828_s6 + $0x1d4] sm:$0xf] %v497_v9  ;;  %500 = vst [vmem:[%s2828_s6 + $0x1d8] sm:$0xf] %v499_v10  ;;  %v503_v12 = vld [vmem:[%s2823_s0 + $0x5a0] sm:$0xf] }
  0x8a   : > { %502 = vst [vmem:[%s2828_s6 + $0x1dc] sm:$0xf] %v501_v11  ;;  %v505_v13 = vld [vmem:[%s2823_s0 + $0x5ac] sm:$0xf]  ;;  %v507_v14 = vld [vmem:[%s2823_s0 + $0x5b8] sm:$0xf] }
  0x8b   : > { %504 = vst [vmem:[%s2828_s6 + $0x1e0] sm:$0xf] %v503_v12  ;;  %506 = vst [vmem:[%s2828_s6 + $0x1e4] sm:$0xf] %v505_v13  ;;  %v509_v15 = vld [vmem:[%s2823_s0 + $0x5c4] sm:$0xf] }
  0x8c   : > { %508 = vst [vmem:[%s2828_s6 + $0x1e8] sm:$0xf] %v507_v14  ;;  %v511_v16 = vld [vmem:[%s2823_s0 + $0x5d0] sm:$0xf]  ;;  %v513_v17 = vld [vmem:[%s2823_s0 + $0x5dc] sm:$0xf] }
  0x8d   : > { %510 = vst [vmem:[%s2828_s6 + $0x1ec] sm:$0xf] %v509_v15  ;;  %512 = vst [vmem:[%s2828_s6 + $0x1f0] sm:$0xf] %v511_v16  ;;  %v515_v18 = vld [vmem:[%s2823_s0 + $0x5e8] sm:$0xf] }
  0x8e   : > { %514 = vst [vmem:[%s2828_s6 + $0x1f4] sm:$0xf] %v513_v17  ;;  %v517_v19 = vld [vmem:[%s2823_s0 + $0x5f4] sm:$0xf]  ;;  %v519_v20 = vld [vmem:[%s2823_s0 + $0x600] sm:$0xf] }
  0x8f   : > { %516 = vst [vmem:[%s2828_s6 + $0x1f8] sm:$0xf] %v515_v18  ;;  %518 = vst [vmem:[%s2828_s6 + $0x1fc] sm:$0xf] %v517_v19  ;;  %v521_v21 = vld [vmem:[%s2823_s0 + $0x60c] sm:$0xf] }
  0x90   : > { %520 = vst [vmem:[%s2828_s6 + $0x200] sm:$0xf] %v519_v20  ;;  %v523_v22 = vld [vmem:[%s2823_s0 + $0x618] sm:$0xf]  ;;  %v525_v23 = vld [vmem:[%s2823_s0 + $0x624] sm:$0xf] }
  0x91   : > { %522 = vst [vmem:[%s2828_s6 + $0x204] sm:$0xf] %v521_v21  ;;  %524 = vst [vmem:[%s2828_s6 + $0x208] sm:$0xf] %v523_v22  ;;  %v527_v24 = vld [vmem:[%s2823_s0 + $0x630] sm:$0xf] }
  0x92   : > { %526 = vst [vmem:[%s2828_s6 + $0x20c] sm:$0xf] %v525_v23  ;;  %v529_v25 = vld [vmem:[%s2823_s0 + $0x63c] sm:$0xf]  ;;  %v531_v26 = vld [vmem:[%s2823_s0 + $0x648] sm:$0xf] }
  0x93   : > { %528 = vst [vmem:[%s2828_s6 + $0x210] sm:$0xf] %v527_v24  ;;  %530 = vst [vmem:[%s2828_s6 + $0x214] sm:$0xf] %v529_v25  ;;  %v533_v27 = vld [vmem:[%s2823_s0 + $0x654] sm:$0xf] }
  0x94   : > { %532 = vst [vmem:[%s2828_s6 + $0x218] sm:$0xf] %v531_v26  ;;  %v535_v28 = vld [vmem:[%s2823_s0 + $0x660] sm:$0xf]  ;;  %v537_v29 = vld [vmem:[%s2823_s0 + $0x66c] sm:$0xf] }
  0x95   : > { %534 = vst [vmem:[%s2828_s6 + $0x21c] sm:$0xf] %v533_v27  ;;  %536 = vst [vmem:[%s2828_s6 + $0x220] sm:$0xf] %v535_v28  ;;  %v539_v30 = vld [vmem:[%s2823_s0 + $0x678] sm:$0xf] }
  0x96   : > { %538 = vst [vmem:[%s2828_s6 + $0x224] sm:$0xf] %v537_v29  ;;  %v541_v31 = vld [vmem:[%s2823_s0 + $0x684] sm:$0xf]  ;;  %v543_v32 = vld [vmem:[%s2823_s0 + $0x690] sm:$0xf] }
  0x97   : > { %540 = vst [vmem:[%s2828_s6 + $0x228] sm:$0xf] %v539_v30  ;;  %542 = vst [vmem:[%s2828_s6 + $0x22c] sm:$0xf] %v541_v31  ;;  %v545_v33 = vld [vmem:[%s2823_s0 + $0x69c] sm:$0xf] }
  0x98   : > { %544 = vst [vmem:[%s2828_s6 + $0x230] sm:$0xf] %v543_v32  ;;  %v547_v34 = vld [vmem:[%s2823_s0 + $0x6a8] sm:$0xf]  ;;  %v549_v35 = vld [vmem:[%s2823_s0 + $0x6b4] sm:$0xf] }
  0x99   : > { %546 = vst [vmem:[%s2828_s6 + $0x234] sm:$0xf] %v545_v33  ;;  %548 = vst [vmem:[%s2828_s6 + $0x238] sm:$0xf] %v547_v34 }
  0x9a   : > { %550 = vst [vmem:[%s2828_s6 + $0x23c] sm:$0xf] %v549_v35 }
  0x9b PF: > { %p2102_p0 = scmp.ge.s32.totalorder %s2642_s22, 1  ;;  %p867_p1 = scmp.lt.s32.totalorder %s2642_s22, 7 }
  0x9d   : > { %p868_p2 = pnand %p2102_p0, %p867_p1 }
  0x9e   : > { %s874_s5 = sand.u32 (!%p868_p2), 1, %s2618_s16   ;;  %s881_s23 = sand.u32 (!%p868_p2), 1, %s2610_s14  }
  0x9f   : > { %871 = sbr.rel (%p868_p2) target bundleno = 497 (0x1f1), region = 91  ;;  %s907_s0 = sand.u32 (!%p868_p2), 1, %s2602_s12  }
  0xa0   : > { %s2366_s28 = smul.u32 (!%p868_p2), 144, %s874_s5  ;;  %s2103_s11 = sshll.u32 (!%p868_p2), %s907_s0, 4 }
  0xa1   : > { %s2367_s7 = smul.u32 (!%p868_p2), 576, %s881_s23  ;;  %p913_p3 = scmp.lt.s32.totalorder (!%p868_p2), %s2630_s19, 2 }
  0xa2   : > { %s3128_s6 = scalar_lea.vmem (!%p868_p2), [#allocation3], %s2366_s28  ;;  %s3132_s25 = scalar_lea.vmem (!%p868_p2), [#allocation5], %s2103_s11 }
  0xa3   : > { %s3130_s1 = scalar_lea.vmem (!%p868_p2), [#allocation4], %s2367_s7  ;;  %p2104_p4 = scmp.ne.s32.totalorder (!%p868_p2), %s2626_s18, 0 }
  0xa4   : > { %s3122_s26 = scalar_select %p913_p3, %s2630_s19, 2 }
  0xa5   : > { %921 = sbr.rel (%p2104_p4) target bundleno = 173 (0xad), region = 103 }
  0xa6   : > { %s915_s4 = scalar_lea.vmem %s3278_s2, %s3122_s26 }
  0xaa   : > { %v2644_v36 = vmov 0.0  }
  0xab   : > { %922 = vst [vmem:[#allocation2 + $0x10] sm:$0xff] %v2644_v36  ;;  %923 = vst [vmem:[#allocation2] sm:$0xff] %v2644_v36 }
  0xac   : > { %924 = vst [vmem:[#allocation2 + $0x18] sm:$0xff] %v2644_v36  ;;  %925 = vst [vmem:[#allocation2 + $0x8] sm:$0xff] %v2644_v36 }
  0xad PF: > { %v2458_v37 = vld [vmem:[%s3130_s1 + $0x78] sm:$0xff]   ;;  %v2462_v41 = vld [vmem:[%s3130_s1 + $0x70] sm:$0xff]   ;;  %v2466_v45 = vld [vmem:[%s3130_s1 + $0x68] sm:$0xff]   ;;  %p2195_p5 = scmp.ne.s32.totalorder %s2626_s18, 1 }
  0xae   : > { %v2459_v38 = vld [vmem:[%s3130_s1 + $0xf8] sm:$0xff]   ;;  %2221 = vmatprep.subr.bf16.mxu0 %v2458_v37  ;;  %v2463_v42 = vld [vmem:[%s3130_s1 + $0xf0] sm:$0xff]   ;;  %v2467_v46 = vld [vmem:[%s3130_s1 + $0xe8] sm:$0xff]  }
  0xaf   : > { %v2460_v39 = vld [vmem:[%s3130_s1 + $0x38] sm:$0xff]   ;;  %2249 = vmatprep.subr.bf16.mxu1 %v2459_v38  ;;  %v2464_v43 = vld [vmem:[%s3130_s1 + $0x30] sm:$0xff]   ;;  %v2468_v47 = vld [vmem:[%s3130_s1 + $0x28] sm:$0xff]  }
  0xb0   : > { %v2461_v40 = vld [vmem:[%s3130_s1 + $0xb8] sm:$0xff]   ;;  %2222 = vmatpush3.bf16.msra.mxu0 %v2460_v39  ;;  %v2465_v44 = vld [vmem:[%s3130_s1 + $0xb0] sm:$0xff]   ;;  %v2469_v48 = vld [vmem:[%s3130_s1 + $0xa8] sm:$0xff]  }
  0xb1   : > { %2250 = vmatpush3.bf16.msra.mxu1 %v2461_v40  ;;  %2223 = vmatprep.subr.bf16.mxu0 %v2462_v41  ;;  %v2470_v49 = vld [vmem:[%s3130_s1 + $0x60] sm:$0xff]   ;;  %v2474_v53 = vld [vmem:[%s3130_s1 + $0x58] sm:$0xff]   ;;  %v2478_v57 = vld [vmem:[%s3130_s1 + $0x50] sm:$0xff]  }
  0xb2   : > { %2251 = vmatprep.subr.bf16.mxu1 %v2463_v42  ;;  %v2471_v50 = vld [vmem:[%s3130_s1 + $0xe0] sm:$0xff]   ;;  %v2475_v54 = vld [vmem:[%s3130_s1 + $0xd8] sm:$0xff]   ;;  %v2479_v58 = vld [vmem:[%s3130_s1 + $0xd0] sm:$0xff]  }
  0xb3   : > { %v2472_v51 = vld [vmem:[%s3130_s1 + $0x20] sm:$0xff]   ;;  %v2476_v55 = vld [vmem:[%s3130_s1 + $0x18] sm:$0xff]   ;;  %v2480_v59 = vld [vmem:[%s3130_s1 + $0x10] sm:$0xff]  }
  0xb4   : > { %2224 = vmatpush3.bf16.msra.mxu0 %v2464_v43  ;;  %v2473_v52 = vld [vmem:[%s3130_s1 + $0xa0] sm:$0xff]   ;;  %v2477_v56 = vld [vmem:[%s3130_s1 + $0x98] sm:$0xff]   ;;  %v2481_v60 = vld [vmem:[%s3130_s1 + $0x90] sm:$0xff]  }
  0xb5   : > { %2252 = vmatpush3.bf16.msra.mxu1 %v2465_v44  ;;  %2225 = vmatprep.subr.bf16.mxu0 %v2466_v45  ;;  %v2482_v61 = vld [vmem:[%s3130_s1 + $0x48] sm:$0xff]   ;;  %v2486_v1 = vld [vmem:[%s3130_s1 + $0x40] sm:$0xff]   ;;  %v2496_v9 = vld [vmem:[%s3130_s1 + $0x178] sm:$0xff]  }
  0xb6   : > { %2253 = vmatprep.subr.bf16.mxu1 %v2467_v46  ;;  %v2483_v62 = vld [vmem:[%s3130_s1 + $0xc8] sm:$0xff]   ;;  %v2487_v2 = vld [vmem:[%s3130_s1 + $0xc0] sm:$0xff]   ;;  %v2497_v10 = vld [vmem:[%s3130_s1 + $0x138] sm:$0xff]  }
  0xb7   : > { %v2484_v63 = vld [vmem:[%s3130_s1 + $0x8] sm:$0xff]   ;;  %v2488_v3 = vld [vmem:[%s3130_s1] sm:$0xff]   ;;  %v2498_v11 = vld [vmem:[%s3130_s1 + $0x1f8] sm:$0xff]  }
  0xb8   : > { %2226 = vmatpush3.bf16.msra.mxu0 %v2468_v47  ;;  %v2485_v0 = vld [vmem:[%s3130_s1 + $0x88] sm:$0xff]   ;;  %v2489_v4 = vld [vmem:[%s3130_s1 + $0x80] sm:$0xff]   ;;  %v2499_v12 = vld [vmem:[%s3130_s1 + $0x1b8] sm:$0xff]  }
  0xb9   : > { %2254 = vmatpush3.bf16.msra.mxu1 %v2469_v48  ;;  %2227 = vmatprep.subr.bf16.mxu0 %v2470_v49  ;;  %v2490_v5 = vld [vmem:[%s3128_s6] ss:$36 sps:$4 sm:$0xff]   ;;  %v2493_v7 = vld [vmem:[%s3128_s6 + $0x8] ss:$36 sps:$4 sm:$0xff]   ;;  %v2516_v28 = vld [vmem:[%s3128_s6 + $0x54] ss:$36 sps:$4 sm:$0xff]  }
  0xba   : > { %2255 = vmatprep.subr.bf16.mxu1 %v2471_v50  ;;  %v2492_v6 = vld [vmem:[%s3128_s6 + $0x4] ss:$36 sps:$4 sm:$0xff]   ;;  %v2495_v8 = vld [vmem:[%s3128_s6 + $0xc] ss:$36 sps:$4 sm:$0xff]   ;;  %v2535_v45 = vld [vmem:[%s3128_s6 + $0x14] ss:$36 sps:$4 sm:$0xff]  }
  0xbb   : > { %1650 = vmatprep.mubr.bf16.mxu0 %v2492_v6  ;;  %1699 = vmatprep.mubr.bf16.mxu1 %v2495_v8  ;;  %v2500_v13 = vld [vmem:[%s3130_s1 + $0x170] sm:$0xff]   ;;  %v2504_v17 = vld [vmem:[%s3130_s1 + $0x168] sm:$0xff]   ;;  %v2508_v21 = vld [vmem:[%s3130_s1 + $0x160] sm:$0xff]  }
  0xbc   : > { %2228 = vmatpush3.bf16.msra.mxu0 %v2472_v51  ;;  %v2501_v14 = vld [vmem:[%s3130_s1 + $0x130] sm:$0xff]   ;;  %v2505_v18 = vld [vmem:[%s3130_s1 + $0x128] sm:$0xff]   ;;  %v2509_v22 = vld [vmem:[%s3130_s1 + $0x120] sm:$0xff]  }
  0xbd   : > { %2256 = vmatpush3.bf16.msra.mxu1 %v2473_v52  ;;  %2229 = vmatprep.subr.bf16.mxu0 %v2474_v53  ;;  %v2502_v15 = vld [vmem:[%s3130_s1 + $0x1f0] sm:$0xff]   ;;  %v2506_v19 = vld [vmem:[%s3130_s1 + $0x1e8] sm:$0xff]   ;;  %v2510_v23 = vld [vmem:[%s3130_s1 + $0x1e0] sm:$0xff]  }
  0xbe   : > { %2257 = vmatprep.subr.bf16.mxu1 %v2475_v54  ;;  %v2503_v16 = vld [vmem:[%s3130_s1 + $0x1b0] sm:$0xff]   ;;  %v2507_v20 = vld [vmem:[%s3130_s1 + $0x1a8] sm:$0xff]   ;;  %v2511_v24 = vld [vmem:[%s3130_s1 + $0x1a0] sm:$0xff]  }
  0xbf   : > { %v2512_v25 = vld [vmem:[%s3130_s1 + $0x158] sm:$0xff]   ;;  %v2520_v31 = vld [vmem:[%s3128_s6 + $0x50] ss:$36 sps:$4 sm:$0xff]   ;;  %v2526_v37 = vld [vmem:[%s3130_s1 + $0x148] sm:$0xff]  }
  0xc0   : > { %2230 = vmatpush3.bf16.msra.mxu0 %v2476_v55  ;;  %v2513_v26 = vld [vmem:[%s3130_s1 + $0x118] sm:$0xff]   ;;  %v2522_v33 = vld [vmem:[%s3130_s1 + $0x150] sm:$0xff]   ;;  %v2527_v38 = vld [vmem:[%s3130_s1 + $0x108] sm:$0xff]  }
  0xc1   : > { %2258 = vmatpush3.bf16.msra.mxu1 %v2477_v56  ;;  %2231 = vmatprep.subr.bf16.mxu0 %v2478_v57  ;;  %v2514_v27 = vld [vmem:[%s3128_s6 + $0x4c] ss:$36 sps:$4 sm:$0xff]   ;;  %v2538_v48 = vld [vmem:[%s3128_s6 + $0x18] ss:$36 sps:$4 sm:$0xff]   ;;  %v2546_v54 = vld [vmem:[%s3128_s6 + $0x64] ss:$36 sps:$4 sm:$0xff]  }
  0xc2   : > { %2259 = vmatprep.subr.bf16.mxu1 %v2479_v58  ;;  %v2518_v29 = vld [vmem:[%s3130_s1 + $0x1d8] sm:$0xff]   ;;  %v2523_v34 = vld [vmem:[%s3130_s1 + $0x110] sm:$0xff]   ;;  %v2528_v39 = vld [vmem:[%s3130_s1 + $0x1c8] sm:$0xff]  }
  0xc3   : > { %v2519_v30 = vld [vmem:[%s3128_s6 + $0x48] ss:$36 sps:$4 sm:$0xff]   ;;  %v2524_v35 = vld [vmem:[%s3130_s1 + $0x1d0] sm:$0xff]   ;;  %v2530_v41 = vld [vmem:[%s3130_s1 + $0x140] sm:$0xff]  }
  0xc4   : > { %2232 = vmatpush3.bf16.msra.mxu0 %v2480_v59  ;;  %v2521_v32 = vld [vmem:[%s3130_s1 + $0x198] sm:$0xff]   ;;  %v2525_v36 = vld [vmem:[%s3130_s1 + $0x190] sm:$0xff]   ;;  %v2529_v40 = vld [vmem:[%s3130_s1 + $0x188] sm:$0xff]  }
  0xc5   : > { %2260 = vmatpush3.bf16.msra.mxu1 %v2481_v60  ;;  %2233 = vmatprep.subr.bf16.mxu0 %v2482_v61  ;;  %v2531_v42 = vld [vmem:[%s3130_s1 + $0x100] sm:$0xff]   ;;  %v2537_v47 = vld [vmem:[%s3130_s1 + $0x238] sm:$0xff]   ;;  %v2541_v50 = vld [vmem:[%s3130_s1 + $0x230] sm:$0xff]  }
  0xc6   : > { %2261 = vmatprep.subr.bf16.mxu1 %v2483_v62  ;;  %v2532_v43 = vld [vmem:[%s3130_s1 + $0x1c0] sm:$0xff]   ;;  %v2544_v52 = vld [vmem:[%s3128_s6 + $0x58] ss:$36 sps:$4 sm:$0xff]   ;;  %v2551_v59 = vld [vmem:[%s3130_s1 + $0x210] sm:$0xff]  }
  0xc7   : > { %v2533_v44 = vld [vmem:[%s3128_s6 + $0x10] ss:$36 sps:$4 sm:$0xff]   ;;  %v2540_v49 = vld [vmem:[%s3128_s6 + $0x1c] ss:$36 sps:$4 sm:$0xff]   ;;  %v2555_v62 = vld [vmem:[%s3128_s6 + $0x68] ss:$36 sps:$4 sm:$0xff]  }
  0xc8   : > { %2234 = vmatpush3.bf16.msra.mxu0 %v2484_v63  ;;  %v2536_v46 = vld [vmem:[%s3130_s1 + $0x180] sm:$0xff]   ;;  %v2545_v53 = vld [vmem:[%s3130_s1 + $0x228] sm:$0xff]   ;;  %v2550_v57 = vld [vmem:[%s3130_s1 + $0x218] sm:$0xff]  }
  0xc9   : > { %2262 = vmatpush3.bf16.msra.mxu1 %v2485_v0  ;;  %2235 = vmatprep.subr.bf16.mxu0 %v2486_v1  ;;  %v2542_v51 = vld [vmem:[%s3128_s6 + $0x5c] ss:$36 sps:$4 sm:$0xff]  }
  0xca   : > { %2263 = vmatprep.subr.bf16.mxu1 %v2487_v2  ;;  %v2548_v55 = vld [vmem:[%s3128_s6 + $0x60] ss:$36 sps:$4 sm:$0xff]   ;;  %v2552_v60 = vld [vmem:[%s3130_s1 + $0x208] sm:$0xff]  }
  0xcb   : > { %v2549_v56 = vld [vmem:[%s3130_s1 + $0x220] sm:$0xff]  }
  0xcc   : > { %2236 = vmatpush3.bf16.msra.mxu0 %v2488_v3  ;;  %v2554_v58 = vld [vmem:[%s3128_s6 + $0x20] ss:$36 sps:$4 sm:$0xff]  }
  0xcd   : > { %2264 = vmatpush3.bf16.msra.mxu1 %v2489_v4  ;;  %2277 = vmatprep.subr.bf16.mxu0 %v2496_v9  ;;  %v2553_v61 = vld [vmem:[%s3130_s1 + $0x200] sm:$0xff]  }
  0xce   : > { %2305 = vmatprep.subr.bf16.mxu1 %v2498_v11 }
  0xcf   : > { %1651 = vmatmul.mubr.bf16.vlgmr.msra.gmra.mxu0 %v2490_v5 }
  0xd0   : > { %1700 = vmatmul.mubr.bf16.vlgmr.msra.gmra.mxu1 %v2493_v7  ;;  %2278 = vmatpush3.bf16.msra.mxu0 %v2497_v10 }
  0xd1   : > { %2306 = vmatpush3.bf16.msra.mxu1 %v2499_v12  ;;  %2279 = vmatprep.subr.bf16.mxu0 %v2500_v13 }
  0xd2   : > { %2307 = vmatprep.subr.bf16.mxu1 %v2502_v15  ;;  %1658 = vmatprep.mubr.bf16.mxu0 %v2514_v27 }
  0xd3   : > { %1707 = vmatprep.mubr.bf16.mxu1 %v2516_v28 }
  0xd4   : > { %2280 = vmatpush3.bf16.msra.mxu0 %v2501_v14 }
  0xd5   : > { %2308 = vmatpush3.bf16.msra.mxu1 %v2503_v16  ;;  %2281 = vmatprep.subr.bf16.mxu0 %v2504_v17 }
  0xd6   : > { %2309 = vmatprep.subr.bf16.mxu1 %v2506_v19 }
  0xd7   : > { %1659 = vmatmul.mubr.bf16.gmra.mxu0 %v2519_v30 }
  0xd8   : > { %2282 = vmatpush3.bf16.msra.mxu0 %v2505_v18  ;;  %1708 = vmatmul.mubr.bf16.gmra.mxu1 %v2520_v31 }
  0xd9   : > { %2310 = vmatpush3.bf16.msra.mxu1 %v2507_v20  ;;  %2283 = vmatprep.subr.bf16.mxu0 %v2508_v21 }
  0xda   : > { %2311 = vmatprep.subr.bf16.mxu1 %v2510_v23  ;;  %1748 = vmatprep.mubr.bf16.mxu0 %v2535_v45 }
  0xdb   : > { %1797 = vmatprep.mubr.bf16.mxu1 %v2540_v49 }
  0xdc   : > { %2284 = vmatpush3.bf16.msra.mxu0 %v2509_v22 }
  0xdd   : > { %2312 = vmatpush3.bf16.msra.mxu1 %v2511_v24  ;;  %2285 = vmatprep.subr.bf16.mxu0 %v2512_v25 }
  0xde   : > { %2313 = vmatprep.subr.bf16.mxu1 %v2518_v29 }
  0xe0   : > { %2286 = vmatpush3.bf16.msra.mxu0 %v2513_v26 }
  0xe1   : > { %2314 = vmatpush3.bf16.msra.mxu1 %v2521_v32  ;;  %2287 = vmatprep.subr.bf16.mxu0 %v2522_v33 }
  0xe2   : > { %2315 = vmatprep.subr.bf16.mxu1 %v2524_v35 }
  0xe4   : > { %2288 = vmatpush3.bf16.msra.mxu0 %v2523_v34 }
  0xe5   : > { %2316 = vmatpush3.bf16.msra.mxu1 %v2525_v36  ;;  %2289 = vmatprep.subr.bf16.mxu0 %v2526_v37 }
  0xe6   : > { %2317 = vmatprep.subr.bf16.mxu1 %v2528_v39 }
  0xe8   : > { %2290 = vmatpush3.bf16.msra.mxu0 %v2527_v38 }
  0xe9   : > { %2318 = vmatpush3.bf16.msra.mxu1 %v2529_v40  ;;  %2291 = vmatprep.subr.bf16.mxu0 %v2530_v41 }
  0xea   : > { %2319 = vmatprep.subr.bf16.mxu1 %v2532_v43 }
  0xec   : > { %2292 = vmatpush3.bf16.msra.mxu0 %v2531_v42 }
  0xed   : > { %2320 = vmatpush3.bf16.msra.mxu1 %v2536_v46  ;;  %2343 = vmatprep.subr.bf16.mxu0 %v2537_v47 }
  0xef   : > { %1749 = vmatmul.mubr.bf16.vlgmr.msra.gmra.mxu0 %v2533_v44 }
  0xf0   : > { %2344 = vmatpush3.bf16.msra.mxu0 %v2537_v47  ;;  %1798 = vmatmul.mubr.bf16.vlgmr.msra.gmra.mxu1 %v2538_v48 }
  0xf1   : > { %2345 = vmatprep.subr.bf16.mxu0 %v2541_v50  ;;  %1756 = vmatprep.mubr.bf16.mxu0 %v2542_v51 }
  0xf2   : > { %1805 = vmatprep.mubr.bf16.mxu1 %v2546_v54  ;;  %v928_v54 = vld [vmem:[#allocation2 + $0x18] sm:$0xff] }
  0xf4   : > { %2346 = vmatpush3.bf16.msra.mxu0 %v2541_v50 }
  0xf5   : > { %2347 = vmatprep.subr.bf16.mxu0 %v2545_v53 }
  0xf7   : > { %1757 = vmatmul.mubr.bf16.gmra.mxu0 %v2544_v52 }
  0xf8   : > { %2348 = vmatpush3.bf16.msra.mxu0 %v2545_v53  ;;  %1806 = vmatmul.mubr.bf16.gmra.mxu1 %v2548_v55 }
  0xf9   : > { %2349 = vmatprep.subr.bf16.mxu0 %v2549_v56  ;;  %2359 = vmatprep.mubr.bf16.mxu0 %v2554_v58 }
  0xfc   : > { %2350 = vmatpush3.bf16.msra.mxu0 %v2549_v56 }
  0xfd   : > { %2351 = vmatprep.subr.bf16.mxu0 %v2550_v57 }
 0x100   : > { %2352 = vmatpush3.bf16.msra.mxu0 %v2550_v57 }
 0x101   : > { %2353 = vmatprep.subr.bf16.mxu0 %v2551_v59 }
 0x104   : > { %2354 = vmatpush3.bf16.msra.mxu0 %v2551_v59 }
 0x105   : > { %2355 = vmatprep.subr.bf16.mxu0 %v2552_v60 }
 0x108   : > { %2356 = vmatpush3.bf16.msra.mxu0 %v2552_v60  ;;  %v926_v60 = vld [vmem:[#allocation2 + $0x10] sm:$0xff] }
 0x109   : > { %2357 = vmatprep.subr.bf16.mxu0 %v2553_v61 }
 0x10c   : > { %2358 = vmatpush3.bf16.msra.mxu0 %v2553_v61 }
 0x10f   : > { %2360 = vmatmul.mubr.bf16.vlgmr.msra.gmra.mxu0 %v2555_v62 }
 0x18f   : > { %v2237_v63 = vpop.f32.mrf.mxu0 }
 0x190   : > { %v2265_v0 = vpop.f32.mrf.mxu1 }
 0x191   : > { %v2238_v1 = vpop.f32.mrf.mxu0 }
 0x192   : > { %v2266_v2 = vpop.f32.mrf.mxu1  ;;  %v2239_v30 = vadd.f32 %v2238_v1, %v2237_v63  ;;  %v929_v1 = vld [vmem:[#allocation2 + $0x8] sm:$0xff] }
 0x193   : > { %v2240_v3 = vpop.f32.mrf.mxu0  ;;  %v2267_v31 = vadd.f32 %v2266_v2, %v2265_v0 }
 0x194   : > { %v2268_v4 = vpop.f32.mrf.mxu1 }
 0x195   : > { %v2241_v5 = vpop.f32.mrf.mxu0  ;;  %v1702_v39 = vadd.f32 %v2267_v31, %v2239_v30 }
 0x196   : > { %v2269_v7 = vpop.f32.mrf.mxu1  ;;  %v2242_v40 = vadd.f32 %v2241_v5, %v2240_v3 }
 0x197   : > { %v2243_v6 = vpop.f32.mrf.mxu0  ;;  %v2270_v41 = vadd.f32 %v2269_v7, %v2268_v4 }
 0x198   : > { %v2271_v8 = vpop.f32.mrf.mxu1 }
 0x199   : > { %v2244_v9 = vpop.f32.mrf.mxu0  ;;  %v1705_v50 = vadd.f32 %v2270_v41, %v2242_v40 }
 0x19a   : > { %v2272_v10 = vpop.f32.mrf.mxu1  ;;  %v2245_v28 = vadd.f32 %v2244_v9, %v2243_v6  ;;  %v927_v6 = vld [vmem:[#allocation2] sm:$0xff] }
 0x19b   : > { %v2246_v11 = vpop.f32.mrf.mxu0  ;;  %v2273_v29 = vadd.f32 %v2272_v10, %v2271_v8 }
 0x19c   : > { %v2274_v12 = vpop.f32.mrf.mxu1 }
 0x19d   : > { %v2247_v13 = vpop.f32.mrf.mxu0  ;;  %v1710_v35 = vadd.f32 %v2273_v29, %v2245_v28 }
 0x19e   : > { %v2275_v15 = vpop.f32.mrf.mxu1  ;;  %v2248_v36 = vadd.f32 %v2247_v13, %v2246_v11 }
 0x19f   : > { %v2276_v37 = vadd.f32 %v2275_v15, %v2274_v12 }
 0x1a1   : > { %v1713_v46 = vadd.f32 %v2276_v37, %v2248_v36 }
 0x1af   : > { %v2293_v14 = vpop.f32.mrf.mxu0 }
 0x1b0   : > { %v2321_v17 = vpop.f32.mrf.mxu1 }
 0x1b1   : > { %v2294_v16 = vpop.f32.mrf.mxu0 }
 0x1b2   : > { %v2322_v19 = vpop.f32.mrf.mxu1  ;;  %v2295_v38 = vadd.f32 %v2294_v16, %v2293_v14 }
 0x1b3   : > { %v2296_v18 = vpop.f32.mrf.mxu0  ;;  %v2323_v48 = vadd.f32 %v2322_v19, %v2321_v17 }
 0x1b4   : > { %v2324_v21 = vpop.f32.mrf.mxu1  ;;  %v1751_v47 = vadd.f32 %v2295_v38, %v1702_v39 }
 0x1b5   : > { %v2297_v20 = vpop.f32.mrf.mxu0 }
 0x1b6   : > { %v2325_v23 = vpop.f32.mrf.mxu1  ;;  %v2298_v49 = vadd.f32 %v2297_v20, %v2296_v18  ;;  %v1800_v59 = vadd.f32 %v2323_v48, %v1751_v47 }
 0x1b7   : > { %v2299_v22 = vpop.f32.mrf.mxu0  ;;  %v2326_v57 = vadd.f32 %v2325_v23, %v2324_v21 }
 0x1b8   : > { %v2327_v25 = vpop.f32.mrf.mxu1  ;;  %v1754_v56 = vadd.f32 %v2298_v49, %v1705_v50 }
 0x1b9   : > { %v2300_v24 = vpop.f32.mrf.mxu0 }
 0x1ba   : > { %v2328_v27 = vpop.f32.mrf.mxu1  ;;  %v2301_v32 = vadd.f32 %v2300_v24, %v2299_v22  ;;  %v1803_v5 = vadd.f32 %v2326_v57, %v1754_v56 }
 0x1bb   : > { %v2302_v26 = vpop.f32.mrf.mxu0  ;;  %v2329_v43 = vadd.f32 %v2328_v27, %v2327_v25 }
 0x1bc   : > { %v2330_v34 = vpop.f32.mrf.mxu1  ;;  %v1759_v42 = vadd.f32 %v2301_v32, %v1710_v35 }
 0x1bd   : > { %v2303_v33 = vpop.f32.mrf.mxu0 }
 0x1be   : > { %v2304_v44 = vadd.f32 %v2303_v33, %v2302_v26  ;;  %v2331_v45 = vpop.f32.mrf.mxu1  ;;  %v1808_v53 = vadd.f32 %v2329_v43, %v1759_v42 }
 0x1bf   : > { %v2332_v52 = vadd.f32 %v2331_v45, %v2330_v34 }
 0x1c0   : > { %v1762_v51 = vadd.f32 %v2304_v44, %v1713_v46 }
 0x1c2   : > { %v1811_v0 = vadd.f32 %v2332_v52, %v1762_v51 }
 0x1cf   : > { %v2361_v55 = vpop.f32.mrf.mxu0 }
 0x1d0   : > { %v1857_v58 = vadd.f32 %v2361_v55, %v1808_v53 }
 0x1d1   : > { %v1848_v61 = vpop.f32.mrf.mxu0 }
 0x1d2   : > { %v1865_v62 = vadd.f32 %v1857_v58, %v928_v54  ;;  %v1849_v63 = vadd.f32 %v1848_v61, %v1800_v59 }
 0x1d3   : > { %v2362_v2 = vpop.f32.mrf.mxu0 }
 0x1d4   : > { %1869 = vst [vmem:[#allocation2 + $0x18] sm:$0xff] %v1865_v62  ;;  %v1863_v3 = vadd.f32 %v1849_v63, %v926_v60  ;;  %v1860_v4 = vadd.f32 %v2362_v2, %v1811_v0 }
 0x1d5   : > { %v1851_v7 = vpop.f32.mrf.mxu0 }
 0x1d6   : > { %1867 = vst [vmem:[#allocation2 + $0x10] sm:$0xff] %v1863_v3  ;;  %v1866_v8 = vadd.f32 %v1860_v4, %v929_v1  ;;  %v1852_v9 = vadd.f32 %v1851_v7, %v1803_v5  ;;  %1874 = sbr.rel (%p2195_p5) target bundleno = 489 (0x1e9), region = 107 }
 0x1d8   : > { %1870 = vst [vmem:[#allocation2 + $0x8] sm:$0xff] %v1866_v8  ;;  %v1864_v10 = vadd.f32 %v1852_v9, %v927_v6 }
 0x1da   : > { %1868 = vst [vmem:[#allocation2] sm:$0xff] %v1864_v10 }
 0x1db   : > { %v2196_v13 = vld [vmem:[%s915_s4] ss:$0 sm:$0xff]  ;;  %v1877_v16 = vld [vmem:[#allocation2 + $0x18] sm:$0xff] }
 0x1dc   : > { %v1888_v18 = vadd.f32 %v2196_v13, %v1877_v16 }
 0x1dd   : > { %v1875_v11 = vld [vmem:[#allocation2 + $0x10] sm:$0xff] }
 0x1de   : > { %v1886_v14 = vadd.f32 %v2196_v13, %v1875_v11  ;;  %v1892_v22 = vmax.f32 %v1888_v18, 0.0 }
 0x1df   : > { %v1878_v17 = vld [vmem:[#allocation2 + $0x8] sm:$0xff] }
 0x1e0   : > { %v1889_v19 = vadd.f32 %v2196_v13, %v1878_v17  ;;  %v1890_v20 = vmax.f32 %v1886_v14, 0.0 }
 0x1e1   : > { %v1876_v12 = vld [vmem:[#allocation2] sm:$0xff] }
 0x1e2   : > { %v1887_v15 = vadd.f32 %v2196_v13, %v1876_v12  ;;  %v1893_v23 = vmax.f32 %v1889_v19, 0.0 }
 0x1e4   : > { %v1891_v21 = vmax.f32 %v1887_v15, 0.0  ;;  %v2218_v25 = vpack.c.bf16 %v1893_v23, %v1892_v22 }
 0x1e6   : > { %v2213_v24 = vpack.c.bf16 %v1891_v21, %v1890_v20  ;;  %2220 = vst [vmem:[%s3132_s25 + $0x8] sm:$0xff] %v2218_v25  }
 0x1e8   : > { %2214 = vst [vmem:[%s3132_s25] sm:$0xff] %v2213_v24  }
 0x1e9 PF: > { %1920 = sbr.rel (!%p2759_p12) target bundleno = 497 (0x1f1), region = 111  ;;  %s2202_s14 = sshll.u32 (%p2759_p12), %s2630_s19, 2 }
 0x1ea   : > { %s1925_s5 = scalar_lea.vmem (%p2759_p12), %s3279_s3, %s2202_s14 }
 0x1ed   : > { %v1946_v28 = vld [vmem:[%s3132_s25 + $0x8] sm:$0xf] (%p2759_p12)  ;;  %v1948_v29 = vld [vmem:[%s3132_s25 + $0xc] sm:$0xf] (%p2759_p12) }
 0x1ee   : > { %1947 = vst [vmem:[%s1925_s5 + $0x18] sm:$0xf] %v1946_v28  ;;  %1949 = vst [vmem:[%s1925_s5 + $0x24] sm:$0xf] %v1948_v29 }
 0x1ef   : > { %v1942_v26 = vld [vmem:[%s3132_s25] sm:$0xf]  ;;  %v1944_v27 = vld [vmem:[%s3132_s25 + $0x4] sm:$0xf] }
 0x1f0   : > { %1943 = vst [vmem:[%s1925_s5] sm:$0xf] %v1942_v26  ;;  %1945 = vst [vmem:[%s1925_s5 + $0xc] sm:$0xf] %v1944_v27 }
 0x1f1 PF: > { %s13_s22 = sadd.s32 1, %s2642_s22   ;;  %s3289_s10 = sld [smem:[#allocation6_spill]] }
 0x1f2   : > { %p10_p6 = scmp.ge.s32.totalorder %s13_s22, 8   ;;  %s3290_s12 = smov %s2606_s13 }
 0x1f3   : > { %s3291_s13 = smov %s2757_s9  ;;  %s3292_s14 = smov %s2614_s15 }
 0x1f4   : > { %s3293_s15 = smov %s2754_s8  ;;  %s3294_s16 = smov %s2622_s17 }
 0x1f5   : > { %s3295_s17 = smov %s2740_s30  ;;  %s3296_s18 = smov %s2634_s20 }
 0x1f6   : > { %s3297_s19 = smov %s2638_s21  ;;  %s3298_s20 = smov %s3301_s24 }
 0x1f7   : > { %s3299_s21 = smov %s3289_s10  ;;  %12 = sbr.rel (!%p10_p6) target bundleno = 9 (0x9), region = 200 }

// kernel: _lambda_.19
= control target key start
LH: loop header
LB: loop body
LE: loop exit
PB: predicated region body
PF: predicated region fallthrough
CT: control target
= control target key end

     0   :  { %s244_s6 = smov 0   ;;  %s261_s0 = inlined_call_operand.vmem [shape: bf16[2,3,3,256], index: 0, kind: input, shape index: {}]   ;;  %s262_s1 = inlined_call_operand.vmem [shape: bf16[2,1,1,256], index: 1, kind: output, shape index: {}]  }
   0x1 LB: > { %s204_s7 = sadd.s32 4294967295, %s231_s6   ;;  %p208_p0 = scmp.ge.s32.totalorder %s231_s6, 1  ;;  %s231_s6 = sphi %s244_s6, %s11_s6  }
   0x2   : > { %p87_p1 = scmp.lt.s32.totalorder %s231_s6, 3 }
   0x4   : > { %p88_p2 = pnand %p208_p0, %p87_p1 }
   0x5   : > { %p106_p3 = scmp.lt.s32.totalorder (!%p88_p2), %s204_s7, 1 }
   0x6   : > { %91 = sbr.rel (%p88_p2) target bundleno = 30 (0x1e), region = 24 }
   0xb   : > { %s264_s7 = smov (!%p106_p3, %s204_s7), 1  ;;  %v233_v0 = vmov 1966171168   ;;  %v136_v2 = vlaneseq  ;;  %vm141_vm0 = vcmask 1040384   ;;  %vm142_vm1 = vsmask.f32 256 }
   0xc   : > { %s215_s8 = smul.u32 12, %s264_s7  ;;  %v134_v1 = vunpack.c.l.s4 %v233_v0  ;;  %s210_s12 = sshll.u32 %s264_s7, 1  ;;  %vm144_vm2 = vcmask 1041409   ;;  %vm145_vm3 = vsmask.f32 1280  ;;  %vm143_vm4 = vmand %vm141_vm0, %vm142_vm1 }
   0xd   : > { %v137_v9 = vshrl.u32 %v136_v2, 7  ;;  %s114_s15 = scalar_lea.vmem %s262_s1, %s210_s12  ;;  %vm146_vm5 = vmand %vm144_vm2, %vm145_vm3 }
   0xe   : > { %s110_s11 = scalar_lea.vmem %s261_s0, %s215_s8  ;;  %v135_v8 = vunpack.c.0.s8 %v134_v1  ;;  %vm147_vm6 = vmor %vm146_vm5, %vm143_vm4  ;;  %v148_v15 = vld [vmem:[%s114_s15] sm:$0x3] }
   0xf   : > { %v115_v3 = vld [vmem:[%s110_s11] sm:$0xf]  ;;  %v116_v4 = vld [vmem:[%s110_s11 + $0x4] sm:$0xf]  ;;  %v117_v5 = vld [vmem:[%s110_s11 + $0x8] sm:$0xf] }
  0x10   : > { %v118_v6 = vmax.bf16 %v116_v4, %v115_v3  ;;  %v138_v13 = vsub.s32 %v135_v8, %v137_v9 }
  0x12   : > { %v119_v7 = vmax.bf16 %v118_v6, %v117_v5 }
  0x14   : > { %v121_v10 = vshrl.u32 %v119_v7, 16  ;;  %v212_v11 = vrot.slane %v119_v7, 9 }
  0x16   : > { %v126_v12 = vmax.bf16 %v121_v10, %v119_v7 }
  0x18   : > { %v131_v14 = vmax.bf16 %v212_v11, %v126_v12 }
  0x1a   : > { %v139_v16 = vrot.slane %v131_v14, %v138_v13 }
  0x1c   : > { %v149_v17 = vsel %vm147_vm6, %v139_v16, %v148_v15 }
  0x1d   : > { %150 = vst [vmem:[%s114_s15] sm:$0x3] %v149_v17 }
  0x1e PF: > { %s11_s6 = sadd.s32 1, %s231_s6  }
  0x1f   : > { %p8_p4 = scmp.ge.s32.totalorder %s11_s6, 4  }
  0x21   :  { %10 = sbr.rel (!%p8_p4) target bundleno = 1 (0x1), region = 54 }

// kernel: _lambda_.17
= control target key start
LH: loop header
LB: loop body
LE: loop exit
PB: predicated region body
PF: predicated region fallthrough
CT: control target
= control target key end

     0   :  { %s3276_s0 = inlined_call_operand.vmem [shape: bf16[32,3456], index: 0, kind: input, shape index: {}]   ;;  %s3277_s1 = inlined_call_operand.vmem [shape: bf16[3456,384], index: 1, kind: input, shape index: {}]   ;;  %s3278_s2 = inlined_call_operand.vmem [shape: f32[1,384], index: 2, kind: input, shape index: {}]   ;;  %s3279_s3 = inlined_call_operand.vmem [shape: bf16[32,384], index: 3, kind: output, shape index: {}]  }
   0x1   :  { %3281 = sst [smem:[#allocation7_spill]] %s3276_s0 }
   0x2   :  { %3282 = sst [smem:[#allocation8_spill]] %s3277_s1 }
   0x3   :  { %s2665_s12 = smov 0   ;;  %s2667_s13 = smov 0  }
   0x4   :  { %s2669_s14 = smov 0   ;;  %s2671_s15 = smov 0  }
   0x5   :  { %s2673_s16 = smov 0   ;;  %s2675_s17 = smov 0  }
   0x6   :  { %s2677_s18 = smov 0   ;;  %s2679_s19 = smov 0  }
   0x7   :  { %s2681_s20 = smov 0   ;;  %s2683_s21 = smov 0  }
   0x8   :  { %s2685_s22 = smov 0  }
   0x9 LB: > { %s2088_s23 = sadd.s32 4294967295, %s2642_s22   ;;  %s25_s24 = sadd.s32 1, %s2634_s20  ;;  %s2642_s22 = sphi %s2685_s22, %s13_s22   ;;  %s2638_s21 = sphi %s2683_s21, %s3299_s21   ;;  %s2634_s20 = sphi %s2681_s20, %s3298_s20   ;;  %s2630_s19 = sphi %s2679_s19, %s3297_s19   ;;  %s2626_s18 = sphi %s2677_s18, %s3296_s18   ;;  %s2622_s17 = sphi %s2675_s17, %s3295_s17   ;;  %s2618_s16 = sphi %s2673_s16, %s3294_s16   ;;  %s2614_s15 = sphi %s2671_s15, %s3293_s15   ;;  %s2610_s14 = sphi %s2669_s14, %s3292_s14   ;;  %s2606_s13 = sphi %s2667_s13, %s3291_s13   ;;  %s2602_s12 = sphi %s2665_s12, %s3290_s12  }
   0xa   : > { %p26_p0 = scmp.ge.s32.totalorder %s25_s24, 3  ;;  %s28_s25 = sadd.s32 1, %s2638_s21 }
   0xb   : > { %s41_s26 = sadd.s32 1, %s2622_s17  ;;  %p48_p1 = scmp.ne.s32.totalorder %s2622_s17, %s2618_s16 }
   0xc   : > { %s3301_s24 = smov (%p26_p0, %s25_s24), 0  ;;  %s3303_s25 = smov (!%p26_p0, %s28_s25), %s2638_s21 }
   0xd   : > { %s37_s27 = ssub.s32 %s2634_s20, %s3301_s24  ;;  %p49_p2 = scmp.eq.s32.totalorder %s2642_s22, 0 }
   0xe   : > { %p30_p3 = scmp.ge.s32.totalorder %s3303_s25, 3  ;;  %p39_p4 = scmp.eq.s32.totalorder %s37_s27, 0 }
   0xf   : > { %p2732_p5 = por %p49_p2, %p48_p1  ;;  %s69_s29 = sadd.s32 1, %s2614_s15 }
  0x10   : > { %s3305_s25 = smov (%p30_p3, %s3303_s25), 0  ;;  %p76_p6 = scmp.ne.s32.totalorder %s2614_s15, %s2610_s14 }
  0x11   : > { %3284 = sst [smem:[#allocation6_spill]] %s3305_s25  ;;  %s65_s4 = ssub.s32 %s2638_s21, %s3305_s25 }
  0x12   : > { %s2740_s30 = scalar_select %p39_p4, %s2622_s17, %s41_s26  }
  0x13   : > { %s66_s5 = sor.u32 %s65_s4, %s37_s27  ;;  %p121_p7 = scmp.eq.s32.totalorder %s65_s4, 0 }
  0x14   : > { %p67_p8 = scmp.eq.s32.totalorder %s66_s5, 0  ;;  %p2746_p9 = por %p76_p6, %p49_p2 }
  0x15   : > { %s123_s7 = sadd.s32 1, %s2606_s13  ;;  %p133_p10 = scmp.ne.s32.totalorder %s2606_s13, %s2602_s12 }
  0x16   : > { %s2754_s8 = scalar_select %p67_p8, %s2614_s15, %s69_s29  }
  0x17   : > { %s2757_s9 = scalar_select %p121_p7, %s2606_s13, %s123_s7  }
  0x18   : > { %p134_p11 = scmp.eq.s32.totalorder %s2088_s23, 8  ;;  %p2091_p13 = scmp.ge.s32.totalorder %s2642_s22, 9 }
  0x1a   : > { %p2759_p12 = por %p134_p11, %p133_p10  ;;  %156 = sbr.rel (%p2091_p13) target bundleno = 155 (0x9b), region = 16 }
  0x1f   : > { %159 = sbr.rel (!%p2732_p5) target bundleno = 50 (0x32), region = 20  ;;  %s161_s11 = sand.u32 (%p2732_p5), 1, %s2622_s17  }
  0x20   : > { %s2205_s26 = smul.u32 (%p2732_p5), 36, %s2634_s20  ;;  %s3287_s0 = sld [smem:[#allocation7_spill]] (%p2732_p5) }
  0x21   : > { %s2363_s27 = smul.u32 (%p2732_p5), 144, %s161_s11 }
  0x23   : > { %s2776_s23 = scalar_lea.vmem (%p2732_p5), [#allocation3], %s2363_s27 }
  0x26   : > { %s2771_s5 = scalar_lea.vmem %s3287_s0, %s2205_s26 }
  0x27   : > { %v184_v0 = vld [vmem:[%s2771_s5] sm:$0xff]  ;;  %v186_v1 = vld [vmem:[%s2771_s5 + $0x8] sm:$0xff]  ;;  %v188_v2 = vld [vmem:[%s2771_s5 + $0x10] sm:$0xff] }
  0x28   : > { %185 = vst [vmem:[%s2776_s23] sm:$0xff] %v184_v0  ;;  %187 = vst [vmem:[%s2776_s23 + $0x8] sm:$0xff] %v186_v1  ;;  %v190_v3 = vld [vmem:[%s2771_s5 + $0x18] sm:$0xff]  ;;  %v192_v4 = vld [vmem:[%s2771_s5 + $0x6c] sm:$0xff] }
  0x29   : > { %189 = vst [vmem:[%s2776_s23 + $0x10] sm:$0xff] %v188_v2  ;;  %v194_v5 = vld [vmem:[%s2771_s5 + $0x74] sm:$0xff]  ;;  %191 = vst [vmem:[%s2776_s23 + $0x18] sm:$0xff] %v190_v3  ;;  %v196_v6 = vld [vmem:[%s2771_s5 + $0x7c] sm:$0xff] }
  0x2a   : > { %193 = vst [vmem:[%s2776_s23 + $0x24] sm:$0xff] %v192_v4  ;;  %195 = vst [vmem:[%s2776_s23 + $0x2c] sm:$0xff] %v194_v5  ;;  %v198_v7 = vld [vmem:[%s2771_s5 + $0x84] sm:$0xff]  ;;  %v200_v8 = vld [vmem:[%s2771_s5 + $0xd8] sm:$0xff] }
  0x2b   : > { %197 = vst [vmem:[%s2776_s23 + $0x34] sm:$0xff] %v196_v6  ;;  %199 = vst [vmem:[%s2776_s23 + $0x3c] sm:$0xff] %v198_v7  ;;  %v202_v9 = vld [vmem:[%s2771_s5 + $0xe0] sm:$0xff]  ;;  %v204_v10 = vld [vmem:[%s2771_s5 + $0xe8] sm:$0xff] }
  0x2c   : > { %201 = vst [vmem:[%s2776_s23 + $0x48] sm:$0xff] %v200_v8  ;;  %v206_v11 = vld [vmem:[%s2771_s5 + $0xf0] sm:$0xff]  ;;  %203 = vst [vmem:[%s2776_s23 + $0x50] sm:$0xff] %v202_v9  ;;  %v208_v12 = vld [vmem:[%s2771_s5 + $0x144] sm:$0xff] }
  0x2d   : > { %205 = vst [vmem:[%s2776_s23 + $0x58] sm:$0xff] %v204_v10  ;;  %207 = vst [vmem:[%s2776_s23 + $0x60] sm:$0xff] %v206_v11  ;;  %v210_v13 = vld [vmem:[%s2771_s5 + $0x14c] sm:$0xff]  ;;  %v212_v14 = vld [vmem:[%s2771_s5 + $0x154] sm:$0xff] }
  0x2e   : > { %209 = vst [vmem:[%s2776_s23 + $0x6c] sm:$0xff] %v208_v12  ;;  %211 = vst [vmem:[%s2776_s23 + $0x74] sm:$0xff] %v210_v13  ;;  %v214_v15 = vld [vmem:[%s2771_s5 + $0x15c] sm:$0xff]  ;;  %v2095_v17 = vld [vmem:[%s2771_s5 + $0x8c] sm:$0xf] }
  0x2f   : > { %213 = vst [vmem:[%s2776_s23 + $0x7c] sm:$0xff] %v212_v14  ;;  %v2093_v16 = vld [vmem:[%s2771_s5 + $0x20] sm:$0xf]  ;;  %215 = vst [vmem:[%s2776_s23 + $0x84] sm:$0xff] %v214_v15  ;;  %v2097_v18 = vld [vmem:[%s2771_s5 + $0xf8] sm:$0xf] }
  0x30   : > { %2094 = vst [vmem:[%s2776_s23 + $0x20] sm:$0xf] %v2093_v16  ;;  %2096 = vst [vmem:[%s2776_s23 + $0x44] sm:$0xf] %v2095_v17  ;;  %v2099_v19 = vld [vmem:[%s2771_s5 + $0x164] sm:$0xf] }
  0x31   : > { %2098 = vst [vmem:[%s2776_s23 + $0x68] sm:$0xf] %v2097_v18  ;;  %2100 = vst [vmem:[%s2776_s23 + $0x8c] sm:$0xf] %v2099_v19 }
  0x32 PF: > { %237 = sbr.rel (!%p2746_p9) target bundleno = 155 (0x9b), region = 46  ;;  %s239_s28 = sand.u32 (%p2746_p9), 1, %s2614_s15  }
  0x33   : > { %s2364_s7 = smul.u32 (%p2746_p9), 576, %s239_s28  ;;  %s3288_s1 = sld [smem:[#allocation8_spill]] (%p2746_p9) }
  0x34   : > { %s2368_s11 = smul.u32 (%p2746_p9), 432, %s2634_s20 }
  0x35   : > { %s2828_s6 = scalar_lea.vmem (%p2746_p9), [#allocation4], %s2364_s7 }
  0x36   : > { %s244_s26 = sadd.s32 (%p2746_p9), %s2638_s21, %s2368_s11 }
  0x37   : > { %s2101_s27 = sshll.u32 %s244_s26, 2 }
  0x39   : > { %s2823_s0 = scalar_lea.vmem %s3288_s1, %s2101_s27 }
  0x3a   : > { %v263_v20 = vld [vmem:[%s2823_s0] sm:$0xf]  ;;  %v265_v21 = vld [vmem:[%s2823_s0 + $0xc] sm:$0xf]  ;;  %v267_v22 = vld [vmem:[%s2823_s0 + $0x18] sm:$0xf] }
  0x3b   : > { %264 = vst [vmem:[%s2828_s6] sm:$0xf] %v263_v20  ;;  %266 = vst [vmem:[%s2828_s6 + $0x4] sm:$0xf] %v265_v21  ;;  %v269_v23 = vld [vmem:[%s2823_s0 + $0x24] sm:$0xf] }
  0x3c   : > { %268 = vst [vmem:[%s2828_s6 + $0x8] sm:$0xf] %v267_v22  ;;  %v271_v24 = vld [vmem:[%s2823_s0 + $0x30] sm:$0xf]  ;;  %v273_v25 = vld [vmem:[%s2823_s0 + $0x3c] sm:$0xf] }
  0x3d   : > { %270 = vst [vmem:[%s2828_s6 + $0xc] sm:$0xf] %v269_v23  ;;  %272 = vst [vmem:[%s2828_s6 + $0x10] sm:$0xf] %v271_v24  ;;  %v275_v26 = vld [vmem:[%s2823_s0 + $0x48] sm:$0xf] }
  0x3e   : > { %274 = vst [vmem:[%s2828_s6 + $0x14] sm:$0xf] %v273_v25  ;;  %v277_v27 = vld [vmem:[%s2823_s0 + $0x54] sm:$0xf]  ;;  %v279_v28 = vld [vmem:[%s2823_s0 + $0x60] sm:$0xf] }
  0x3f   : > { %276 = vst [vmem:[%s2828_s6 + $0x18] sm:$0xf] %v275_v26  ;;  %278 = vst [vmem:[%s2828_s6 + $0x1c] sm:$0xf] %v277_v27  ;;  %v281_v29 = vld [vmem:[%s2823_s0 + $0x6c] sm:$0xf] }
  0x40   : > { %280 = vst [vmem:[%s2828_s6 + $0x20] sm:$0xf] %v279_v28  ;;  %v283_v30 = vld [vmem:[%s2823_s0 + $0x78] sm:$0xf]  ;;  %v285_v31 = vld [vmem:[%s2823_s0 + $0x84] sm:$0xf] }
  0x41   : > { %282 = vst [vmem:[%s2828_s6 + $0x24] sm:$0xf] %v281_v29  ;;  %284 = vst [vmem:[%s2828_s6 + $0x28] sm:$0xf] %v283_v30  ;;  %v287_v32 = vld [vmem:[%s2823_s0 + $0x90] sm:$0xf] }
  0x42   : > { %286 = vst [vmem:[%s2828_s6 + $0x2c] sm:$0xf] %v285_v31  ;;  %v289_v33 = vld [vmem:[%s2823_s0 + $0x9c] sm:$0xf]  ;;  %v291_v34 = vld [vmem:[%s2823_s0 + $0xa8] sm:$0xf] }
  0x43   : > { %288 = vst [vmem:[%s2828_s6 + $0x30] sm:$0xf] %v287_v32  ;;  %290 = vst [vmem:[%s2828_s6 + $0x34] sm:$0xf] %v289_v33  ;;  %v293_v35 = vld [vmem:[%s2823_s0 + $0xb4] sm:$0xf] }
  0x44   : > { %292 = vst [vmem:[%s2828_s6 + $0x38] sm:$0xf] %v291_v34  ;;  %v295_v36 = vld [vmem:[%s2823_s0 + $0xc0] sm:$0xf]  ;;  %v297_v37 = vld [vmem:[%s2823_s0 + $0xcc] sm:$0xf] }
  0x45   : > { %294 = vst [vmem:[%s2828_s6 + $0x3c] sm:$0xf] %v293_v35  ;;  %296 = vst [vmem:[%s2828_s6 + $0x40] sm:$0xf] %v295_v36  ;;  %v299_v38 = vld [vmem:[%s2823_s0 + $0xd8] sm:$0xf] }
  0x46   : > { %298 = vst [vmem:[%s2828_s6 + $0x44] sm:$0xf] %v297_v37  ;;  %v301_v39 = vld [vmem:[%s2823_s0 + $0xe4] sm:$0xf]  ;;  %v303_v40 = vld [vmem:[%s2823_s0 + $0xf0] sm:$0xf] }
  0x47   : > { %300 = vst [vmem:[%s2828_s6 + $0x48] sm:$0xf] %v299_v38  ;;  %302 = vst [vmem:[%s2828_s6 + $0x4c] sm:$0xf] %v301_v39  ;;  %v305_v41 = vld [vmem:[%s2823_s0 + $0xfc] sm:$0xf] }
  0x48   : > { %304 = vst [vmem:[%s2828_s6 + $0x50] sm:$0xf] %v303_v40  ;;  %v307_v42 = vld [vmem:[%s2823_s0 + $0x108] sm:$0xf]  ;;  %v309_v43 = vld [vmem:[%s2823_s0 + $0x114] sm:$0xf] }
  0x49   : > { %306 = vst [vmem:[%s2828_s6 + $0x54] sm:$0xf] %v305_v41  ;;  %308 = vst [vmem:[%s2828_s6 + $0x58] sm:$0xf] %v307_v42  ;;  %v311_v44 = vld [vmem:[%s2823_s0 + $0x120] sm:$0xf] }
  0x4a   : > { %310 = vst [vmem:[%s2828_s6 + $0x5c] sm:$0xf] %v309_v43  ;;  %v313_v45 = vld [vmem:[%s2823_s0 + $0x12c] sm:$0xf]  ;;  %v315_v46 = vld [vmem:[%s2823_s0 + $0x138] sm:$0xf] }
  0x4b   : > { %312 = vst [vmem:[%s2828_s6 + $0x60] sm:$0xf] %v311_v44  ;;  %314 = vst [vmem:[%s2828_s6 + $0x64] sm:$0xf] %v313_v45  ;;  %v317_v47 = vld [vmem:[%s2823_s0 + $0x144] sm:$0xf] }
  0x4c   : > { %316 = vst [vmem:[%s2828_s6 + $0x68] sm:$0xf] %v315_v46  ;;  %v319_v48 = vld [vmem:[%s2823_s0 + $0x150] sm:$0xf]  ;;  %v321_v49 = vld [vmem:[%s2823_s0 + $0x15c] sm:$0xf] }
  0x4d   : > { %318 = vst [vmem:[%s2828_s6 + $0x6c] sm:$0xf] %v317_v47  ;;  %320 = vst [vmem:[%s2828_s6 + $0x70] sm:$0xf] %v319_v48  ;;  %v323_v50 = vld [vmem:[%s2823_s0 + $0x168] sm:$0xf] }
  0x4e   : > { %322 = vst [vmem:[%s2828_s6 + $0x74] sm:$0xf] %v321_v49  ;;  %v325_v51 = vld [vmem:[%s2823_s0 + $0x174] sm:$0xf]  ;;  %v327_v52 = vld [vmem:[%s2823_s0 + $0x180] sm:$0xf] }
  0x4f   : > { %324 = vst [vmem:[%s2828_s6 + $0x78] sm:$0xf] %v323_v50  ;;  %326 = vst [vmem:[%s2828_s6 + $0x7c] sm:$0xf] %v325_v51  ;;  %v329_v53 = vld [vmem:[%s2823_s0 + $0x18c] sm:$0xf] }
  0x50   : > { %328 = vst [vmem:[%s2828_s6 + $0x80] sm:$0xf] %v327_v52  ;;  %v331_v54 = vld [vmem:[%s2823_s0 + $0x198] sm:$0xf]  ;;  %v333_v55 = vld [vmem:[%s2823_s0 + $0x1a4] sm:$0xf] }
  0x51   : > { %330 = vst [vmem:[%s2828_s6 + $0x84] sm:$0xf] %v329_v53  ;;  %332 = vst [vmem:[%s2828_s6 + $0x88] sm:$0xf] %v331_v54  ;;  %v335_v56 = vld [vmem:[%s2823_s0 + $0x1b0] sm:$0xf] }
  0x52   : > { %334 = vst [vmem:[%s2828_s6 + $0x8c] sm:$0xf] %v333_v55  ;;  %v337_v57 = vld [vmem:[%s2823_s0 + $0x1bc] sm:$0xf]  ;;  %v339_v58 = vld [vmem:[%s2823_s0 + $0x1c8] sm:$0xf] }
  0x53   : > { %336 = vst [vmem:[%s2828_s6 + $0x90] sm:$0xf] %v335_v56  ;;  %338 = vst [vmem:[%s2828_s6 + $0x94] sm:$0xf] %v337_v57  ;;  %v341_v59 = vld [vmem:[%s2823_s0 + $0x1d4] sm:$0xf] }
  0x54   : > { %340 = vst [vmem:[%s2828_s6 + $0x98] sm:$0xf] %v339_v58  ;;  %v343_v60 = vld [vmem:[%s2823_s0 + $0x1e0] sm:$0xf]  ;;  %v345_v61 = vld [vmem:[%s2823_s0 + $0x1ec] sm:$0xf] }
  0x55   : > { %342 = vst [vmem:[%s2828_s6 + $0x9c] sm:$0xf] %v341_v59  ;;  %344 = vst [vmem:[%s2828_s6 + $0xa0] sm:$0xf] %v343_v60  ;;  %v347_v62 = vld [vmem:[%s2823_s0 + $0x1f8] sm:$0xf] }
  0x56   : > { %346 = vst [vmem:[%s2828_s6 + $0xa4] sm:$0xf] %v345_v61  ;;  %v349_v63 = vld [vmem:[%s2823_s0 + $0x204] sm:$0xf]  ;;  %v351_v0 = vld [vmem:[%s2823_s0 + $0x210] sm:$0xf] }
  0x57   : > { %348 = vst [vmem:[%s2828_s6 + $0xa8] sm:$0xf] %v347_v62  ;;  %350 = vst [vmem:[%s2828_s6 + $0xac] sm:$0xf] %v349_v63  ;;  %v353_v1 = vld [vmem:[%s2823_s0 + $0x21c] sm:$0xf] }
  0x58   : > { %352 = vst [vmem:[%s2828_s6 + $0xb0] sm:$0xf] %v351_v0  ;;  %v355_v2 = vld [vmem:[%s2823_s0 + $0x228] sm:$0xf]  ;;  %v357_v3 = vld [vmem:[%s2823_s0 + $0x234] sm:$0xf] }
  0x59   : > { %354 = vst [vmem:[%s2828_s6 + $0xb4] sm:$0xf] %v353_v1  ;;  %356 = vst [vmem:[%s2828_s6 + $0xb8] sm:$0xf] %v355_v2  ;;  %v359_v4 = vld [vmem:[%s2823_s0 + $0x240] sm:$0xf] }
  0x5a   : > { %358 = vst [vmem:[%s2828_s6 + $0xbc] sm:$0xf] %v357_v3  ;;  %v361_v5 = vld [vmem:[%s2823_s0 + $0x24c] sm:$0xf]  ;;  %v363_v6 = vld [vmem:[%s2823_s0 + $0x258] sm:$0xf] }
  0x5b   : > { %360 = vst [vmem:[%s2828_s6 + $0xc0] sm:$0xf] %v359_v4  ;;  %362 = vst [vmem:[%s2828_s6 + $0xc4] sm:$0xf] %v361_v5  ;;  %v365_v7 = vld [vmem:[%s2823_s0 + $0x264] sm:$0xf] }
  0x5c   : > { %364 = vst [vmem:[%s2828_s6 + $0xc8] sm:$0xf] %v363_v6  ;;  %v367_v8 = vld [vmem:[%s2823_s0 + $0x270] sm:$0xf]  ;;  %v369_v9 = vld [vmem:[%s2823_s0 + $0x27c] sm:$0xf] }
  0x5d   : > { %366 = vst [vmem:[%s2828_s6 + $0xcc] sm:$0xf] %v365_v7  ;;  %368 = vst [vmem:[%s2828_s6 + $0xd0] sm:$0xf] %v367_v8  ;;  %v371_v10 = vld [vmem:[%s2823_s0 + $0x288] sm:$0xf] }
  0x5e   : > { %370 = vst [vmem:[%s2828_s6 + $0xd4] sm:$0xf] %v369_v9  ;;  %v373_v11 = vld [vmem:[%s2823_s0 + $0x294] sm:$0xf]  ;;  %v375_v12 = vld [vmem:[%s2823_s0 + $0x2a0] sm:$0xf] }
  0x5f   : > { %372 = vst [vmem:[%s2828_s6 + $0xd8] sm:$0xf] %v371_v10  ;;  %374 = vst [vmem:[%s2828_s6 + $0xdc] sm:$0xf] %v373_v11  ;;  %v377_v13 = vld [vmem:[%s2823_s0 + $0x2ac] sm:$0xf] }
  0x60   : > { %376 = vst [vmem:[%s2828_s6 + $0xe0] sm:$0xf] %v375_v12  ;;  %v379_v14 = vld [vmem:[%s2823_s0 + $0x2b8] sm:$0xf]  ;;  %v381_v15 = vld [vmem:[%s2823_s0 + $0x2c4] sm:$0xf] }
  0x61   : > { %378 = vst [vmem:[%s2828_s6 + $0xe4] sm:$0xf] %v377_v13  ;;  %380 = vst [vmem:[%s2828_s6 + $0xe8] sm:$0xf] %v379_v14  ;;  %v383_v16 = vld [vmem:[%s2823_s0 + $0x2d0] sm:$0xf] }
  0x62   : > { %382 = vst [vmem:[%s2828_s6 + $0xec] sm:$0xf] %v381_v15  ;;  %v385_v17 = vld [vmem:[%s2823_s0 + $0x2dc] sm:$0xf]  ;;  %v387_v18 = vld [vmem:[%s2823_s0 + $0x2e8] sm:$0xf] }
  0x63   : > { %384 = vst [vmem:[%s2828_s6 + $0xf0] sm:$0xf] %v383_v16  ;;  %386 = vst [vmem:[%s2828_s6 + $0xf4] sm:$0xf] %v385_v17  ;;  %v389_v19 = vld [vmem:[%s2823_s0 + $0x2f4] sm:$0xf] }
  0x64   : > { %388 = vst [vmem:[%s2828_s6 + $0xf8] sm:$0xf] %v387_v18  ;;  %v391_v20 = vld [vmem:[%s2823_s0 + $0x300] sm:$0xf]  ;;  %v393_v21 = vld [vmem:[%s2823_s0 + $0x30c] sm:$0xf] }
  0x65   : > { %390 = vst [vmem:[%s2828_s6 + $0xfc] sm:$0xf] %v389_v19  ;;  %392 = vst [vmem:[%s2828_s6 + $0x100] sm:$0xf] %v391_v20  ;;  %v395_v22 = vld [vmem:[%s2823_s0 + $0x318] sm:$0xf] }
  0x66   : > { %394 = vst [vmem:[%s2828_s6 + $0x104] sm:$0xf] %v393_v21  ;;  %v397_v23 = vld [vmem:[%s2823_s0 + $0x324] sm:$0xf]  ;;  %v399_v24 = vld [vmem:[%s2823_s0 + $0x330] sm:$0xf] }
  0x67   : > { %396 = vst [vmem:[%s2828_s6 + $0x108] sm:$0xf] %v395_v22  ;;  %398 = vst [vmem:[%s2828_s6 + $0x10c] sm:$0xf] %v397_v23  ;;  %v401_v25 = vld [vmem:[%s2823_s0 + $0x33c] sm:$0xf] }
  0x68   : > { %400 = vst [vmem:[%s2828_s6 + $0x110] sm:$0xf] %v399_v24  ;;  %v403_v26 = vld [vmem:[%s2823_s0 + $0x348] sm:$0xf]  ;;  %v405_v27 = vld [vmem:[%s2823_s0 + $0x354] sm:$0xf] }
  0x69   : > { %402 = vst [vmem:[%s2828_s6 + $0x114] sm:$0xf] %v401_v25  ;;  %404 = vst [vmem:[%s2828_s6 + $0x118] sm:$0xf] %v403_v26  ;;  %v407_v28 = vld [vmem:[%s2823_s0 + $0x360] sm:$0xf] }
  0x6a   : > { %406 = vst [vmem:[%s2828_s6 + $0x11c] sm:$0xf] %v405_v27  ;;  %v409_v29 = vld [vmem:[%s2823_s0 + $0x36c] sm:$0xf]  ;;  %v411_v30 = vld [vmem:[%s2823_s0 + $0x378] sm:$0xf] }
  0x6b   : > { %408 = vst [vmem:[%s2828_s6 + $0x120] sm:$0xf] %v407_v28  ;;  %410 = vst [vmem:[%s2828_s6 + $0x124] sm:$0xf] %v409_v29  ;;  %v413_v31 = vld [vmem:[%s2823_s0 + $0x384] sm:$0xf] }
  0x6c   : > { %412 = vst [vmem:[%s2828_s6 + $0x128] sm:$0xf] %v411_v30  ;;  %v415_v32 = vld [vmem:[%s2823_s0 + $0x390] sm:$0xf]  ;;  %v417_v33 = vld [vmem:[%s2823_s0 + $0x39c] sm:$0xf] }
  0x6d   : > { %414 = vst [vmem:[%s2828_s6 + $0x12c] sm:$0xf] %v413_v31  ;;  %416 = vst [vmem:[%s2828_s6 + $0x130] sm:$0xf] %v415_v32  ;;  %v419_v34 = vld [vmem:[%s2823_s0 + $0x3a8] sm:$0xf] }
  0x6e   : > { %418 = vst [vmem:[%s2828_s6 + $0x134] sm:$0xf] %v417_v33  ;;  %v421_v35 = vld [vmem:[%s2823_s0 + $0x3b4] sm:$0xf]  ;;  %v423_v36 = vld [vmem:[%s2823_s0 + $0x3c0] sm:$0xf] }
  0x6f   : > { %420 = vst [vmem:[%s2828_s6 + $0x138] sm:$0xf] %v419_v34  ;;  %422 = vst [vmem:[%s2828_s6 + $0x13c] sm:$0xf] %v421_v35  ;;  %v425_v37 = vld [vmem:[%s2823_s0 + $0x3cc] sm:$0xf] }
  0x70   : > { %424 = vst [vmem:[%s2828_s6 + $0x140] sm:$0xf] %v423_v36  ;;  %v427_v38 = vld [vmem:[%s2823_s0 + $0x3d8] sm:$0xf]  ;;  %v429_v39 = vld [vmem:[%s2823_s0 + $0x3e4] sm:$0xf] }
  0x71   : > { %426 = vst [vmem:[%s2828_s6 + $0x144] sm:$0xf] %v425_v37  ;;  %428 = vst [vmem:[%s2828_s6 + $0x148] sm:$0xf] %v427_v38  ;;  %v431_v40 = vld [vmem:[%s2823_s0 + $0x3f0] sm:$0xf] }
  0x72   : > { %430 = vst [vmem:[%s2828_s6 + $0x14c] sm:$0xf] %v429_v39  ;;  %v433_v41 = vld [vmem:[%s2823_s0 + $0x3fc] sm:$0xf]  ;;  %v435_v42 = vld [vmem:[%s2823_s0 + $0x408] sm:$0xf] }
  0x73   : > { %432 = vst [vmem:[%s2828_s6 + $0x150] sm:$0xf] %v431_v40  ;;  %434 = vst [vmem:[%s2828_s6 + $0x154] sm:$0xf] %v433_v41  ;;  %v437_v43 = vld [vmem:[%s2823_s0 + $0x414] sm:$0xf] }
  0x74   : > { %436 = vst [vmem:[%s2828_s6 + $0x158] sm:$0xf] %v435_v42  ;;  %v439_v44 = vld [vmem:[%s2823_s0 + $0x420] sm:$0xf]  ;;  %v441_v45 = vld [vmem:[%s2823_s0 + $0x42c] sm:$0xf] }
  0x75   : > { %438 = vst [vmem:[%s2828_s6 + $0x15c] sm:$0xf] %v437_v43  ;;  %440 = vst [vmem:[%s2828_s6 + $0x160] sm:$0xf] %v439_v44  ;;  %v443_v46 = vld [vmem:[%s2823_s0 + $0x438] sm:$0xf] }
  0x76   : > { %442 = vst [vmem:[%s2828_s6 + $0x164] sm:$0xf] %v441_v45  ;;  %v445_v47 = vld [vmem:[%s2823_s0 + $0x444] sm:$0xf]  ;;  %v447_v48 = vld [vmem:[%s2823_s0 + $0x450] sm:$0xf] }
  0x77   : > { %444 = vst [vmem:[%s2828_s6 + $0x168] sm:$0xf] %v443_v46  ;;  %446 = vst [vmem:[%s2828_s6 + $0x16c] sm:$0xf] %v445_v47  ;;  %v449_v49 = vld [vmem:[%s2823_s0 + $0x45c] sm:$0xf] }
  0x78   : > { %448 = vst [vmem:[%s2828_s6 + $0x170] sm:$0xf] %v447_v48  ;;  %v451_v50 = vld [vmem:[%s2823_s0 + $0x468] sm:$0xf]  ;;  %v453_v51 = vld [vmem:[%s2823_s0 + $0x474] sm:$0xf] }
  0x79   : > { %450 = vst [vmem:[%s2828_s6 + $0x174] sm:$0xf] %v449_v49  ;;  %452 = vst [vmem:[%s2828_s6 + $0x178] sm:$0xf] %v451_v50  ;;  %v455_v52 = vld [vmem:[%s2823_s0 + $0x480] sm:$0xf] }
  0x7a   : > { %454 = vst [vmem:[%s2828_s6 + $0x17c] sm:$0xf] %v453_v51  ;;  %v457_v53 = vld [vmem:[%s2823_s0 + $0x48c] sm:$0xf]  ;;  %v459_v54 = vld [vmem:[%s2823_s0 + $0x498] sm:$0xf] }
  0x7b   : > { %456 = vst [vmem:[%s2828_s6 + $0x180] sm:$0xf] %v455_v52  ;;  %458 = vst [vmem:[%s2828_s6 + $0x184] sm:$0xf] %v457_v53  ;;  %v461_v55 = vld [vmem:[%s2823_s0 + $0x4a4] sm:$0xf] }
  0x7c   : > { %460 = vst [vmem:[%s2828_s6 + $0x188] sm:$0xf] %v459_v54  ;;  %v463_v56 = vld [vmem:[%s2823_s0 + $0x4b0] sm:$0xf]  ;;  %v465_v57 = vld [vmem:[%s2823_s0 + $0x4bc] sm:$0xf] }
  0x7d   : > { %462 = vst [vmem:[%s2828_s6 + $0x18c] sm:$0xf] %v461_v55  ;;  %464 = vst [vmem:[%s2828_s6 + $0x190] sm:$0xf] %v463_v56  ;;  %v467_v58 = vld [vmem:[%s2823_s0 + $0x4c8] sm:$0xf] }
  0x7e   : > { %466 = vst [vmem:[%s2828_s6 + $0x194] sm:$0xf] %v465_v57  ;;  %v469_v59 = vld [vmem:[%s2823_s0 + $0x4d4] sm:$0xf]  ;;  %v471_v60 = vld [vmem:[%s2823_s0 + $0x4e0] sm:$0xf] }
  0x7f   : > { %468 = vst [vmem:[%s2828_s6 + $0x198] sm:$0xf] %v467_v58  ;;  %470 = vst [vmem:[%s2828_s6 + $0x19c] sm:$0xf] %v469_v59  ;;  %v473_v61 = vld [vmem:[%s2823_s0 + $0x4ec] sm:$0xf] }
  0x80   : > { %472 = vst [vmem:[%s2828_s6 + $0x1a0] sm:$0xf] %v471_v60  ;;  %v475_v62 = vld [vmem:[%s2823_s0 + $0x4f8] sm:$0xf]  ;;  %v477_v63 = vld [vmem:[%s2823_s0 + $0x504] sm:$0xf] }
  0x81   : > { %474 = vst [vmem:[%s2828_s6 + $0x1a4] sm:$0xf] %v473_v61  ;;  %476 = vst [vmem:[%s2828_s6 + $0x1a8] sm:$0xf] %v475_v62  ;;  %v479_v0 = vld [vmem:[%s2823_s0 + $0x510] sm:$0xf] }
  0x82   : > { %478 = vst [vmem:[%s2828_s6 + $0x1ac] sm:$0xf] %v477_v63  ;;  %v481_v1 = vld [vmem:[%s2823_s0 + $0x51c] sm:$0xf]  ;;  %v483_v2 = vld [vmem:[%s2823_s0 + $0x528] sm:$0xf] }
  0x83   : > { %480 = vst [vmem:[%s2828_s6 + $0x1b0] sm:$0xf] %v479_v0  ;;  %482 = vst [vmem:[%s2828_s6 + $0x1b4] sm:$0xf] %v481_v1  ;;  %v485_v3 = vld [vmem:[%s2823_s0 + $0x534] sm:$0xf] }
  0x84   : > { %484 = vst [vmem:[%s2828_s6 + $0x1b8] sm:$0xf] %v483_v2  ;;  %v487_v4 = vld [vmem:[%s2823_s0 + $0x540] sm:$0xf]  ;;  %v489_v5 = vld [vmem:[%s2823_s0 + $0x54c] sm:$0xf] }
  0x85   : > { %486 = vst [vmem:[%s2828_s6 + $0x1bc] sm:$0xf] %v485_v3  ;;  %488 = vst [vmem:[%s2828_s6 + $0x1c0] sm:$0xf] %v487_v4  ;;  %v491_v6 = vld [vmem:[%s2823_s0 + $0x558] sm:$0xf] }
  0x86   : > { %490 = vst [vmem:[%s2828_s6 + $0x1c4] sm:$0xf] %v489_v5  ;;  %v493_v7 = vld [vmem:[%s2823_s0 + $0x564] sm:$0xf]  ;;  %v495_v8 = vld [vmem:[%s2823_s0 + $0x570] sm:$0xf] }
  0x87   : > { %492 = vst [vmem:[%s2828_s6 + $0x1c8] sm:$0xf] %v491_v6  ;;  %494 = vst [vmem:[%s2828_s6 + $0x1cc] sm:$0xf] %v493_v7  ;;  %v497_v9 = vld [vmem:[%s2823_s0 + $0x57c] sm:$0xf] }
  0x88   : > { %496 = vst [vmem:[%s2828_s6 + $0x1d0] sm:$0xf] %v495_v8  ;;  %v499_v10 = vld [vmem:[%s2823_s0 + $0x588] sm:$0xf]  ;;  %v501_v11 = vld [vmem:[%s2823_s0 + $0x594] sm:$0xf] }
  0x89   : > { %498 = vst [vmem:[%s2828_s6 + $0x1d4] sm:$0xf] %v497_v9  ;;  %500 = vst [vmem:[%s2828_s6 + $0x1d8] sm:$0xf] %v499_v10  ;;  %v503_v12 = vld [vmem:[%s2823_s0 + $0x5a0] sm:$0xf] }
  0x8a   : > { %502 = vst [vmem:[%s2828_s6 + $0x1dc] sm:$0xf] %v501_v11  ;;  %v505_v13 = vld [vmem:[%s2823_s0 + $0x5ac] sm:$0xf]  ;;  %v507_v14 = vld [vmem:[%s2823_s0 + $0x5b8] sm:$0xf] }
  0x8b   : > { %504 = vst [vmem:[%s2828_s6 + $0x1e0] sm:$0xf] %v503_v12  ;;  %506 = vst [vmem:[%s2828_s6 + $0x1e4] sm:$0xf] %v505_v13  ;;  %v509_v15 = vld [vmem:[%s2823_s0 + $0x5c4] sm:$0xf] }
  0x8c   : > { %508 = vst [vmem:[%s2828_s6 + $0x1e8] sm:$0xf] %v507_v14  ;;  %v511_v16 = vld [vmem:[%s2823_s0 + $0x5d0] sm:$0xf]  ;;  %v513_v17 = vld [vmem:[%s2823_s0 + $0x5dc] sm:$0xf] }
  0x8d   : > { %510 = vst [vmem:[%s2828_s6 + $0x1ec] sm:$0xf] %v509_v15  ;;  %512 = vst [vmem:[%s2828_s6 + $0x1f0] sm:$0xf] %v511_v16  ;;  %v515_v18 = vld [vmem:[%s2823_s0 + $0x5e8] sm:$0xf] }
  0x8e   : > { %514 = vst [vmem:[%s2828_s6 + $0x1f4] sm:$0xf] %v513_v17  ;;  %v517_v19 = vld [vmem:[%s2823_s0 + $0x5f4] sm:$0xf]  ;;  %v519_v20 = vld [vmem:[%s2823_s0 + $0x600] sm:$0xf] }
  0x8f   : > { %516 = vst [vmem:[%s2828_s6 + $0x1f8] sm:$0xf] %v515_v18  ;;  %518 = vst [vmem:[%s2828_s6 + $0x1fc] sm:$0xf] %v517_v19  ;;  %v521_v21 = vld [vmem:[%s2823_s0 + $0x60c] sm:$0xf] }
  0x90   : > { %520 = vst [vmem:[%s2828_s6 + $0x200] sm:$0xf] %v519_v20  ;;  %v523_v22 = vld [vmem:[%s2823_s0 + $0x618] sm:$0xf]  ;;  %v525_v23 = vld [vmem:[%s2823_s0 + $0x624] sm:$0xf] }
  0x91   : > { %522 = vst [vmem:[%s2828_s6 + $0x204] sm:$0xf] %v521_v21  ;;  %524 = vst [vmem:[%s2828_s6 + $0x208] sm:$0xf] %v523_v22  ;;  %v527_v24 = vld [vmem:[%s2823_s0 + $0x630] sm:$0xf] }
  0x92   : > { %526 = vst [vmem:[%s2828_s6 + $0x20c] sm:$0xf] %v525_v23  ;;  %v529_v25 = vld [vmem:[%s2823_s0 + $0x63c] sm:$0xf]  ;;  %v531_v26 = vld [vmem:[%s2823_s0 + $0x648] sm:$0xf] }
  0x93   : > { %528 = vst [vmem:[%s2828_s6 + $0x210] sm:$0xf] %v527_v24  ;;  %530 = vst [vmem:[%s2828_s6 + $0x214] sm:$0xf] %v529_v25  ;;  %v533_v27 = vld [vmem:[%s2823_s0 + $0x654] sm:$0xf] }
  0x94   : > { %532 = vst [vmem:[%s2828_s6 + $0x218] sm:$0xf] %v531_v26  ;;  %v535_v28 = vld [vmem:[%s2823_s0 + $0x660] sm:$0xf]  ;;  %v537_v29 = vld [vmem:[%s2823_s0 + $0x66c] sm:$0xf] }
  0x95   : > { %534 = vst [vmem:[%s2828_s6 + $0x21c] sm:$0xf] %v533_v27  ;;  %536 = vst [vmem:[%s2828_s6 + $0x220] sm:$0xf] %v535_v28  ;;  %v539_v30 = vld [vmem:[%s2823_s0 + $0x678] sm:$0xf] }
  0x96   : > { %538 = vst [vmem:[%s2828_s6 + $0x224] sm:$0xf] %v537_v29  ;;  %v541_v31 = vld [vmem:[%s2823_s0 + $0x684] sm:$0xf]  ;;  %v543_v32 = vld [vmem:[%s2823_s0 + $0x690] sm:$0xf] }
  0x97   : > { %540 = vst [vmem:[%s2828_s6 + $0x228] sm:$0xf] %v539_v30  ;;  %542 = vst [vmem:[%s2828_s6 + $0x22c] sm:$0xf] %v541_v31  ;;  %v545_v33 = vld [vmem:[%s2823_s0 + $0x69c] sm:$0xf] }
  0x98   : > { %544 = vst [vmem:[%s2828_s6 + $0x230] sm:$0xf] %v543_v32  ;;  %v547_v34 = vld [vmem:[%s2823_s0 + $0x6a8] sm:$0xf]  ;;  %v549_v35 = vld [vmem:[%s2823_s0 + $0x6b4] sm:$0xf] }
  0x99   : > { %546 = vst [vmem:[%s2828_s6 + $0x234] sm:$0xf] %v545_v33  ;;  %548 = vst [vmem:[%s2828_s6 + $0x238] sm:$0xf] %v547_v34 }
  0x9a   : > { %550 = vst [vmem:[%s2828_s6 + $0x23c] sm:$0xf] %v549_v35 }
  0x9b PF: > { %p2102_p0 = scmp.ge.s32.totalorder %s2642_s22, 1  ;;  %p867_p1 = scmp.lt.s32.totalorder %s2642_s22, 10 }
  0x9d   : > { %p868_p2 = pnand %p2102_p0, %p867_p1 }
  0x9e   : > { %s874_s5 = sand.u32 (!%p868_p2), 1, %s2618_s16   ;;  %s881_s23 = sand.u32 (!%p868_p2), 1, %s2610_s14  }
  0x9f   : > { %871 = sbr.rel (%p868_p2) target bundleno = 497 (0x1f1), region = 91  ;;  %s907_s0 = sand.u32 (!%p868_p2), 1, %s2602_s12  }
  0xa0   : > { %s2366_s28 = smul.u32 (!%p868_p2), 144, %s874_s5  ;;  %s2103_s11 = sshll.u32 (!%p868_p2), %s907_s0, 4 }
  0xa1   : > { %s2367_s7 = smul.u32 (!%p868_p2), 576, %s881_s23  ;;  %p913_p3 = scmp.lt.s32.totalorder (!%p868_p2), %s2630_s19, 2 }
  0xa2   : > { %s3128_s6 = scalar_lea.vmem (!%p868_p2), [#allocation3], %s2366_s28  ;;  %s3132_s25 = scalar_lea.vmem (!%p868_p2), [#allocation5], %s2103_s11 }
  0xa3   : > { %s3130_s1 = scalar_lea.vmem (!%p868_p2), [#allocation4], %s2367_s7  ;;  %p2104_p4 = scmp.ne.s32.totalorder (!%p868_p2), %s2626_s18, 0 }
  0xa4   : > { %s3122_s26 = scalar_select %p913_p3, %s2630_s19, 2 }
  0xa5   : > { %921 = sbr.rel (%p2104_p4) target bundleno = 173 (0xad), region = 103 }
  0xa6   : > { %s915_s4 = scalar_lea.vmem %s3278_s2, %s3122_s26 }
  0xaa   : > { %v2644_v36 = vmov 0.0  }
  0xab   : > { %922 = vst [vmem:[#allocation2 + $0x10] sm:$0xff] %v2644_v36  ;;  %923 = vst [vmem:[#allocation2] sm:$0xff] %v2644_v36 }
  0xac   : > { %924 = vst [vmem:[#allocation2 + $0x18] sm:$0xff] %v2644_v36  ;;  %925 = vst [vmem:[#allocation2 + $0x8] sm:$0xff] %v2644_v36 }
  0xad PF: > { %v2458_v37 = vld [vmem:[%s3130_s1 + $0x78] sm:$0xff]   ;;  %v2462_v41 = vld [vmem:[%s3130_s1 + $0x70] sm:$0xff]   ;;  %v2466_v45 = vld [vmem:[%s3130_s1 + $0x68] sm:$0xff]   ;;  %p2195_p5 = scmp.ne.s32.totalorder %s2626_s18, 2 }
  0xae   : > { %v2459_v38 = vld [vmem:[%s3130_s1 + $0xf8] sm:$0xff]   ;;  %2221 = vmatprep.subr.bf16.mxu0 %v2458_v37  ;;  %v2463_v42 = vld [vmem:[%s3130_s1 + $0xf0] sm:$0xff]   ;;  %v2467_v46 = vld [vmem:[%s3130_s1 + $0xe8] sm:$0xff]  }
  0xaf   : > { %v2460_v39 = vld [vmem:[%s3130_s1 + $0x38] sm:$0xff]   ;;  %2249 = vmatprep.subr.bf16.mxu1 %v2459_v38  ;;  %v2464_v43 = vld [vmem:[%s3130_s1 + $0x30] sm:$0xff]   ;;  %v2468_v47 = vld [vmem:[%s3130_s1 + $0x28] sm:$0xff]  }
  0xb0   : > { %v2461_v40 = vld [vmem:[%s3130_s1 + $0xb8] sm:$0xff]   ;;  %2222 = vmatpush3.bf16.msra.mxu0 %v2460_v39  ;;  %v2465_v44 = vld [vmem:[%s3130_s1 + $0xb0] sm:$0xff]   ;;  %v2469_v48 = vld [vmem:[%s3130_s1 + $0xa8] sm:$0xff]  }
  0xb1   : > { %2250 = vmatpush3.bf16.msra.mxu1 %v2461_v40  ;;  %2223 = vmatprep.subr.bf16.mxu0 %v2462_v41  ;;  %v2470_v49 = vld [vmem:[%s3130_s1 + $0x60] sm:$0xff]   ;;  %v2474_v53 = vld [vmem:[%s3130_s1 + $0x58] sm:$0xff]   ;;  %v2478_v57 = vld [vmem:[%s3130_s1 + $0x50] sm:$0xff]  }
  0xb2   : > { %2251 = vmatprep.subr.bf16.mxu1 %v2463_v42  ;;  %v2471_v50 = vld [vmem:[%s3130_s1 + $0xe0] sm:$0xff]   ;;  %v2475_v54 = vld [vmem:[%s3130_s1 + $0xd8] sm:$0xff]   ;;  %v2479_v58 = vld [vmem:[%s3130_s1 + $0xd0] sm:$0xff]  }
  0xb3   : > { %v2472_v51 = vld [vmem:[%s3130_s1 + $0x20] sm:$0xff]   ;;  %v2476_v55 = vld [vmem:[%s3130_s1 + $0x18] sm:$0xff]   ;;  %v2480_v59 = vld [vmem:[%s3130_s1 + $0x10] sm:$0xff]  }
  0xb4   : > { %2224 = vmatpush3.bf16.msra.mxu0 %v2464_v43  ;;  %v2473_v52 = vld [vmem:[%s3130_s1 + $0xa0] sm:$0xff]   ;;  %v2477_v56 = vld [vmem:[%s3130_s1 + $0x98] sm:$0xff]   ;;  %v2481_v60 = vld [vmem:[%s3130_s1 + $0x90] sm:$0xff]  }
  0xb5   : > { %2252 = vmatpush3.bf16.msra.mxu1 %v2465_v44  ;;  %2225 = vmatprep.subr.bf16.mxu0 %v2466_v45  ;;  %v2482_v61 = vld [vmem:[%s3130_s1 + $0x48] sm:$0xff]   ;;  %v2486_v1 = vld [vmem:[%s3130_s1 + $0x40] sm:$0xff]   ;;  %v2496_v9 = vld [vmem:[%s3130_s1 + $0x178] sm:$0xff]  }
  0xb6   : > { %2253 = vmatprep.subr.bf16.mxu1 %v2467_v46  ;;  %v2483_v62 = vld [vmem:[%s3130_s1 + $0xc8] sm:$0xff]   ;;  %v2487_v2 = vld [vmem:[%s3130_s1 + $0xc0] sm:$0xff]   ;;  %v2497_v10 = vld [vmem:[%s3130_s1 + $0x138] sm:$0xff]  }
  0xb7   : > { %v2484_v63 = vld [vmem:[%s3130_s1 + $0x8] sm:$0xff]   ;;  %v2488_v3 = vld [vmem:[%s3130_s1] sm:$0xff]   ;;  %v2498_v11 = vld [vmem:[%s3130_s1 + $0x1f8] sm:$0xff]  }
  0xb8   : > { %2226 = vmatpush3.bf16.msra.mxu0 %v2468_v47  ;;  %v2485_v0 = vld [vmem:[%s3130_s1 + $0x88] sm:$0xff]   ;;  %v2489_v4 = vld [vmem:[%s3130_s1 + $0x80] sm:$0xff]   ;;  %v2499_v12 = vld [vmem:[%s3130_s1 + $0x1b8] sm:$0xff]  }
  0xb9   : > { %2254 = vmatpush3.bf16.msra.mxu1 %v2469_v48  ;;  %2227 = vmatprep.subr.bf16.mxu0 %v2470_v49  ;;  %v2490_v5 = vld [vmem:[%s3128_s6] ss:$36 sps:$4 sm:$0xff]   ;;  %v2493_v7 = vld [vmem:[%s3128_s6 + $0x8] ss:$36 sps:$4 sm:$0xff]   ;;  %v2516_v28 = vld [vmem:[%s3128_s6 + $0x54] ss:$36 sps:$4 sm:$0xff]  }
  0xba   : > { %2255 = vmatprep.subr.bf16.mxu1 %v2471_v50  ;;  %v2492_v6 = vld [vmem:[%s3128_s6 + $0x4] ss:$36 sps:$4 sm:$0xff]   ;;  %v2495_v8 = vld [vmem:[%s3128_s6 + $0xc] ss:$36 sps:$4 sm:$0xff]   ;;  %v2535_v45 = vld [vmem:[%s3128_s6 + $0x14] ss:$36 sps:$4 sm:$0xff]  }
  0xbb   : > { %1650 = vmatprep.mubr.bf16.mxu0 %v2492_v6  ;;  %1699 = vmatprep.mubr.bf16.mxu1 %v2495_v8  ;;  %v2500_v13 = vld [vmem:[%s3130_s1 + $0x170] sm:$0xff]   ;;  %v2504_v17 = vld [vmem:[%s3130_s1 + $0x168] sm:$0xff]   ;;  %v2508_v21 = vld [vmem:[%s3130_s1 + $0x160] sm:$0xff]  }
  0xbc   : > { %2228 = vmatpush3.bf16.msra.mxu0 %v2472_v51  ;;  %v2501_v14 = vld [vmem:[%s3130_s1 + $0x130] sm:$0xff]   ;;  %v2505_v18 = vld [vmem:[%s3130_s1 + $0x128] sm:$0xff]   ;;  %v2509_v22 = vld [vmem:[%s3130_s1 + $0x120] sm:$0xff]  }
  0xbd   : > { %2256 = vmatpush3.bf16.msra.mxu1 %v2473_v52  ;;  %2229 = vmatprep.subr.bf16.mxu0 %v2474_v53  ;;  %v2502_v15 = vld [vmem:[%s3130_s1 + $0x1f0] sm:$0xff]   ;;  %v2506_v19 = vld [vmem:[%s3130_s1 + $0x1e8] sm:$0xff]   ;;  %v2510_v23 = vld [vmem:[%s3130_s1 + $0x1e0] sm:$0xff]  }
  0xbe   : > { %2257 = vmatprep.subr.bf16.mxu1 %v2475_v54  ;;  %v2503_v16 = vld [vmem:[%s3130_s1 + $0x1b0] sm:$0xff]   ;;  %v2507_v20 = vld [vmem:[%s3130_s1 + $0x1a8] sm:$0xff]   ;;  %v2511_v24 = vld [vmem:[%s3130_s1 + $0x1a0] sm:$0xff]  }
  0xbf   : > { %v2512_v25 = vld [vmem:[%s3130_s1 + $0x158] sm:$0xff]   ;;  %v2520_v31 = vld [vmem:[%s3128_s6 + $0x50] ss:$36 sps:$4 sm:$0xff]   ;;  %v2526_v37 = vld [vmem:[%s3130_s1 + $0x148] sm:$0xff]  }
  0xc0   : > { %2230 = vmatpush3.bf16.msra.mxu0 %v2476_v55  ;;  %v2513_v26 = vld [vmem:[%s3130_s1 + $0x118] sm:$0xff]   ;;  %v2522_v33 = vld [vmem:[%s3130_s1 + $0x150] sm:$0xff]   ;;  %v2527_v38 = vld [vmem:[%s3130_s1 + $0x108] sm:$0xff]  }
  0xc1   : > { %2258 = vmatpush3.bf16.msra.mxu1 %v2477_v56  ;;  %2231 = vmatprep.subr.bf16.mxu0 %v2478_v57  ;;  %v2514_v27 = vld [vmem:[%s3128_s6 + $0x4c] ss:$36 sps:$4 sm:$0xff]   ;;  %v2538_v48 = vld [vmem:[%s3128_s6 + $0x18] ss:$36 sps:$4 sm:$0xff]   ;;  %v2546_v54 = vld [vmem:[%s3128_s6 + $0x64] ss:$36 sps:$4 sm:$0xff]  }
  0xc2   : > { %2259 = vmatprep.subr.bf16.mxu1 %v2479_v58  ;;  %v2518_v29 = vld [vmem:[%s3130_s1 + $0x1d8] sm:$0xff]   ;;  %v2523_v34 = vld [vmem:[%s3130_s1 + $0x110] sm:$0xff]   ;;  %v2528_v39 = vld [vmem:[%s3130_s1 + $0x1c8] sm:$0xff]  }
  0xc3   : > { %v2519_v30 = vld [vmem:[%s3128_s6 + $0x48] ss:$36 sps:$4 sm:$0xff]   ;;  %v2524_v35 = vld [vmem:[%s3130_s1 + $0x1d0] sm:$0xff]   ;;  %v2530_v41 = vld [vmem:[%s3130_s1 + $0x140] sm:$0xff]  }
  0xc4   : > { %2232 = vmatpush3.bf16.msra.mxu0 %v2480_v59  ;;  %v2521_v32 = vld [vmem:[%s3130_s1 + $0x198] sm:$0xff]   ;;  %v2525_v36 = vld [vmem:[%s3130_s1 + $0x190] sm:$0xff]   ;;  %v2529_v40 = vld [vmem:[%s3130_s1 + $0x188] sm:$0xff]  }
  0xc5   : > { %2260 = vmatpush3.bf16.msra.mxu1 %v2481_v60  ;;  %2233 = vmatprep.subr.bf16.mxu0 %v2482_v61  ;;  %v2531_v42 = vld [vmem:[%s3130_s1 + $0x100] sm:$0xff]   ;;  %v2537_v47 = vld [vmem:[%s3130_s1 + $0x238] sm:$0xff]   ;;  %v2541_v50 = vld [vmem:[%s3130_s1 + $0x230] sm:$0xff]  }
  0xc6   : > { %2261 = vmatprep.subr.bf16.mxu1 %v2483_v62  ;;  %v2532_v43 = vld [vmem:[%s3130_s1 + $0x1c0] sm:$0xff]   ;;  %v2544_v52 = vld [vmem:[%s3128_s6 + $0x58] ss:$36 sps:$4 sm:$0xff]   ;;  %v2551_v59 = vld [vmem:[%s3130_s1 + $0x210] sm:$0xff]  }
  0xc7   : > { %v2533_v44 = vld [vmem:[%s3128_s6 + $0x10] ss:$36 sps:$4 sm:$0xff]   ;;  %v2540_v49 = vld [vmem:[%s3128_s6 + $0x1c] ss:$36 sps:$4 sm:$0xff]   ;;  %v2555_v62 = vld [vmem:[%s3128_s6 + $0x68] ss:$36 sps:$4 sm:$0xff]  }
  0xc8   : > { %2234 = vmatpush3.bf16.msra.mxu0 %v2484_v63  ;;  %v2536_v46 = vld [vmem:[%s3130_s1 + $0x180] sm:$0xff]   ;;  %v2545_v53 = vld [vmem:[%s3130_s1 + $0x228] sm:$0xff]   ;;  %v2550_v57 = vld [vmem:[%s3130_s1 + $0x218] sm:$0xff]  }
  0xc9   : > { %2262 = vmatpush3.bf16.msra.mxu1 %v2485_v0  ;;  %2235 = vmatprep.subr.bf16.mxu0 %v2486_v1  ;;  %v2542_v51 = vld [vmem:[%s3128_s6 + $0x5c] ss:$36 sps:$4 sm:$0xff]  }
  0xca   : > { %2263 = vmatprep.subr.bf16.mxu1 %v2487_v2  ;;  %v2548_v55 = vld [vmem:[%s3128_s6 + $0x60] ss:$36 sps:$4 sm:$0xff]   ;;  %v2552_v60 = vld [vmem:[%s3130_s1 + $0x208] sm:$0xff]  }
  0xcb   : > { %v2549_v56 = vld [vmem:[%s3130_s1 + $0x220] sm:$0xff]  }
  0xcc   : > { %2236 = vmatpush3.bf16.msra.mxu0 %v2488_v3  ;;  %v2554_v58 = vld [vmem:[%s3128_s6 + $0x20] ss:$36 sps:$4 sm:$0xff]  }
  0xcd   : > { %2264 = vmatpush3.bf16.msra.mxu1 %v2489_v4  ;;  %2277 = vmatprep.subr.bf16.mxu0 %v2496_v9  ;;  %v2553_v61 = vld [vmem:[%s3130_s1 + $0x200] sm:$0xff]  }
  0xce   : > { %2305 = vmatprep.subr.bf16.mxu1 %v2498_v11 }
  0xcf   : > { %1651 = vmatmul.mubr.bf16.vlgmr.msra.gmra.mxu0 %v2490_v5 }
  0xd0   : > { %1700 = vmatmul.mubr.bf16.vlgmr.msra.gmra.mxu1 %v2493_v7  ;;  %2278 = vmatpush3.bf16.msra.mxu0 %v2497_v10 }
  0xd1   : > { %2306 = vmatpush3.bf16.msra.mxu1 %v2499_v12  ;;  %2279 = vmatprep.subr.bf16.mxu0 %v2500_v13 }
  0xd2   : > { %2307 = vmatprep.subr.bf16.mxu1 %v2502_v15  ;;  %1658 = vmatprep.mubr.bf16.mxu0 %v2514_v27 }
  0xd3   : > { %1707 = vmatprep.mubr.bf16.mxu1 %v2516_v28 }
  0xd4   : > { %2280 = vmatpush3.bf16.msra.mxu0 %v2501_v14 }
  0xd5   : > { %2308 = vmatpush3.bf16.msra.mxu1 %v2503_v16  ;;  %2281 = vmatprep.subr.bf16.mxu0 %v2504_v17 }
  0xd6   : > { %2309 = vmatprep.subr.bf16.mxu1 %v2506_v19 }
  0xd7   : > { %1659 = vmatmul.mubr.bf16.gmra.mxu0 %v2519_v30 }
  0xd8   : > { %2282 = vmatpush3.bf16.msra.mxu0 %v2505_v18  ;;  %1708 = vmatmul.mubr.bf16.gmra.mxu1 %v2520_v31 }
  0xd9   : > { %2310 = vmatpush3.bf16.msra.mxu1 %v2507_v20  ;;  %2283 = vmatprep.subr.bf16.mxu0 %v2508_v21 }
  0xda   : > { %2311 = vmatprep.subr.bf16.mxu1 %v2510_v23  ;;  %1748 = vmatprep.mubr.bf16.mxu0 %v2535_v45 }
  0xdb   : > { %1797 = vmatprep.mubr.bf16.mxu1 %v2540_v49 }
  0xdc   : > { %2284 = vmatpush3.bf16.msra.mxu0 %v2509_v22 }
  0xdd   : > { %2312 = vmatpush3.bf16.msra.mxu1 %v2511_v24  ;;  %2285 = vmatprep.subr.bf16.mxu0 %v2512_v25 }
  0xde   : > { %2313 = vmatprep.subr.bf16.mxu1 %v2518_v29 }
  0xe0   : > { %2286 = vmatpush3.bf16.msra.mxu0 %v2513_v26 }
  0xe1   : > { %2314 = vmatpush3.bf16.msra.mxu1 %v2521_v32  ;;  %2287 = vmatprep.subr.bf16.mxu0 %v2522_v33 }
  0xe2   : > { %2315 = vmatprep.subr.bf16.mxu1 %v2524_v35 }
  0xe4   : > { %2288 = vmatpush3.bf16.msra.mxu0 %v2523_v34 }
  0xe5   : > { %2316 = vmatpush3.bf16.msra.mxu1 %v2525_v36  ;;  %2289 = vmatprep.subr.bf16.mxu0 %v2526_v37 }
  0xe6   : > { %2317 = vmatprep.subr.bf16.mxu1 %v2528_v39 }
  0xe8   : > { %2290 = vmatpush3.bf16.msra.mxu0 %v2527_v38 }
  0xe9   : > { %2318 = vmatpush3.bf16.msra.mxu1 %v2529_v40  ;;  %2291 = vmatprep.subr.bf16.mxu0 %v2530_v41 }
  0xea   : > { %2319 = vmatprep.subr.bf16.mxu1 %v2532_v43 }
  0xec   : > { %2292 = vmatpush3.bf16.msra.mxu0 %v2531_v42 }
  0xed   : > { %2320 = vmatpush3.bf16.msra.mxu1 %v2536_v46  ;;  %2343 = vmatprep.subr.bf16.mxu0 %v2537_v47 }
  0xef   : > { %1749 = vmatmul.mubr.bf16.vlgmr.msra.gmra.mxu0 %v2533_v44 }
  0xf0   : > { %2344 = vmatpush3.bf16.msra.mxu0 %v2537_v47  ;;  %1798 = vmatmul.mubr.bf16.vlgmr.msra.gmra.mxu1 %v2538_v48 }
  0xf1   : > { %2345 = vmatprep.subr.bf16.mxu0 %v2541_v50  ;;  %1756 = vmatprep.mubr.bf16.mxu0 %v2542_v51 }
  0xf2   : > { %1805 = vmatprep.mubr.bf16.mxu1 %v2546_v54  ;;  %v928_v54 = vld [vmem:[#allocation2 + $0x18] sm:$0xff] }
  0xf4   : > { %2346 = vmatpush3.bf16.msra.mxu0 %v2541_v50 }
  0xf5   : > { %2347 = vmatprep.subr.bf16.mxu0 %v2545_v53 }
  0xf7   : > { %1757 = vmatmul.mubr.bf16.gmra.mxu0 %v2544_v52 }
  0xf8   : > { %2348 = vmatpush3.bf16.msra.mxu0 %v2545_v53  ;;  %1806 = vmatmul.mubr.bf16.gmra.mxu1 %v2548_v55 }
  0xf9   : > { %2349 = vmatprep.subr.bf16.mxu0 %v2549_v56  ;;  %2359 = vmatprep.mubr.bf16.mxu0 %v2554_v58 }
  0xfc   : > { %2350 = vmatpush3.bf16.msra.mxu0 %v2549_v56 }
  0xfd   : > { %2351 = vmatprep.subr.bf16.mxu0 %v2550_v57 }
 0x100   : > { %2352 = vmatpush3.bf16.msra.mxu0 %v2550_v57 }
 0x101   : > { %2353 = vmatprep.subr.bf16.mxu0 %v2551_v59 }
 0x104   : > { %2354 = vmatpush3.bf16.msra.mxu0 %v2551_v59 }
 0x105   : > { %2355 = vmatprep.subr.bf16.mxu0 %v2552_v60 }
 0x108   : > { %2356 = vmatpush3.bf16.msra.mxu0 %v2552_v60  ;;  %v926_v60 = vld [vmem:[#allocation2 + $0x10] sm:$0xff] }
 0x109   : > { %2357 = vmatprep.subr.bf16.mxu0 %v2553_v61 }
 0x10c   : > { %2358 = vmatpush3.bf16.msra.mxu0 %v2553_v61 }
 0x10f   : > { %2360 = vmatmul.mubr.bf16.vlgmr.msra.gmra.mxu0 %v2555_v62 }
 0x18f   : > { %v2237_v63 = vpop.f32.mrf.mxu0 }
 0x190   : > { %v2265_v0 = vpop.f32.mrf.mxu1 }
 0x191   : > { %v2238_v1 = vpop.f32.mrf.mxu0 }
 0x192   : > { %v2266_v2 = vpop.f32.mrf.mxu1  ;;  %v2239_v30 = vadd.f32 %v2238_v1, %v2237_v63  ;;  %v929_v1 = vld [vmem:[#allocation2 + $0x8] sm:$0xff] }
 0x193   : > { %v2240_v3 = vpop.f32.mrf.mxu0  ;;  %v2267_v31 = vadd.f32 %v2266_v2, %v2265_v0 }
 0x194   : > { %v2268_v4 = vpop.f32.mrf.mxu1 }
 0x195   : > { %v2241_v5 = vpop.f32.mrf.mxu0  ;;  %v1702_v39 = vadd.f32 %v2267_v31, %v2239_v30 }
 0x196   : > { %v2269_v7 = vpop.f32.mrf.mxu1  ;;  %v2242_v40 = vadd.f32 %v2241_v5, %v2240_v3 }
 0x197   : > { %v2243_v6 = vpop.f32.mrf.mxu0  ;;  %v2270_v41 = vadd.f32 %v2269_v7, %v2268_v4 }
 0x198   : > { %v2271_v8 = vpop.f32.mrf.mxu1 }
 0x199   : > { %v2244_v9 = vpop.f32.mrf.mxu0  ;;  %v1705_v50 = vadd.f32 %v2270_v41, %v2242_v40 }
 0x19a   : > { %v2272_v10 = vpop.f32.mrf.mxu1  ;;  %v2245_v28 = vadd.f32 %v2244_v9, %v2243_v6  ;;  %v927_v6 = vld [vmem:[#allocation2] sm:$0xff] }
 0x19b   : > { %v2246_v11 = vpop.f32.mrf.mxu0  ;;  %v2273_v29 = vadd.f32 %v2272_v10, %v2271_v8 }
 0x19c   : > { %v2274_v12 = vpop.f32.mrf.mxu1 }
 0x19d   : > { %v2247_v13 = vpop.f32.mrf.mxu0  ;;  %v1710_v35 = vadd.f32 %v2273_v29, %v2245_v28 }
 0x19e   : > { %v2275_v15 = vpop.f32.mrf.mxu1  ;;  %v2248_v36 = vadd.f32 %v2247_v13, %v2246_v11 }
 0x19f   : > { %v2276_v37 = vadd.f32 %v2275_v15, %v2274_v12 }
 0x1a1   : > { %v1713_v46 = vadd.f32 %v2276_v37, %v2248_v36 }
 0x1af   : > { %v2293_v14 = vpop.f32.mrf.mxu0 }
 0x1b0   : > { %v2321_v17 = vpop.f32.mrf.mxu1 }
 0x1b1   : > { %v2294_v16 = vpop.f32.mrf.mxu0 }
 0x1b2   : > { %v2322_v19 = vpop.f32.mrf.mxu1  ;;  %v2295_v38 = vadd.f32 %v2294_v16, %v2293_v14 }
 0x1b3   : > { %v2296_v18 = vpop.f32.mrf.mxu0  ;;  %v2323_v48 = vadd.f32 %v2322_v19, %v2321_v17 }
 0x1b4   : > { %v2324_v21 = vpop.f32.mrf.mxu1  ;;  %v1751_v47 = vadd.f32 %v2295_v38, %v1702_v39 }
 0x1b5   : > { %v2297_v20 = vpop.f32.mrf.mxu0 }
 0x1b6   : > { %v2325_v23 = vpop.f32.mrf.mxu1  ;;  %v2298_v49 = vadd.f32 %v2297_v20, %v2296_v18  ;;  %v1800_v59 = vadd.f32 %v2323_v48, %v1751_v47 }
 0x1b7   : > { %v2299_v22 = vpop.f32.mrf.mxu0  ;;  %v2326_v57 = vadd.f32 %v2325_v23, %v2324_v21 }
 0x1b8   : > { %v2327_v25 = vpop.f32.mrf.mxu1  ;;  %v1754_v56 = vadd.f32 %v2298_v49, %v1705_v50 }
 0x1b9   : > { %v2300_v24 = vpop.f32.mrf.mxu0 }
 0x1ba   : > { %v2328_v27 = vpop.f32.mrf.mxu1  ;;  %v2301_v32 = vadd.f32 %v2300_v24, %v2299_v22  ;;  %v1803_v5 = vadd.f32 %v2326_v57, %v1754_v56 }
 0x1bb   : > { %v2302_v26 = vpop.f32.mrf.mxu0  ;;  %v2329_v43 = vadd.f32 %v2328_v27, %v2327_v25 }
 0x1bc   : > { %v2330_v34 = vpop.f32.mrf.mxu1  ;;  %v1759_v42 = vadd.f32 %v2301_v32, %v1710_v35 }
 0x1bd   : > { %v2303_v33 = vpop.f32.mrf.mxu0 }
 0x1be   : > { %v2304_v44 = vadd.f32 %v2303_v33, %v2302_v26  ;;  %v2331_v45 = vpop.f32.mrf.mxu1  ;;  %v1808_v53 = vadd.f32 %v2329_v43, %v1759_v42 }
 0x1bf   : > { %v2332_v52 = vadd.f32 %v2331_v45, %v2330_v34 }
 0x1c0   : > { %v1762_v51 = vadd.f32 %v2304_v44, %v1713_v46 }
 0x1c2   : > { %v1811_v0 = vadd.f32 %v2332_v52, %v1762_v51 }
 0x1cf   : > { %v2361_v55 = vpop.f32.mrf.mxu0 }
 0x1d0   : > { %v1857_v58 = vadd.f32 %v2361_v55, %v1808_v53 }
 0x1d1   : > { %v1848_v61 = vpop.f32.mrf.mxu0 }
 0x1d2   : > { %v1865_v62 = vadd.f32 %v1857_v58, %v928_v54  ;;  %v1849_v63 = vadd.f32 %v1848_v61, %v1800_v59 }
 0x1d3   : > { %v2362_v2 = vpop.f32.mrf.mxu0 }
 0x1d4   : > { %1869 = vst [vmem:[#allocation2 + $0x18] sm:$0xff] %v1865_v62  ;;  %v1863_v3 = vadd.f32 %v1849_v63, %v926_v60  ;;  %v1860_v4 = vadd.f32 %v2362_v2, %v1811_v0 }
 0x1d5   : > { %v1851_v7 = vpop.f32.mrf.mxu0 }
 0x1d6   : > { %1867 = vst [vmem:[#allocation2 + $0x10] sm:$0xff] %v1863_v3  ;;  %v1866_v8 = vadd.f32 %v1860_v4, %v929_v1  ;;  %v1852_v9 = vadd.f32 %v1851_v7, %v1803_v5  ;;  %1874 = sbr.rel (%p2195_p5) target bundleno = 489 (0x1e9), region = 107 }
 0x1d8   : > { %1870 = vst [vmem:[#allocation2 + $0x8] sm:$0xff] %v1866_v8  ;;  %v1864_v10 = vadd.f32 %v1852_v9, %v927_v6 }
 0x1da   : > { %1868 = vst [vmem:[#allocation2] sm:$0xff] %v1864_v10 }
 0x1db   : > { %v2196_v13 = vld [vmem:[%s915_s4] ss:$0 sm:$0xff]  ;;  %v1877_v16 = vld [vmem:[#allocation2 + $0x18] sm:$0xff] }
 0x1dc   : > { %v1888_v18 = vadd.f32 %v2196_v13, %v1877_v16 }
 0x1dd   : > { %v1875_v11 = vld [vmem:[#allocation2 + $0x10] sm:$0xff] }
 0x1de   : > { %v1886_v14 = vadd.f32 %v2196_v13, %v1875_v11  ;;  %v1892_v22 = vmax.f32 %v1888_v18, 0.0 }
 0x1df   : > { %v1878_v17 = vld [vmem:[#allocation2 + $0x8] sm:$0xff] }
 0x1e0   : > { %v1889_v19 = vadd.f32 %v2196_v13, %v1878_v17  ;;  %v1890_v20 = vmax.f32 %v1886_v14, 0.0 }
 0x1e1   : > { %v1876_v12 = vld [vmem:[#allocation2] sm:$0xff] }
 0x1e2   : > { %v1887_v15 = vadd.f32 %v2196_v13, %v1876_v12  ;;  %v1893_v23 = vmax.f32 %v1889_v19, 0.0 }
 0x1e4   : > { %v1891_v21 = vmax.f32 %v1887_v15, 0.0  ;;  %v2218_v25 = vpack.c.bf16 %v1893_v23, %v1892_v22 }
 0x1e6   : > { %v2213_v24 = vpack.c.bf16 %v1891_v21, %v1890_v20  ;;  %2220 = vst [vmem:[%s3132_s25 + $0x8] sm:$0xff] %v2218_v25  }
 0x1e8   : > { %2214 = vst [vmem:[%s3132_s25] sm:$0xff] %v2213_v24  }
 0x1e9 PF: > { %1920 = sbr.rel (!%p2759_p12) target bundleno = 497 (0x1f1), region = 111  ;;  %s2202_s14 = sshll.u32 (%p2759_p12), %s2630_s19, 2 }
 0x1ea   : > { %s1925_s5 = scalar_lea.vmem (%p2759_p12), %s3279_s3, %s2202_s14 }
 0x1ed   : > { %v1946_v28 = vld [vmem:[%s3132_s25 + $0x8] sm:$0xf] (%p2759_p12)  ;;  %v1948_v29 = vld [vmem:[%s3132_s25 + $0xc] sm:$0xf] (%p2759_p12) }
 0x1ee   : > { %1947 = vst [vmem:[%s1925_s5 + $0x18] sm:$0xf] %v1946_v28  ;;  %1949 = vst [vmem:[%s1925_s5 + $0x24] sm:$0xf] %v1948_v29 }
 0x1ef   : > { %v1942_v26 = vld [vmem:[%s3132_s25] sm:$0xf]  ;;  %v1944_v27 = vld [vmem:[%s3132_s25 + $0x4] sm:$0xf] }
 0x1f0   : > { %1943 = vst [vmem:[%s1925_s5] sm:$0xf] %v1942_v26  ;;  %1945 = vst [vmem:[%s1925_s5 + $0xc] sm:$0xf] %v1944_v27 }
 0x1f1 PF: > { %s13_s22 = sadd.s32 1, %s2642_s22   ;;  %s3289_s10 = sld [smem:[#allocation6_spill]] }
 0x1f2   : > { %p10_p6 = scmp.ge.s32.totalorder %s13_s22, 11   ;;  %s3290_s12 = smov %s2606_s13 }
 0x1f3   : > { %s3291_s13 = smov %s2757_s9  ;;  %s3292_s14 = smov %s2614_s15 }
 0x1f4   : > { %s3293_s15 = smov %s2754_s8  ;;  %s3294_s16 = smov %s2622_s17 }
 0x1f5   : > { %s3295_s17 = smov %s2740_s30  ;;  %s3296_s18 = smov %s2634_s20 }
 0x1f6   : > { %s3297_s19 = smov %s2638_s21  ;;  %s3298_s20 = smov %s3301_s24 }
 0x1f7   : > { %s3299_s21 = smov %s3289_s10  ;;  %12 = sbr.rel (!%p10_p6) target bundleno = 9 (0x9), region = 200 }

// kernel: _lambda_.18
= control target key start
LH: loop header
LB: loop body
LE: loop exit
PB: predicated region body
PF: predicated region fallthrough
CT: control target
= control target key end

     0   :  { %s3276_s0 = inlined_call_operand.vmem [shape: bf16[32,3456], index: 0, kind: input, shape index: {}]   ;;  %s3277_s1 = inlined_call_operand.vmem [shape: bf16[3456,256], index: 1, kind: input, shape index: {}]   ;;  %s3278_s2 = inlined_call_operand.vmem [shape: f32[1,256], index: 2, kind: input, shape index: {}]   ;;  %s3279_s3 = inlined_call_operand.vmem [shape: bf16[32,256], index: 3, kind: output, shape index: {}]  }
   0x1   :  { %3281 = sst [smem:[#allocation7_spill]] %s3276_s0 }
   0x2   :  { %3282 = sst [smem:[#allocation8_spill]] %s3277_s1 }
   0x3   :  { %s2665_s12 = smov 0   ;;  %s2667_s13 = smov 0  }
   0x4   :  { %s2669_s14 = smov 0   ;;  %s2671_s15 = smov 0  }
   0x5   :  { %s2673_s16 = smov 0   ;;  %s2675_s17 = smov 0  }
   0x6   :  { %s2677_s18 = smov 0   ;;  %s2679_s19 = smov 0  }
   0x7   :  { %s2681_s20 = smov 0   ;;  %s2683_s21 = smov 0  }
   0x8   :  { %s2685_s22 = smov 0  }
   0x9 LB: > { %s2088_s23 = sadd.s32 4294967295, %s2642_s22   ;;  %s25_s24 = sadd.s32 1, %s2634_s20  ;;  %s2642_s22 = sphi %s2685_s22, %s13_s22   ;;  %s2638_s21 = sphi %s2683_s21, %s3299_s21   ;;  %s2634_s20 = sphi %s2681_s20, %s3298_s20   ;;  %s2630_s19 = sphi %s2679_s19, %s3297_s19   ;;  %s2626_s18 = sphi %s2677_s18, %s3296_s18   ;;  %s2622_s17 = sphi %s2675_s17, %s3295_s17   ;;  %s2618_s16 = sphi %s2673_s16, %s3294_s16   ;;  %s2614_s15 = sphi %s2671_s15, %s3293_s15   ;;  %s2610_s14 = sphi %s2669_s14, %s3292_s14   ;;  %s2606_s13 = sphi %s2667_s13, %s3291_s13   ;;  %s2602_s12 = sphi %s2665_s12, %s3290_s12  }
   0xa   : > { %p26_p0 = scmp.ge.s32.totalorder %s25_s24, 3  ;;  %s28_s25 = sadd.s32 1, %s2638_s21 }
   0xb   : > { %s41_s26 = sadd.s32 1, %s2622_s17  ;;  %p48_p1 = scmp.ne.s32.totalorder %s2622_s17, %s2618_s16 }
   0xc   : > { %s3301_s24 = smov (%p26_p0, %s25_s24), 0  ;;  %s3303_s25 = smov (!%p26_p0, %s28_s25), %s2638_s21 }
   0xd   : > { %s37_s27 = ssub.s32 %s2634_s20, %s3301_s24  ;;  %p49_p2 = scmp.eq.s32.totalorder %s2642_s22, 0 }
   0xe   : > { %p30_p3 = scmp.ge.s32.totalorder %s3303_s25, 2  ;;  %p39_p4 = scmp.eq.s32.totalorder %s37_s27, 0 }
   0xf   : > { %p2732_p5 = por %p49_p2, %p48_p1  ;;  %s69_s29 = sadd.s32 1, %s2614_s15 }
  0x10   : > { %s3305_s25 = smov (%p30_p3, %s3303_s25), 0  ;;  %p76_p6 = scmp.ne.s32.totalorder %s2614_s15, %s2610_s14 }
  0x11   : > { %3284 = sst [smem:[#allocation6_spill]] %s3305_s25  ;;  %s65_s4 = ssub.s32 %s2638_s21, %s3305_s25 }
  0x12   : > { %s2740_s30 = scalar_select %p39_p4, %s2622_s17, %s41_s26  }
  0x13   : > { %s66_s5 = sor.u32 %s65_s4, %s37_s27  ;;  %p121_p7 = scmp.eq.s32.totalorder %s65_s4, 0 }
  0x14   : > { %p67_p8 = scmp.eq.s32.totalorder %s66_s5, 0  ;;  %p2746_p9 = por %p76_p6, %p49_p2 }
  0x15   : > { %s123_s7 = sadd.s32 1, %s2606_s13  ;;  %p133_p10 = scmp.ne.s32.totalorder %s2606_s13, %s2602_s12 }
  0x16   : > { %s2754_s8 = scalar_select %p67_p8, %s2614_s15, %s69_s29  }
  0x17   : > { %s2757_s9 = scalar_select %p121_p7, %s2606_s13, %s123_s7  }
  0x18   : > { %p134_p11 = scmp.eq.s32.totalorder %s2088_s23, 5  ;;  %p2091_p13 = scmp.ge.s32.totalorder %s2642_s22, 6 }
  0x1a   : > { %p2759_p12 = por %p134_p11, %p133_p10  ;;  %156 = sbr.rel (%p2091_p13) target bundleno = 155 (0x9b), region = 16 }
  0x1f   : > { %159 = sbr.rel (!%p2732_p5) target bundleno = 50 (0x32), region = 20  ;;  %s161_s11 = sand.u32 (%p2732_p5), 1, %s2622_s17  }
  0x20   : > { %s2206_s26 = smul.u32 (%p2732_p5), 36, %s2634_s20  ;;  %s3287_s0 = sld [smem:[#allocation7_spill]] (%p2732_p5) }
  0x21   : > { %s2365_s27 = smul.u32 (%p2732_p5), 144, %s161_s11 }
  0x23   : > { %s2776_s23 = scalar_lea.vmem (%p2732_p5), [#allocation3], %s2365_s27 }
  0x26   : > { %s2771_s5 = scalar_lea.vmem %s3287_s0, %s2206_s26 }
  0x27   : > { %v184_v0 = vld [vmem:[%s2771_s5] sm:$0xff]  ;;  %v186_v1 = vld [vmem:[%s2771_s5 + $0x8] sm:$0xff]  ;;  %v188_v2 = vld [vmem:[%s2771_s5 + $0x10] sm:$0xff] }
  0x28   : > { %185 = vst [vmem:[%s2776_s23] sm:$0xff] %v184_v0  ;;  %187 = vst [vmem:[%s2776_s23 + $0x8] sm:$0xff] %v186_v1  ;;  %v190_v3 = vld [vmem:[%s2771_s5 + $0x18] sm:$0xff]  ;;  %v192_v4 = vld [vmem:[%s2771_s5 + $0x6c] sm:$0xff] }
  0x29   : > { %189 = vst [vmem:[%s2776_s23 + $0x10] sm:$0xff] %v188_v2  ;;  %v194_v5 = vld [vmem:[%s2771_s5 + $0x74] sm:$0xff]  ;;  %191 = vst [vmem:[%s2776_s23 + $0x18] sm:$0xff] %v190_v3  ;;  %v196_v6 = vld [vmem:[%s2771_s5 + $0x7c] sm:$0xff] }
  0x2a   : > { %193 = vst [vmem:[%s2776_s23 + $0x24] sm:$0xff] %v192_v4  ;;  %195 = vst [vmem:[%s2776_s23 + $0x2c] sm:$0xff] %v194_v5  ;;  %v198_v7 = vld [vmem:[%s2771_s5 + $0x84] sm:$0xff]  ;;  %v200_v8 = vld [vmem:[%s2771_s5 + $0xd8] sm:$0xff] }
  0x2b   : > { %197 = vst [vmem:[%s2776_s23 + $0x34] sm:$0xff] %v196_v6  ;;  %199 = vst [vmem:[%s2776_s23 + $0x3c] sm:$0xff] %v198_v7  ;;  %v202_v9 = vld [vmem:[%s2771_s5 + $0xe0] sm:$0xff]  ;;  %v204_v10 = vld [vmem:[%s2771_s5 + $0xe8] sm:$0xff] }
  0x2c   : > { %201 = vst [vmem:[%s2776_s23 + $0x48] sm:$0xff] %v200_v8  ;;  %v206_v11 = vld [vmem:[%s2771_s5 + $0xf0] sm:$0xff]  ;;  %203 = vst [vmem:[%s2776_s23 + $0x50] sm:$0xff] %v202_v9  ;;  %v208_v12 = vld [vmem:[%s2771_s5 + $0x144] sm:$0xff] }
  0x2d   : > { %205 = vst [vmem:[%s2776_s23 + $0x58] sm:$0xff] %v204_v10  ;;  %207 = vst [vmem:[%s2776_s23 + $0x60] sm:$0xff] %v206_v11  ;;  %v210_v13 = vld [vmem:[%s2771_s5 + $0x14c] sm:$0xff]  ;;  %v212_v14 = vld [vmem:[%s2771_s5 + $0x154] sm:$0xff] }
  0x2e   : > { %209 = vst [vmem:[%s2776_s23 + $0x6c] sm:$0xff] %v208_v12  ;;  %211 = vst [vmem:[%s2776_s23 + $0x74] sm:$0xff] %v210_v13  ;;  %v214_v15 = vld [vmem:[%s2771_s5 + $0x15c] sm:$0xff]  ;;  %v2095_v17 = vld [vmem:[%s2771_s5 + $0x8c] sm:$0xf] }
  0x2f   : > { %213 = vst [vmem:[%s2776_s23 + $0x7c] sm:$0xff] %v212_v14  ;;  %v2093_v16 = vld [vmem:[%s2771_s5 + $0x20] sm:$0xf]  ;;  %215 = vst [vmem:[%s2776_s23 + $0x84] sm:$0xff] %v214_v15  ;;  %v2097_v18 = vld [vmem:[%s2771_s5 + $0xf8] sm:$0xf] }
  0x30   : > { %2094 = vst [vmem:[%s2776_s23 + $0x20] sm:$0xf] %v2093_v16  ;;  %2096 = vst [vmem:[%s2776_s23 + $0x44] sm:$0xf] %v2095_v17  ;;  %v2099_v19 = vld [vmem:[%s2771_s5 + $0x164] sm:$0xf] }
  0x31   : > { %2098 = vst [vmem:[%s2776_s23 + $0x68] sm:$0xf] %v2097_v18  ;;  %2100 = vst [vmem:[%s2776_s23 + $0x8c] sm:$0xf] %v2099_v19 }
  0x32 PF: > { %237 = sbr.rel (!%p2746_p9) target bundleno = 155 (0x9b), region = 46  ;;  %s239_s28 = sand.u32 (%p2746_p9), 1, %s2614_s15  }
  0x33   : > { %s2207_s7 = smul.u32 (%p2746_p9), 288, %s2634_s20  ;;  %s3288_s1 = sld [smem:[#allocation8_spill]] (%p2746_p9) }
  0x34   : > { %s2366_s11 = smul.u32 (%p2746_p9), 576, %s239_s28 }
  0x35   : > { %s244_s26 = sadd.s32 (%p2746_p9), %s2638_s21, %s2207_s7 }
  0x36   : > { %s2102_s27 = sshll.u32 (%p2746_p9), %s244_s26, 2  ;;  %s2828_s6 = scalar_lea.vmem (%p2746_p9), [#allocation4], %s2366_s11 }
  0x39   : > { %s2823_s0 = scalar_lea.vmem %s3288_s1, %s2102_s27 }
  0x3a   : > { %v263_v20 = vld [vmem:[%s2823_s0] sm:$0xf]  ;;  %v265_v21 = vld [vmem:[%s2823_s0 + $0x8] sm:$0xf]  ;;  %v267_v22 = vld [vmem:[%s2823_s0 + $0x10] sm:$0xf] }
  0x3b   : > { %264 = vst [vmem:[%s2828_s6] sm:$0xf] %v263_v20  ;;  %266 = vst [vmem:[%s2828_s6 + $0x4] sm:$0xf] %v265_v21  ;;  %v269_v23 = vld [vmem:[%s2823_s0 + $0x18] sm:$0xf] }
  0x3c   : > { %268 = vst [vmem:[%s2828_s6 + $0x8] sm:$0xf] %v267_v22  ;;  %v271_v24 = vld [vmem:[%s2823_s0 + $0x20] sm:$0xf]  ;;  %v273_v25 = vld [vmem:[%s2823_s0 + $0x28] sm:$0xf] }
  0x3d   : > { %270 = vst [vmem:[%s2828_s6 + $0xc] sm:$0xf] %v269_v23  ;;  %272 = vst [vmem:[%s2828_s6 + $0x10] sm:$0xf] %v271_v24  ;;  %v275_v26 = vld [vmem:[%s2823_s0 + $0x30] sm:$0xf] }
  0x3e   : > { %274 = vst [vmem:[%s2828_s6 + $0x14] sm:$0xf] %v273_v25  ;;  %v277_v27 = vld [vmem:[%s2823_s0 + $0x38] sm:$0xf]  ;;  %v279_v28 = vld [vmem:[%s2823_s0 + $0x40] sm:$0xf] }
  0x3f   : > { %276 = vst [vmem:[%s2828_s6 + $0x18] sm:$0xf] %v275_v26  ;;  %278 = vst [vmem:[%s2828_s6 + $0x1c] sm:$0xf] %v277_v27  ;;  %v281_v29 = vld [vmem:[%s2823_s0 + $0x48] sm:$0xf] }
  0x40   : > { %280 = vst [vmem:[%s2828_s6 + $0x20] sm:$0xf] %v279_v28  ;;  %v283_v30 = vld [vmem:[%s2823_s0 + $0x50] sm:$0xf]  ;;  %v285_v31 = vld [vmem:[%s2823_s0 + $0x58] sm:$0xf] }
  0x41   : > { %282 = vst [vmem:[%s2828_s6 + $0x24] sm:$0xf] %v281_v29  ;;  %284 = vst [vmem:[%s2828_s6 + $0x28] sm:$0xf] %v283_v30  ;;  %v287_v32 = vld [vmem:[%s2823_s0 + $0x60] sm:$0xf] }
  0x42   : > { %286 = vst [vmem:[%s2828_s6 + $0x2c] sm:$0xf] %v285_v31  ;;  %v289_v33 = vld [vmem:[%s2823_s0 + $0x68] sm:$0xf]  ;;  %v291_v34 = vld [vmem:[%s2823_s0 + $0x70] sm:$0xf] }
  0x43   : > { %288 = vst [vmem:[%s2828_s6 + $0x30] sm:$0xf] %v287_v32  ;;  %290 = vst [vmem:[%s2828_s6 + $0x34] sm:$0xf] %v289_v33  ;;  %v293_v35 = vld [vmem:[%s2823_s0 + $0x78] sm:$0xf] }
  0x44   : > { %292 = vst [vmem:[%s2828_s6 + $0x38] sm:$0xf] %v291_v34  ;;  %v295_v36 = vld [vmem:[%s2823_s0 + $0x80] sm:$0xf]  ;;  %v297_v37 = vld [vmem:[%s2823_s0 + $0x88] sm:$0xf] }
  0x45   : > { %294 = vst [vmem:[%s2828_s6 + $0x3c] sm:$0xf] %v293_v35  ;;  %296 = vst [vmem:[%s2828_s6 + $0x40] sm:$0xf] %v295_v36  ;;  %v299_v38 = vld [vmem:[%s2823_s0 + $0x90] sm:$0xf] }
  0x46   : > { %298 = vst [vmem:[%s2828_s6 + $0x44] sm:$0xf] %v297_v37  ;;  %v301_v39 = vld [vmem:[%s2823_s0 + $0x98] sm:$0xf]  ;;  %v303_v40 = vld [vmem:[%s2823_s0 + $0xa0] sm:$0xf] }
  0x47   : > { %300 = vst [vmem:[%s2828_s6 + $0x48] sm:$0xf] %v299_v38  ;;  %302 = vst [vmem:[%s2828_s6 + $0x4c] sm:$0xf] %v301_v39  ;;  %v305_v41 = vld [vmem:[%s2823_s0 + $0xa8] sm:$0xf] }
  0x48   : > { %304 = vst [vmem:[%s2828_s6 + $0x50] sm:$0xf] %v303_v40  ;;  %v307_v42 = vld [vmem:[%s2823_s0 + $0xb0] sm:$0xf]  ;;  %v309_v43 = vld [vmem:[%s2823_s0 + $0xb8] sm:$0xf] }
  0x49   : > { %306 = vst [vmem:[%s2828_s6 + $0x54] sm:$0xf] %v305_v41  ;;  %308 = vst [vmem:[%s2828_s6 + $0x58] sm:$0xf] %v307_v42  ;;  %v311_v44 = vld [vmem:[%s2823_s0 + $0xc0] sm:$0xf] }
  0x4a   : > { %310 = vst [vmem:[%s2828_s6 + $0x5c] sm:$0xf] %v309_v43  ;;  %v313_v45 = vld [vmem:[%s2823_s0 + $0xc8] sm:$0xf]  ;;  %v315_v46 = vld [vmem:[%s2823_s0 + $0xd0] sm:$0xf] }
  0x4b   : > { %312 = vst [vmem:[%s2828_s6 + $0x60] sm:$0xf] %v311_v44  ;;  %314 = vst [vmem:[%s2828_s6 + $0x64] sm:$0xf] %v313_v45  ;;  %v317_v47 = vld [vmem:[%s2823_s0 + $0xd8] sm:$0xf] }
  0x4c   : > { %316 = vst [vmem:[%s2828_s6 + $0x68] sm:$0xf] %v315_v46  ;;  %v319_v48 = vld [vmem:[%s2823_s0 + $0xe0] sm:$0xf]  ;;  %v321_v49 = vld [vmem:[%s2823_s0 + $0xe8] sm:$0xf] }
  0x4d   : > { %318 = vst [vmem:[%s2828_s6 + $0x6c] sm:$0xf] %v317_v47  ;;  %320 = vst [vmem:[%s2828_s6 + $0x70] sm:$0xf] %v319_v48  ;;  %v323_v50 = vld [vmem:[%s2823_s0 + $0xf0] sm:$0xf] }
  0x4e   : > { %322 = vst [vmem:[%s2828_s6 + $0x74] sm:$0xf] %v321_v49  ;;  %v325_v51 = vld [vmem:[%s2823_s0 + $0xf8] sm:$0xf]  ;;  %v327_v52 = vld [vmem:[%s2823_s0 + $0x100] sm:$0xf] }
  0x4f   : > { %324 = vst [vmem:[%s2828_s6 + $0x78] sm:$0xf] %v323_v50  ;;  %326 = vst [vmem:[%s2828_s6 + $0x7c] sm:$0xf] %v325_v51  ;;  %v329_v53 = vld [vmem:[%s2823_s0 + $0x108] sm:$0xf] }
  0x50   : > { %328 = vst [vmem:[%s2828_s6 + $0x80] sm:$0xf] %v327_v52  ;;  %v331_v54 = vld [vmem:[%s2823_s0 + $0x110] sm:$0xf]  ;;  %v333_v55 = vld [vmem:[%s2823_s0 + $0x118] sm:$0xf] }
  0x51   : > { %330 = vst [vmem:[%s2828_s6 + $0x84] sm:$0xf] %v329_v53  ;;  %332 = vst [vmem:[%s2828_s6 + $0x88] sm:$0xf] %v331_v54  ;;  %v335_v56 = vld [vmem:[%s2823_s0 + $0x120] sm:$0xf] }
  0x52   : > { %334 = vst [vmem:[%s2828_s6 + $0x8c] sm:$0xf] %v333_v55  ;;  %v337_v57 = vld [vmem:[%s2823_s0 + $0x128] sm:$0xf]  ;;  %v339_v58 = vld [vmem:[%s2823_s0 + $0x130] sm:$0xf] }
  0x53   : > { %336 = vst [vmem:[%s2828_s6 + $0x90] sm:$0xf] %v335_v56  ;;  %338 = vst [vmem:[%s2828_s6 + $0x94] sm:$0xf] %v337_v57  ;;  %v341_v59 = vld [vmem:[%s2823_s0 + $0x138] sm:$0xf] }
  0x54   : > { %340 = vst [vmem:[%s2828_s6 + $0x98] sm:$0xf] %v339_v58  ;;  %v343_v60 = vld [vmem:[%s2823_s0 + $0x140] sm:$0xf]  ;;  %v345_v61 = vld [vmem:[%s2823_s0 + $0x148] sm:$0xf] }
  0x55   : > { %342 = vst [vmem:[%s2828_s6 + $0x9c] sm:$0xf] %v341_v59  ;;  %344 = vst [vmem:[%s2828_s6 + $0xa0] sm:$0xf] %v343_v60  ;;  %v347_v62 = vld [vmem:[%s2823_s0 + $0x150] sm:$0xf] }
  0x56   : > { %346 = vst [vmem:[%s2828_s6 + $0xa4] sm:$0xf] %v345_v61  ;;  %v349_v63 = vld [vmem:[%s2823_s0 + $0x158] sm:$0xf]  ;;  %v351_v0 = vld [vmem:[%s2823_s0 + $0x160] sm:$0xf] }
  0x57   : > { %348 = vst [vmem:[%s2828_s6 + $0xa8] sm:$0xf] %v347_v62  ;;  %350 = vst [vmem:[%s2828_s6 + $0xac] sm:$0xf] %v349_v63  ;;  %v353_v1 = vld [vmem:[%s2823_s0 + $0x168] sm:$0xf] }
  0x58   : > { %352 = vst [vmem:[%s2828_s6 + $0xb0] sm:$0xf] %v351_v0  ;;  %v355_v2 = vld [vmem:[%s2823_s0 + $0x170] sm:$0xf]  ;;  %v357_v3 = vld [vmem:[%s2823_s0 + $0x178] sm:$0xf] }
  0x59   : > { %354 = vst [vmem:[%s2828_s6 + $0xb4] sm:$0xf] %v353_v1  ;;  %356 = vst [vmem:[%s2828_s6 + $0xb8] sm:$0xf] %v355_v2  ;;  %v359_v4 = vld [vmem:[%s2823_s0 + $0x180] sm:$0xf] }
  0x5a   : > { %358 = vst [vmem:[%s2828_s6 + $0xbc] sm:$0xf] %v357_v3  ;;  %v361_v5 = vld [vmem:[%s2823_s0 + $0x188] sm:$0xf]  ;;  %v363_v6 = vld [vmem:[%s2823_s0 + $0x190] sm:$0xf] }
  0x5b   : > { %360 = vst [vmem:[%s2828_s6 + $0xc0] sm:$0xf] %v359_v4  ;;  %362 = vst [vmem:[%s2828_s6 + $0xc4] sm:$0xf] %v361_v5  ;;  %v365_v7 = vld [vmem:[%s2823_s0 + $0x198] sm:$0xf] }
  0x5c   : > { %364 = vst [vmem:[%s2828_s6 + $0xc8] sm:$0xf] %v363_v6  ;;  %v367_v8 = vld [vmem:[%s2823_s0 + $0x1a0] sm:$0xf]  ;;  %v369_v9 = vld [vmem:[%s2823_s0 + $0x1a8] sm:$0xf] }
  0x5d   : > { %366 = vst [vmem:[%s2828_s6 + $0xcc] sm:$0xf] %v365_v7  ;;  %368 = vst [vmem:[%s2828_s6 + $0xd0] sm:$0xf] %v367_v8  ;;  %v371_v10 = vld [vmem:[%s2823_s0 + $0x1b0] sm:$0xf] }
  0x5e   : > { %370 = vst [vmem:[%s2828_s6 + $0xd4] sm:$0xf] %v369_v9  ;;  %v373_v11 = vld [vmem:[%s2823_s0 + $0x1b8] sm:$0xf]  ;;  %v375_v12 = vld [vmem:[%s2823_s0 + $0x1c0] sm:$0xf] }
  0x5f   : > { %372 = vst [vmem:[%s2828_s6 + $0xd8] sm:$0xf] %v371_v10  ;;  %374 = vst [vmem:[%s2828_s6 + $0xdc] sm:$0xf] %v373_v11  ;;  %v377_v13 = vld [vmem:[%s2823_s0 + $0x1c8] sm:$0xf] }
  0x60   : > { %376 = vst [vmem:[%s2828_s6 + $0xe0] sm:$0xf] %v375_v12  ;;  %v379_v14 = vld [vmem:[%s2823_s0 + $0x1d0] sm:$0xf]  ;;  %v381_v15 = vld [vmem:[%s2823_s0 + $0x1d8] sm:$0xf] }
  0x61   : > { %378 = vst [vmem:[%s2828_s6 + $0xe4] sm:$0xf] %v377_v13  ;;  %380 = vst [vmem:[%s2828_s6 + $0xe8] sm:$0xf] %v379_v14  ;;  %v383_v16 = vld [vmem:[%s2823_s0 + $0x1e0] sm:$0xf] }
  0x62   : > { %382 = vst [vmem:[%s2828_s6 + $0xec] sm:$0xf] %v381_v15  ;;  %v385_v17 = vld [vmem:[%s2823_s0 + $0x1e8] sm:$0xf]  ;;  %v387_v18 = vld [vmem:[%s2823_s0 + $0x1f0] sm:$0xf] }
  0x63   : > { %384 = vst [vmem:[%s2828_s6 + $0xf0] sm:$0xf] %v383_v16  ;;  %386 = vst [vmem:[%s2828_s6 + $0xf4] sm:$0xf] %v385_v17  ;;  %v389_v19 = vld [vmem:[%s2823_s0 + $0x1f8] sm:$0xf] }
  0x64   : > { %388 = vst [vmem:[%s2828_s6 + $0xf8] sm:$0xf] %v387_v18  ;;  %v391_v20 = vld [vmem:[%s2823_s0 + $0x200] sm:$0xf]  ;;  %v393_v21 = vld [vmem:[%s2823_s0 + $0x208] sm:$0xf] }
  0x65   : > { %390 = vst [vmem:[%s2828_s6 + $0xfc] sm:$0xf] %v389_v19  ;;  %392 = vst [vmem:[%s2828_s6 + $0x100] sm:$0xf] %v391_v20  ;;  %v395_v22 = vld [vmem:[%s2823_s0 + $0x210] sm:$0xf] }
  0x66   : > { %394 = vst [vmem:[%s2828_s6 + $0x104] sm:$0xf] %v393_v21  ;;  %v397_v23 = vld [vmem:[%s2823_s0 + $0x218] sm:$0xf]  ;;  %v399_v24 = vld [vmem:[%s2823_s0 + $0x220] sm:$0xf] }
  0x67   : > { %396 = vst [vmem:[%s2828_s6 + $0x108] sm:$0xf] %v395_v22  ;;  %398 = vst [vmem:[%s2828_s6 + $0x10c] sm:$0xf] %v397_v23  ;;  %v401_v25 = vld [vmem:[%s2823_s0 + $0x228] sm:$0xf] }
  0x68   : > { %400 = vst [vmem:[%s2828_s6 + $0x110] sm:$0xf] %v399_v24  ;;  %v403_v26 = vld [vmem:[%s2823_s0 + $0x230] sm:$0xf]  ;;  %v405_v27 = vld [vmem:[%s2823_s0 + $0x238] sm:$0xf] }
  0x69   : > { %402 = vst [vmem:[%s2828_s6 + $0x114] sm:$0xf] %v401_v25  ;;  %404 = vst [vmem:[%s2828_s6 + $0x118] sm:$0xf] %v403_v26  ;;  %v407_v28 = vld [vmem:[%s2823_s0 + $0x240] sm:$0xf] }
  0x6a   : > { %406 = vst [vmem:[%s2828_s6 + $0x11c] sm:$0xf] %v405_v27  ;;  %v409_v29 = vld [vmem:[%s2823_s0 + $0x248] sm:$0xf]  ;;  %v411_v30 = vld [vmem:[%s2823_s0 + $0x250] sm:$0xf] }
  0x6b   : > { %408 = vst [vmem:[%s2828_s6 + $0x120] sm:$0xf] %v407_v28  ;;  %410 = vst [vmem:[%s2828_s6 + $0x124] sm:$0xf] %v409_v29  ;;  %v413_v31 = vld [vmem:[%s2823_s0 + $0x258] sm:$0xf] }
  0x6c   : > { %412 = vst [vmem:[%s2828_s6 + $0x128] sm:$0xf] %v411_v30  ;;  %v415_v32 = vld [vmem:[%s2823_s0 + $0x260] sm:$0xf]  ;;  %v417_v33 = vld [vmem:[%s2823_s0 + $0x268] sm:$0xf] }
  0x6d   : > { %414 = vst [vmem:[%s2828_s6 + $0x12c] sm:$0xf] %v413_v31  ;;  %416 = vst [vmem:[%s2828_s6 + $0x130] sm:$0xf] %v415_v32  ;;  %v419_v34 = vld [vmem:[%s2823_s0 + $0x270] sm:$0xf] }
  0x6e   : > { %418 = vst [vmem:[%s2828_s6 + $0x134] sm:$0xf] %v417_v33  ;;  %v421_v35 = vld [vmem:[%s2823_s0 + $0x278] sm:$0xf]  ;;  %v423_v36 = vld [vmem:[%s2823_s0 + $0x280] sm:$0xf] }
  0x6f   : > { %420 = vst [vmem:[%s2828_s6 + $0x138] sm:$0xf] %v419_v34  ;;  %422 = vst [vmem:[%s2828_s6 + $0x13c] sm:$0xf] %v421_v35  ;;  %v425_v37 = vld [vmem:[%s2823_s0 + $0x288] sm:$0xf] }
  0x70   : > { %424 = vst [vmem:[%s2828_s6 + $0x140] sm:$0xf] %v423_v36  ;;  %v427_v38 = vld [vmem:[%s2823_s0 + $0x290] sm:$0xf]  ;;  %v429_v39 = vld [vmem:[%s2823_s0 + $0x298] sm:$0xf] }
  0x71   : > { %426 = vst [vmem:[%s2828_s6 + $0x144] sm:$0xf] %v425_v37  ;;  %428 = vst [vmem:[%s2828_s6 + $0x148] sm:$0xf] %v427_v38  ;;  %v431_v40 = vld [vmem:[%s2823_s0 + $0x2a0] sm:$0xf] }
  0x72   : > { %430 = vst [vmem:[%s2828_s6 + $0x14c] sm:$0xf] %v429_v39  ;;  %v433_v41 = vld [vmem:[%s2823_s0 + $0x2a8] sm:$0xf]  ;;  %v435_v42 = vld [vmem:[%s2823_s0 + $0x2b0] sm:$0xf] }
  0x73   : > { %432 = vst [vmem:[%s2828_s6 + $0x150] sm:$0xf] %v431_v40  ;;  %434 = vst [vmem:[%s2828_s6 + $0x154] sm:$0xf] %v433_v41  ;;  %v437_v43 = vld [vmem:[%s2823_s0 + $0x2b8] sm:$0xf] }
  0x74   : > { %436 = vst [vmem:[%s2828_s6 + $0x158] sm:$0xf] %v435_v42  ;;  %v439_v44 = vld [vmem:[%s2823_s0 + $0x2c0] sm:$0xf]  ;;  %v441_v45 = vld [vmem:[%s2823_s0 + $0x2c8] sm:$0xf] }
  0x75   : > { %438 = vst [vmem:[%s2828_s6 + $0x15c] sm:$0xf] %v437_v43  ;;  %440 = vst [vmem:[%s2828_s6 + $0x160] sm:$0xf] %v439_v44  ;;  %v443_v46 = vld [vmem:[%s2823_s0 + $0x2d0] sm:$0xf] }
  0x76   : > { %442 = vst [vmem:[%s2828_s6 + $0x164] sm:$0xf] %v441_v45  ;;  %v445_v47 = vld [vmem:[%s2823_s0 + $0x2d8] sm:$0xf]  ;;  %v447_v48 = vld [vmem:[%s2823_s0 + $0x2e0] sm:$0xf] }
  0x77   : > { %444 = vst [vmem:[%s2828_s6 + $0x168] sm:$0xf] %v443_v46  ;;  %446 = vst [vmem:[%s2828_s6 + $0x16c] sm:$0xf] %v445_v47  ;;  %v449_v49 = vld [vmem:[%s2823_s0 + $0x2e8] sm:$0xf] }
  0x78   : > { %448 = vst [vmem:[%s2828_s6 + $0x170] sm:$0xf] %v447_v48  ;;  %v451_v50 = vld [vmem:[%s2823_s0 + $0x2f0] sm:$0xf]  ;;  %v453_v51 = vld [vmem:[%s2823_s0 + $0x2f8] sm:$0xf] }
  0x79   : > { %450 = vst [vmem:[%s2828_s6 + $0x174] sm:$0xf] %v449_v49  ;;  %452 = vst [vmem:[%s2828_s6 + $0x178] sm:$0xf] %v451_v50  ;;  %v455_v52 = vld [vmem:[%s2823_s0 + $0x300] sm:$0xf] }
  0x7a   : > { %454 = vst [vmem:[%s2828_s6 + $0x17c] sm:$0xf] %v453_v51  ;;  %v457_v53 = vld [vmem:[%s2823_s0 + $0x308] sm:$0xf]  ;;  %v459_v54 = vld [vmem:[%s2823_s0 + $0x310] sm:$0xf] }
  0x7b   : > { %456 = vst [vmem:[%s2828_s6 + $0x180] sm:$0xf] %v455_v52  ;;  %458 = vst [vmem:[%s2828_s6 + $0x184] sm:$0xf] %v457_v53  ;;  %v461_v55 = vld [vmem:[%s2823_s0 + $0x318] sm:$0xf] }
  0x7c   : > { %460 = vst [vmem:[%s2828_s6 + $0x188] sm:$0xf] %v459_v54  ;;  %v463_v56 = vld [vmem:[%s2823_s0 + $0x320] sm:$0xf]  ;;  %v465_v57 = vld [vmem:[%s2823_s0 + $0x328] sm:$0xf] }
  0x7d   : > { %462 = vst [vmem:[%s2828_s6 + $0x18c] sm:$0xf] %v461_v55  ;;  %464 = vst [vmem:[%s2828_s6 + $0x190] sm:$0xf] %v463_v56  ;;  %v467_v58 = vld [vmem:[%s2823_s0 + $0x330] sm:$0xf] }
  0x7e   : > { %466 = vst [vmem:[%s2828_s6 + $0x194] sm:$0xf] %v465_v57  ;;  %v469_v59 = vld [vmem:[%s2823_s0 + $0x338] sm:$0xf]  ;;  %v471_v60 = vld [vmem:[%s2823_s0 + $0x340] sm:$0xf] }
  0x7f   : > { %468 = vst [vmem:[%s2828_s6 + $0x198] sm:$0xf] %v467_v58  ;;  %470 = vst [vmem:[%s2828_s6 + $0x19c] sm:$0xf] %v469_v59  ;;  %v473_v61 = vld [vmem:[%s2823_s0 + $0x348] sm:$0xf] }
  0x80   : > { %472 = vst [vmem:[%s2828_s6 + $0x1a0] sm:$0xf] %v471_v60  ;;  %v475_v62 = vld [vmem:[%s2823_s0 + $0x350] sm:$0xf]  ;;  %v477_v63 = vld [vmem:[%s2823_s0 + $0x358] sm:$0xf] }
  0x81   : > { %474 = vst [vmem:[%s2828_s6 + $0x1a4] sm:$0xf] %v473_v61  ;;  %476 = vst [vmem:[%s2828_s6 + $0x1a8] sm:$0xf] %v475_v62  ;;  %v479_v0 = vld [vmem:[%s2823_s0 + $0x360] sm:$0xf] }
  0x82   : > { %478 = vst [vmem:[%s2828_s6 + $0x1ac] sm:$0xf] %v477_v63  ;;  %v481_v1 = vld [vmem:[%s2823_s0 + $0x368] sm:$0xf]  ;;  %v483_v2 = vld [vmem:[%s2823_s0 + $0x370] sm:$0xf] }
  0x83   : > { %480 = vst [vmem:[%s2828_s6 + $0x1b0] sm:$0xf] %v479_v0  ;;  %482 = vst [vmem:[%s2828_s6 + $0x1b4] sm:$0xf] %v481_v1  ;;  %v485_v3 = vld [vmem:[%s2823_s0 + $0x378] sm:$0xf] }
  0x84   : > { %484 = vst [vmem:[%s2828_s6 + $0x1b8] sm:$0xf] %v483_v2  ;;  %v487_v4 = vld [vmem:[%s2823_s0 + $0x380] sm:$0xf]  ;;  %v489_v5 = vld [vmem:[%s2823_s0 + $0x388] sm:$0xf] }
  0x85   : > { %486 = vst [vmem:[%s2828_s6 + $0x1bc] sm:$0xf] %v485_v3  ;;  %488 = vst [vmem:[%s2828_s6 + $0x1c0] sm:$0xf] %v487_v4  ;;  %v491_v6 = vld [vmem:[%s2823_s0 + $0x390] sm:$0xf] }
  0x86   : > { %490 = vst [vmem:[%s2828_s6 + $0x1c4] sm:$0xf] %v489_v5  ;;  %v493_v7 = vld [vmem:[%s2823_s0 + $0x398] sm:$0xf]  ;;  %v495_v8 = vld [vmem:[%s2823_s0 + $0x3a0] sm:$0xf] }
  0x87   : > { %492 = vst [vmem:[%s2828_s6 + $0x1c8] sm:$0xf] %v491_v6  ;;  %494 = vst [vmem:[%s2828_s6 + $0x1cc] sm:$0xf] %v493_v7  ;;  %v497_v9 = vld [vmem:[%s2823_s0 + $0x3a8] sm:$0xf] }
  0x88   : > { %496 = vst [vmem:[%s2828_s6 + $0x1d0] sm:$0xf] %v495_v8  ;;  %v499_v10 = vld [vmem:[%s2823_s0 + $0x3b0] sm:$0xf]  ;;  %v501_v11 = vld [vmem:[%s2823_s0 + $0x3b8] sm:$0xf] }
  0x89   : > { %498 = vst [vmem:[%s2828_s6 + $0x1d4] sm:$0xf] %v497_v9  ;;  %500 = vst [vmem:[%s2828_s6 + $0x1d8] sm:$0xf] %v499_v10  ;;  %v503_v12 = vld [vmem:[%s2823_s0 + $0x3c0] sm:$0xf] }
  0x8a   : > { %502 = vst [vmem:[%s2828_s6 + $0x1dc] sm:$0xf] %v501_v11  ;;  %v505_v13 = vld [vmem:[%s2823_s0 + $0x3c8] sm:$0xf]  ;;  %v507_v14 = vld [vmem:[%s2823_s0 + $0x3d0] sm:$0xf] }
  0x8b   : > { %504 = vst [vmem:[%s2828_s6 + $0x1e0] sm:$0xf] %v503_v12  ;;  %506 = vst [vmem:[%s2828_s6 + $0x1e4] sm:$0xf] %v505_v13  ;;  %v509_v15 = vld [vmem:[%s2823_s0 + $0x3d8] sm:$0xf] }
  0x8c   : > { %508 = vst [vmem:[%s2828_s6 + $0x1e8] sm:$0xf] %v507_v14  ;;  %v511_v16 = vld [vmem:[%s2823_s0 + $0x3e0] sm:$0xf]  ;;  %v513_v17 = vld [vmem:[%s2823_s0 + $0x3e8] sm:$0xf] }
  0x8d   : > { %510 = vst [vmem:[%s2828_s6 + $0x1ec] sm:$0xf] %v509_v15  ;;  %512 = vst [vmem:[%s2828_s6 + $0x1f0] sm:$0xf] %v511_v16  ;;  %v515_v18 = vld [vmem:[%s2823_s0 + $0x3f0] sm:$0xf] }
  0x8e   : > { %514 = vst [vmem:[%s2828_s6 + $0x1f4] sm:$0xf] %v513_v17  ;;  %v517_v19 = vld [vmem:[%s2823_s0 + $0x3f8] sm:$0xf]  ;;  %v519_v20 = vld [vmem:[%s2823_s0 + $0x400] sm:$0xf] }
  0x8f   : > { %516 = vst [vmem:[%s2828_s6 + $0x1f8] sm:$0xf] %v515_v18  ;;  %518 = vst [vmem:[%s2828_s6 + $0x1fc] sm:$0xf] %v517_v19  ;;  %v521_v21 = vld [vmem:[%s2823_s0 + $0x408] sm:$0xf] }
  0x90   : > { %520 = vst [vmem:[%s2828_s6 + $0x200] sm:$0xf] %v519_v20  ;;  %v523_v22 = vld [vmem:[%s2823_s0 + $0x410] sm:$0xf]  ;;  %v525_v23 = vld [vmem:[%s2823_s0 + $0x418] sm:$0xf] }
  0x91   : > { %522 = vst [vmem:[%s2828_s6 + $0x204] sm:$0xf] %v521_v21  ;;  %524 = vst [vmem:[%s2828_s6 + $0x208] sm:$0xf] %v523_v22  ;;  %v527_v24 = vld [vmem:[%s2823_s0 + $0x420] sm:$0xf] }
  0x92   : > { %526 = vst [vmem:[%s2828_s6 + $0x20c] sm:$0xf] %v525_v23  ;;  %v529_v25 = vld [vmem:[%s2823_s0 + $0x428] sm:$0xf]  ;;  %v531_v26 = vld [vmem:[%s2823_s0 + $0x430] sm:$0xf] }
  0x93   : > { %528 = vst [vmem:[%s2828_s6 + $0x210] sm:$0xf] %v527_v24  ;;  %530 = vst [vmem:[%s2828_s6 + $0x214] sm:$0xf] %v529_v25  ;;  %v533_v27 = vld [vmem:[%s2823_s0 + $0x438] sm:$0xf] }
  0x94   : > { %532 = vst [vmem:[%s2828_s6 + $0x218] sm:$0xf] %v531_v26  ;;  %v535_v28 = vld [vmem:[%s2823_s0 + $0x440] sm:$0xf]  ;;  %v537_v29 = vld [vmem:[%s2823_s0 + $0x448] sm:$0xf] }
  0x95   : > { %534 = vst [vmem:[%s2828_s6 + $0x21c] sm:$0xf] %v533_v27  ;;  %536 = vst [vmem:[%s2828_s6 + $0x220] sm:$0xf] %v535_v28  ;;  %v539_v30 = vld [vmem:[%s2823_s0 + $0x450] sm:$0xf] }
  0x96   : > { %538 = vst [vmem:[%s2828_s6 + $0x224] sm:$0xf] %v537_v29  ;;  %v541_v31 = vld [vmem:[%s2823_s0 + $0x458] sm:$0xf]  ;;  %v543_v32 = vld [vmem:[%s2823_s0 + $0x460] sm:$0xf] }
  0x97   : > { %540 = vst [vmem:[%s2828_s6 + $0x228] sm:$0xf] %v539_v30  ;;  %542 = vst [vmem:[%s2828_s6 + $0x22c] sm:$0xf] %v541_v31  ;;  %v545_v33 = vld [vmem:[%s2823_s0 + $0x468] sm:$0xf] }
  0x98   : > { %544 = vst [vmem:[%s2828_s6 + $0x230] sm:$0xf] %v543_v32  ;;  %v547_v34 = vld [vmem:[%s2823_s0 + $0x470] sm:$0xf]  ;;  %v549_v35 = vld [vmem:[%s2823_s0 + $0x478] sm:$0xf] }
  0x99   : > { %546 = vst [vmem:[%s2828_s6 + $0x234] sm:$0xf] %v545_v33  ;;  %548 = vst [vmem:[%s2828_s6 + $0x238] sm:$0xf] %v547_v34 }
  0x9a   : > { %550 = vst [vmem:[%s2828_s6 + $0x23c] sm:$0xf] %v549_v35 }
  0x9b PF: > { %p2103_p0 = scmp.ge.s32.totalorder %s2642_s22, 1  ;;  %p867_p1 = scmp.lt.s32.totalorder %s2642_s22, 7 }
  0x9d   : > { %p868_p2 = pnand %p2103_p0, %p867_p1 }
  0x9e   : > { %s874_s5 = sand.u32 (!%p868_p2), 1, %s2618_s16   ;;  %s881_s23 = sand.u32 (!%p868_p2), 1, %s2610_s14  }
  0x9f   : > { %871 = sbr.rel (%p868_p2) target bundleno = 497 (0x1f1), region = 91  ;;  %s907_s0 = sand.u32 (!%p868_p2), 1, %s2602_s12  }
  0xa0   : > { %s2367_s28 = smul.u32 (!%p868_p2), 144, %s874_s5  ;;  %s2104_s11 = sshll.u32 (!%p868_p2), %s907_s0, 4 }
  0xa1   : > { %s2368_s7 = smul.u32 (!%p868_p2), 576, %s881_s23  ;;  %p913_p3 = scmp.lt.s32.totalorder (!%p868_p2), %s2630_s19, 1 }
  0xa2   : > { %s3128_s6 = scalar_lea.vmem (!%p868_p2), [#allocation3], %s2367_s28  ;;  %s3132_s25 = scalar_lea.vmem (!%p868_p2), [#allocation5], %s2104_s11 }
  0xa3   : > { %s3130_s1 = scalar_lea.vmem (!%p868_p2), [#allocation4], %s2368_s7  ;;  %p2105_p4 = scmp.ne.s32.totalorder (!%p868_p2), %s2626_s18, 0 }
  0xa4   : > { %s3122_s26 = scalar_select %p913_p3, %s2630_s19, 1 }
  0xa5   : > { %921 = sbr.rel (%p2105_p4) target bundleno = 173 (0xad), region = 103 }
  0xa6   : > { %s915_s4 = scalar_lea.vmem %s3278_s2, %s3122_s26 }
  0xaa   : > { %v2644_v36 = vmov 0.0  }
  0xab   : > { %922 = vst [vmem:[#allocation2 + $0x10] sm:$0xff] %v2644_v36  ;;  %923 = vst [vmem:[#allocation2] sm:$0xff] %v2644_v36 }
  0xac   : > { %924 = vst [vmem:[#allocation2 + $0x18] sm:$0xff] %v2644_v36  ;;  %925 = vst [vmem:[#allocation2 + $0x8] sm:$0xff] %v2644_v36 }
  0xad PF: > { %v2458_v37 = vld [vmem:[%s3130_s1 + $0x78] sm:$0xff]   ;;  %v2462_v41 = vld [vmem:[%s3130_s1 + $0x70] sm:$0xff]   ;;  %v2466_v45 = vld [vmem:[%s3130_s1 + $0x68] sm:$0xff]   ;;  %p2196_p5 = scmp.ne.s32.totalorder %s2626_s18, 2 }
  0xae   : > { %v2459_v38 = vld [vmem:[%s3130_s1 + $0xf8] sm:$0xff]   ;;  %2223 = vmatprep.subr.bf16.mxu0 %v2458_v37  ;;  %v2463_v42 = vld [vmem:[%s3130_s1 + $0xf0] sm:$0xff]   ;;  %v2467_v46 = vld [vmem:[%s3130_s1 + $0xe8] sm:$0xff]  }
  0xaf   : > { %v2460_v39 = vld [vmem:[%s3130_s1 + $0x38] sm:$0xff]   ;;  %2251 = vmatprep.subr.bf16.mxu1 %v2459_v38  ;;  %v2464_v43 = vld [vmem:[%s3130_s1 + $0x30] sm:$0xff]   ;;  %v2468_v47 = vld [vmem:[%s3130_s1 + $0x28] sm:$0xff]  }
  0xb0   : > { %v2461_v40 = vld [vmem:[%s3130_s1 + $0xb8] sm:$0xff]   ;;  %2224 = vmatpush3.bf16.msra.mxu0 %v2460_v39  ;;  %v2465_v44 = vld [vmem:[%s3130_s1 + $0xb0] sm:$0xff]   ;;  %v2469_v48 = vld [vmem:[%s3130_s1 + $0xa8] sm:$0xff]  }
  0xb1   : > { %2252 = vmatpush3.bf16.msra.mxu1 %v2461_v40  ;;  %2225 = vmatprep.subr.bf16.mxu0 %v2462_v41  ;;  %v2470_v49 = vld [vmem:[%s3130_s1 + $0x60] sm:$0xff]   ;;  %v2474_v53 = vld [vmem:[%s3130_s1 + $0x58] sm:$0xff]   ;;  %v2478_v57 = vld [vmem:[%s3130_s1 + $0x50] sm:$0xff]  }
  0xb2   : > { %2253 = vmatprep.subr.bf16.mxu1 %v2463_v42  ;;  %v2471_v50 = vld [vmem:[%s3130_s1 + $0xe0] sm:$0xff]   ;;  %v2475_v54 = vld [vmem:[%s3130_s1 + $0xd8] sm:$0xff]   ;;  %v2479_v58 = vld [vmem:[%s3130_s1 + $0xd0] sm:$0xff]  }
  0xb3   : > { %v2472_v51 = vld [vmem:[%s3130_s1 + $0x20] sm:$0xff]   ;;  %v2476_v55 = vld [vmem:[%s3130_s1 + $0x18] sm:$0xff]   ;;  %v2480_v59 = vld [vmem:[%s3130_s1 + $0x10] sm:$0xff]  }
  0xb4   : > { %2226 = vmatpush3.bf16.msra.mxu0 %v2464_v43  ;;  %v2473_v52 = vld [vmem:[%s3130_s1 + $0xa0] sm:$0xff]   ;;  %v2477_v56 = vld [vmem:[%s3130_s1 + $0x98] sm:$0xff]   ;;  %v2481_v60 = vld [vmem:[%s3130_s1 + $0x90] sm:$0xff]  }
  0xb5   : > { %2254 = vmatpush3.bf16.msra.mxu1 %v2465_v44  ;;  %2227 = vmatprep.subr.bf16.mxu0 %v2466_v45  ;;  %v2482_v61 = vld [vmem:[%s3130_s1 + $0x48] sm:$0xff]   ;;  %v2486_v1 = vld [vmem:[%s3130_s1 + $0x40] sm:$0xff]   ;;  %v2496_v9 = vld [vmem:[%s3130_s1 + $0x178] sm:$0xff]  }
  0xb6   : > { %2255 = vmatprep.subr.bf16.mxu1 %v2467_v46  ;;  %v2483_v62 = vld [vmem:[%s3130_s1 + $0xc8] sm:$0xff]   ;;  %v2487_v2 = vld [vmem:[%s3130_s1 + $0xc0] sm:$0xff]   ;;  %v2497_v10 = vld [vmem:[%s3130_s1 + $0x138] sm:$0xff]  }
  0xb7   : > { %v2484_v63 = vld [vmem:[%s3130_s1 + $0x8] sm:$0xff]   ;;  %v2488_v3 = vld [vmem:[%s3130_s1] sm:$0xff]   ;;  %v2498_v11 = vld [vmem:[%s3130_s1 + $0x1f8] sm:$0xff]  }
  0xb8   : > { %2228 = vmatpush3.bf16.msra.mxu0 %v2468_v47  ;;  %v2485_v0 = vld [vmem:[%s3130_s1 + $0x88] sm:$0xff]   ;;  %v2489_v4 = vld [vmem:[%s3130_s1 + $0x80] sm:$0xff]   ;;  %v2499_v12 = vld [vmem:[%s3130_s1 + $0x1b8] sm:$0xff]  }
  0xb9   : > { %2256 = vmatpush3.bf16.msra.mxu1 %v2469_v48  ;;  %2229 = vmatprep.subr.bf16.mxu0 %v2470_v49  ;;  %v2490_v5 = vld [vmem:[%s3128_s6] ss:$36 sps:$4 sm:$0xff]   ;;  %v2493_v7 = vld [vmem:[%s3128_s6 + $0x8] ss:$36 sps:$4 sm:$0xff]   ;;  %v2516_v28 = vld [vmem:[%s3128_s6 + $0x54] ss:$36 sps:$4 sm:$0xff]  }
  0xba   : > { %2257 = vmatprep.subr.bf16.mxu1 %v2471_v50  ;;  %v2492_v6 = vld [vmem:[%s3128_s6 + $0x4] ss:$36 sps:$4 sm:$0xff]   ;;  %v2495_v8 = vld [vmem:[%s3128_s6 + $0xc] ss:$36 sps:$4 sm:$0xff]   ;;  %v2535_v45 = vld [vmem:[%s3128_s6 + $0x14] ss:$36 sps:$4 sm:$0xff]  }
  0xbb   : > { %1650 = vmatprep.mubr.bf16.mxu0 %v2492_v6  ;;  %1699 = vmatprep.mubr.bf16.mxu1 %v2495_v8  ;;  %v2500_v13 = vld [vmem:[%s3130_s1 + $0x170] sm:$0xff]   ;;  %v2504_v17 = vld [vmem:[%s3130_s1 + $0x168] sm:$0xff]   ;;  %v2508_v21 = vld [vmem:[%s3130_s1 + $0x160] sm:$0xff]  }
  0xbc   : > { %2230 = vmatpush3.bf16.msra.mxu0 %v2472_v51  ;;  %v2501_v14 = vld [vmem:[%s3130_s1 + $0x130] sm:$0xff]   ;;  %v2505_v18 = vld [vmem:[%s3130_s1 + $0x128] sm:$0xff]   ;;  %v2509_v22 = vld [vmem:[%s3130_s1 + $0x120] sm:$0xff]  }
  0xbd   : > { %2258 = vmatpush3.bf16.msra.mxu1 %v2473_v52  ;;  %2231 = vmatprep.subr.bf16.mxu0 %v2474_v53  ;;  %v2502_v15 = vld [vmem:[%s3130_s1 + $0x1f0] sm:$0xff]   ;;  %v2506_v19 = vld [vmem:[%s3130_s1 + $0x1e8] sm:$0xff]   ;;  %v2510_v23 = vld [vmem:[%s3130_s1 + $0x1e0] sm:$0xff]  }
  0xbe   : > { %2259 = vmatprep.subr.bf16.mxu1 %v2475_v54  ;;  %v2503_v16 = vld [vmem:[%s3130_s1 + $0x1b0] sm:$0xff]   ;;  %v2507_v20 = vld [vmem:[%s3130_s1 + $0x1a8] sm:$0xff]   ;;  %v2511_v24 = vld [vmem:[%s3130_s1 + $0x1a0] sm:$0xff]  }
  0xbf   : > { %v2512_v25 = vld [vmem:[%s3130_s1 + $0x158] sm:$0xff]   ;;  %v2520_v31 = vld [vmem:[%s3128_s6 + $0x50] ss:$36 sps:$4 sm:$0xff]   ;;  %v2526_v37 = vld [vmem:[%s3130_s1 + $0x148] sm:$0xff]  }
  0xc0   : > { %2232 = vmatpush3.bf16.msra.mxu0 %v2476_v55  ;;  %v2513_v26 = vld [vmem:[%s3130_s1 + $0x118] sm:$0xff]   ;;  %v2522_v33 = vld [vmem:[%s3130_s1 + $0x150] sm:$0xff]   ;;  %v2527_v38 = vld [vmem:[%s3130_s1 + $0x108] sm:$0xff]  }
  0xc1   : > { %2260 = vmatpush3.bf16.msra.mxu1 %v2477_v56  ;;  %2233 = vmatprep.subr.bf16.mxu0 %v2478_v57  ;;  %v2514_v27 = vld [vmem:[%s3128_s6 + $0x4c] ss:$36 sps:$4 sm:$0xff]   ;;  %v2538_v48 = vld [vmem:[%s3128_s6 + $0x18] ss:$36 sps:$4 sm:$0xff]   ;;  %v2546_v54 = vld [vmem:[%s3128_s6 + $0x64] ss:$36 sps:$4 sm:$0xff]  }
  0xc2   : > { %2261 = vmatprep.subr.bf16.mxu1 %v2479_v58  ;;  %v2518_v29 = vld [vmem:[%s3130_s1 + $0x1d8] sm:$0xff]   ;;  %v2523_v34 = vld [vmem:[%s3130_s1 + $0x110] sm:$0xff]   ;;  %v2528_v39 = vld [vmem:[%s3130_s1 + $0x1c8] sm:$0xff]  }
  0xc3   : > { %v2519_v30 = vld [vmem:[%s3128_s6 + $0x48] ss:$36 sps:$4 sm:$0xff]   ;;  %v2524_v35 = vld [vmem:[%s3130_s1 + $0x1d0] sm:$0xff]   ;;  %v2530_v41 = vld [vmem:[%s3130_s1 + $0x140] sm:$0xff]  }
  0xc4   : > { %2234 = vmatpush3.bf16.msra.mxu0 %v2480_v59  ;;  %v2521_v32 = vld [vmem:[%s3130_s1 + $0x198] sm:$0xff]   ;;  %v2525_v36 = vld [vmem:[%s3130_s1 + $0x190] sm:$0xff]   ;;  %v2529_v40 = vld [vmem:[%s3130_s1 + $0x188] sm:$0xff]  }
  0xc5   : > { %2262 = vmatpush3.bf16.msra.mxu1 %v2481_v60  ;;  %2235 = vmatprep.subr.bf16.mxu0 %v2482_v61  ;;  %v2531_v42 = vld [vmem:[%s3130_s1 + $0x100] sm:$0xff]   ;;  %v2537_v47 = vld [vmem:[%s3130_s1 + $0x238] sm:$0xff]   ;;  %v2541_v50 = vld [vmem:[%s3130_s1 + $0x230] sm:$0xff]  }
  0xc6   : > { %2263 = vmatprep.subr.bf16.mxu1 %v2483_v62  ;;  %v2532_v43 = vld [vmem:[%s3130_s1 + $0x1c0] sm:$0xff]   ;;  %v2544_v52 = vld [vmem:[%s3128_s6 + $0x58] ss:$36 sps:$4 sm:$0xff]   ;;  %v2551_v59 = vld [vmem:[%s3130_s1 + $0x210] sm:$0xff]  }
  0xc7   : > { %v2533_v44 = vld [vmem:[%s3128_s6 + $0x10] ss:$36 sps:$4 sm:$0xff]   ;;  %v2540_v49 = vld [vmem:[%s3128_s6 + $0x1c] ss:$36 sps:$4 sm:$0xff]   ;;  %v2555_v62 = vld [vmem:[%s3128_s6 + $0x68] ss:$36 sps:$4 sm:$0xff]  }
  0xc8   : > { %2236 = vmatpush3.bf16.msra.mxu0 %v2484_v63  ;;  %v2536_v46 = vld [vmem:[%s3130_s1 + $0x180] sm:$0xff]   ;;  %v2545_v53 = vld [vmem:[%s3130_s1 + $0x228] sm:$0xff]   ;;  %v2550_v57 = vld [vmem:[%s3130_s1 + $0x218] sm:$0xff]  }
  0xc9   : > { %2264 = vmatpush3.bf16.msra.mxu1 %v2485_v0  ;;  %2237 = vmatprep.subr.bf16.mxu0 %v2486_v1  ;;  %v2542_v51 = vld [vmem:[%s3128_s6 + $0x5c] ss:$36 sps:$4 sm:$0xff]  }
  0xca   : > { %2265 = vmatprep.subr.bf16.mxu1 %v2487_v2  ;;  %v2548_v55 = vld [vmem:[%s3128_s6 + $0x60] ss:$36 sps:$4 sm:$0xff]   ;;  %v2552_v60 = vld [vmem:[%s3130_s1 + $0x208] sm:$0xff]  }
  0xcb   : > { %v2549_v56 = vld [vmem:[%s3130_s1 + $0x220] sm:$0xff]  }
  0xcc   : > { %2238 = vmatpush3.bf16.msra.mxu0 %v2488_v3  ;;  %v2554_v58 = vld [vmem:[%s3128_s6 + $0x20] ss:$36 sps:$4 sm:$0xff]  }
  0xcd   : > { %2266 = vmatpush3.bf16.msra.mxu1 %v2489_v4  ;;  %2279 = vmatprep.subr.bf16.mxu0 %v2496_v9  ;;  %v2553_v61 = vld [vmem:[%s3130_s1 + $0x200] sm:$0xff]  }
  0xce   : > { %2307 = vmatprep.subr.bf16.mxu1 %v2498_v11 }
  0xcf   : > { %1651 = vmatmul.mubr.bf16.vlgmr.msra.gmra.mxu0 %v2490_v5 }
  0xd0   : > { %1700 = vmatmul.mubr.bf16.vlgmr.msra.gmra.mxu1 %v2493_v7  ;;  %2280 = vmatpush3.bf16.msra.mxu0 %v2497_v10 }
  0xd1   : > { %2308 = vmatpush3.bf16.msra.mxu1 %v2499_v12  ;;  %2281 = vmatprep.subr.bf16.mxu0 %v2500_v13 }
  0xd2   : > { %2309 = vmatprep.subr.bf16.mxu1 %v2502_v15  ;;  %1658 = vmatprep.mubr.bf16.mxu0 %v2514_v27 }
  0xd3   : > { %1707 = vmatprep.mubr.bf16.mxu1 %v2516_v28 }
  0xd4   : > { %2282 = vmatpush3.bf16.msra.mxu0 %v2501_v14 }
  0xd5   : > { %2310 = vmatpush3.bf16.msra.mxu1 %v2503_v16  ;;  %2283 = vmatprep.subr.bf16.mxu0 %v2504_v17 }
  0xd6   : > { %2311 = vmatprep.subr.bf16.mxu1 %v2506_v19 }
  0xd7   : > { %1659 = vmatmul.mubr.bf16.gmra.mxu0 %v2519_v30 }
  0xd8   : > { %2284 = vmatpush3.bf16.msra.mxu0 %v2505_v18  ;;  %1708 = vmatmul.mubr.bf16.gmra.mxu1 %v2520_v31 }
  0xd9   : > { %2312 = vmatpush3.bf16.msra.mxu1 %v2507_v20  ;;  %2285 = vmatprep.subr.bf16.mxu0 %v2508_v21 }
  0xda   : > { %2313 = vmatprep.subr.bf16.mxu1 %v2510_v23  ;;  %1748 = vmatprep.mubr.bf16.mxu0 %v2535_v45 }
  0xdb   : > { %1797 = vmatprep.mubr.bf16.mxu1 %v2540_v49 }
  0xdc   : > { %2286 = vmatpush3.bf16.msra.mxu0 %v2509_v22 }
  0xdd   : > { %2314 = vmatpush3.bf16.msra.mxu1 %v2511_v24  ;;  %2287 = vmatprep.subr.bf16.mxu0 %v2512_v25 }
  0xde   : > { %2315 = vmatprep.subr.bf16.mxu1 %v2518_v29 }
  0xe0   : > { %2288 = vmatpush3.bf16.msra.mxu0 %v2513_v26 }
  0xe1   : > { %2316 = vmatpush3.bf16.msra.mxu1 %v2521_v32  ;;  %2289 = vmatprep.subr.bf16.mxu0 %v2522_v33 }
  0xe2   : > { %2317 = vmatprep.subr.bf16.mxu1 %v2524_v35 }
  0xe4   : > { %2290 = vmatpush3.bf16.msra.mxu0 %v2523_v34 }
  0xe5   : > { %2318 = vmatpush3.bf16.msra.mxu1 %v2525_v36  ;;  %2291 = vmatprep.subr.bf16.mxu0 %v2526_v37 }
  0xe6   : > { %2319 = vmatprep.subr.bf16.mxu1 %v2528_v39 }
  0xe8   : > { %2292 = vmatpush3.bf16.msra.mxu0 %v2527_v38 }
  0xe9   : > { %2320 = vmatpush3.bf16.msra.mxu1 %v2529_v40  ;;  %2293 = vmatprep.subr.bf16.mxu0 %v2530_v41 }
  0xea   : > { %2321 = vmatprep.subr.bf16.mxu1 %v2532_v43 }
  0xec   : > { %2294 = vmatpush3.bf16.msra.mxu0 %v2531_v42 }
  0xed   : > { %2322 = vmatpush3.bf16.msra.mxu1 %v2536_v46  ;;  %2345 = vmatprep.subr.bf16.mxu0 %v2537_v47 }
  0xef   : > { %1749 = vmatmul.mubr.bf16.vlgmr.msra.gmra.mxu0 %v2533_v44 }
  0xf0   : > { %2346 = vmatpush3.bf16.msra.mxu0 %v2537_v47  ;;  %1798 = vmatmul.mubr.bf16.vlgmr.msra.gmra.mxu1 %v2538_v48 }
  0xf1   : > { %2347 = vmatprep.subr.bf16.mxu0 %v2541_v50  ;;  %1756 = vmatprep.mubr.bf16.mxu0 %v2542_v51 }
  0xf2   : > { %1805 = vmatprep.mubr.bf16.mxu1 %v2546_v54  ;;  %v928_v54 = vld [vmem:[#allocation2 + $0x18] sm:$0xff] }
  0xf4   : > { %2348 = vmatpush3.bf16.msra.mxu0 %v2541_v50 }
  0xf5   : > { %2349 = vmatprep.subr.bf16.mxu0 %v2545_v53 }
  0xf7   : > { %1757 = vmatmul.mubr.bf16.gmra.mxu0 %v2544_v52 }
  0xf8   : > { %2350 = vmatpush3.bf16.msra.mxu0 %v2545_v53  ;;  %1806 = vmatmul.mubr.bf16.gmra.mxu1 %v2548_v55 }
  0xf9   : > { %2351 = vmatprep.subr.bf16.mxu0 %v2549_v56  ;;  %2361 = vmatprep.mubr.bf16.mxu0 %v2554_v58 }
  0xfc   : > { %2352 = vmatpush3.bf16.msra.mxu0 %v2549_v56 }
  0xfd   : > { %2353 = vmatprep.subr.bf16.mxu0 %v2550_v57 }
 0x100   : > { %2354 = vmatpush3.bf16.msra.mxu0 %v2550_v57 }
 0x101   : > { %2355 = vmatprep.subr.bf16.mxu0 %v2551_v59 }
 0x104   : > { %2356 = vmatpush3.bf16.msra.mxu0 %v2551_v59 }
 0x105   : > { %2357 = vmatprep.subr.bf16.mxu0 %v2552_v60 }
 0x108   : > { %2358 = vmatpush3.bf16.msra.mxu0 %v2552_v60  ;;  %v926_v60 = vld [vmem:[#allocation2 + $0x10] sm:$0xff] }
 0x109   : > { %2359 = vmatprep.subr.bf16.mxu0 %v2553_v61 }
 0x10c   : > { %2360 = vmatpush3.bf16.msra.mxu0 %v2553_v61 }
 0x10f   : > { %2362 = vmatmul.mubr.bf16.vlgmr.msra.gmra.mxu0 %v2555_v62 }
 0x18f   : > { %v2239_v63 = vpop.f32.mrf.mxu0 }
 0x190   : > { %v2267_v0 = vpop.f32.mrf.mxu1 }
 0x191   : > { %v2240_v1 = vpop.f32.mrf.mxu0 }
 0x192   : > { %v2268_v2 = vpop.f32.mrf.mxu1  ;;  %v2241_v30 = vadd.f32 %v2240_v1, %v2239_v63  ;;  %v929_v1 = vld [vmem:[#allocation2 + $0x8] sm:$0xff] }
 0x193   : > { %v2242_v3 = vpop.f32.mrf.mxu0  ;;  %v2269_v31 = vadd.f32 %v2268_v2, %v2267_v0 }
 0x194   : > { %v2270_v4 = vpop.f32.mrf.mxu1 }
 0x195   : > { %v2243_v5 = vpop.f32.mrf.mxu0  ;;  %v1702_v39 = vadd.f32 %v2269_v31, %v2241_v30 }
 0x196   : > { %v2271_v7 = vpop.f32.mrf.mxu1  ;;  %v2244_v40 = vadd.f32 %v2243_v5, %v2242_v3 }
 0x197   : > { %v2245_v6 = vpop.f32.mrf.mxu0  ;;  %v2272_v41 = vadd.f32 %v2271_v7, %v2270_v4 }
 0x198   : > { %v2273_v8 = vpop.f32.mrf.mxu1 }
 0x199   : > { %v2246_v9 = vpop.f32.mrf.mxu0  ;;  %v1705_v50 = vadd.f32 %v2272_v41, %v2244_v40 }
 0x19a   : > { %v2274_v10 = vpop.f32.mrf.mxu1  ;;  %v2247_v28 = vadd.f32 %v2246_v9, %v2245_v6  ;;  %v927_v6 = vld [vmem:[#allocation2] sm:$0xff] }
 0x19b   : > { %v2248_v11 = vpop.f32.mrf.mxu0  ;;  %v2275_v29 = vadd.f32 %v2274_v10, %v2273_v8 }
 0x19c   : > { %v2276_v12 = vpop.f32.mrf.mxu1 }
 0x19d   : > { %v2249_v13 = vpop.f32.mrf.mxu0  ;;  %v1710_v35 = vadd.f32 %v2275_v29, %v2247_v28 }
 0x19e   : > { %v2277_v15 = vpop.f32.mrf.mxu1  ;;  %v2250_v36 = vadd.f32 %v2249_v13, %v2248_v11 }
 0x19f   : > { %v2278_v37 = vadd.f32 %v2277_v15, %v2276_v12 }
 0x1a1   : > { %v1713_v46 = vadd.f32 %v2278_v37, %v2250_v36 }
 0x1af   : > { %v2295_v14 = vpop.f32.mrf.mxu0 }
 0x1b0   : > { %v2323_v17 = vpop.f32.mrf.mxu1 }
 0x1b1   : > { %v2296_v16 = vpop.f32.mrf.mxu0 }
 0x1b2   : > { %v2324_v19 = vpop.f32.mrf.mxu1  ;;  %v2297_v38 = vadd.f32 %v2296_v16, %v2295_v14 }
 0x1b3   : > { %v2298_v18 = vpop.f32.mrf.mxu0  ;;  %v2325_v48 = vadd.f32 %v2324_v19, %v2323_v17 }
 0x1b4   : > { %v2326_v21 = vpop.f32.mrf.mxu1  ;;  %v1751_v47 = vadd.f32 %v2297_v38, %v1702_v39 }
 0x1b5   : > { %v2299_v20 = vpop.f32.mrf.mxu0 }
 0x1b6   : > { %v2327_v23 = vpop.f32.mrf.mxu1  ;;  %v2300_v49 = vadd.f32 %v2299_v20, %v2298_v18  ;;  %v1800_v59 = vadd.f32 %v2325_v48, %v1751_v47 }
 0x1b7   : > { %v2301_v22 = vpop.f32.mrf.mxu0  ;;  %v2328_v57 = vadd.f32 %v2327_v23, %v2326_v21 }
 0x1b8   : > { %v2329_v25 = vpop.f32.mrf.mxu1  ;;  %v1754_v56 = vadd.f32 %v2300_v49, %v1705_v50 }
 0x1b9   : > { %v2302_v24 = vpop.f32.mrf.mxu0 }
 0x1ba   : > { %v2330_v27 = vpop.f32.mrf.mxu1  ;;  %v2303_v32 = vadd.f32 %v2302_v24, %v2301_v22  ;;  %v1803_v5 = vadd.f32 %v2328_v57, %v1754_v56 }
 0x1bb   : > { %v2304_v26 = vpop.f32.mrf.mxu0  ;;  %v2331_v43 = vadd.f32 %v2330_v27, %v2329_v25 }
 0x1bc   : > { %v2332_v34 = vpop.f32.mrf.mxu1  ;;  %v1759_v42 = vadd.f32 %v2303_v32, %v1710_v35 }
 0x1bd   : > { %v2305_v33 = vpop.f32.mrf.mxu0 }
 0x1be   : > { %v2306_v44 = vadd.f32 %v2305_v33, %v2304_v26  ;;  %v2333_v45 = vpop.f32.mrf.mxu1  ;;  %v1808_v53 = vadd.f32 %v2331_v43, %v1759_v42 }
 0x1bf   : > { %v2334_v52 = vadd.f32 %v2333_v45, %v2332_v34 }
 0x1c0   : > { %v1762_v51 = vadd.f32 %v2306_v44, %v1713_v46 }
 0x1c2   : > { %v1811_v0 = vadd.f32 %v2334_v52, %v1762_v51 }
 0x1cf   : > { %v2363_v55 = vpop.f32.mrf.mxu0 }
 0x1d0   : > { %v1857_v58 = vadd.f32 %v2363_v55, %v1808_v53 }
 0x1d1   : > { %v1848_v61 = vpop.f32.mrf.mxu0 }
 0x1d2   : > { %v1865_v62 = vadd.f32 %v1857_v58, %v928_v54  ;;  %v1849_v63 = vadd.f32 %v1848_v61, %v1800_v59 }
 0x1d3   : > { %v2364_v2 = vpop.f32.mrf.mxu0 }
 0x1d4   : > { %1869 = vst [vmem:[#allocation2 + $0x18] sm:$0xff] %v1865_v62  ;;  %v1863_v3 = vadd.f32 %v1849_v63, %v926_v60  ;;  %v1860_v4 = vadd.f32 %v2364_v2, %v1811_v0 }
 0x1d5   : > { %v1851_v7 = vpop.f32.mrf.mxu0 }
 0x1d6   : > { %1867 = vst [vmem:[#allocation2 + $0x10] sm:$0xff] %v1863_v3  ;;  %v1866_v8 = vadd.f32 %v1860_v4, %v929_v1  ;;  %v1852_v9 = vadd.f32 %v1851_v7, %v1803_v5  ;;  %1874 = sbr.rel (%p2196_p5) target bundleno = 489 (0x1e9), region = 107 }
 0x1d8   : > { %1870 = vst [vmem:[#allocation2 + $0x8] sm:$0xff] %v1866_v8  ;;  %v1864_v10 = vadd.f32 %v1852_v9, %v927_v6 }
 0x1da   : > { %1868 = vst [vmem:[#allocation2] sm:$0xff] %v1864_v10 }
 0x1db   : > { %v2197_v13 = vld [vmem:[%s915_s4] ss:$0 sm:$0xff]  ;;  %v1877_v16 = vld [vmem:[#allocation2 + $0x18] sm:$0xff] }
 0x1dc   : > { %v1888_v18 = vadd.f32 %v2197_v13, %v1877_v16 }
 0x1dd   : > { %v1875_v11 = vld [vmem:[#allocation2 + $0x10] sm:$0xff] }
 0x1de   : > { %v1886_v14 = vadd.f32 %v2197_v13, %v1875_v11  ;;  %v1892_v22 = vmax.f32 %v1888_v18, 0.0 }
 0x1df   : > { %v1878_v17 = vld [vmem:[#allocation2 + $0x8] sm:$0xff] }
 0x1e0   : > { %v1889_v19 = vadd.f32 %v2197_v13, %v1878_v17  ;;  %v1890_v20 = vmax.f32 %v1886_v14, 0.0 }
 0x1e1   : > { %v1876_v12 = vld [vmem:[#allocation2] sm:$0xff] }
 0x1e2   : > { %v1887_v15 = vadd.f32 %v2197_v13, %v1876_v12  ;;  %v1893_v23 = vmax.f32 %v1889_v19, 0.0 }
 0x1e4   : > { %v1891_v21 = vmax.f32 %v1887_v15, 0.0  ;;  %v2220_v25 = vpack.c.bf16 %v1893_v23, %v1892_v22 }
 0x1e6   : > { %v2215_v24 = vpack.c.bf16 %v1891_v21, %v1890_v20  ;;  %2222 = vst [vmem:[%s3132_s25 + $0x8] sm:$0xff] %v2220_v25  }
 0x1e8   : > { %2216 = vst [vmem:[%s3132_s25] sm:$0xff] %v2215_v24  }
 0x1e9 PF: > { %1920 = sbr.rel (!%p2759_p12) target bundleno = 497 (0x1f1), region = 111  ;;  %s2203_s14 = sshll.u32 (%p2759_p12), %s2630_s19, 2 }
 0x1ea   : > { %s1925_s5 = scalar_lea.vmem (%p2759_p12), %s3279_s3, %s2203_s14 }
 0x1ed   : > { %v1946_v28 = vld [vmem:[%s3132_s25 + $0x8] sm:$0xf] (%p2759_p12)  ;;  %v1948_v29 = vld [vmem:[%s3132_s25 + $0xc] sm:$0xf] (%p2759_p12) }
 0x1ee   : > { %1947 = vst [vmem:[%s1925_s5 + $0x10] sm:$0xf] %v1946_v28  ;;  %1949 = vst [vmem:[%s1925_s5 + $0x18] sm:$0xf] %v1948_v29 }
 0x1ef   : > { %v1942_v26 = vld [vmem:[%s3132_s25] sm:$0xf]  ;;  %v1944_v27 = vld [vmem:[%s3132_s25 + $0x4] sm:$0xf] }
 0x1f0   : > { %1943 = vst [vmem:[%s1925_s5] sm:$0xf] %v1942_v26  ;;  %1945 = vst [vmem:[%s1925_s5 + $0x8] sm:$0xf] %v1944_v27 }
 0x1f1 PF: > { %s13_s22 = sadd.s32 1, %s2642_s22   ;;  %s3289_s10 = sld [smem:[#allocation6_spill]] }
 0x1f2   : > { %p10_p6 = scmp.ge.s32.totalorder %s13_s22, 8   ;;  %s3290_s12 = smov %s2606_s13 }
 0x1f3   : > { %s3291_s13 = smov %s2757_s9  ;;  %s3292_s14 = smov %s2614_s15 }
 0x1f4   : > { %s3293_s15 = smov %s2754_s8  ;;  %s3294_s16 = smov %s2622_s17 }
 0x1f5   : > { %s3295_s17 = smov %s2740_s30  ;;  %s3296_s18 = smov %s2634_s20 }
 0x1f6   : > { %s3297_s19 = smov %s2638_s21  ;;  %s3298_s20 = smov %s3301_s24 }
 0x1f7   : > { %s3299_s21 = smov %s3289_s10  ;;  %12 = sbr.rel (!%p10_p6) target bundleno = 9 (0x9), region = 200 }

// kernel: _lambda_.20
= control target key start
LH: loop header
LB: loop body
LE: loop exit
PB: predicated region body
PF: predicated region fallthrough
CT: control target
= control target key end

     0   :  { %s247_s6 = smov 0   ;;  %s264_s0 = inlined_call_operand.vmem [shape: bf16[2,1,1,256], index: 0, kind: input, shape index: {}]   ;;  %s265_s1 = inlined_call_operand.vmem [shape: bf16[2,6,6,256], index: 1, kind: output, shape index: {}]  }
   0x1 LB: > { %s209_s7 = sadd.s32 4294967295, %s235_s6   ;;  %p213_p0 = scmp.ge.s32.totalorder %s235_s6, 1  ;;  %s235_s6 = sphi %s247_s6, %s11_s6  }
   0x2   : > { %p86_p1 = scmp.lt.s32.totalorder %s235_s6, 3 }
   0x4   : > { %p87_p2 = pnand %p213_p0, %p86_p1 }
   0x5   : > { %p105_p3 = scmp.lt.s32.totalorder (!%p87_p2), %s209_s7, 1 }
   0x6   : > { %90 = sbr.rel (%p87_p2) target bundleno = 24 (0x18), region = 24 }
   0xb   : > { %v118_v0 = vlaneseq  ;;  %s267_s7 = smov (!%p105_p3, %s209_s7), 1 }
   0xc   : > { %s214_s8 = sshll.u32 %s267_s7, 1  ;;  %s220_s12 = smul.u32 48, %s267_s7 }
   0xd   : > { %v119_v1 = vshrl.u32 %v118_v0, 7  ;;  %s108_s11 = scalar_lea.vmem %s264_s0, %s214_s8 }
   0xe   : > { %v114_v4 = vld [vmem:[%s108_s11] sm:$0x3]  ;;  %s113_s15 = scalar_lea.vmem %s265_s1, %s220_s12 }
   0xf   : > { %v120_v2 = vsub.s32 0, %v119_v1  ;;  %v124_v3 = vsub.s32 2, %v119_v1  ;;  %v115_v5 = vunpack.c.l.bf16 %v114_v4 }
  0x11   : > { %v121_v6 = vrot.slane %v115_v5, %v120_v2  ;;  %v125_v7 = vrot.slane %v115_v5, %v124_v3 }
  0x13   : > { %v219_v8 = vpack.c.bf16 %v125_v7, %v121_v6 }
  0x15   : > { %148 = vst [vmem:[%s113_s15] sm:$0x77] %v219_v8  ;;  %149 = vst [vmem:[%s113_s15 + $0x8] sm:$0x77] %v219_v8 }
  0x16   : > { %150 = vst [vmem:[%s113_s15 + $0x10] sm:$0x77] %v219_v8  ;;  %151 = vst [vmem:[%s113_s15 + $0x18] sm:$0x77] %v219_v8 }
  0x17   : > { %152 = vst [vmem:[%s113_s15 + $0x20] sm:$0x77] %v219_v8  ;;  %153 = vst [vmem:[%s113_s15 + $0x28] sm:$0x77] %v219_v8 }
  0x18 PF: > { %s11_s6 = sadd.s32 1, %s235_s6  }
  0x19   : > { %p8_p4 = scmp.ge.s32.totalorder %s11_s6, 4  }
  0x1b   :  { %10 = sbr.rel (!%p8_p4) target bundleno = 1 (0x1), region = 54 }

// kernel: _lambda_.21
= control target key start
LH: loop header
LB: loop body
LE: loop exit
PB: predicated region body
PF: predicated region fallthrough
CT: control target
= control target key end

     0   :  { %s3211_s0 = inlined_call_operand.vmem [shape: bf16[16,9216], index: 0, kind: input, shape index: {}]   ;;  %s3212_s1 = inlined_call_operand.hbm [shape: bf16[9216,4096], index: 1, kind: input, shape index: {}]   ;;  %s3213_s2 = inlined_call_operand.vmem [shape: f32[1,4096], index: 2, kind: input, shape index: {}]   ;;  %s3214_s3 = inlined_call_operand.vmem [shape: bf16[16,4096], index: 3, kind: output, shape index: {}]  }
   0x1   :  { %3220 = sst [smem:[#allocation15_spill]] %s3211_s0 }
   0x2   :  { %8 = vsyncpa [#allocation5], 0 }
   0x3   :  { %10 = vsyncpa [#allocation5 + $0x1], 0  ;;  %s2801_s12 = smov 0   ;;  %s2803_s13 = smov 0  }
   0x4   :  { %s2805_s14 = smov 0   ;;  %s2807_s15 = smov 0  }
   0x5   :  { %s2809_s16 = smov 0   ;;  %s2811_s17 = smov 0  }
   0x6   :  { %s2813_s18 = smov 0   ;;  %s2815_s19 = smov 0  }
   0x7   :  { %s2817_s20 = smov 0   ;;  %s2819_s21 = smov 0  }
   0x8   :  { %s2821_s22 = smov 0   ;;  %s2823_s23 = smov 0  }
   0x9 LB: > { %3221 = sst [smem:[#allocation8_spill]] %s2746_s16  ;;  %s2009_s24 = sadd.s32 4294967295, %s2774_s23   ;;  %s2774_s23 = sphi %s2823_s23, %s16_s23   ;;  %s2770_s22 = sphi %s2821_s22, %s3246_s22   ;;  %s2766_s21 = sphi %s2819_s21, %s3245_s21   ;;  %s2762_s20 = sphi %s2817_s20, %s3237_s20   ;;  %s2758_s19 = sphi %s2815_s19, %s3244_s19   ;;  %s2754_s18 = sphi %s2813_s18, %s3236_s18   ;;  %s2750_s17 = sphi %s2811_s17, %s3235_s17   ;;  %s2746_s16 = sphi %s2809_s16, %s3234_s16   ;;  %s2742_s15 = sphi %s2807_s15, %s3243_s15   ;;  %s2738_s14 = sphi %s2805_s14, %s3242_s14   ;;  %s2734_s13 = sphi %s2803_s13, %s3241_s13   ;;  %s2730_s12 = sphi %s2801_s12, %s3240_s12  }
   0xa   : > { %3222 = sst [smem:[#allocation9_spill]] %s2754_s18  ;;  %s28_s25 = sadd.s32 1, %s2766_s21 }
   0xb   : > { %3223 = sst [smem:[#allocation10_spill]] %s2770_s22  ;;  %p29_p0 = scmp.ge.s32.totalorder %s28_s25, 6 }
   0xc   : > { %s31_s26 = sadd.s32 1, %s2770_s22  ;;  %s44_s27 = sadd.s32 1, %s2754_s18 }
   0xd   : > { %p51_p1 = scmp.ne.s32.totalorder %s2754_s18, %s2750_s17  ;;  %s3248_s25 = smov (%p29_p0, %s28_s25), 0 }
   0xe   : > { %3224 = sst [smem:[#allocation11_spill]] %s3248_s25  ;;  %s3250_s26 = smov (!%p29_p0, %s31_s26), %s2770_s22 }
   0xf   : > { %s40_s28 = ssub.s32 %s2766_s21, %s3248_s25  ;;  %p52_p2 = scmp.eq.s32.totalorder %s2774_s23, 0 }
  0x10   : > { %p33_p3 = scmp.ge.s32.totalorder %s3250_s26, 16  ;;  %p42_p4 = scmp.eq.s32.totalorder %s40_s28, 0 }
  0x11   : > { %p2873_p5 = por %p52_p2, %p51_p1  ;;  %s72_s30 = sadd.s32 1, %s2746_s16 }
  0x12   : > { %s3252_s26 = smov (%p33_p3, %s3250_s26), 0  ;;  %p79_p6 = scmp.ne.s32.totalorder %s2746_s16, %s2742_s15 }
  0x13   : > { %3226 = sst [smem:[#allocation12_spill]] %s3252_s26  ;;  %s68_s5 = ssub.s32 %s2770_s22, %s3252_s26 }
  0x14   : > { %s2881_s4 = scalar_select %p42_p4, %s2754_s18, %s44_s27  }
  0x15   : > { %s69_s6 = sor.u32 %s68_s5, %s40_s28  ;;  %p85_p7 = scmp.ne.s32.totalorder %s2742_s15, %s2738_s14 }
  0x16   : > { %3227 = sst [smem:[#allocation13_spill]] %s2881_s4  ;;  %p70_p8 = scmp.eq.s32.totalorder %s69_s6, 0 }
  0x17   : > { %p2889_p9 = por %p79_p6, %p52_p2  ;;  %p86_p10 = scmp.eq.s32.totalorder %s2009_s24, 0 }
  0x18   : > { %p124_p11 = scmp.eq.s32.totalorder %s68_s5, 0  ;;  %s126_s10 = sadd.s32 1, %s2734_s13 }
  0x19   : > { %s2896_s8 = scalar_select %p70_p8, %s2746_s16, %s72_s30  }
  0x1a   : > { %p2898_p12 = por %p86_p10, %p85_p7  ;;  %p136_p13 = scmp.ne.s32.totalorder %s2734_s13, %s2730_s12 }
  0x1b   : > { %3229 = sst [smem:[#allocation14_spill]] %s2896_s8  ;;  %p137_p0 = scmp.eq.s32.totalorder %s2009_s24, 95 }
  0x1c   : > { %s2904_s11 = scalar_select %p124_p11, %s2734_s13, %s126_s10  }
  0x1d   : > { %p2910_p1 = por %p137_p0, %p136_p13  ;;  %p2012_p2 = scmp.ge.s32.totalorder %s2774_s23, 96 }
  0x1f   : > { %159 = sbr.rel (%p2012_p2) target bundleno = 69 (0x45), region = 16 }
  0x24   : > { %162 = sbr.rel (!%p2873_p5) target bundleno = 51 (0x33), region = 20  ;;  %s164_s27 = sand.u32 (%p2873_p5), 1, %s2754_s18  }
  0x25   : > { %s2233_s28 = smul.u32 (%p2873_p5), 48, %s2766_s21  ;;  %s3232_s0 = sld [smem:[#allocation15_spill]] (%p2873_p5) }
  0x26   : > { %s2238_s30 = smul.u32 (%p2873_p5), 96, %s164_s27 }
  0x28   : > { %s166_s24 = scalar_lea.vmem (%p2873_p5), [#allocation3], %s2238_s30 }
  0x2b   : > { %s172_s10 = scalar_lea.vmem %s3232_s0, %s2233_s28 }
  0x2c   : > { %v185_v0 = vld [vmem:[%s172_s10] sm:$0xff]  ;;  %v187_v1 = vld [vmem:[%s172_s10 + $0x8] sm:$0xff]  ;;  %v189_v2 = vld [vmem:[%s172_s10 + $0x10] sm:$0xff] }
  0x2d   : > { %186 = vst [vmem:[%s166_s24] sm:$0xff] %v185_v0  ;;  %188 = vst [vmem:[%s166_s24 + $0x8] sm:$0xff] %v187_v1  ;;  %v191_v3 = vld [vmem:[%s172_s10 + $0x18] sm:$0xff]  ;;  %v193_v4 = vld [vmem:[%s172_s10 + $0x20] sm:$0xff] }
  0x2e   : > { %190 = vst [vmem:[%s166_s24 + $0x10] sm:$0xff] %v189_v2  ;;  %v195_v5 = vld [vmem:[%s172_s10 + $0x28] sm:$0xff]  ;;  %192 = vst [vmem:[%s166_s24 + $0x18] sm:$0xff] %v191_v3  ;;  %v197_v6 = vld [vmem:[%s172_s10 + $0x120] sm:$0xff] }
  0x2f   : > { %194 = vst [vmem:[%s166_s24 + $0x20] sm:$0xff] %v193_v4  ;;  %196 = vst [vmem:[%s166_s24 + $0x28] sm:$0xff] %v195_v5  ;;  %v199_v7 = vld [vmem:[%s172_s10 + $0x128] sm:$0xff]  ;;  %v201_v8 = vld [vmem:[%s172_s10 + $0x130] sm:$0xff] }
  0x30   : > { %198 = vst [vmem:[%s166_s24 + $0x30] sm:$0xff] %v197_v6  ;;  %200 = vst [vmem:[%s166_s24 + $0x38] sm:$0xff] %v199_v7  ;;  %v203_v9 = vld [vmem:[%s172_s10 + $0x138] sm:$0xff]  ;;  %v205_v10 = vld [vmem:[%s172_s10 + $0x140] sm:$0xff] }
  0x31   : > { %202 = vst [vmem:[%s166_s24 + $0x40] sm:$0xff] %v201_v8  ;;  %v207_v11 = vld [vmem:[%s172_s10 + $0x148] sm:$0xff]  ;;  %204 = vst [vmem:[%s166_s24 + $0x48] sm:$0xff] %v203_v9 }
  0x32   : > { %206 = vst [vmem:[%s166_s24 + $0x50] sm:$0xff] %v205_v10  ;;  %208 = vst [vmem:[%s166_s24 + $0x58] sm:$0xff] %v207_v11 }
  0x33 PF: > { %s215_s29 = sand.u32 1, %s2746_s16   ;;  %s2014_s27 = sshll.u32 %s2770_s22, 1 }
  0x34   : > { %s2239_s28 = smul.u32 1536, %s215_s29  ;;  %s216_s18 = scalar_lea.sflag [#allocation5], %s215_s29 }
  0x35   : > { %s2234_s30 = smul.u32 6144, %s2766_s21  ;;  %s2776_s8 = smov [#allocation4]  }
  0x36   : > { %s219_s6 = scalar_lea.vmem [#allocation4], %s2239_s28  ;;  %s2666_s16 = sshll.u32 %s2776_s8, 4  ;;  %s2667_s16 = int_to_ptr.vmem [resolvable:$false] %s2666_s16 }
  0x37   : > { %s226_s5 = sadd.s32 %s2234_s30, %s2014_s27  ;;  %s229_s0 = sshll.u32 %s219_s6, 4  ;;  %s230_s0 = int_to_ptr.vmem [resolvable:$true] %s229_s0 }
  0x38   : > { %s2016_s26 = sshll.u32 %s226_s5, 6  ;;  %s2662_s24 = scalar_lea.vmem %s230_s0, 24576 }
  0x39   : > { %s228_s10 = scalar_lea.hbm %s3212_s1, %s2016_s26  ;;  %p2663_p3 = scmp.ne.s32.totalorder %s230_s0, %s2662_s24 }
  0x3a   : > { %s2668_s22 = scalar_lea.vmem %s2667_s16, 49152  ;;  %p2669_p6 = scmp.lt.s32.totalorder %s230_s0, %s2667_s16 }
  0x3b   : > { %p2664_p4 = pnand %p2663_p3, %p2889_p9  ;;  %p2670_p7 = scmp.lt.s32.totalorder %s2668_s22, %s2662_s24 }
  0x3d   : > { %p2665_p5 = pneg %p2664_p4  ;;  %p2671_p8 = por %p2670_p7, %p2669_p6 }
  0x3f   : > { %p2672_p10 = pnand %p2671_p8, %p2665_p5 }
  0x41   : > { %2675 = shalt.err (!%p2672_p10)
}
  0x42   : > { %s2777_s27 = smov 2048   ;;  %s2778_s28 = smov 128  }
  0x43   : > { %s2779_s25 = smov 8  }
  0x44   : > { %2242 = dma.hbm_to_vmem [thread:$0]  (%p2889_p9), %s228_s10, 24576, %s230_s0, %s216_s18, %s2777_s27, %s2778_s28, %s2779_s25  }
  0x45 PF: > { %p2017_p11 = scmp.ge.s32.totalorder %s2774_s23, 1  ;;  %p245_p13 = scmp.lt.s32.totalorder %s2774_s23, 97 }
  0x47   : > { %p246_p0 = pnand %p2017_p11, %p245_p13 }
  0x48   : > { %s252_s16 = sand.u32 (!%p246_p0), 1, %s2750_s17   ;;  %s258_s22 = sand.u32 (!%p246_p0), 1, %s2742_s15  }
  0x49   : > { %249 = sbr.rel (%p246_p0) target bundleno = 513 (0x201), region = 51  ;;  %s259_s29 = scalar_lea.sflag (!%p246_p0), [#allocation5], %s258_s22 }
  0x4a   : > { %s2240_s26 = smul.u32 (!%p246_p0), 96, %s252_s16 }
  0x4b   : > { %s2241_s4 = smul.u32 (!%p246_p0), 1536, %s258_s22 }
  0x4c   : > { %s2936_s8 = scalar_lea.vmem (!%p246_p0), [#allocation3], %s2240_s26 }
  0x4d   : > { %s2938_s30 = scalar_lea.vmem (!%p246_p0), [#allocation4], %s2241_s4 }
  0x4e   : > { %2725 = dma.done.wait (%p2898_p12), %s259_s29, 24576  }
  0x4f   : > { %2727 = vsyncadd (%p2898_p12), %s259_s29, 4294942720  ;;  %s289_s0 = sand.u32 1, %s2730_s12   ;;  %s2019_s18 = sshll.u32 %s2762_s20, 1 }
  0x50   : > { %s2018_s7 = sshll.u32 %s289_s0, 4  ;;  %p297_p9 = scmp.lt.s32.totalorder %s2019_s18, 31 }
  0x51   : > { %s2952_s10 = scalar_lea.vmem [#allocation6], %s2018_s7  ;;  %p2020_p2 = scmp.ne.s32.totalorder %s2758_s19, 0 }
  0x52   : > { %s3254_s18 = smov (!%p297_p9, %s2019_s18), 31 }
  0x53   : > { %s299_s6 = scalar_lea.vmem %s3213_s2, %s3254_s18  ;;  %306 = sbr.rel (%p2020_p2) target bundleno = 91 (0x5b), region = 63 }
  0x58   : > { %v2780_v12 = vmov 0.0  }
  0x59   : > { %307 = vst [vmem:[#allocation2 + $0x10] sm:$0xff] %v2780_v12  ;;  %308 = vst [vmem:[#allocation2] sm:$0xff] %v2780_v12 }
  0x5a   : > { %309 = vst [vmem:[#allocation2 + $0x18] sm:$0xff] %v2780_v12  ;;  %310 = vst [vmem:[#allocation2 + $0x8] sm:$0xff] %v2780_v12 }
  0x5b PF: > { %v2344_v13 = vld [vmem:[%s2938_s30 + $0x74] ss:$8 sps:$4 sm:$0xff]   ;;  %v2348_v15 = vld [vmem:[%s2938_s30 + $0x70] ss:$8 sps:$4 sm:$0xff]   ;;  %v2350_v17 = vld [vmem:[%s2938_s30 + $0x64] ss:$8 sps:$4 sm:$0xff]  }
  0x5c   : > { %v2346_v14 = vld [vmem:[%s2938_s30 + $0x174] ss:$8 sps:$4 sm:$0xff]   ;;  %1539 = vmatprep.subr.bf16.mxu0 %v2344_v13  ;;  %v2349_v16 = vld [vmem:[%s2938_s30 + $0x170] ss:$8 sps:$4 sm:$0xff]   ;;  %v2352_v18 = vld [vmem:[%s2938_s30 + $0x164] ss:$8 sps:$4 sm:$0xff]  }
  0x5d   : > { %1582 = vmatprep.subr.bf16.mxu1 %v2346_v14  ;;  %1540 = vmatpush1.bf16.msra.mxu0 %v2348_v15  ;;  %v2354_v19 = vld [vmem:[%s2938_s30 + $0x60] ss:$8 sps:$4 sm:$0xff]   ;;  %v2356_v21 = vld [vmem:[%s2938_s30 + $0x54] ss:$8 sps:$4 sm:$0xff]   ;;  %v2360_v23 = vld [vmem:[%s2938_s30 + $0x50] ss:$8 sps:$4 sm:$0xff]  }
  0x5e   : > { %1583 = vmatpush1.bf16.msra.mxu1 %v2349_v16  ;;  %1541 = vmatprep.subr.bf16.mxu0 %v2350_v17  ;;  %v2355_v20 = vld [vmem:[%s2938_s30 + $0x160] ss:$8 sps:$4 sm:$0xff]   ;;  %v2358_v22 = vld [vmem:[%s2938_s30 + $0x154] ss:$8 sps:$4 sm:$0xff]   ;;  %v2361_v24 = vld [vmem:[%s2938_s30 + $0x150] ss:$8 sps:$4 sm:$0xff]  }
  0x5f   : > { %1584 = vmatprep.subr.bf16.mxu1 %v2352_v18  ;;  %v2362_v25 = vld [vmem:[%s2938_s30 + $0x44] ss:$8 sps:$4 sm:$0xff]   ;;  %v2366_v27 = vld [vmem:[%s2938_s30 + $0x40] ss:$8 sps:$4 sm:$0xff]   ;;  %v2368_v29 = vld [vmem:[%s2938_s30 + $0x34] ss:$8 sps:$4 sm:$0xff]  }
  0x60   : > { %v2364_v26 = vld [vmem:[%s2938_s30 + $0x144] ss:$8 sps:$4 sm:$0xff]   ;;  %v2367_v28 = vld [vmem:[%s2938_s30 + $0x140] ss:$8 sps:$4 sm:$0xff]   ;;  %v2370_v30 = vld [vmem:[%s2938_s30 + $0x134] ss:$8 sps:$4 sm:$0xff]  }
  0x61   : > { %1542 = vmatpush1.bf16.msra.mxu0 %v2354_v19  ;;  %v2372_v31 = vld [vmem:[%s2938_s30 + $0x30] ss:$8 sps:$4 sm:$0xff]   ;;  %v2374_v33 = vld [vmem:[%s2938_s30 + $0x24] ss:$8 sps:$4 sm:$0xff]   ;;  %v2378_v35 = vld [vmem:[%s2938_s30 + $0x20] ss:$8 sps:$4 sm:$0xff]  }
  0x62   : > { %1585 = vmatpush1.bf16.msra.mxu1 %v2355_v20  ;;  %1543 = vmatprep.subr.bf16.mxu0 %v2356_v21  ;;  %v2373_v32 = vld [vmem:[%s2938_s30 + $0x130] ss:$8 sps:$4 sm:$0xff]   ;;  %v2376_v34 = vld [vmem:[%s2938_s30 + $0x124] ss:$8 sps:$4 sm:$0xff]   ;;  %v2379_v36 = vld [vmem:[%s2938_s30 + $0x120] ss:$8 sps:$4 sm:$0xff]  }
  0x63   : > { %1586 = vmatprep.subr.bf16.mxu1 %v2358_v22  ;;  %v2380_v37 = vld [vmem:[%s2938_s30 + $0x14] ss:$8 sps:$4 sm:$0xff]   ;;  %v2384_v39 = vld [vmem:[%s2938_s30 + $0x10] ss:$8 sps:$4 sm:$0xff]   ;;  %v2386_v41 = vld [vmem:[%s2938_s30 + $0x4] ss:$8 sps:$4 sm:$0xff]  }
  0x64   : > { %v2382_v38 = vld [vmem:[%s2938_s30 + $0x114] ss:$8 sps:$4 sm:$0xff]   ;;  %v2385_v40 = vld [vmem:[%s2938_s30 + $0x110] ss:$8 sps:$4 sm:$0xff]   ;;  %v2388_v42 = vld [vmem:[%s2938_s30 + $0x104] ss:$8 sps:$4 sm:$0xff]  }
  0x65   : > { %1544 = vmatpush1.bf16.msra.mxu0 %v2360_v23  ;;  %v2390_v43 = vld [vmem:[%s2938_s30] ss:$8 sps:$4 sm:$0xff]   ;;  %v2392_v45 = vld [vmem:[%s2938_s30 + $0xf4] ss:$8 sps:$4 sm:$0xff]   ;;  %v2396_v47 = vld [vmem:[%s2938_s30 + $0xf0] ss:$8 sps:$4 sm:$0xff]  }
  0x66   : > { %1587 = vmatpush1.bf16.msra.mxu1 %v2361_v24  ;;  %1545 = vmatprep.subr.bf16.mxu0 %v2362_v25  ;;  %v2391_v44 = vld [vmem:[%s2938_s30 + $0x100] ss:$8 sps:$4 sm:$0xff]   ;;  %v2394_v46 = vld [vmem:[%s2938_s30 + $0x1f4] ss:$8 sps:$4 sm:$0xff]   ;;  %v2397_v48 = vld [vmem:[%s2938_s30 + $0x1f0] ss:$8 sps:$4 sm:$0xff]  }
  0x67   : > { %1588 = vmatprep.subr.bf16.mxu1 %v2364_v26  ;;  %v2398_v49 = vld [vmem:[%s2938_s30 + $0xe4] ss:$8 sps:$4 sm:$0xff]   ;;  %v2402_v51 = vld [vmem:[%s2938_s30 + $0xe0] ss:$8 sps:$4 sm:$0xff]   ;;  %v2404_v53 = vld [vmem:[%s2938_s30 + $0xd4] ss:$8 sps:$4 sm:$0xff]  }
  0x68   : > { %v2400_v50 = vld [vmem:[%s2938_s30 + $0x1e4] ss:$8 sps:$4 sm:$0xff]   ;;  %v2403_v52 = vld [vmem:[%s2938_s30 + $0x1e0] ss:$8 sps:$4 sm:$0xff]   ;;  %v2406_v54 = vld [vmem:[%s2938_s30 + $0x1d4] ss:$8 sps:$4 sm:$0xff]  }
  0x69   : > { %1546 = vmatpush1.bf16.msra.mxu0 %v2366_v27  ;;  %v2408_v55 = vld [vmem:[%s2938_s30 + $0xd0] ss:$8 sps:$4 sm:$0xff]   ;;  %v2410_v57 = vld [vmem:[%s2938_s30 + $0xc4] ss:$8 sps:$4 sm:$0xff]   ;;  %v2414_v59 = vld [vmem:[%s2938_s30 + $0xc0] ss:$8 sps:$4 sm:$0xff]  }
  0x6a   : > { %1589 = vmatpush1.bf16.msra.mxu1 %v2367_v28  ;;  %1547 = vmatprep.subr.bf16.mxu0 %v2368_v29  ;;  %v2409_v56 = vld [vmem:[%s2938_s30 + $0x1d0] ss:$8 sps:$4 sm:$0xff]   ;;  %v2412_v58 = vld [vmem:[%s2938_s30 + $0x1c4] ss:$8 sps:$4 sm:$0xff]   ;;  %v2415_v60 = vld [vmem:[%s2938_s30 + $0x1c0] ss:$8 sps:$4 sm:$0xff]  }
  0x6b   : > { %1590 = vmatprep.subr.bf16.mxu1 %v2370_v30  ;;  %v2416_v61 = vld [vmem:[%s2938_s30 + $0xb4] ss:$8 sps:$4 sm:$0xff]   ;;  %v2420_v1 = vld [vmem:[%s2938_s30 + $0xb0] ss:$8 sps:$4 sm:$0xff]   ;;  %v2422_v3 = vld [vmem:[%s2938_s30 + $0xa4] ss:$8 sps:$4 sm:$0xff]  }
  0x6c   : > { %v2442_v62 = vld [vmem:[%s2936_s8 + $0x4] ss:$48 sps:$4 sm:$0xff]   ;;  %v2445_v0 = vld [vmem:[%s2936_s8 + $0xc] ss:$48 sps:$4 sm:$0xff]   ;;  %v2421_v2 = vld [vmem:[%s2938_s30 + $0x1b0] ss:$8 sps:$4 sm:$0xff]  }
  0x6d   : > { %1548 = vmatpush1.bf16.msra.mxu0 %v2372_v31  ;;  %v2418_v63 = vld [vmem:[%s2938_s30 + $0x1b4] ss:$8 sps:$4 sm:$0xff]   ;;  %1571 = vmatprep.mubr.bf16.mxu0 %v2442_v62  ;;  %v2424_v4 = vld [vmem:[%s2938_s30 + $0x1a4] ss:$8 sps:$4 sm:$0xff]   ;;  %v2426_v5 = vld [vmem:[%s2938_s30 + $0xa0] ss:$8 sps:$4 sm:$0xff]  }
  0x6e   : > { %1591 = vmatpush1.bf16.msra.mxu1 %v2373_v32  ;;  %1549 = vmatprep.subr.bf16.mxu0 %v2374_v33  ;;  %v2427_v6 = vld [vmem:[%s2938_s30 + $0x1a0] ss:$8 sps:$4 sm:$0xff]   ;;  %v2428_v7 = vld [vmem:[%s2938_s30 + $0x94] ss:$8 sps:$4 sm:$0xff]   ;;  %v2432_v9 = vld [vmem:[%s2938_s30 + $0x90] ss:$8 sps:$4 sm:$0xff]  }
  0x6f   : > { %1592 = vmatprep.subr.bf16.mxu1 %v2376_v34  ;;  %1614 = vmatprep.mubr.bf16.mxu1 %v2445_v0  ;;  %v2430_v8 = vld [vmem:[%s2938_s30 + $0x194] ss:$8 sps:$4 sm:$0xff]   ;;  %v2433_v10 = vld [vmem:[%s2938_s30 + $0x190] ss:$8 sps:$4 sm:$0xff]   ;;  %v2434_v11 = vld [vmem:[%s2938_s30 + $0x84] ss:$8 sps:$4 sm:$0xff]  }
  0x70   : > { %v2436_v12 = vld [vmem:[%s2938_s30 + $0x184] ss:$8 sps:$4 sm:$0xff]   ;;  %v2438_v13 = vld [vmem:[%s2938_s30 + $0x80] ss:$8 sps:$4 sm:$0xff]   ;;  %v2448_v15 = vld [vmem:[%s2938_s30 + $0x274] ss:$8 sps:$4 sm:$0xff]  }
  0x71   : > { %1550 = vmatpush1.bf16.msra.mxu0 %v2378_v35  ;;  %v2439_v14 = vld [vmem:[%s2938_s30 + $0x180] ss:$8 sps:$4 sm:$0xff]   ;;  %v2451_v16 = vld [vmem:[%s2938_s30 + $0x374] ss:$8 sps:$4 sm:$0xff]   ;;  %v2446_v19 = vld [vmem:[%s2938_s30 + $0x270] ss:$8 sps:$4 sm:$0xff]  }
  0x72   : > { %1593 = vmatpush1.bf16.msra.mxu1 %v2379_v36  ;;  %1551 = vmatprep.subr.bf16.mxu0 %v2380_v37  ;;  %v2440_v17 = vld [vmem:[%s2936_s8] ss:$48 sps:$4 sm:$0xff]   ;;  %v2443_v18 = vld [vmem:[%s2936_s8 + $0x8] ss:$48 sps:$4 sm:$0xff]   ;;  %v2454_v21 = vld [vmem:[%s2938_s30 + $0x264] ss:$8 sps:$4 sm:$0xff]  }
  0x73   : > { %1594 = vmatprep.subr.bf16.mxu1 %v2382_v38  ;;  %v2449_v20 = vld [vmem:[%s2938_s30 + $0x370] ss:$8 sps:$4 sm:$0xff]   ;;  %v2457_v22 = vld [vmem:[%s2938_s30 + $0x364] ss:$8 sps:$4 sm:$0xff]   ;;  %v2452_v23 = vld [vmem:[%s2938_s30 + $0x260] ss:$8 sps:$4 sm:$0xff]  }
  0x74   : > { %v2455_v24 = vld [vmem:[%s2938_s30 + $0x360] ss:$8 sps:$4 sm:$0xff]   ;;  %v2460_v25 = vld [vmem:[%s2938_s30 + $0x254] ss:$8 sps:$4 sm:$0xff]   ;;  %v2458_v27 = vld [vmem:[%s2938_s30 + $0x250] ss:$8 sps:$4 sm:$0xff]  }
  0x75   : > { %1552 = vmatpush1.bf16.msra.mxu0 %v2384_v39  ;;  %v2463_v26 = vld [vmem:[%s2938_s30 + $0x354] ss:$8 sps:$4 sm:$0xff]   ;;  %v2461_v28 = vld [vmem:[%s2938_s30 + $0x350] ss:$8 sps:$4 sm:$0xff]   ;;  %v2466_v29 = vld [vmem:[%s2938_s30 + $0x244] ss:$8 sps:$4 sm:$0xff]  }
  0x76   : > { %1595 = vmatpush1.bf16.msra.mxu1 %v2385_v40  ;;  %1553 = vmatprep.subr.bf16.mxu0 %v2386_v41  ;;  %v2469_v30 = vld [vmem:[%s2938_s30 + $0x344] ss:$8 sps:$4 sm:$0xff]   ;;  %v2464_v31 = vld [vmem:[%s2938_s30 + $0x240] ss:$8 sps:$4 sm:$0xff]   ;;  %v2472_v33 = vld [vmem:[%s2938_s30 + $0x234] ss:$8 sps:$4 sm:$0xff]  }
  0x77   : > { %1596 = vmatprep.subr.bf16.mxu1 %v2388_v42  ;;  %v2467_v32 = vld [vmem:[%s2938_s30 + $0x340] ss:$8 sps:$4 sm:$0xff]   ;;  %v2475_v34 = vld [vmem:[%s2938_s30 + $0x334] ss:$8 sps:$4 sm:$0xff]   ;;  %v2470_v35 = vld [vmem:[%s2938_s30 + $0x230] ss:$8 sps:$4 sm:$0xff]  }
  0x78   : > { %v2473_v36 = vld [vmem:[%s2938_s30 + $0x330] ss:$8 sps:$4 sm:$0xff]   ;;  %v2478_v37 = vld [vmem:[%s2938_s30 + $0x224] ss:$8 sps:$4 sm:$0xff]   ;;  %v2476_v39 = vld [vmem:[%s2938_s30 + $0x220] ss:$8 sps:$4 sm:$0xff]  }
  0x79   : > { %1554 = vmatpush1.bf16.msra.mxu0 %v2390_v43  ;;  %v2481_v38 = vld [vmem:[%s2938_s30 + $0x324] ss:$8 sps:$4 sm:$0xff]   ;;  %v2479_v40 = vld [vmem:[%s2938_s30 + $0x320] ss:$8 sps:$4 sm:$0xff]   ;;  %v2484_v41 = vld [vmem:[%s2938_s30 + $0x214] ss:$8 sps:$4 sm:$0xff]  }
  0x7a   : > { %1597 = vmatpush1.bf16.msra.mxu1 %v2391_v44  ;;  %1555 = vmatprep.subr.bf16.mxu0 %v2392_v45  ;;  %v2487_v42 = vld [vmem:[%s2938_s30 + $0x314] ss:$8 sps:$4 sm:$0xff]   ;;  %v2482_v43 = vld [vmem:[%s2938_s30 + $0x210] ss:$8 sps:$4 sm:$0xff]   ;;  %v2490_v45 = vld [vmem:[%s2938_s30 + $0x204] ss:$8 sps:$4 sm:$0xff]  }
  0x7b   : > { %1598 = vmatprep.subr.bf16.mxu1 %v2394_v46  ;;  %v2485_v44 = vld [vmem:[%s2938_s30 + $0x310] ss:$8 sps:$4 sm:$0xff]   ;;  %v2493_v46 = vld [vmem:[%s2938_s30 + $0x304] ss:$8 sps:$4 sm:$0xff]   ;;  %p2225_p12 = scmp.ne.s32.totalorder %s2758_s19, 5 }
  0x7c   : > { %v2509_v62 = vld [vmem:[%s2938_s30 + $0x3d0] ss:$8 sps:$4 sm:$0xff]   ;;  %v2517_v0 = vld [vmem:[%s2938_s30 + $0x3c4] ss:$8 sps:$4 sm:$0xff]  }
  0x7d   : > { %1556 = vmatpush2.bf16.msra.mxu0 %v2396_v47  ;;  %v2544_v47 = vld [vmem:[%s2936_s8 + $0x14] ss:$48 sps:$4 sm:$0xff]  }
  0x7e   : > { %1599 = vmatpush2.bf16.msra.mxu1 %v2397_v48  ;;  %1557 = vmatprep.subr.bf16.mxu0 %v2398_v49  ;;  %v2547_v48 = vld [vmem:[%s2936_s8 + $0x1c] ss:$48 sps:$4 sm:$0xff]   ;;  %v2488_v49 = vld [vmem:[%s2938_s30 + $0x200] ss:$8 sps:$4 sm:$0xff]  }
  0x7f   : > { %1600 = vmatprep.subr.bf16.mxu1 %v2400_v50  ;;  %v2491_v50 = vld [vmem:[%s2938_s30 + $0x300] ss:$8 sps:$4 sm:$0xff]  }
  0x81   : > { %1558 = vmatpush2.bf16.msra.mxu0 %v2402_v51  ;;  %v2496_v51 = vld [vmem:[%s2938_s30 + $0x2f4] ss:$8 sps:$4 sm:$0xff]  }
  0x82   : > { %1601 = vmatpush2.bf16.msra.mxu1 %v2403_v52  ;;  %1559 = vmatprep.subr.bf16.mxu0 %v2404_v53  ;;  %v2499_v52 = vld [vmem:[%s2938_s30 + $0x3f4] ss:$8 sps:$4 sm:$0xff]   ;;  %v2494_v53 = vld [vmem:[%s2938_s30 + $0x2f0] ss:$8 sps:$4 sm:$0xff]  }
  0x83   : > { %1602 = vmatprep.subr.bf16.mxu1 %v2406_v54  ;;  %v2497_v54 = vld [vmem:[%s2938_s30 + $0x3f0] ss:$8 sps:$4 sm:$0xff]  }
  0x85   : > { %1560 = vmatpush2.bf16.msra.mxu0 %v2408_v55  ;;  %v2502_v55 = vld [vmem:[%s2938_s30 + $0x2e4] ss:$8 sps:$4 sm:$0xff]  }
  0x86   : > { %1603 = vmatpush2.bf16.msra.mxu1 %v2409_v56  ;;  %1561 = vmatprep.subr.bf16.mxu0 %v2410_v57  ;;  %v2505_v56 = vld [vmem:[%s2938_s30 + $0x3e4] ss:$8 sps:$4 sm:$0xff]   ;;  %v2500_v57 = vld [vmem:[%s2938_s30 + $0x2e0] ss:$8 sps:$4 sm:$0xff]  }
  0x87   : > { %1604 = vmatprep.subr.bf16.mxu1 %v2412_v58  ;;  %v2503_v58 = vld [vmem:[%s2938_s30 + $0x3e0] ss:$8 sps:$4 sm:$0xff]  }
  0x89   : > { %1562 = vmatpush2.bf16.msra.mxu0 %v2414_v59  ;;  %v2508_v59 = vld [vmem:[%s2938_s30 + $0x2d4] ss:$8 sps:$4 sm:$0xff]  }
  0x8a   : > { %1605 = vmatpush2.bf16.msra.mxu1 %v2415_v60  ;;  %1563 = vmatprep.subr.bf16.mxu0 %v2416_v61  ;;  %v2511_v60 = vld [vmem:[%s2938_s30 + $0x3d4] ss:$8 sps:$4 sm:$0xff]   ;;  %v2506_v61 = vld [vmem:[%s2938_s30 + $0x2d0] ss:$8 sps:$4 sm:$0xff]  }
  0x8b   : > { %1606 = vmatprep.subr.bf16.mxu1 %v2418_v63  ;;  %v2514_v63 = vld [vmem:[%s2938_s30 + $0x2c4] ss:$8 sps:$4 sm:$0xff]  }
  0x8d   : > { %1564 = vmatpush2.bf16.msra.mxu0 %v2420_v1  ;;  %v2512_v1 = vld [vmem:[%s2938_s30 + $0x2c0] ss:$8 sps:$4 sm:$0xff]  }
  0x8e   : > { %1607 = vmatpush2.bf16.msra.mxu1 %v2421_v2  ;;  %1565 = vmatprep.subr.bf16.mxu0 %v2422_v3  ;;  %v2515_v2 = vld [vmem:[%s2938_s30 + $0x3c0] ss:$8 sps:$4 sm:$0xff]   ;;  %v2520_v3 = vld [vmem:[%s2938_s30 + $0x2b4] ss:$8 sps:$4 sm:$0xff]  }
  0x8f   : > { %1608 = vmatprep.subr.bf16.mxu1 %v2424_v4  ;;  %v2523_v4 = vld [vmem:[%s2938_s30 + $0x3b4] ss:$8 sps:$4 sm:$0xff]  }
  0x91   : > { %1566 = vmatpush2.bf16.msra.mxu0 %v2426_v5  ;;  %v2518_v5 = vld [vmem:[%s2938_s30 + $0x2b0] ss:$8 sps:$4 sm:$0xff]  }
  0x92   : > { %1609 = vmatpush2.bf16.msra.mxu1 %v2427_v6  ;;  %1567 = vmatprep.subr.bf16.mxu0 %v2428_v7  ;;  %v2521_v6 = vld [vmem:[%s2938_s30 + $0x3b0] ss:$8 sps:$4 sm:$0xff]   ;;  %v2526_v7 = vld [vmem:[%s2938_s30 + $0x2a4] ss:$8 sps:$4 sm:$0xff]  }
  0x93   : > { %1610 = vmatprep.subr.bf16.mxu1 %v2430_v8  ;;  %v2529_v8 = vld [vmem:[%s2938_s30 + $0x3a4] ss:$8 sps:$4 sm:$0xff]  }
  0x95   : > { %1568 = vmatpush2.bf16.msra.mxu0 %v2432_v9  ;;  %v2524_v9 = vld [vmem:[%s2938_s30 + $0x2a0] ss:$8 sps:$4 sm:$0xff]  }
  0x96   : > { %1611 = vmatpush2.bf16.msra.mxu1 %v2433_v10  ;;  %1569 = vmatprep.subr.bf16.mxu0 %v2434_v11  ;;  %v2527_v10 = vld [vmem:[%s2938_s30 + $0x3a0] ss:$8 sps:$4 sm:$0xff]   ;;  %v2532_v11 = vld [vmem:[%s2938_s30 + $0x294] ss:$8 sps:$4 sm:$0xff]  }
  0x97   : > { %1612 = vmatprep.subr.bf16.mxu1 %v2436_v12  ;;  %v2535_v12 = vld [vmem:[%s2938_s30 + $0x394] ss:$8 sps:$4 sm:$0xff]  }
  0x99   : > { %1570 = vmatpush2.bf16.msra.mxu0 %v2438_v13  ;;  %v2530_v13 = vld [vmem:[%s2938_s30 + $0x290] ss:$8 sps:$4 sm:$0xff]  }
  0x9a   : > { %1613 = vmatpush2.bf16.msra.mxu1 %v2439_v14  ;;  %1625 = vmatprep.subr.bf16.mxu0 %v2448_v15  ;;  %v2533_v14 = vld [vmem:[%s2938_s30 + $0x390] ss:$8 sps:$4 sm:$0xff]   ;;  %v2538_v15 = vld [vmem:[%s2938_s30 + $0x284] ss:$8 sps:$4 sm:$0xff]  }
  0x9b   : > { %1668 = vmatprep.subr.bf16.mxu1 %v2451_v16  ;;  %v2541_v16 = vld [vmem:[%s2938_s30 + $0x384] ss:$8 sps:$4 sm:$0xff]  }
  0x9c   : > { %1572 = vmatmul.mubr.bf16.vlgmr.msra.gmra.mxu0 %v2440_v17  ;;  %v2536_v17 = vld [vmem:[%s2938_s30 + $0x280] ss:$8 sps:$4 sm:$0xff]  }
  0x9d   : > { %1615 = vmatmul.mubr.bf16.vlgmr.msra.gmra.mxu1 %v2443_v18  ;;  %1626 = vmatpush1.bf16.msra.mxu0 %v2446_v19  ;;  %v2539_v18 = vld [vmem:[%s2938_s30 + $0x380] ss:$8 sps:$4 sm:$0xff]   ;;  %v2550_v19 = vld [vmem:[%s2938_s30 + $0x474] ss:$8 sps:$4 sm:$0xff]  }
  0x9e   : > { %1669 = vmatpush1.bf16.msra.mxu1 %v2449_v20  ;;  %1627 = vmatprep.subr.bf16.mxu0 %v2454_v21  ;;  %v2553_v20 = vld [vmem:[%s2938_s30 + $0x574] ss:$8 sps:$4 sm:$0xff]   ;;  %v2542_v21 = vld [vmem:[%s2936_s8 + $0x10] ss:$48 sps:$4 sm:$0xff]  }
  0x9f   : > { %1670 = vmatprep.subr.bf16.mxu1 %v2457_v22  ;;  %1657 = vmatprep.mubr.bf16.mxu0 %v2544_v47  ;;  %v2545_v22 = vld [vmem:[%s2936_s8 + $0x18] ss:$48 sps:$4 sm:$0xff]   ;;  %v2586_v47 = vld [vmem:[%s2938_s30 + $0x414] ss:$8 sps:$4 sm:$0xff]  }
  0xa0   : > { %1700 = vmatprep.mubr.bf16.mxu1 %v2547_v48  ;;  %v2589_v48 = vld [vmem:[%s2938_s30 + $0x514] ss:$8 sps:$4 sm:$0xff]  }
  0xa1   : > { %1628 = vmatpush1.bf16.msra.mxu0 %v2452_v23  ;;  %v2548_v23 = vld [vmem:[%s2938_s30 + $0x470] ss:$8 sps:$4 sm:$0xff]  }
  0xa2   : > { %1671 = vmatpush1.bf16.msra.mxu1 %v2455_v24  ;;  %1629 = vmatprep.subr.bf16.mxu0 %v2460_v25  ;;  %v2551_v24 = vld [vmem:[%s2938_s30 + $0x570] ss:$8 sps:$4 sm:$0xff]   ;;  %v2556_v25 = vld [vmem:[%s2938_s30 + $0x464] ss:$8 sps:$4 sm:$0xff]  }
  0xa3   : > { %1672 = vmatprep.subr.bf16.mxu1 %v2463_v26  ;;  %v2559_v26 = vld [vmem:[%s2938_s30 + $0x564] ss:$8 sps:$4 sm:$0xff]  }
  0xa5   : > { %1630 = vmatpush1.bf16.msra.mxu0 %v2458_v27  ;;  %v2554_v27 = vld [vmem:[%s2938_s30 + $0x460] ss:$8 sps:$4 sm:$0xff]  }
  0xa6   : > { %1673 = vmatpush1.bf16.msra.mxu1 %v2461_v28  ;;  %1631 = vmatprep.subr.bf16.mxu0 %v2466_v29  ;;  %v2557_v28 = vld [vmem:[%s2938_s30 + $0x560] ss:$8 sps:$4 sm:$0xff]   ;;  %v2562_v29 = vld [vmem:[%s2938_s30 + $0x454] ss:$8 sps:$4 sm:$0xff]  }
  0xa7   : > { %1674 = vmatprep.subr.bf16.mxu1 %v2469_v30  ;;  %v2565_v30 = vld [vmem:[%s2938_s30 + $0x554] ss:$8 sps:$4 sm:$0xff]  }
  0xa9   : > { %1632 = vmatpush1.bf16.msra.mxu0 %v2464_v31  ;;  %v2646_v31 = vld [vmem:[%s2936_s8 + $0x24] ss:$48 sps:$4 sm:$0xff]  }
  0xaa   : > { %1675 = vmatpush1.bf16.msra.mxu1 %v2467_v32  ;;  %1633 = vmatprep.subr.bf16.mxu0 %v2472_v33  ;;  %v2649_v32 = vld [vmem:[%s2936_s8 + $0x2c] ss:$48 sps:$4 sm:$0xff]   ;;  %v2560_v33 = vld [vmem:[%s2938_s30 + $0x450] ss:$8 sps:$4 sm:$0xff]  }
  0xab   : > { %1676 = vmatprep.subr.bf16.mxu1 %v2475_v34  ;;  %v2563_v34 = vld [vmem:[%s2938_s30 + $0x550] ss:$8 sps:$4 sm:$0xff]  }
  0xad   : > { %1634 = vmatpush1.bf16.msra.mxu0 %v2470_v35  ;;  %v2568_v35 = vld [vmem:[%s2938_s30 + $0x444] ss:$8 sps:$4 sm:$0xff]  }
  0xae   : > { %1677 = vmatpush1.bf16.msra.mxu1 %v2473_v36  ;;  %1635 = vmatprep.subr.bf16.mxu0 %v2478_v37  ;;  %v2571_v36 = vld [vmem:[%s2938_s30 + $0x544] ss:$8 sps:$4 sm:$0xff]   ;;  %v2566_v37 = vld [vmem:[%s2938_s30 + $0x440] ss:$8 sps:$4 sm:$0xff]  }
  0xaf   : > { %1678 = vmatprep.subr.bf16.mxu1 %v2481_v38  ;;  %v2569_v38 = vld [vmem:[%s2938_s30 + $0x540] ss:$8 sps:$4 sm:$0xff]  }
  0xb1   : > { %1636 = vmatpush1.bf16.msra.mxu0 %v2476_v39  ;;  %v2574_v39 = vld [vmem:[%s2938_s30 + $0x434] ss:$8 sps:$4 sm:$0xff]  }
  0xb2   : > { %1679 = vmatpush1.bf16.msra.mxu1 %v2479_v40  ;;  %1637 = vmatprep.subr.bf16.mxu0 %v2484_v41  ;;  %v2577_v40 = vld [vmem:[%s2938_s30 + $0x534] ss:$8 sps:$4 sm:$0xff]   ;;  %v2572_v41 = vld [vmem:[%s2938_s30 + $0x430] ss:$8 sps:$4 sm:$0xff]  }
  0xb3   : > { %1680 = vmatprep.subr.bf16.mxu1 %v2487_v42  ;;  %v2575_v42 = vld [vmem:[%s2938_s30 + $0x530] ss:$8 sps:$4 sm:$0xff]  }
  0xb5   : > { %1638 = vmatpush1.bf16.msra.mxu0 %v2482_v43  ;;  %v2580_v43 = vld [vmem:[%s2938_s30 + $0x424] ss:$8 sps:$4 sm:$0xff]  }
  0xb6   : > { %1681 = vmatpush1.bf16.msra.mxu1 %v2485_v44  ;;  %1639 = vmatprep.subr.bf16.mxu0 %v2490_v45  ;;  %v2583_v44 = vld [vmem:[%s2938_s30 + $0x524] ss:$8 sps:$4 sm:$0xff]   ;;  %v2578_v45 = vld [vmem:[%s2938_s30 + $0x420] ss:$8 sps:$4 sm:$0xff]  }
  0xb7   : > { %1682 = vmatprep.subr.bf16.mxu1 %v2493_v46  ;;  %v2581_v46 = vld [vmem:[%s2938_s30 + $0x520] ss:$8 sps:$4 sm:$0xff]  }
  0xb9   : > { %1640 = vmatpush1.bf16.msra.mxu0 %v2488_v49  ;;  %v2584_v49 = vld [vmem:[%s2938_s30 + $0x410] ss:$8 sps:$4 sm:$0xff]  }
  0xba   : > { %1683 = vmatpush1.bf16.msra.mxu1 %v2491_v50  ;;  %1641 = vmatprep.subr.bf16.mxu0 %v2496_v51  ;;  %v2587_v50 = vld [vmem:[%s2938_s30 + $0x510] ss:$8 sps:$4 sm:$0xff]   ;;  %v2592_v51 = vld [vmem:[%s2938_s30 + $0x404] ss:$8 sps:$4 sm:$0xff]  }
  0xbb   : > { %1684 = vmatprep.subr.bf16.mxu1 %v2499_v52  ;;  %v2595_v52 = vld [vmem:[%s2938_s30 + $0x504] ss:$8 sps:$4 sm:$0xff]  }
  0xbd   : > { %1642 = vmatpush2.bf16.msra.mxu0 %v2494_v53  ;;  %v2590_v53 = vld [vmem:[%s2938_s30 + $0x400] ss:$8 sps:$4 sm:$0xff]  }
  0xbe   : > { %1685 = vmatpush2.bf16.msra.mxu1 %v2497_v54  ;;  %1643 = vmatprep.subr.bf16.mxu0 %v2502_v55  ;;  %v2593_v54 = vld [vmem:[%s2938_s30 + $0x500] ss:$8 sps:$4 sm:$0xff]   ;;  %v2598_v55 = vld [vmem:[%s2938_s30 + $0x4f4] ss:$8 sps:$4 sm:$0xff]  }
  0xbf   : > { %1686 = vmatprep.subr.bf16.mxu1 %v2505_v56  ;;  %v2601_v56 = vld [vmem:[%s2938_s30 + $0x5f4] ss:$8 sps:$4 sm:$0xff]  }
  0xc1   : > { %1644 = vmatpush2.bf16.msra.mxu0 %v2500_v57  ;;  %v2596_v57 = vld [vmem:[%s2938_s30 + $0x4f0] ss:$8 sps:$4 sm:$0xff]  }
  0xc2   : > { %1687 = vmatpush2.bf16.msra.mxu1 %v2503_v58  ;;  %1645 = vmatprep.subr.bf16.mxu0 %v2508_v59  ;;  %v2599_v58 = vld [vmem:[%s2938_s30 + $0x5f0] ss:$8 sps:$4 sm:$0xff]   ;;  %v2604_v59 = vld [vmem:[%s2938_s30 + $0x4e4] ss:$8 sps:$4 sm:$0xff]  }
  0xc3   : > { %1688 = vmatprep.subr.bf16.mxu1 %v2511_v60  ;;  %v2607_v60 = vld [vmem:[%s2938_s30 + $0x5e4] ss:$8 sps:$4 sm:$0xff]  }
  0xc5   : > { %1646 = vmatpush2.bf16.msra.mxu0 %v2506_v61  ;;  %v2602_v61 = vld [vmem:[%s2938_s30 + $0x4e0] ss:$8 sps:$4 sm:$0xff]  }
  0xc6   : > { %1689 = vmatpush2.bf16.msra.mxu1 %v2509_v62  ;;  %1647 = vmatprep.subr.bf16.mxu0 %v2514_v63  ;;  %v2605_v62 = vld [vmem:[%s2938_s30 + $0x5e0] ss:$8 sps:$4 sm:$0xff]   ;;  %v2610_v63 = vld [vmem:[%s2938_s30 + $0x4d4] ss:$8 sps:$4 sm:$0xff]  }
  0xc7   : > { %1690 = vmatprep.subr.bf16.mxu1 %v2517_v0  ;;  %v2613_v0 = vld [vmem:[%s2938_s30 + $0x5d4] ss:$8 sps:$4 sm:$0xff]  }
  0xc9   : > { %1648 = vmatpush2.bf16.msra.mxu0 %v2512_v1  ;;  %v2608_v1 = vld [vmem:[%s2938_s30 + $0x4d0] ss:$8 sps:$4 sm:$0xff]  }
  0xca   : > { %1691 = vmatpush2.bf16.msra.mxu1 %v2515_v2  ;;  %1649 = vmatprep.subr.bf16.mxu0 %v2520_v3  ;;  %v2611_v2 = vld [vmem:[%s2938_s30 + $0x5d0] ss:$8 sps:$4 sm:$0xff]   ;;  %v2616_v3 = vld [vmem:[%s2938_s30 + $0x4c4] ss:$8 sps:$4 sm:$0xff]  }
  0xcb   : > { %1692 = vmatprep.subr.bf16.mxu1 %v2523_v4  ;;  %v2619_v4 = vld [vmem:[%s2938_s30 + $0x5c4] ss:$8 sps:$4 sm:$0xff]  }
  0xcd   : > { %1650 = vmatpush2.bf16.msra.mxu0 %v2518_v5  ;;  %v2614_v5 = vld [vmem:[%s2938_s30 + $0x4c0] ss:$8 sps:$4 sm:$0xff]  }
  0xce   : > { %1693 = vmatpush2.bf16.msra.mxu1 %v2521_v6  ;;  %1651 = vmatprep.subr.bf16.mxu0 %v2526_v7  ;;  %v2617_v6 = vld [vmem:[%s2938_s30 + $0x5c0] ss:$8 sps:$4 sm:$0xff]   ;;  %v2622_v7 = vld [vmem:[%s2938_s30 + $0x4b4] ss:$8 sps:$4 sm:$0xff]  }
  0xcf   : > { %1694 = vmatprep.subr.bf16.mxu1 %v2529_v8  ;;  %v2625_v8 = vld [vmem:[%s2938_s30 + $0x5b4] ss:$8 sps:$4 sm:$0xff]  }
  0xd1   : > { %1652 = vmatpush2.bf16.msra.mxu0 %v2524_v9  ;;  %v2620_v9 = vld [vmem:[%s2938_s30 + $0x4b0] ss:$8 sps:$4 sm:$0xff]  }
  0xd2   : > { %1695 = vmatpush2.bf16.msra.mxu1 %v2527_v10  ;;  %1653 = vmatprep.subr.bf16.mxu0 %v2532_v11  ;;  %v2623_v10 = vld [vmem:[%s2938_s30 + $0x5b0] ss:$8 sps:$4 sm:$0xff]   ;;  %v2628_v11 = vld [vmem:[%s2938_s30 + $0x4a4] ss:$8 sps:$4 sm:$0xff]  }
  0xd3   : > { %1696 = vmatprep.subr.bf16.mxu1 %v2535_v12  ;;  %v2631_v12 = vld [vmem:[%s2938_s30 + $0x5a4] ss:$8 sps:$4 sm:$0xff]  }
  0xd5   : > { %1654 = vmatpush2.bf16.msra.mxu0 %v2530_v13  ;;  %v2626_v13 = vld [vmem:[%s2938_s30 + $0x4a0] ss:$8 sps:$4 sm:$0xff]  }
  0xd6   : > { %1697 = vmatpush2.bf16.msra.mxu1 %v2533_v14  ;;  %1655 = vmatprep.subr.bf16.mxu0 %v2538_v15  ;;  %v2629_v14 = vld [vmem:[%s2938_s30 + $0x5a0] ss:$8 sps:$4 sm:$0xff]   ;;  %v2634_v15 = vld [vmem:[%s2938_s30 + $0x494] ss:$8 sps:$4 sm:$0xff]  }
  0xd7   : > { %1698 = vmatprep.subr.bf16.mxu1 %v2541_v16  ;;  %v2637_v16 = vld [vmem:[%s2938_s30 + $0x594] ss:$8 sps:$4 sm:$0xff]  }
  0xd9   : > { %1656 = vmatpush2.bf16.msra.mxu0 %v2536_v17  ;;  %v2632_v17 = vld [vmem:[%s2938_s30 + $0x490] ss:$8 sps:$4 sm:$0xff]  }
  0xda   : > { %1699 = vmatpush2.bf16.msra.mxu1 %v2539_v18  ;;  %1711 = vmatprep.subr.bf16.mxu0 %v2550_v19  ;;  %v2635_v18 = vld [vmem:[%s2938_s30 + $0x590] ss:$8 sps:$4 sm:$0xff]   ;;  %v2640_v19 = vld [vmem:[%s2938_s30 + $0x484] ss:$8 sps:$4 sm:$0xff]  }
  0xdb   : > { %1754 = vmatprep.subr.bf16.mxu1 %v2553_v20  ;;  %v2643_v20 = vld [vmem:[%s2938_s30 + $0x584] ss:$8 sps:$4 sm:$0xff]  }
  0xdc   : > { %1658 = vmatmul.mubr.bf16.vlgmr.msra.gmra.mxu0 %v2542_v21  ;;  %v2638_v21 = vld [vmem:[%s2938_s30 + $0x480] ss:$8 sps:$4 sm:$0xff]  }
  0xdd   : > { %1701 = vmatmul.mubr.bf16.vlgmr.msra.gmra.mxu1 %v2545_v22  ;;  %1712 = vmatpush1.bf16.msra.mxu0 %v2548_v23  ;;  %v2641_v22 = vld [vmem:[%s2938_s30 + $0x580] ss:$8 sps:$4 sm:$0xff]  }
  0xde   : > { %1755 = vmatpush1.bf16.msra.mxu1 %v2551_v24  ;;  %1713 = vmatprep.subr.bf16.mxu0 %v2556_v25  ;;  %v2644_v23 = vld [vmem:[%s2936_s8 + $0x20] ss:$48 sps:$4 sm:$0xff]   ;;  %v2647_v24 = vld [vmem:[%s2936_s8 + $0x28] ss:$48 sps:$4 sm:$0xff]  }
  0xdf   : > { %1756 = vmatprep.subr.bf16.mxu1 %v2559_v26  ;;  %1743 = vmatprep.mubr.bf16.mxu0 %v2646_v31 }
  0xe0   : > { %1786 = vmatprep.mubr.bf16.mxu1 %v2649_v32 }
  0xe1   : > { %1714 = vmatpush1.bf16.msra.mxu0 %v2554_v27 }
  0xe2   : > { %1757 = vmatpush1.bf16.msra.mxu1 %v2557_v28  ;;  %1715 = vmatprep.subr.bf16.mxu0 %v2562_v29 }
  0xe3   : > { %1758 = vmatprep.subr.bf16.mxu1 %v2565_v30 }
  0xe5   : > { %1716 = vmatpush1.bf16.msra.mxu0 %v2560_v33 }
  0xe6   : > { %1759 = vmatpush1.bf16.msra.mxu1 %v2563_v34  ;;  %1717 = vmatprep.subr.bf16.mxu0 %v2568_v35 }
  0xe7   : > { %1760 = vmatprep.subr.bf16.mxu1 %v2571_v36 }
  0xe9   : > { %1718 = vmatpush1.bf16.msra.mxu0 %v2566_v37 }
  0xea   : > { %1761 = vmatpush1.bf16.msra.mxu1 %v2569_v38  ;;  %1719 = vmatprep.subr.bf16.mxu0 %v2574_v39 }
  0xeb   : > { %1762 = vmatprep.subr.bf16.mxu1 %v2577_v40 }
  0xed   : > { %1720 = vmatpush1.bf16.msra.mxu0 %v2572_v41 }
  0xee   : > { %1763 = vmatpush1.bf16.msra.mxu1 %v2575_v42  ;;  %1721 = vmatprep.subr.bf16.mxu0 %v2580_v43 }
  0xef   : > { %1764 = vmatprep.subr.bf16.mxu1 %v2583_v44 }
  0xf1   : > { %1722 = vmatpush1.bf16.msra.mxu0 %v2578_v45 }
  0xf2   : > { %1765 = vmatpush1.bf16.msra.mxu1 %v2581_v46  ;;  %1723 = vmatprep.subr.bf16.mxu0 %v2586_v47 }
  0xf3   : > { %1766 = vmatprep.subr.bf16.mxu1 %v2589_v48 }
  0xf5   : > { %1724 = vmatpush1.bf16.msra.mxu0 %v2584_v49 }
  0xf6   : > { %1767 = vmatpush1.bf16.msra.mxu1 %v2587_v50  ;;  %1725 = vmatprep.subr.bf16.mxu0 %v2592_v51 }
  0xf7   : > { %1768 = vmatprep.subr.bf16.mxu1 %v2595_v52 }
  0xf9   : > { %1726 = vmatpush1.bf16.msra.mxu0 %v2590_v53 }
  0xfa   : > { %1769 = vmatpush1.bf16.msra.mxu1 %v2593_v54  ;;  %1727 = vmatprep.subr.bf16.mxu0 %v2598_v55  ;;  %v311_v54 = vld [vmem:[#allocation2 + $0x10] sm:$0xff] }
  0xfb   : > { %1770 = vmatprep.subr.bf16.mxu1 %v2601_v56 }
  0xfd   : > { %1728 = vmatpush2.bf16.msra.mxu0 %v2596_v57 }
  0xfe   : > { %1771 = vmatpush2.bf16.msra.mxu1 %v2599_v58  ;;  %1729 = vmatprep.subr.bf16.mxu0 %v2604_v59 }
  0xff   : > { %1772 = vmatprep.subr.bf16.mxu1 %v2607_v60  ;;  %v312_v60 = vld [vmem:[#allocation2] sm:$0xff] }
 0x101   : > { %1730 = vmatpush2.bf16.msra.mxu0 %v2602_v61 }
 0x102   : > { %1773 = vmatpush2.bf16.msra.mxu1 %v2605_v62  ;;  %1731 = vmatprep.subr.bf16.mxu0 %v2610_v63 }
 0x103   : > { %1774 = vmatprep.subr.bf16.mxu1 %v2613_v0 }
 0x105   : > { %1732 = vmatpush2.bf16.msra.mxu0 %v2608_v1 }
 0x106   : > { %1775 = vmatpush2.bf16.msra.mxu1 %v2611_v2  ;;  %1733 = vmatprep.subr.bf16.mxu0 %v2616_v3  ;;  %v313_v3 = vld [vmem:[#allocation2 + $0x18] sm:$0xff] }
 0x107   : > { %1776 = vmatprep.subr.bf16.mxu1 %v2619_v4 }
 0x109   : > { %1734 = vmatpush2.bf16.msra.mxu0 %v2614_v5 }
 0x10a   : > { %1777 = vmatpush2.bf16.msra.mxu1 %v2617_v6  ;;  %1735 = vmatprep.subr.bf16.mxu0 %v2622_v7 }
 0x10b   : > { %1778 = vmatprep.subr.bf16.mxu1 %v2625_v8  ;;  %v314_v8 = vld [vmem:[#allocation2 + $0x8] sm:$0xff] }
 0x10d   : > { %1736 = vmatpush2.bf16.msra.mxu0 %v2620_v9 }
 0x10e   : > { %1779 = vmatpush2.bf16.msra.mxu1 %v2623_v10  ;;  %1737 = vmatprep.subr.bf16.mxu0 %v2628_v11 }
 0x10f   : > { %1780 = vmatprep.subr.bf16.mxu1 %v2631_v12 }
 0x111   : > { %1738 = vmatpush2.bf16.msra.mxu0 %v2626_v13 }
 0x112   : > { %1781 = vmatpush2.bf16.msra.mxu1 %v2629_v14  ;;  %1739 = vmatprep.subr.bf16.mxu0 %v2634_v15 }
 0x113   : > { %1782 = vmatprep.subr.bf16.mxu1 %v2637_v16 }
 0x115   : > { %1740 = vmatpush2.bf16.msra.mxu0 %v2632_v17 }
 0x116   : > { %1783 = vmatpush2.bf16.msra.mxu1 %v2635_v18  ;;  %1741 = vmatprep.subr.bf16.mxu0 %v2640_v19 }
 0x117   : > { %1784 = vmatprep.subr.bf16.mxu1 %v2643_v20 }
 0x119   : > { %1742 = vmatpush2.bf16.msra.mxu0 %v2638_v21 }
 0x11a   : > { %1785 = vmatpush2.bf16.msra.mxu1 %v2641_v22 }
 0x11c   : > { %1744 = vmatmul.mubr.bf16.vlgmr.msra.gmra.mxu0 %v2644_v23 }
 0x11d   : > { %1787 = vmatmul.mubr.bf16.vlgmr.msra.gmra.mxu1 %v2647_v24 }
 0x15c   : > { %v1573_v25 = vpop.f32.mrf.mxu0 }
 0x15d   : > { %v1616_v26 = vpop.f32.mrf.mxu1 }
 0x15e   : > { %v1575_v27 = vpop.f32.mrf.mxu0  ;;  %v1617_v37 = vadd.f32 %v1616_v26, %v1573_v25 }
 0x15f   : > { %v1618_v28 = vpop.f32.mrf.mxu1 }
 0x160   : > { %v1577_v29 = vpop.f32.mrf.mxu0  ;;  %v1619_v40 = vadd.f32 %v1618_v28, %v1575_v27 }
 0x161   : > { %v1620_v30 = vpop.f32.mrf.mxu1 }
 0x162   : > { %v1579_v31 = vpop.f32.mrf.mxu0  ;;  %v1621_v42 = vadd.f32 %v1620_v30, %v1577_v29 }
 0x163   : > { %v1622_v32 = vpop.f32.mrf.mxu1 }
 0x164   : > { %v1623_v46 = vadd.f32 %v1622_v32, %v1579_v31 }
 0x19c   : > { %v1659_v33 = vpop.f32.mrf.mxu0 }
 0x19d   : > { %v1702_v34 = vpop.f32.mrf.mxu1  ;;  %v1660_v41 = vadd.f32 %v1659_v33, %v1617_v37 }
 0x19e   : > { %v1661_v35 = vpop.f32.mrf.mxu0 }
 0x19f   : > { %v1704_v36 = vpop.f32.mrf.mxu1  ;;  %v1662_v43 = vadd.f32 %v1661_v35, %v1619_v40  ;;  %v1703_v47 = vadd.f32 %v1702_v34, %v1660_v41 }
 0x1a0   : > { %v1663_v38 = vpop.f32.mrf.mxu0 }
 0x1a1   : > { %v1706_v39 = vpop.f32.mrf.mxu1  ;;  %v1664_v48 = vadd.f32 %v1663_v38, %v1621_v42  ;;  %v1705_v51 = vadd.f32 %v1704_v36, %v1662_v43 }
 0x1a2   : > { %v1665_v44 = vpop.f32.mrf.mxu0 }
 0x1a3   : > { %v1708_v45 = vpop.f32.mrf.mxu1  ;;  %v1666_v52 = vadd.f32 %v1665_v44, %v1623_v46  ;;  %v1707_v57 = vadd.f32 %v1706_v39, %v1664_v48 }
 0x1a5   : > { %v1709_v63 = vadd.f32 %v1708_v45, %v1666_v52 }
 0x1dc   : > { %v1745_v49 = vpop.f32.mrf.mxu0 }
 0x1dd   : > { %v1788_v50 = vpop.f32.mrf.mxu1  ;;  %v1746_v53 = vadd.f32 %v1745_v49, %v1703_v47 }
 0x1de   : > { %v1747_v55 = vpop.f32.mrf.mxu0 }
 0x1df   : > { %v1790_v56 = vpop.f32.mrf.mxu1  ;;  %v1789_v58 = vadd.f32 %v1788_v50, %v1746_v53  ;;  %v1748_v59 = vadd.f32 %v1747_v55, %v1705_v51 }
 0x1e0   : > { %v1749_v61 = vpop.f32.mrf.mxu0 }
 0x1e1   : > { %v1792_v62 = vpop.f32.mrf.mxu1  ;;  %v1797_v0 = vadd.f32 %v1789_v58, %v311_v54  ;;  %v1791_v1 = vadd.f32 %v1790_v56, %v1748_v59  ;;  %v1750_v2 = vadd.f32 %v1749_v61, %v1707_v57 }
 0x1e2   : > { %v1751_v4 = vpop.f32.mrf.mxu0 }
 0x1e3   : > { %1801 = vst [vmem:[#allocation2 + $0x10] sm:$0xff] %v1797_v0  ;;  %v1798_v5 = vadd.f32 %v1791_v1, %v312_v60  ;;  %v1793_v6 = vadd.f32 %v1792_v62, %v1750_v2  ;;  %v1752_v7 = vadd.f32 %v1751_v4, %v1709_v63  ;;  %v1794_v9 = vpop.f32.mrf.mxu1 }
 0x1e5   : > { %1802 = vst [vmem:[#allocation2] sm:$0xff] %v1798_v5  ;;  %v1799_v10 = vadd.f32 %v1793_v6, %v313_v3  ;;  %v1795_v11 = vadd.f32 %v1794_v9, %v1752_v7  ;;  %1808 = sbr.rel (%p2225_p12) target bundleno = 505 (0x1f9), region = 67 }
 0x1e7   : > { %1803 = vst [vmem:[#allocation2 + $0x18] sm:$0xff] %v1799_v10  ;;  %v1800_v12 = vadd.f32 %v1795_v11, %v314_v8 }
 0x1e9   : > { %1804 = vst [vmem:[#allocation2 + $0x8] sm:$0xff] %v1800_v12 }
 0x1ea   : > { %v1815_v13 = vlaneseq  ;;  %v1813_v15 = vld [vmem:[%s299_s6] sm:$0x3]  ;;  %v1809_v16 = vld [vmem:[#allocation2 + $0x10] sm:$0xff] }
 0x1ec   : > { %v1816_v14 = vshrl.u32 %v1815_v13, 7  ;;  %v1810_v19 = vld [vmem:[#allocation2] sm:$0xff] }
 0x1ee   : > { %v1817_v17 = vsub.s32 0, %v1816_v14  ;;  %v1821_v18 = vsub.s32 1, %v1816_v14  ;;  %v1811_v20 = vld [vmem:[#allocation2 + $0x18] sm:$0xff] }
 0x1f0   : > { %v1812_v21 = vld [vmem:[#allocation2 + $0x8] sm:$0xff]  ;;  %v1818_v22 = vrot.slane %v1813_v15, %v1817_v17  ;;  %v1822_v23 = vrot.slane %v1813_v15, %v1821_v18 }
 0x1f2   : > { %v1825_v24 = vadd.f32 %v1818_v22, %v1809_v16  ;;  %v1826_v25 = vadd.f32 %v1822_v23, %v1810_v19  ;;  %v1827_v26 = vadd.f32 %v1818_v22, %v1811_v20  ;;  %v1828_v27 = vadd.f32 %v1822_v23, %v1812_v21 }
 0x1f4   : > { %v1829_v28 = vmax.f32 %v1825_v24, 0.0  ;;  %v1830_v29 = vmax.f32 %v1826_v25, 0.0  ;;  %v1831_v30 = vmax.f32 %v1827_v26, 0.0  ;;  %v1832_v31 = vmax.f32 %v1828_v27, 0.0 }
 0x1f6   : > { %v2235_v32 = vpack.c.bf16 %v1830_v29, %v1829_v28  ;;  %v2236_v33 = vpack.c.bf16 %v1832_v31, %v1831_v30 }
 0x1f8   : > { %1845 = vst [vmem:[%s2952_s10] sm:$0xff] %v2235_v32  ;;  %1846 = vst [vmem:[%s2952_s10 + $0x8] sm:$0xff] %v2236_v33 }
 0x1f9 PF: > { %1853 = sbr.rel (!%p2910_p1) target bundleno = 513 (0x201), region = 71  ;;  %s2237_s19 = sshll.u32 (%p2910_p1), %s2762_s20, 3 }
 0x1fa   : > { %s1859_s28 = scalar_lea.vmem (%p2910_p1), %s3214_s3, %s2237_s19 }
 0x1ff   : > { %v1890_v34 = vld [vmem:[%s2952_s10] sm:$0xff]  ;;  %v1892_v35 = vld [vmem:[%s2952_s10 + $0x8] sm:$0xff] }
 0x200   : > { %1891 = vst [vmem:[%s1859_s28] sm:$0xff] %v1890_v34  ;;  %1893 = vst [vmem:[%s1859_s28 + $0x80] sm:$0xff] %v1892_v35 }
 0x201 PF: > { %s16_s23 = sadd.s32 1, %s2774_s23   ;;  %s3233_s25 = sld [smem:[#allocation8_spill]] }
 0x202   : > { %p13_p3 = scmp.ge.s32.totalorder %s16_s23, 98   ;;  %s3234_s16 = sld [smem:[#allocation14_spill]] }
 0x203   : > { %s3235_s17 = sld [smem:[#allocation9_spill]]  ;;  %s3240_s12 = smov %s2734_s13 }
 0x204   : > { %s3236_s18 = sld [smem:[#allocation13_spill]]  ;;  %s3241_s13 = smov %s2904_s11 }
 0x205   : > { %s3237_s20 = sld [smem:[#allocation10_spill]]  ;;  %s3242_s14 = smov %s2742_s15 }
 0x206   : > { %s3238_s22 = sld [smem:[#allocation11_spill]]  ;;  %s3244_s19 = smov %s2766_s21 }
 0x207   : > { %s3239_s26 = sld [smem:[#allocation12_spill]]  ;;  %s3243_s15 = smov %s3233_s25 }
 0x209   :  { %15 = sbr.rel (!%p13_p3) target bundleno = 9 (0x9), region = 152 }
 0x20c   : > { %s3245_s21 = smov %s3238_s22 }
 0x20d   : > { %s3246_s22 = smov %s3239_s26 }
 0x20e   :  { %1909 = vsyncpa [#allocation5], 1 }
 0x20f   :  { %1911 = vsyncpa [#allocation5 + $0x1], 1 }

// kernel: _lambda_.22
= control target key start
LH: loop header
LB: loop body
LE: loop exit
PB: predicated region body
PF: predicated region fallthrough
CT: control target
= control target key end

     0   :  { %s3177_s0 = inlined_call_operand.vmem [shape: bf16[16,4096], index: 0, kind: input, shape index: {}]   ;;  %s3178_s1 = inlined_call_operand.vmem [shape: bf16[4096,4096], index: 1, kind: input, shape index: {}]   ;;  %s3179_s2 = inlined_call_operand.vmem [shape: f32[1,4096], index: 2, kind: input, shape index: {}]   ;;  %s3180_s3 = inlined_call_operand.vmem [shape: bf16[16,4096], index: 3, kind: output, shape index: {}]  }
   0x1   :  { %3182 = sst [smem:[#allocation7_spill]] %s3177_s0 }
   0x2   :  { %3183 = sst [smem:[#allocation8_spill]] %s3178_s1 }
   0x3   :  { %s2583_s12 = smov 0   ;;  %s2585_s13 = smov 0  }
   0x4   :  { %s2587_s14 = smov 0   ;;  %s2589_s15 = smov 0  }
   0x5   :  { %s2591_s16 = smov 0   ;;  %s2593_s17 = smov 0  }
   0x6   :  { %s2595_s18 = smov 0   ;;  %s2597_s19 = smov 0  }
   0x7   :  { %s2599_s20 = smov 0   ;;  %s2601_s21 = smov 0  }
   0x8   :  { %s2603_s22 = smov 0  }
   0x9 LB: > { %s2026_s23 = sadd.s32 4294967295, %s2560_s22   ;;  %s25_s24 = sadd.s32 1, %s2552_s20  ;;  %s2560_s22 = sphi %s2603_s22, %s13_s22   ;;  %s2556_s21 = sphi %s2601_s21, %s3200_s21   ;;  %s2552_s20 = sphi %s2599_s20, %s3199_s20   ;;  %s2548_s19 = sphi %s2597_s19, %s3198_s19   ;;  %s2544_s18 = sphi %s2595_s18, %s3197_s18   ;;  %s2540_s17 = sphi %s2593_s17, %s3196_s17   ;;  %s2536_s16 = sphi %s2591_s16, %s3195_s16   ;;  %s2532_s15 = sphi %s2589_s15, %s3194_s15   ;;  %s2528_s14 = sphi %s2587_s14, %s3193_s14   ;;  %s2524_s13 = sphi %s2585_s13, %s3192_s13   ;;  %s2520_s12 = sphi %s2583_s12, %s3191_s12  }
   0xa   : > { %p26_p0 = scmp.ge.s32.totalorder %s25_s24, 4  ;;  %s28_s25 = sadd.s32 1, %s2556_s21 }
   0xb   : > { %s41_s26 = sadd.s32 1, %s2540_s17  ;;  %p48_p1 = scmp.ne.s32.totalorder %s2540_s17, %s2536_s16 }
   0xc   : > { %s3202_s24 = smov (%p26_p0, %s25_s24), 0  ;;  %s3204_s25 = smov (!%p26_p0, %s28_s25), %s2556_s21 }
   0xd   : > { %s37_s27 = ssub.s32 %s2552_s20, %s3202_s24  ;;  %p49_p2 = scmp.eq.s32.totalorder %s2560_s22, 0 }
   0xe   : > { %p30_p3 = scmp.ge.s32.totalorder %s3204_s25, 16  ;;  %p39_p4 = scmp.eq.s32.totalorder %s37_s27, 0 }
   0xf   : > { %p2650_p5 = por %p49_p2, %p48_p1  ;;  %s69_s29 = sadd.s32 1, %s2532_s15 }
  0x10   : > { %s3206_s25 = smov (%p30_p3, %s3204_s25), 0  ;;  %p76_p6 = scmp.ne.s32.totalorder %s2532_s15, %s2528_s14 }
  0x11   : > { %3185 = sst [smem:[#allocation6_spill]] %s3206_s25  ;;  %s65_s4 = ssub.s32 %s2556_s21, %s3206_s25 }
  0x12   : > { %s2658_s30 = scalar_select %p39_p4, %s2540_s17, %s41_s26  }
  0x13   : > { %s66_s5 = sor.u32 %s65_s4, %s37_s27  ;;  %p121_p7 = scmp.eq.s32.totalorder %s65_s4, 0 }
  0x14   : > { %p67_p8 = scmp.eq.s32.totalorder %s66_s5, 0  ;;  %p2664_p9 = por %p76_p6, %p49_p2 }
  0x15   : > { %s123_s7 = sadd.s32 1, %s2524_s13  ;;  %p133_p10 = scmp.ne.s32.totalorder %s2524_s13, %s2520_s12 }
  0x16   : > { %s2672_s8 = scalar_select %p67_p8, %s2532_s15, %s69_s29  }
  0x17   : > { %s2675_s9 = scalar_select %p121_p7, %s2524_s13, %s123_s7  }
  0x18   : > { %p134_p11 = scmp.eq.s32.totalorder %s2026_s23, 63  ;;  %p2029_p13 = scmp.ge.s32.totalorder %s2560_s22, 64 }
  0x1a   : > { %p2677_p12 = por %p134_p11, %p133_p10  ;;  %156 = sbr.rel (%p2029_p13) target bundleno = 183 (0xb7), region = 16 }
  0x1f   : > { %159 = sbr.rel (!%p2650_p5) target bundleno = 45 (0x2d), region = 20  ;;  %s161_s11 = sand.u32 (%p2650_p5), 1, %s2540_s17  }
  0x20   : > { %s2188_s26 = sshll.u32 (%p2650_p5), %s2552_s20, 5  ;;  %s2030_s27 = sshll.u32 (%p2650_p5), %s161_s11, 6 }
  0x21   : > { %s3188_s0 = sld [smem:[#allocation7_spill]] (%p2650_p5)  ;;  %s163_s23 = scalar_lea.vmem (%p2650_p5), [#allocation3], %s2030_s27 }
  0x27   : > { %s169_s5 = scalar_lea.vmem %s3188_s0, %s2188_s26 }
  0x28   : > { %v182_v0 = vld [vmem:[%s169_s5] sm:$0xff]  ;;  %v184_v1 = vld [vmem:[%s169_s5 + $0x8] sm:$0xff]  ;;  %v186_v2 = vld [vmem:[%s169_s5 + $0x10] sm:$0xff] }
  0x29   : > { %183 = vst [vmem:[%s163_s23] sm:$0xff] %v182_v0  ;;  %185 = vst [vmem:[%s163_s23 + $0x8] sm:$0xff] %v184_v1  ;;  %v188_v3 = vld [vmem:[%s169_s5 + $0x18] sm:$0xff]  ;;  %v190_v4 = vld [vmem:[%s169_s5 + $0x80] sm:$0xff] }
  0x2a   : > { %187 = vst [vmem:[%s163_s23 + $0x10] sm:$0xff] %v186_v2  ;;  %v192_v5 = vld [vmem:[%s169_s5 + $0x88] sm:$0xff]  ;;  %189 = vst [vmem:[%s163_s23 + $0x18] sm:$0xff] %v188_v3  ;;  %v194_v6 = vld [vmem:[%s169_s5 + $0x90] sm:$0xff] }
  0x2b   : > { %191 = vst [vmem:[%s163_s23 + $0x20] sm:$0xff] %v190_v4  ;;  %193 = vst [vmem:[%s163_s23 + $0x28] sm:$0xff] %v192_v5  ;;  %v196_v7 = vld [vmem:[%s169_s5 + $0x98] sm:$0xff] }
  0x2c   : > { %195 = vst [vmem:[%s163_s23 + $0x30] sm:$0xff] %v194_v6  ;;  %197 = vst [vmem:[%s163_s23 + $0x38] sm:$0xff] %v196_v7 }
  0x2d PF: > { %203 = sbr.rel (!%p2664_p9) target bundleno = 183 (0xb7), region = 43  ;;  %s205_s28 = sand.u32 (%p2664_p9), 1, %s2532_s15  }
  0x2e   : > { %s2035_s7 = sshll.u32 (%p2664_p9), %s2556_s21, 1  ;;  %s2033_s11 = sshll.u32 (%p2664_p9), %s205_s28, 10 }
  0x2f   : > { %s2189_s26 = sshll.u32 (%p2664_p9), %s2552_s20, 12  ;;  %s3189_s1 = sld [smem:[#allocation8_spill]] (%p2664_p9) }
  0x30   : > { %s211_s27 = sadd.s32 (%p2664_p9), %s2189_s26, %s2035_s7  ;;  %s2702_s6 = scalar_lea.vmem (%p2664_p9), [#allocation4], %s2033_s11 }
  0x31   : > { %s2037_s29 = sshll.u32 (%p2664_p9), %s211_s27, 2 }
  0x35   : > { %s2697_s25 = scalar_lea.vmem %s3189_s1, %s2037_s29 }
  0x36   : > { %v496_v8 = vld [vmem:[%s2697_s25] sm:$0xff] }
  0x37   : > { %v498_v9 = vld [vmem:[%s2697_s25 + $0x80] sm:$0xff]  ;;  %497 = vst [vmem:[%s2702_s6] sm:$0xff] %v496_v8 }
  0x38   : > { %v500_v10 = vld [vmem:[%s2697_s25 + $0x100] sm:$0xff]  ;;  %499 = vst [vmem:[%s2702_s6 + $0x8] sm:$0xff] %v498_v9 }
  0x39   : > { %501 = vst [vmem:[%s2702_s6 + $0x10] sm:$0xff] %v500_v10  ;;  %v502_v11 = vld [vmem:[%s2697_s25 + $0x180] sm:$0xff] }
  0x3a   : > { %v504_v12 = vld [vmem:[%s2697_s25 + $0x200] sm:$0xff]  ;;  %503 = vst [vmem:[%s2702_s6 + $0x18] sm:$0xff] %v502_v11 }
  0x3b   : > { %v506_v13 = vld [vmem:[%s2697_s25 + $0x280] sm:$0xff]  ;;  %505 = vst [vmem:[%s2702_s6 + $0x20] sm:$0xff] %v504_v12 }
  0x3c   : > { %507 = vst [vmem:[%s2702_s6 + $0x28] sm:$0xff] %v506_v13  ;;  %v508_v14 = vld [vmem:[%s2697_s25 + $0x300] sm:$0xff] }
  0x3d   : > { %v510_v15 = vld [vmem:[%s2697_s25 + $0x380] sm:$0xff]  ;;  %509 = vst [vmem:[%s2702_s6 + $0x30] sm:$0xff] %v508_v14 }
  0x3e   : > { %v512_v16 = vld [vmem:[%s2697_s25 + $0x400] sm:$0xff]  ;;  %511 = vst [vmem:[%s2702_s6 + $0x38] sm:$0xff] %v510_v15 }
  0x3f   : > { %513 = vst [vmem:[%s2702_s6 + $0x40] sm:$0xff] %v512_v16  ;;  %v514_v17 = vld [vmem:[%s2697_s25 + $0x480] sm:$0xff] }
  0x40   : > { %v516_v18 = vld [vmem:[%s2697_s25 + $0x500] sm:$0xff]  ;;  %515 = vst [vmem:[%s2702_s6 + $0x48] sm:$0xff] %v514_v17 }
  0x41   : > { %v518_v19 = vld [vmem:[%s2697_s25 + $0x580] sm:$0xff]  ;;  %517 = vst [vmem:[%s2702_s6 + $0x50] sm:$0xff] %v516_v18 }
  0x42   : > { %519 = vst [vmem:[%s2702_s6 + $0x58] sm:$0xff] %v518_v19  ;;  %v520_v20 = vld [vmem:[%s2697_s25 + $0x600] sm:$0xff] }
  0x43   : > { %v522_v21 = vld [vmem:[%s2697_s25 + $0x680] sm:$0xff]  ;;  %521 = vst [vmem:[%s2702_s6 + $0x60] sm:$0xff] %v520_v20 }
  0x44   : > { %v524_v22 = vld [vmem:[%s2697_s25 + $0x700] sm:$0xff]  ;;  %523 = vst [vmem:[%s2702_s6 + $0x68] sm:$0xff] %v522_v21 }
  0x45   : > { %525 = vst [vmem:[%s2702_s6 + $0x70] sm:$0xff] %v524_v22  ;;  %v526_v23 = vld [vmem:[%s2697_s25 + $0x780] sm:$0xff] }
  0x46   : > { %v528_v24 = vld [vmem:[%s2697_s25 + $0x800] sm:$0xff]  ;;  %527 = vst [vmem:[%s2702_s6 + $0x78] sm:$0xff] %v526_v23 }
  0x47   : > { %v530_v25 = vld [vmem:[%s2697_s25 + $0x880] sm:$0xff]  ;;  %529 = vst [vmem:[%s2702_s6 + $0x80] sm:$0xff] %v528_v24 }
  0x48   : > { %531 = vst [vmem:[%s2702_s6 + $0x88] sm:$0xff] %v530_v25  ;;  %v532_v26 = vld [vmem:[%s2697_s25 + $0x900] sm:$0xff] }
  0x49   : > { %v534_v27 = vld [vmem:[%s2697_s25 + $0x980] sm:$0xff]  ;;  %533 = vst [vmem:[%s2702_s6 + $0x90] sm:$0xff] %v532_v26 }
  0x4a   : > { %v536_v28 = vld [vmem:[%s2697_s25 + $0xa00] sm:$0xff]  ;;  %535 = vst [vmem:[%s2702_s6 + $0x98] sm:$0xff] %v534_v27 }
  0x4b   : > { %537 = vst [vmem:[%s2702_s6 + $0xa0] sm:$0xff] %v536_v28  ;;  %v538_v29 = vld [vmem:[%s2697_s25 + $0xa80] sm:$0xff] }
  0x4c   : > { %v540_v30 = vld [vmem:[%s2697_s25 + $0xb00] sm:$0xff]  ;;  %539 = vst [vmem:[%s2702_s6 + $0xa8] sm:$0xff] %v538_v29 }
  0x4d   : > { %v542_v31 = vld [vmem:[%s2697_s25 + $0xb80] sm:$0xff]  ;;  %541 = vst [vmem:[%s2702_s6 + $0xb0] sm:$0xff] %v540_v30 }
  0x4e   : > { %543 = vst [vmem:[%s2702_s6 + $0xb8] sm:$0xff] %v542_v31  ;;  %v544_v32 = vld [vmem:[%s2697_s25 + $0xc00] sm:$0xff] }
  0x4f   : > { %v546_v33 = vld [vmem:[%s2697_s25 + $0xc80] sm:$0xff]  ;;  %545 = vst [vmem:[%s2702_s6 + $0xc0] sm:$0xff] %v544_v32 }
  0x50   : > { %v548_v34 = vld [vmem:[%s2697_s25 + $0xd00] sm:$0xff]  ;;  %547 = vst [vmem:[%s2702_s6 + $0xc8] sm:$0xff] %v546_v33 }
  0x51   : > { %549 = vst [vmem:[%s2702_s6 + $0xd0] sm:$0xff] %v548_v34  ;;  %v550_v35 = vld [vmem:[%s2697_s25 + $0xd80] sm:$0xff] }
  0x52   : > { %v552_v36 = vld [vmem:[%s2697_s25 + $0xe00] sm:$0xff]  ;;  %551 = vst [vmem:[%s2702_s6 + $0xd8] sm:$0xff] %v550_v35 }
  0x53   : > { %v554_v37 = vld [vmem:[%s2697_s25 + $0xe80] sm:$0xff]  ;;  %553 = vst [vmem:[%s2702_s6 + $0xe0] sm:$0xff] %v552_v36 }
  0x54   : > { %555 = vst [vmem:[%s2702_s6 + $0xe8] sm:$0xff] %v554_v37  ;;  %v556_v38 = vld [vmem:[%s2697_s25 + $0xf00] sm:$0xff] }
  0x55   : > { %v558_v39 = vld [vmem:[%s2697_s25 + $0xf80] sm:$0xff]  ;;  %557 = vst [vmem:[%s2702_s6 + $0xf0] sm:$0xff] %v556_v38 }
  0x56   : > { %v560_v40 = vld [vmem:[%s2697_s25 + $0x1000] sm:$0xff]  ;;  %559 = vst [vmem:[%s2702_s6 + $0xf8] sm:$0xff] %v558_v39 }
  0x57   : > { %561 = vst [vmem:[%s2702_s6 + $0x100] sm:$0xff] %v560_v40  ;;  %v562_v41 = vld [vmem:[%s2697_s25 + $0x1080] sm:$0xff] }
  0x58   : > { %v564_v42 = vld [vmem:[%s2697_s25 + $0x1100] sm:$0xff]  ;;  %563 = vst [vmem:[%s2702_s6 + $0x108] sm:$0xff] %v562_v41 }
  0x59   : > { %v566_v43 = vld [vmem:[%s2697_s25 + $0x1180] sm:$0xff]  ;;  %565 = vst [vmem:[%s2702_s6 + $0x110] sm:$0xff] %v564_v42 }
  0x5a   : > { %567 = vst [vmem:[%s2702_s6 + $0x118] sm:$0xff] %v566_v43  ;;  %v568_v44 = vld [vmem:[%s2697_s25 + $0x1200] sm:$0xff] }
  0x5b   : > { %v570_v45 = vld [vmem:[%s2697_s25 + $0x1280] sm:$0xff]  ;;  %569 = vst [vmem:[%s2702_s6 + $0x120] sm:$0xff] %v568_v44 }
  0x5c   : > { %v572_v46 = vld [vmem:[%s2697_s25 + $0x1300] sm:$0xff]  ;;  %571 = vst [vmem:[%s2702_s6 + $0x128] sm:$0xff] %v570_v45 }
  0x5d   : > { %573 = vst [vmem:[%s2702_s6 + $0x130] sm:$0xff] %v572_v46  ;;  %v574_v47 = vld [vmem:[%s2697_s25 + $0x1380] sm:$0xff] }
  0x5e   : > { %v576_v48 = vld [vmem:[%s2697_s25 + $0x1400] sm:$0xff]  ;;  %575 = vst [vmem:[%s2702_s6 + $0x138] sm:$0xff] %v574_v47 }
  0x5f   : > { %v578_v49 = vld [vmem:[%s2697_s25 + $0x1480] sm:$0xff]  ;;  %577 = vst [vmem:[%s2702_s6 + $0x140] sm:$0xff] %v576_v48 }
  0x60   : > { %579 = vst [vmem:[%s2702_s6 + $0x148] sm:$0xff] %v578_v49  ;;  %v580_v50 = vld [vmem:[%s2697_s25 + $0x1500] sm:$0xff] }
  0x61   : > { %v582_v51 = vld [vmem:[%s2697_s25 + $0x1580] sm:$0xff]  ;;  %581 = vst [vmem:[%s2702_s6 + $0x150] sm:$0xff] %v580_v50 }
  0x62   : > { %v584_v52 = vld [vmem:[%s2697_s25 + $0x1600] sm:$0xff]  ;;  %583 = vst [vmem:[%s2702_s6 + $0x158] sm:$0xff] %v582_v51 }
  0x63   : > { %585 = vst [vmem:[%s2702_s6 + $0x160] sm:$0xff] %v584_v52  ;;  %v586_v53 = vld [vmem:[%s2697_s25 + $0x1680] sm:$0xff] }
  0x64   : > { %v588_v54 = vld [vmem:[%s2697_s25 + $0x1700] sm:$0xff]  ;;  %587 = vst [vmem:[%s2702_s6 + $0x168] sm:$0xff] %v586_v53 }
  0x65   : > { %v590_v55 = vld [vmem:[%s2697_s25 + $0x1780] sm:$0xff]  ;;  %589 = vst [vmem:[%s2702_s6 + $0x170] sm:$0xff] %v588_v54 }
  0x66   : > { %591 = vst [vmem:[%s2702_s6 + $0x178] sm:$0xff] %v590_v55  ;;  %v592_v56 = vld [vmem:[%s2697_s25 + $0x1800] sm:$0xff] }
  0x67   : > { %v594_v57 = vld [vmem:[%s2697_s25 + $0x1880] sm:$0xff]  ;;  %593 = vst [vmem:[%s2702_s6 + $0x180] sm:$0xff] %v592_v56 }
  0x68   : > { %v596_v58 = vld [vmem:[%s2697_s25 + $0x1900] sm:$0xff]  ;;  %595 = vst [vmem:[%s2702_s6 + $0x188] sm:$0xff] %v594_v57 }
  0x69   : > { %597 = vst [vmem:[%s2702_s6 + $0x190] sm:$0xff] %v596_v58  ;;  %v598_v59 = vld [vmem:[%s2697_s25 + $0x1980] sm:$0xff] }
  0x6a   : > { %v600_v60 = vld [vmem:[%s2697_s25 + $0x1a00] sm:$0xff]  ;;  %599 = vst [vmem:[%s2702_s6 + $0x198] sm:$0xff] %v598_v59 }
  0x6b   : > { %v602_v61 = vld [vmem:[%s2697_s25 + $0x1a80] sm:$0xff]  ;;  %601 = vst [vmem:[%s2702_s6 + $0x1a0] sm:$0xff] %v600_v60 }
  0x6c   : > { %603 = vst [vmem:[%s2702_s6 + $0x1a8] sm:$0xff] %v602_v61  ;;  %v604_v62 = vld [vmem:[%s2697_s25 + $0x1b00] sm:$0xff] }
  0x6d   : > { %v606_v63 = vld [vmem:[%s2697_s25 + $0x1b80] sm:$0xff]  ;;  %605 = vst [vmem:[%s2702_s6 + $0x1b0] sm:$0xff] %v604_v62 }
  0x6e   : > { %v608_v0 = vld [vmem:[%s2697_s25 + $0x1c00] sm:$0xff]  ;;  %607 = vst [vmem:[%s2702_s6 + $0x1b8] sm:$0xff] %v606_v63 }
  0x6f   : > { %609 = vst [vmem:[%s2702_s6 + $0x1c0] sm:$0xff] %v608_v0  ;;  %v610_v1 = vld [vmem:[%s2697_s25 + $0x1c80] sm:$0xff] }
  0x70   : > { %v612_v2 = vld [vmem:[%s2697_s25 + $0x1d00] sm:$0xff]  ;;  %611 = vst [vmem:[%s2702_s6 + $0x1c8] sm:$0xff] %v610_v1 }
  0x71   : > { %v614_v3 = vld [vmem:[%s2697_s25 + $0x1d80] sm:$0xff]  ;;  %613 = vst [vmem:[%s2702_s6 + $0x1d0] sm:$0xff] %v612_v2 }
  0x72   : > { %615 = vst [vmem:[%s2702_s6 + $0x1d8] sm:$0xff] %v614_v3  ;;  %v616_v4 = vld [vmem:[%s2697_s25 + $0x1e00] sm:$0xff] }
  0x73   : > { %v618_v5 = vld [vmem:[%s2697_s25 + $0x1e80] sm:$0xff]  ;;  %617 = vst [vmem:[%s2702_s6 + $0x1e0] sm:$0xff] %v616_v4 }
  0x74   : > { %v620_v6 = vld [vmem:[%s2697_s25 + $0x1f00] sm:$0xff]  ;;  %619 = vst [vmem:[%s2702_s6 + $0x1e8] sm:$0xff] %v618_v5 }
  0x75   : > { %621 = vst [vmem:[%s2702_s6 + $0x1f0] sm:$0xff] %v620_v6  ;;  %v622_v7 = vld [vmem:[%s2697_s25 + $0x1f80] sm:$0xff] }
  0x76   : > { %v624_v8 = vld [vmem:[%s2697_s25 + $0x2000] sm:$0xff]  ;;  %623 = vst [vmem:[%s2702_s6 + $0x1f8] sm:$0xff] %v622_v7 }
  0x77   : > { %v626_v9 = vld [vmem:[%s2697_s25 + $0x2080] sm:$0xff]  ;;  %625 = vst [vmem:[%s2702_s6 + $0x200] sm:$0xff] %v624_v8 }
  0x78   : > { %627 = vst [vmem:[%s2702_s6 + $0x208] sm:$0xff] %v626_v9  ;;  %v628_v10 = vld [vmem:[%s2697_s25 + $0x2100] sm:$0xff] }
  0x79   : > { %v630_v11 = vld [vmem:[%s2697_s25 + $0x2180] sm:$0xff]  ;;  %629 = vst [vmem:[%s2702_s6 + $0x210] sm:$0xff] %v628_v10 }
  0x7a   : > { %v632_v12 = vld [vmem:[%s2697_s25 + $0x2200] sm:$0xff]  ;;  %631 = vst [vmem:[%s2702_s6 + $0x218] sm:$0xff] %v630_v11 }
  0x7b   : > { %633 = vst [vmem:[%s2702_s6 + $0x220] sm:$0xff] %v632_v12  ;;  %v634_v13 = vld [vmem:[%s2697_s25 + $0x2280] sm:$0xff] }
  0x7c   : > { %v636_v14 = vld [vmem:[%s2697_s25 + $0x2300] sm:$0xff]  ;;  %635 = vst [vmem:[%s2702_s6 + $0x228] sm:$0xff] %v634_v13 }
  0x7d   : > { %v638_v15 = vld [vmem:[%s2697_s25 + $0x2380] sm:$0xff]  ;;  %637 = vst [vmem:[%s2702_s6 + $0x230] sm:$0xff] %v636_v14 }
  0x7e   : > { %639 = vst [vmem:[%s2702_s6 + $0x238] sm:$0xff] %v638_v15  ;;  %v640_v16 = vld [vmem:[%s2697_s25 + $0x2400] sm:$0xff] }
  0x7f   : > { %v642_v17 = vld [vmem:[%s2697_s25 + $0x2480] sm:$0xff]  ;;  %641 = vst [vmem:[%s2702_s6 + $0x240] sm:$0xff] %v640_v16 }
  0x80   : > { %v644_v18 = vld [vmem:[%s2697_s25 + $0x2500] sm:$0xff]  ;;  %643 = vst [vmem:[%s2702_s6 + $0x248] sm:$0xff] %v642_v17 }
  0x81   : > { %645 = vst [vmem:[%s2702_s6 + $0x250] sm:$0xff] %v644_v18  ;;  %v646_v19 = vld [vmem:[%s2697_s25 + $0x2580] sm:$0xff] }
  0x82   : > { %v648_v20 = vld [vmem:[%s2697_s25 + $0x2600] sm:$0xff]  ;;  %647 = vst [vmem:[%s2702_s6 + $0x258] sm:$0xff] %v646_v19 }
  0x83   : > { %v650_v21 = vld [vmem:[%s2697_s25 + $0x2680] sm:$0xff]  ;;  %649 = vst [vmem:[%s2702_s6 + $0x260] sm:$0xff] %v648_v20 }
  0x84   : > { %651 = vst [vmem:[%s2702_s6 + $0x268] sm:$0xff] %v650_v21  ;;  %v652_v22 = vld [vmem:[%s2697_s25 + $0x2700] sm:$0xff] }
  0x85   : > { %v654_v23 = vld [vmem:[%s2697_s25 + $0x2780] sm:$0xff]  ;;  %653 = vst [vmem:[%s2702_s6 + $0x270] sm:$0xff] %v652_v22 }
  0x86   : > { %v656_v24 = vld [vmem:[%s2697_s25 + $0x2800] sm:$0xff]  ;;  %655 = vst [vmem:[%s2702_s6 + $0x278] sm:$0xff] %v654_v23 }
  0x87   : > { %657 = vst [vmem:[%s2702_s6 + $0x280] sm:$0xff] %v656_v24  ;;  %v658_v25 = vld [vmem:[%s2697_s25 + $0x2880] sm:$0xff] }
  0x88   : > { %v660_v26 = vld [vmem:[%s2697_s25 + $0x2900] sm:$0xff]  ;;  %659 = vst [vmem:[%s2702_s6 + $0x288] sm:$0xff] %v658_v25 }
  0x89   : > { %v662_v27 = vld [vmem:[%s2697_s25 + $0x2980] sm:$0xff]  ;;  %661 = vst [vmem:[%s2702_s6 + $0x290] sm:$0xff] %v660_v26 }
  0x8a   : > { %663 = vst [vmem:[%s2702_s6 + $0x298] sm:$0xff] %v662_v27  ;;  %v664_v28 = vld [vmem:[%s2697_s25 + $0x2a00] sm:$0xff] }
  0x8b   : > { %v666_v29 = vld [vmem:[%s2697_s25 + $0x2a80] sm:$0xff]  ;;  %665 = vst [vmem:[%s2702_s6 + $0x2a0] sm:$0xff] %v664_v28 }
  0x8c   : > { %v668_v30 = vld [vmem:[%s2697_s25 + $0x2b00] sm:$0xff]  ;;  %667 = vst [vmem:[%s2702_s6 + $0x2a8] sm:$0xff] %v666_v29 }
  0x8d   : > { %669 = vst [vmem:[%s2702_s6 + $0x2b0] sm:$0xff] %v668_v30  ;;  %v670_v31 = vld [vmem:[%s2697_s25 + $0x2b80] sm:$0xff] }
  0x8e   : > { %v672_v32 = vld [vmem:[%s2697_s25 + $0x2c00] sm:$0xff]  ;;  %671 = vst [vmem:[%s2702_s6 + $0x2b8] sm:$0xff] %v670_v31 }
  0x8f   : > { %v674_v33 = vld [vmem:[%s2697_s25 + $0x2c80] sm:$0xff]  ;;  %673 = vst [vmem:[%s2702_s6 + $0x2c0] sm:$0xff] %v672_v32 }
  0x90   : > { %675 = vst [vmem:[%s2702_s6 + $0x2c8] sm:$0xff] %v674_v33  ;;  %v676_v34 = vld [vmem:[%s2697_s25 + $0x2d00] sm:$0xff] }
  0x91   : > { %v678_v35 = vld [vmem:[%s2697_s25 + $0x2d80] sm:$0xff]  ;;  %677 = vst [vmem:[%s2702_s6 + $0x2d0] sm:$0xff] %v676_v34 }
  0x92   : > { %v680_v36 = vld [vmem:[%s2697_s25 + $0x2e00] sm:$0xff]  ;;  %679 = vst [vmem:[%s2702_s6 + $0x2d8] sm:$0xff] %v678_v35 }
  0x93   : > { %681 = vst [vmem:[%s2702_s6 + $0x2e0] sm:$0xff] %v680_v36  ;;  %v682_v37 = vld [vmem:[%s2697_s25 + $0x2e80] sm:$0xff] }
  0x94   : > { %v684_v38 = vld [vmem:[%s2697_s25 + $0x2f00] sm:$0xff]  ;;  %683 = vst [vmem:[%s2702_s6 + $0x2e8] sm:$0xff] %v682_v37 }
  0x95   : > { %v686_v39 = vld [vmem:[%s2697_s25 + $0x2f80] sm:$0xff]  ;;  %685 = vst [vmem:[%s2702_s6 + $0x2f0] sm:$0xff] %v684_v38 }
  0x96   : > { %687 = vst [vmem:[%s2702_s6 + $0x2f8] sm:$0xff] %v686_v39  ;;  %v688_v40 = vld [vmem:[%s2697_s25 + $0x3000] sm:$0xff] }
  0x97   : > { %v690_v41 = vld [vmem:[%s2697_s25 + $0x3080] sm:$0xff]  ;;  %689 = vst [vmem:[%s2702_s6 + $0x300] sm:$0xff] %v688_v40 }
  0x98   : > { %v692_v42 = vld [vmem:[%s2697_s25 + $0x3100] sm:$0xff]  ;;  %691 = vst [vmem:[%s2702_s6 + $0x308] sm:$0xff] %v690_v41 }
  0x99   : > { %693 = vst [vmem:[%s2702_s6 + $0x310] sm:$0xff] %v692_v42  ;;  %v694_v43 = vld [vmem:[%s2697_s25 + $0x3180] sm:$0xff] }
  0x9a   : > { %v696_v44 = vld [vmem:[%s2697_s25 + $0x3200] sm:$0xff]  ;;  %695 = vst [vmem:[%s2702_s6 + $0x318] sm:$0xff] %v694_v43 }
  0x9b   : > { %v698_v45 = vld [vmem:[%s2697_s25 + $0x3280] sm:$0xff]  ;;  %697 = vst [vmem:[%s2702_s6 + $0x320] sm:$0xff] %v696_v44 }
  0x9c   : > { %699 = vst [vmem:[%s2702_s6 + $0x328] sm:$0xff] %v698_v45  ;;  %v700_v46 = vld [vmem:[%s2697_s25 + $0x3300] sm:$0xff] }
  0x9d   : > { %v702_v47 = vld [vmem:[%s2697_s25 + $0x3380] sm:$0xff]  ;;  %701 = vst [vmem:[%s2702_s6 + $0x330] sm:$0xff] %v700_v46 }
  0x9e   : > { %v704_v48 = vld [vmem:[%s2697_s25 + $0x3400] sm:$0xff]  ;;  %703 = vst [vmem:[%s2702_s6 + $0x338] sm:$0xff] %v702_v47 }
  0x9f   : > { %705 = vst [vmem:[%s2702_s6 + $0x340] sm:$0xff] %v704_v48  ;;  %v706_v49 = vld [vmem:[%s2697_s25 + $0x3480] sm:$0xff] }
  0xa0   : > { %v708_v50 = vld [vmem:[%s2697_s25 + $0x3500] sm:$0xff]  ;;  %707 = vst [vmem:[%s2702_s6 + $0x348] sm:$0xff] %v706_v49 }
  0xa1   : > { %v710_v51 = vld [vmem:[%s2697_s25 + $0x3580] sm:$0xff]  ;;  %709 = vst [vmem:[%s2702_s6 + $0x350] sm:$0xff] %v708_v50 }
  0xa2   : > { %711 = vst [vmem:[%s2702_s6 + $0x358] sm:$0xff] %v710_v51  ;;  %v712_v52 = vld [vmem:[%s2697_s25 + $0x3600] sm:$0xff] }
  0xa3   : > { %v714_v53 = vld [vmem:[%s2697_s25 + $0x3680] sm:$0xff]  ;;  %713 = vst [vmem:[%s2702_s6 + $0x360] sm:$0xff] %v712_v52 }
  0xa4   : > { %v716_v54 = vld [vmem:[%s2697_s25 + $0x3700] sm:$0xff]  ;;  %715 = vst [vmem:[%s2702_s6 + $0x368] sm:$0xff] %v714_v53 }
  0xa5   : > { %717 = vst [vmem:[%s2702_s6 + $0x370] sm:$0xff] %v716_v54  ;;  %v718_v55 = vld [vmem:[%s2697_s25 + $0x3780] sm:$0xff] }
  0xa6   : > { %v720_v56 = vld [vmem:[%s2697_s25 + $0x3800] sm:$0xff]  ;;  %719 = vst [vmem:[%s2702_s6 + $0x378] sm:$0xff] %v718_v55 }
  0xa7   : > { %v722_v57 = vld [vmem:[%s2697_s25 + $0x3880] sm:$0xff]  ;;  %721 = vst [vmem:[%s2702_s6 + $0x380] sm:$0xff] %v720_v56 }
  0xa8   : > { %723 = vst [vmem:[%s2702_s6 + $0x388] sm:$0xff] %v722_v57  ;;  %v724_v58 = vld [vmem:[%s2697_s25 + $0x3900] sm:$0xff] }
  0xa9   : > { %v726_v59 = vld [vmem:[%s2697_s25 + $0x3980] sm:$0xff]  ;;  %725 = vst [vmem:[%s2702_s6 + $0x390] sm:$0xff] %v724_v58 }
  0xaa   : > { %v728_v60 = vld [vmem:[%s2697_s25 + $0x3a00] sm:$0xff]  ;;  %727 = vst [vmem:[%s2702_s6 + $0x398] sm:$0xff] %v726_v59 }
  0xab   : > { %729 = vst [vmem:[%s2702_s6 + $0x3a0] sm:$0xff] %v728_v60  ;;  %v730_v61 = vld [vmem:[%s2697_s25 + $0x3a80] sm:$0xff] }
  0xac   : > { %v732_v62 = vld [vmem:[%s2697_s25 + $0x3b00] sm:$0xff]  ;;  %731 = vst [vmem:[%s2702_s6 + $0x3a8] sm:$0xff] %v730_v61 }
  0xad   : > { %v734_v63 = vld [vmem:[%s2697_s25 + $0x3b80] sm:$0xff]  ;;  %733 = vst [vmem:[%s2702_s6 + $0x3b0] sm:$0xff] %v732_v62 }
  0xae   : > { %735 = vst [vmem:[%s2702_s6 + $0x3b8] sm:$0xff] %v734_v63  ;;  %v736_v0 = vld [vmem:[%s2697_s25 + $0x3c00] sm:$0xff] }
  0xaf   : > { %v738_v1 = vld [vmem:[%s2697_s25 + $0x3c80] sm:$0xff]  ;;  %737 = vst [vmem:[%s2702_s6 + $0x3c0] sm:$0xff] %v736_v0 }
  0xb0   : > { %v740_v2 = vld [vmem:[%s2697_s25 + $0x3d00] sm:$0xff]  ;;  %739 = vst [vmem:[%s2702_s6 + $0x3c8] sm:$0xff] %v738_v1 }
  0xb1   : > { %741 = vst [vmem:[%s2702_s6 + $0x3d0] sm:$0xff] %v740_v2  ;;  %v742_v3 = vld [vmem:[%s2697_s25 + $0x3d80] sm:$0xff] }
  0xb2   : > { %v744_v4 = vld [vmem:[%s2697_s25 + $0x3e00] sm:$0xff]  ;;  %743 = vst [vmem:[%s2702_s6 + $0x3d8] sm:$0xff] %v742_v3 }
  0xb3   : > { %v746_v5 = vld [vmem:[%s2697_s25 + $0x3e80] sm:$0xff]  ;;  %745 = vst [vmem:[%s2702_s6 + $0x3e0] sm:$0xff] %v744_v4 }
  0xb4   : > { %747 = vst [vmem:[%s2702_s6 + $0x3e8] sm:$0xff] %v746_v5  ;;  %v748_v6 = vld [vmem:[%s2697_s25 + $0x3f00] sm:$0xff] }
  0xb5   : > { %v750_v7 = vld [vmem:[%s2697_s25 + $0x3f80] sm:$0xff]  ;;  %749 = vst [vmem:[%s2702_s6 + $0x3f0] sm:$0xff] %v748_v6 }
  0xb6   : > { %751 = vst [vmem:[%s2702_s6 + $0x3f8] sm:$0xff] %v750_v7 }
  0xb7 PF: > { %p2038_p0 = scmp.ge.s32.totalorder %s2560_s22, 1  ;;  %p764_p1 = scmp.lt.s32.totalorder %s2560_s22, 65 }
  0xb9   : > { %p765_p2 = pnand %p2038_p0, %p764_p1 }
  0xba   : > { %s771_s0 = sand.u32 (!%p765_p2), 1, %s2536_s16   ;;  %s778_s5 = sand.u32 (!%p765_p2), 1, %s2528_s14  }
  0xbb   : > { %768 = sbr.rel (%p765_p2) target bundleno = 560 (0x230), region = 85  ;;  %s2039_s23 = sshll.u32 (!%p765_p2), %s771_s0, 6 }
  0xbc   : > { %s2040_s28 = sshll.u32 (!%p765_p2), %s778_s5, 10  ;;  %s805_s7 = sand.u32 (!%p765_p2), 1, %s2520_s12  }
  0xbd   : > { %s2042_s25 = sshll.u32 (!%p765_p2), %s2548_s19, 1  ;;  %s2041_s11 = sshll.u32 (!%p765_p2), %s805_s7, 4 }
  0xbe   : > { %p813_p3 = scmp.lt.s32.totalorder (!%p765_p2), %s2042_s25, 31  ;;  %s2969_s4 = scalar_lea.vmem (!%p765_p2), [#allocation3], %s2039_s23 }
  0xbf   : > { %s2971_s6 = scalar_lea.vmem (!%p765_p2), [#allocation4], %s2040_s28  ;;  %s2973_s1 = scalar_lea.vmem (!%p765_p2), [#allocation5], %s2041_s11 }
  0xc0   : > { %s3208_s25 = smov (!%p813_p3, %s2042_s25), 31  ;;  %p2043_p4 = scmp.ne.s32.totalorder %s2544_s18, 0 }
  0xc1   : > { %s815_s29 = scalar_lea.vmem %s3179_s2, %s3208_s25 }
  0xc2   : > { %822 = sbr.rel (%p2043_p4) target bundleno = 202 (0xca), region = 97 }
  0xc7   : > { %v2562_v8 = vmov 0.0  }
  0xc8   : > { %823 = vst [vmem:[#allocation2 + $0x10] sm:$0xff] %v2562_v8  ;;  %824 = vst [vmem:[#allocation2] sm:$0xff] %v2562_v8 }
  0xc9   : > { %825 = vst [vmem:[#allocation2 + $0x18] sm:$0xff] %v2562_v8  ;;  %826 = vst [vmem:[#allocation2 + $0x8] sm:$0xff] %v2562_v8 }
  0xca PF: > { %v2282_v9 = vld [vmem:[%s2971_s6 + $0x74] ss:$8 sps:$4 sm:$0xff]   ;;  %v2286_v11 = vld [vmem:[%s2971_s6 + $0x70] ss:$8 sps:$4 sm:$0xff]   ;;  %v2288_v13 = vld [vmem:[%s2971_s6 + $0x64] ss:$8 sps:$4 sm:$0xff]  }
  0xcb   : > { %v2284_v10 = vld [vmem:[%s2971_s6 + $0x174] ss:$8 sps:$4 sm:$0xff]   ;;  %1647 = vmatprep.subr.bf16.mxu0 %v2282_v9  ;;  %v2287_v12 = vld [vmem:[%s2971_s6 + $0x170] ss:$8 sps:$4 sm:$0xff]   ;;  %v2290_v14 = vld [vmem:[%s2971_s6 + $0x164] ss:$8 sps:$4 sm:$0xff]  }
  0xcc   : > { %1690 = vmatprep.subr.bf16.mxu1 %v2284_v10  ;;  %1648 = vmatpush1.bf16.msra.mxu0 %v2286_v11  ;;  %v2292_v15 = vld [vmem:[%s2971_s6 + $0x60] ss:$8 sps:$4 sm:$0xff]   ;;  %v2294_v17 = vld [vmem:[%s2971_s6 + $0x54] ss:$8 sps:$4 sm:$0xff]   ;;  %v2298_v19 = vld [vmem:[%s2971_s6 + $0x50] ss:$8 sps:$4 sm:$0xff]  }
  0xcd   : > { %1691 = vmatpush1.bf16.msra.mxu1 %v2287_v12  ;;  %1649 = vmatprep.subr.bf16.mxu0 %v2288_v13  ;;  %v2293_v16 = vld [vmem:[%s2971_s6 + $0x160] ss:$8 sps:$4 sm:$0xff]   ;;  %v2296_v18 = vld [vmem:[%s2971_s6 + $0x154] ss:$8 sps:$4 sm:$0xff]   ;;  %v2299_v20 = vld [vmem:[%s2971_s6 + $0x150] ss:$8 sps:$4 sm:$0xff]  }
  0xce   : > { %1692 = vmatprep.subr.bf16.mxu1 %v2290_v14  ;;  %v2300_v21 = vld [vmem:[%s2971_s6 + $0x44] ss:$8 sps:$4 sm:$0xff]   ;;  %v2304_v23 = vld [vmem:[%s2971_s6 + $0x40] ss:$8 sps:$4 sm:$0xff]   ;;  %v2306_v25 = vld [vmem:[%s2971_s6 + $0x34] ss:$8 sps:$4 sm:$0xff]  }
  0xcf   : > { %v2302_v22 = vld [vmem:[%s2971_s6 + $0x144] ss:$8 sps:$4 sm:$0xff]   ;;  %v2305_v24 = vld [vmem:[%s2971_s6 + $0x140] ss:$8 sps:$4 sm:$0xff]   ;;  %v2308_v26 = vld [vmem:[%s2971_s6 + $0x134] ss:$8 sps:$4 sm:$0xff]  }
  0xd0   : > { %1650 = vmatpush1.bf16.msra.mxu0 %v2292_v15  ;;  %v2310_v27 = vld [vmem:[%s2971_s6 + $0x30] ss:$8 sps:$4 sm:$0xff]   ;;  %v2312_v29 = vld [vmem:[%s2971_s6 + $0x24] ss:$8 sps:$4 sm:$0xff]   ;;  %v2316_v31 = vld [vmem:[%s2971_s6 + $0x20] ss:$8 sps:$4 sm:$0xff]  }
  0xd1   : > { %1693 = vmatpush1.bf16.msra.mxu1 %v2293_v16  ;;  %1651 = vmatprep.subr.bf16.mxu0 %v2294_v17  ;;  %v2311_v28 = vld [vmem:[%s2971_s6 + $0x130] ss:$8 sps:$4 sm:$0xff]   ;;  %v2314_v30 = vld [vmem:[%s2971_s6 + $0x124] ss:$8 sps:$4 sm:$0xff]   ;;  %v2317_v32 = vld [vmem:[%s2971_s6 + $0x120] ss:$8 sps:$4 sm:$0xff]  }
  0xd2   : > { %1694 = vmatprep.subr.bf16.mxu1 %v2296_v18  ;;  %v2318_v33 = vld [vmem:[%s2971_s6 + $0x14] ss:$8 sps:$4 sm:$0xff]   ;;  %v2322_v35 = vld [vmem:[%s2971_s6 + $0x10] ss:$8 sps:$4 sm:$0xff]   ;;  %v2324_v37 = vld [vmem:[%s2971_s6 + $0x4] ss:$8 sps:$4 sm:$0xff]  }
  0xd3   : > { %v2320_v34 = vld [vmem:[%s2971_s6 + $0x114] ss:$8 sps:$4 sm:$0xff]   ;;  %v2323_v36 = vld [vmem:[%s2971_s6 + $0x110] ss:$8 sps:$4 sm:$0xff]   ;;  %v2326_v38 = vld [vmem:[%s2971_s6 + $0x104] ss:$8 sps:$4 sm:$0xff]  }
  0xd4   : > { %1652 = vmatpush1.bf16.msra.mxu0 %v2298_v19  ;;  %v2328_v39 = vld [vmem:[%s2971_s6] ss:$8 sps:$4 sm:$0xff]   ;;  %v2330_v41 = vld [vmem:[%s2971_s6 + $0xf4] ss:$8 sps:$4 sm:$0xff]   ;;  %v2334_v43 = vld [vmem:[%s2971_s6 + $0xf0] ss:$8 sps:$4 sm:$0xff]  }
  0xd5   : > { %1695 = vmatpush1.bf16.msra.mxu1 %v2299_v20  ;;  %1653 = vmatprep.subr.bf16.mxu0 %v2300_v21  ;;  %v2329_v40 = vld [vmem:[%s2971_s6 + $0x100] ss:$8 sps:$4 sm:$0xff]   ;;  %v2332_v42 = vld [vmem:[%s2971_s6 + $0x1f4] ss:$8 sps:$4 sm:$0xff]   ;;  %v2335_v44 = vld [vmem:[%s2971_s6 + $0x1f0] ss:$8 sps:$4 sm:$0xff]  }
  0xd6   : > { %1696 = vmatprep.subr.bf16.mxu1 %v2302_v22  ;;  %v2336_v45 = vld [vmem:[%s2971_s6 + $0xe4] ss:$8 sps:$4 sm:$0xff]   ;;  %v2340_v47 = vld [vmem:[%s2971_s6 + $0xe0] ss:$8 sps:$4 sm:$0xff]   ;;  %v2342_v49 = vld [vmem:[%s2971_s6 + $0xd4] ss:$8 sps:$4 sm:$0xff]  }
  0xd7   : > { %v2338_v46 = vld [vmem:[%s2971_s6 + $0x1e4] ss:$8 sps:$4 sm:$0xff]   ;;  %v2341_v48 = vld [vmem:[%s2971_s6 + $0x1e0] ss:$8 sps:$4 sm:$0xff]   ;;  %v2344_v50 = vld [vmem:[%s2971_s6 + $0x1d4] ss:$8 sps:$4 sm:$0xff]  }
  0xd8   : > { %1654 = vmatpush1.bf16.msra.mxu0 %v2304_v23  ;;  %v2346_v51 = vld [vmem:[%s2971_s6 + $0xd0] ss:$8 sps:$4 sm:$0xff]   ;;  %v2348_v53 = vld [vmem:[%s2971_s6 + $0xc4] ss:$8 sps:$4 sm:$0xff]   ;;  %v2352_v55 = vld [vmem:[%s2971_s6 + $0xc0] ss:$8 sps:$4 sm:$0xff]  }
  0xd9   : > { %1697 = vmatpush1.bf16.msra.mxu1 %v2305_v24  ;;  %1655 = vmatprep.subr.bf16.mxu0 %v2306_v25  ;;  %v2347_v52 = vld [vmem:[%s2971_s6 + $0x1d0] ss:$8 sps:$4 sm:$0xff]   ;;  %v2350_v54 = vld [vmem:[%s2971_s6 + $0x1c4] ss:$8 sps:$4 sm:$0xff]   ;;  %v2353_v56 = vld [vmem:[%s2971_s6 + $0x1c0] ss:$8 sps:$4 sm:$0xff]  }
  0xda   : > { %1698 = vmatprep.subr.bf16.mxu1 %v2308_v26  ;;  %v831_v57 = vld [vmem:[%s2969_s4] sm:$0xff]  ;;  %v832_v59 = vld [vmem:[%s2969_s4 + $0x8] sm:$0xff]  ;;  %v2354_v61 = vld [vmem:[%s2971_s6 + $0xb4] ss:$8 sps:$4 sm:$0xff]   ;;  %p2180_p5 = scmp.ne.s32.totalorder %s2544_s18, 3 }
  0xdb   : > { %v835_v58 = vld [vmem:[%s2969_s4 + $0x20] sm:$0xff]  ;;  %v836_v60 = vld [vmem:[%s2969_s4 + $0x28] sm:$0xff]  ;;  %v2356_v63 = vld [vmem:[%s2971_s6 + $0x1b4] ss:$8 sps:$4 sm:$0xff]  }
  0xdc   : > { %1656 = vmatpush1.bf16.msra.mxu0 %v2310_v27  ;;  %v2045_v62 = vcombine.high %v831_v57, %v835_v58  ;;  %v2047_v0 = vcombine.high %v832_v59, %v836_v60  ;;  %v2358_v1 = vld [vmem:[%s2971_s6 + $0xb0] ss:$8 sps:$4 sm:$0xff]   ;;  %v2360_v3 = vld [vmem:[%s2971_s6 + $0xa4] ss:$8 sps:$4 sm:$0xff]   ;;  %v2364_v5 = vld [vmem:[%s2971_s6 + $0xa0] ss:$8 sps:$4 sm:$0xff]   ;;  %v2044_v17 = vcombine.low %v831_v57, %v835_v58  ;;  %v2046_v18 = vcombine.low %v832_v59, %v836_v60 }
  0xdd   : > { %1699 = vmatpush1.bf16.msra.mxu1 %v2311_v28  ;;  %1657 = vmatprep.subr.bf16.mxu0 %v2312_v29  ;;  %v2359_v2 = vld [vmem:[%s2971_s6 + $0x1b0] ss:$8 sps:$4 sm:$0xff]   ;;  %v2362_v4 = vld [vmem:[%s2971_s6 + $0x1a4] ss:$8 sps:$4 sm:$0xff]   ;;  %v2365_v6 = vld [vmem:[%s2971_s6 + $0x1a0] ss:$8 sps:$4 sm:$0xff]  }
  0xde   : > { %1700 = vmatprep.subr.bf16.mxu1 %v2314_v30  ;;  %1679 = vmatprep.mubr.bf16.mxu0 %v2045_v62  ;;  %v2366_v7 = vld [vmem:[%s2971_s6 + $0x94] ss:$8 sps:$4 sm:$0xff]   ;;  %v2370_v9 = vld [vmem:[%s2971_s6 + $0x90] ss:$8 sps:$4 sm:$0xff]   ;;  %v2372_v11 = vld [vmem:[%s2971_s6 + $0x84] ss:$8 sps:$4 sm:$0xff]  }
  0xdf   : > { %1722 = vmatprep.mubr.bf16.mxu1 %v2047_v0  ;;  %v2368_v8 = vld [vmem:[%s2971_s6 + $0x194] ss:$8 sps:$4 sm:$0xff]   ;;  %v2371_v10 = vld [vmem:[%s2971_s6 + $0x190] ss:$8 sps:$4 sm:$0xff]   ;;  %v2374_v12 = vld [vmem:[%s2971_s6 + $0x184] ss:$8 sps:$4 sm:$0xff]  }
  0xe0   : > { %1658 = vmatpush1.bf16.msra.mxu0 %v2316_v31  ;;  %v2376_v13 = vld [vmem:[%s2971_s6 + $0x80] ss:$8 sps:$4 sm:$0xff]   ;;  %v2380_v15 = vld [vmem:[%s2971_s6 + $0x274] ss:$8 sps:$4 sm:$0xff]   ;;  %v2378_v19 = vld [vmem:[%s2971_s6 + $0x270] ss:$8 sps:$4 sm:$0xff]  }
  0xe1   : > { %1701 = vmatpush1.bf16.msra.mxu1 %v2317_v32  ;;  %1659 = vmatprep.subr.bf16.mxu0 %v2318_v33  ;;  %v2377_v14 = vld [vmem:[%s2971_s6 + $0x180] ss:$8 sps:$4 sm:$0xff]   ;;  %v2383_v16 = vld [vmem:[%s2971_s6 + $0x374] ss:$8 sps:$4 sm:$0xff]   ;;  %v2381_v20 = vld [vmem:[%s2971_s6 + $0x370] ss:$8 sps:$4 sm:$0xff]  }
  0xe2   : > { %1702 = vmatprep.subr.bf16.mxu1 %v2320_v34  ;;  %v2386_v21 = vld [vmem:[%s2971_s6 + $0x264] ss:$8 sps:$4 sm:$0xff]   ;;  %v2384_v23 = vld [vmem:[%s2971_s6 + $0x260] ss:$8 sps:$4 sm:$0xff]   ;;  %v2392_v25 = vld [vmem:[%s2971_s6 + $0x254] ss:$8 sps:$4 sm:$0xff]  }
  0xe3   : > { %v2389_v22 = vld [vmem:[%s2971_s6 + $0x364] ss:$8 sps:$4 sm:$0xff]   ;;  %v2387_v24 = vld [vmem:[%s2971_s6 + $0x360] ss:$8 sps:$4 sm:$0xff]   ;;  %v2395_v26 = vld [vmem:[%s2971_s6 + $0x354] ss:$8 sps:$4 sm:$0xff]  }
  0xe4   : > { %1660 = vmatpush1.bf16.msra.mxu0 %v2322_v35  ;;  %v2390_v27 = vld [vmem:[%s2971_s6 + $0x250] ss:$8 sps:$4 sm:$0xff]   ;;  %v2398_v29 = vld [vmem:[%s2971_s6 + $0x244] ss:$8 sps:$4 sm:$0xff]   ;;  %v2396_v31 = vld [vmem:[%s2971_s6 + $0x240] ss:$8 sps:$4 sm:$0xff]  }
  0xe5   : > { %1703 = vmatpush1.bf16.msra.mxu1 %v2323_v36  ;;  %1661 = vmatprep.subr.bf16.mxu0 %v2324_v37  ;;  %v2393_v28 = vld [vmem:[%s2971_s6 + $0x350] ss:$8 sps:$4 sm:$0xff]   ;;  %v2401_v30 = vld [vmem:[%s2971_s6 + $0x344] ss:$8 sps:$4 sm:$0xff]   ;;  %v2399_v32 = vld [vmem:[%s2971_s6 + $0x340] ss:$8 sps:$4 sm:$0xff]  }
  0xe6   : > { %1704 = vmatprep.subr.bf16.mxu1 %v2326_v38  ;;  %v2404_v33 = vld [vmem:[%s2971_s6 + $0x234] ss:$8 sps:$4 sm:$0xff]   ;;  %v2402_v35 = vld [vmem:[%s2971_s6 + $0x230] ss:$8 sps:$4 sm:$0xff]   ;;  %v2410_v37 = vld [vmem:[%s2971_s6 + $0x224] ss:$8 sps:$4 sm:$0xff]  }
  0xe7   : > { %v2407_v34 = vld [vmem:[%s2971_s6 + $0x334] ss:$8 sps:$4 sm:$0xff]   ;;  %v2405_v36 = vld [vmem:[%s2971_s6 + $0x330] ss:$8 sps:$4 sm:$0xff]   ;;  %v2413_v38 = vld [vmem:[%s2971_s6 + $0x324] ss:$8 sps:$4 sm:$0xff]  }
  0xe8   : > { %1662 = vmatpush1.bf16.msra.mxu0 %v2328_v39  ;;  %v2408_v39 = vld [vmem:[%s2971_s6 + $0x220] ss:$8 sps:$4 sm:$0xff]   ;;  %v2426_v57 = vld [vmem:[%s2971_s6 + $0x2f0] ss:$8 sps:$4 sm:$0xff]   ;;  %v2434_v59 = vld [vmem:[%s2971_s6 + $0x2e4] ss:$8 sps:$4 sm:$0xff]  }
  0xe9   : > { %1705 = vmatpush1.bf16.msra.mxu1 %v2329_v40  ;;  %1663 = vmatprep.subr.bf16.mxu0 %v2330_v41  ;;  %v2411_v40 = vld [vmem:[%s2971_s6 + $0x320] ss:$8 sps:$4 sm:$0xff]   ;;  %v2416_v41 = vld [vmem:[%s2971_s6 + $0x214] ss:$8 sps:$4 sm:$0xff]   ;;  %v2429_v58 = vld [vmem:[%s2971_s6 + $0x3f0] ss:$8 sps:$4 sm:$0xff]  }
  0xea   : > { %1706 = vmatprep.subr.bf16.mxu1 %v2332_v42  ;;  %v2419_v42 = vld [vmem:[%s2971_s6 + $0x314] ss:$8 sps:$4 sm:$0xff]   ;;  %v2437_v60 = vld [vmem:[%s2971_s6 + $0x3e4] ss:$8 sps:$4 sm:$0xff]   ;;  %v2435_v62 = vld [vmem:[%s2971_s6 + $0x3e0] ss:$8 sps:$4 sm:$0xff]  }
  0xeb   : > { %v2443_v0 = vld [vmem:[%s2971_s6 + $0x3d4] ss:$8 sps:$4 sm:$0xff]  }
  0xec   : > { %1664 = vmatpush2.bf16.msra.mxu0 %v2334_v43  ;;  %v3071_v43 = vld [vmem:[%s2969_s4 + $0x10] sm:$0xff] }
  0xed   : > { %1707 = vmatpush2.bf16.msra.mxu1 %v2335_v44  ;;  %1665 = vmatprep.subr.bf16.mxu0 %v2336_v45  ;;  %v3074_v44 = vld [vmem:[%s2969_s4 + $0x30] sm:$0xff]  ;;  %v3077_v45 = vld [vmem:[%s2969_s4 + $0x18] sm:$0xff] }
  0xee   : > { %1708 = vmatprep.subr.bf16.mxu1 %v2338_v46  ;;  %v3080_v46 = vld [vmem:[%s2969_s4 + $0x38] sm:$0xff] }
  0xf0   : > { %1666 = vmatpush2.bf16.msra.mxu0 %v2340_v47  ;;  %v2414_v47 = vld [vmem:[%s2971_s6 + $0x210] ss:$8 sps:$4 sm:$0xff]  }
  0xf1   : > { %1709 = vmatpush2.bf16.msra.mxu1 %v2341_v48  ;;  %1667 = vmatprep.subr.bf16.mxu0 %v2342_v49  ;;  %v2417_v48 = vld [vmem:[%s2971_s6 + $0x310] ss:$8 sps:$4 sm:$0xff]   ;;  %v2049_v49 = vcombine.high %v3071_v43, %v3074_v44 }
  0xf2   : > { %1710 = vmatprep.subr.bf16.mxu1 %v2344_v50  ;;  %v2422_v50 = vld [vmem:[%s2971_s6 + $0x204] ss:$8 sps:$4 sm:$0xff]  }
  0xf4   : > { %1668 = vmatpush2.bf16.msra.mxu0 %v2346_v51  ;;  %v2425_v51 = vld [vmem:[%s2971_s6 + $0x304] ss:$8 sps:$4 sm:$0xff]  }
  0xf5   : > { %1711 = vmatpush2.bf16.msra.mxu1 %v2347_v52  ;;  %1669 = vmatprep.subr.bf16.mxu0 %v2348_v53  ;;  %v2051_v52 = vcombine.high %v3077_v45, %v3080_v46  ;;  %v2420_v53 = vld [vmem:[%s2971_s6 + $0x200] ss:$8 sps:$4 sm:$0xff]  }
  0xf6   : > { %1712 = vmatprep.subr.bf16.mxu1 %v2350_v54  ;;  %v2423_v54 = vld [vmem:[%s2971_s6 + $0x300] ss:$8 sps:$4 sm:$0xff]  }
  0xf8   : > { %1670 = vmatpush2.bf16.msra.mxu0 %v2352_v55  ;;  %v2428_v55 = vld [vmem:[%s2971_s6 + $0x2f4] ss:$8 sps:$4 sm:$0xff]  }
  0xf9   : > { %1713 = vmatpush2.bf16.msra.mxu1 %v2353_v56  ;;  %1671 = vmatprep.subr.bf16.mxu0 %v2354_v61  ;;  %v2431_v56 = vld [vmem:[%s2971_s6 + $0x3f4] ss:$8 sps:$4 sm:$0xff]   ;;  %v2432_v61 = vld [vmem:[%s2971_s6 + $0x2e0] ss:$8 sps:$4 sm:$0xff]  }
  0xfa   : > { %1714 = vmatprep.subr.bf16.mxu1 %v2356_v63  ;;  %v2440_v63 = vld [vmem:[%s2971_s6 + $0x2d4] ss:$8 sps:$4 sm:$0xff]  }
  0xfc   : > { %1672 = vmatpush2.bf16.msra.mxu0 %v2358_v1  ;;  %v2438_v1 = vld [vmem:[%s2971_s6 + $0x2d0] ss:$8 sps:$4 sm:$0xff]  }
  0xfd   : > { %1715 = vmatpush2.bf16.msra.mxu1 %v2359_v2  ;;  %1673 = vmatprep.subr.bf16.mxu0 %v2360_v3  ;;  %v2441_v2 = vld [vmem:[%s2971_s6 + $0x3d0] ss:$8 sps:$4 sm:$0xff]   ;;  %v2446_v3 = vld [vmem:[%s2971_s6 + $0x2c4] ss:$8 sps:$4 sm:$0xff]  }
  0xfe   : > { %1716 = vmatprep.subr.bf16.mxu1 %v2362_v4  ;;  %v2449_v4 = vld [vmem:[%s2971_s6 + $0x3c4] ss:$8 sps:$4 sm:$0xff]  }
 0x100   : > { %1674 = vmatpush2.bf16.msra.mxu0 %v2364_v5  ;;  %v2444_v5 = vld [vmem:[%s2971_s6 + $0x2c0] ss:$8 sps:$4 sm:$0xff]  }
 0x101   : > { %1717 = vmatpush2.bf16.msra.mxu1 %v2365_v6  ;;  %1675 = vmatprep.subr.bf16.mxu0 %v2366_v7  ;;  %v2447_v6 = vld [vmem:[%s2971_s6 + $0x3c0] ss:$8 sps:$4 sm:$0xff]   ;;  %v2452_v7 = vld [vmem:[%s2971_s6 + $0x2b4] ss:$8 sps:$4 sm:$0xff]  }
 0x102   : > { %1718 = vmatprep.subr.bf16.mxu1 %v2368_v8  ;;  %v2455_v8 = vld [vmem:[%s2971_s6 + $0x3b4] ss:$8 sps:$4 sm:$0xff]  }
 0x104   : > { %1676 = vmatpush2.bf16.msra.mxu0 %v2370_v9  ;;  %v2450_v9 = vld [vmem:[%s2971_s6 + $0x2b0] ss:$8 sps:$4 sm:$0xff]  }
 0x105   : > { %1719 = vmatpush2.bf16.msra.mxu1 %v2371_v10  ;;  %1677 = vmatprep.subr.bf16.mxu0 %v2372_v11  ;;  %v2453_v10 = vld [vmem:[%s2971_s6 + $0x3b0] ss:$8 sps:$4 sm:$0xff]   ;;  %v2458_v11 = vld [vmem:[%s2971_s6 + $0x2a4] ss:$8 sps:$4 sm:$0xff]  }
 0x106   : > { %1720 = vmatprep.subr.bf16.mxu1 %v2374_v12  ;;  %v2461_v12 = vld [vmem:[%s2971_s6 + $0x3a4] ss:$8 sps:$4 sm:$0xff]  }
 0x108   : > { %1678 = vmatpush2.bf16.msra.mxu0 %v2376_v13  ;;  %v2456_v13 = vld [vmem:[%s2971_s6 + $0x2a0] ss:$8 sps:$4 sm:$0xff]  }
 0x109   : > { %1721 = vmatpush2.bf16.msra.mxu1 %v2377_v14  ;;  %1733 = vmatprep.subr.bf16.mxu0 %v2380_v15  ;;  %v2459_v14 = vld [vmem:[%s2971_s6 + $0x3a0] ss:$8 sps:$4 sm:$0xff]   ;;  %v2464_v15 = vld [vmem:[%s2971_s6 + $0x294] ss:$8 sps:$4 sm:$0xff]  }
 0x10a   : > { %1776 = vmatprep.subr.bf16.mxu1 %v2383_v16  ;;  %v2467_v16 = vld [vmem:[%s2971_s6 + $0x394] ss:$8 sps:$4 sm:$0xff]  }
 0x10b   : > { %1680 = vmatmul.mubr.bf16.vlgmr.msra.gmra.mxu0 %v2044_v17  ;;  %v2462_v17 = vld [vmem:[%s2971_s6 + $0x290] ss:$8 sps:$4 sm:$0xff]  }
 0x10c   : > { %1723 = vmatmul.mubr.bf16.vlgmr.msra.gmra.mxu1 %v2046_v18  ;;  %1734 = vmatpush1.bf16.msra.mxu0 %v2378_v19  ;;  %v2465_v18 = vld [vmem:[%s2971_s6 + $0x390] ss:$8 sps:$4 sm:$0xff]   ;;  %v2470_v19 = vld [vmem:[%s2971_s6 + $0x284] ss:$8 sps:$4 sm:$0xff]  }
 0x10d   : > { %1777 = vmatpush1.bf16.msra.mxu1 %v2381_v20  ;;  %1735 = vmatprep.subr.bf16.mxu0 %v2386_v21  ;;  %v2473_v20 = vld [vmem:[%s2971_s6 + $0x384] ss:$8 sps:$4 sm:$0xff]   ;;  %v2468_v21 = vld [vmem:[%s2971_s6 + $0x280] ss:$8 sps:$4 sm:$0xff]  }
 0x10e   : > { %1778 = vmatprep.subr.bf16.mxu1 %v2389_v22  ;;  %1765 = vmatprep.mubr.bf16.mxu0 %v2049_v49  ;;  %v2471_v22 = vld [vmem:[%s2971_s6 + $0x380] ss:$8 sps:$4 sm:$0xff]  }
 0x10f   : > { %1808 = vmatprep.mubr.bf16.mxu1 %v2051_v52 }
 0x110   : > { %1736 = vmatpush1.bf16.msra.mxu0 %v2384_v23  ;;  %v2048_v23 = vcombine.low %v3071_v43, %v3074_v44  ;;  %v828_v44 = vld [vmem:[#allocation2] sm:$0xff] }
 0x111   : > { %1779 = vmatpush1.bf16.msra.mxu1 %v2387_v24  ;;  %1737 = vmatprep.subr.bf16.mxu0 %v2392_v25  ;;  %v2050_v24 = vcombine.low %v3077_v45, %v3080_v46 }
 0x112   : > { %1780 = vmatprep.subr.bf16.mxu1 %v2395_v26 }
 0x114   : > { %1738 = vmatpush1.bf16.msra.mxu0 %v2390_v27 }
 0x115   : > { %1781 = vmatpush1.bf16.msra.mxu1 %v2393_v28  ;;  %1739 = vmatprep.subr.bf16.mxu0 %v2398_v29 }
 0x116   : > { %1782 = vmatprep.subr.bf16.mxu1 %v2401_v30 }
 0x118   : > { %1740 = vmatpush1.bf16.msra.mxu0 %v2396_v31 }
 0x119   : > { %1783 = vmatpush1.bf16.msra.mxu1 %v2399_v32  ;;  %1741 = vmatprep.subr.bf16.mxu0 %v2404_v33 }
 0x11a   : > { %1784 = vmatprep.subr.bf16.mxu1 %v2407_v34 }
 0x11c   : > { %1742 = vmatpush1.bf16.msra.mxu0 %v2402_v35 }
 0x11d   : > { %1785 = vmatpush1.bf16.msra.mxu1 %v2405_v36  ;;  %1743 = vmatprep.subr.bf16.mxu0 %v2410_v37 }
 0x11e   : > { %1786 = vmatprep.subr.bf16.mxu1 %v2413_v38  ;;  %v827_v38 = vld [vmem:[#allocation2 + $0x10] sm:$0xff] }
 0x120   : > { %1744 = vmatpush1.bf16.msra.mxu0 %v2408_v39 }
 0x121   : > { %1787 = vmatpush1.bf16.msra.mxu1 %v2411_v40  ;;  %1745 = vmatprep.subr.bf16.mxu0 %v2416_v41 }
 0x122   : > { %1788 = vmatprep.subr.bf16.mxu1 %v2419_v42 }
 0x124   : > { %1746 = vmatpush1.bf16.msra.mxu0 %v2414_v47 }
 0x125   : > { %1789 = vmatpush1.bf16.msra.mxu1 %v2417_v48  ;;  %1747 = vmatprep.subr.bf16.mxu0 %v2422_v50 }
 0x126   : > { %1790 = vmatprep.subr.bf16.mxu1 %v2425_v51  ;;  %v829_v51 = vld [vmem:[#allocation2 + $0x18] sm:$0xff] }
 0x128   : > { %1748 = vmatpush1.bf16.msra.mxu0 %v2420_v53 }
 0x129   : > { %1791 = vmatpush1.bf16.msra.mxu1 %v2423_v54  ;;  %1749 = vmatprep.subr.bf16.mxu0 %v2428_v55 }
 0x12a   : > { %1792 = vmatprep.subr.bf16.mxu1 %v2431_v56  ;;  %v830_v56 = vld [vmem:[#allocation2 + $0x8] sm:$0xff] }
 0x12c   : > { %1750 = vmatpush2.bf16.msra.mxu0 %v2426_v57 }
 0x12d   : > { %1793 = vmatpush2.bf16.msra.mxu1 %v2429_v58  ;;  %1751 = vmatprep.subr.bf16.mxu0 %v2434_v59 }
 0x12e   : > { %1794 = vmatprep.subr.bf16.mxu1 %v2437_v60 }
 0x130   : > { %1752 = vmatpush2.bf16.msra.mxu0 %v2432_v61 }
 0x131   : > { %1795 = vmatpush2.bf16.msra.mxu1 %v2435_v62  ;;  %1753 = vmatprep.subr.bf16.mxu0 %v2440_v63 }
 0x132   : > { %1796 = vmatprep.subr.bf16.mxu1 %v2443_v0 }
 0x134   : > { %1754 = vmatpush2.bf16.msra.mxu0 %v2438_v1 }
 0x135   : > { %1797 = vmatpush2.bf16.msra.mxu1 %v2441_v2  ;;  %1755 = vmatprep.subr.bf16.mxu0 %v2446_v3 }
 0x136   : > { %1798 = vmatprep.subr.bf16.mxu1 %v2449_v4 }
 0x138   : > { %1756 = vmatpush2.bf16.msra.mxu0 %v2444_v5 }
 0x139   : > { %1799 = vmatpush2.bf16.msra.mxu1 %v2447_v6  ;;  %1757 = vmatprep.subr.bf16.mxu0 %v2452_v7 }
 0x13a   : > { %1800 = vmatprep.subr.bf16.mxu1 %v2455_v8 }
 0x13c   : > { %1758 = vmatpush2.bf16.msra.mxu0 %v2450_v9 }
 0x13d   : > { %1801 = vmatpush2.bf16.msra.mxu1 %v2453_v10  ;;  %1759 = vmatprep.subr.bf16.mxu0 %v2458_v11 }
 0x13e   : > { %1802 = vmatprep.subr.bf16.mxu1 %v2461_v12 }
 0x140   : > { %1760 = vmatpush2.bf16.msra.mxu0 %v2456_v13 }
 0x141   : > { %1803 = vmatpush2.bf16.msra.mxu1 %v2459_v14  ;;  %1761 = vmatprep.subr.bf16.mxu0 %v2464_v15 }
 0x142   : > { %1804 = vmatprep.subr.bf16.mxu1 %v2467_v16 }
 0x144   : > { %1762 = vmatpush2.bf16.msra.mxu0 %v2462_v17 }
 0x145   : > { %1805 = vmatpush2.bf16.msra.mxu1 %v2465_v18  ;;  %1763 = vmatprep.subr.bf16.mxu0 %v2470_v19 }
 0x146   : > { %1806 = vmatprep.subr.bf16.mxu1 %v2473_v20 }
 0x148   : > { %1764 = vmatpush2.bf16.msra.mxu0 %v2468_v21 }
 0x149   : > { %1807 = vmatpush2.bf16.msra.mxu1 %v2471_v22 }
 0x14b   : > { %1766 = vmatmul.mubr.bf16.vlgmr.msra.gmra.mxu0 %v2048_v23 }
 0x14c   : > { %1809 = vmatmul.mubr.bf16.vlgmr.msra.gmra.mxu1 %v2050_v24 }
 0x1cb   : > { %v1681_v25 = vpop.f32.mrf.mxu0 }
 0x1cc   : > { %v1724_v26 = vpop.f32.mrf.mxu1 }
 0x1cd   : > { %v1683_v27 = vpop.f32.mrf.mxu0  ;;  %v1725_v33 = vadd.f32 %v1724_v26, %v1681_v25 }
 0x1ce   : > { %v1726_v28 = vpop.f32.mrf.mxu1 }
 0x1cf   : > { %v1685_v29 = vpop.f32.mrf.mxu0  ;;  %v1727_v36 = vadd.f32 %v1726_v28, %v1683_v27 }
 0x1d0   : > { %v1728_v30 = vpop.f32.mrf.mxu1 }
 0x1d1   : > { %v1687_v31 = vpop.f32.mrf.mxu0  ;;  %v1729_v41 = vadd.f32 %v1728_v30, %v1685_v29 }
 0x1d2   : > { %v1730_v32 = vpop.f32.mrf.mxu1 }
 0x1d3   : > { %v1731_v47 = vadd.f32 %v1730_v32, %v1687_v31 }
 0x20b   : > { %v1767_v34 = vpop.f32.mrf.mxu0 }
 0x20c   : > { %v1810_v35 = vpop.f32.mrf.mxu1  ;;  %v1768_v37 = vadd.f32 %v1767_v34, %v1725_v33 }
 0x20d   : > { %v1769_v39 = vpop.f32.mrf.mxu0 }
 0x20e   : > { %v1812_v40 = vpop.f32.mrf.mxu1  ;;  %v1811_v42 = vadd.f32 %v1810_v35, %v1768_v37  ;;  %v1770_v43 = vadd.f32 %v1769_v39, %v1727_v36 }
 0x20f   : > { %v1771_v45 = vpop.f32.mrf.mxu0 }
 0x210   : > { %v1814_v46 = vpop.f32.mrf.mxu1  ;;  %v1819_v48 = vadd.f32 %v1811_v42, %v827_v38  ;;  %v1813_v49 = vadd.f32 %v1812_v40, %v1770_v43  ;;  %v1772_v50 = vadd.f32 %v1771_v45, %v1729_v41 }
 0x211   : > { %v1773_v52 = vpop.f32.mrf.mxu0 }
 0x212   : > { %1823 = vst [vmem:[#allocation2 + $0x10] sm:$0xff] %v1819_v48  ;;  %v1820_v53 = vadd.f32 %v1813_v49, %v828_v44  ;;  %v1815_v54 = vadd.f32 %v1814_v46, %v1772_v50  ;;  %v1774_v55 = vadd.f32 %v1773_v52, %v1731_v47  ;;  %v1816_v57 = vpop.f32.mrf.mxu1 }
 0x214   : > { %1824 = vst [vmem:[#allocation2] sm:$0xff] %v1820_v53  ;;  %v1821_v58 = vadd.f32 %v1815_v54, %v829_v51  ;;  %v1817_v59 = vadd.f32 %v1816_v57, %v1774_v55  ;;  %1830 = sbr.rel (%p2180_p5) target bundleno = 552 (0x228), region = 101 }
 0x216   : > { %1825 = vst [vmem:[#allocation2 + $0x18] sm:$0xff] %v1821_v58  ;;  %v1822_v60 = vadd.f32 %v1817_v59, %v830_v56 }
 0x218   : > { %1826 = vst [vmem:[#allocation2 + $0x8] sm:$0xff] %v1822_v60 }
 0x219   : > { %v1837_v61 = vlaneseq  ;;  %v1835_v63 = vld [vmem:[%s815_s29] sm:$0x3]  ;;  %v1831_v0 = vld [vmem:[#allocation2 + $0x10] sm:$0xff] }
 0x21b   : > { %v1838_v62 = vshrl.u32 %v1837_v61, 7  ;;  %v1832_v3 = vld [vmem:[#allocation2] sm:$0xff] }
 0x21d   : > { %v1839_v1 = vsub.s32 0, %v1838_v62  ;;  %v1843_v2 = vsub.s32 1, %v1838_v62  ;;  %v1833_v4 = vld [vmem:[#allocation2 + $0x18] sm:$0xff] }
 0x21f   : > { %v1834_v5 = vld [vmem:[#allocation2 + $0x8] sm:$0xff]  ;;  %v1840_v6 = vrot.slane %v1835_v63, %v1839_v1  ;;  %v1844_v7 = vrot.slane %v1835_v63, %v1843_v2 }
 0x221   : > { %v1847_v8 = vadd.f32 %v1840_v6, %v1831_v0  ;;  %v1848_v9 = vadd.f32 %v1844_v7, %v1832_v3  ;;  %v1849_v10 = vadd.f32 %v1840_v6, %v1833_v4  ;;  %v1850_v11 = vadd.f32 %v1844_v7, %v1834_v5 }
 0x223   : > { %v1851_v12 = vmax.f32 %v1847_v8, 0.0  ;;  %v1852_v13 = vmax.f32 %v1848_v9, 0.0  ;;  %v1853_v14 = vmax.f32 %v1849_v10, 0.0  ;;  %v1854_v15 = vmax.f32 %v1850_v11, 0.0 }
 0x225   : > { %v2190_v16 = vpack.c.bf16 %v1852_v13, %v1851_v12  ;;  %v2191_v17 = vpack.c.bf16 %v1854_v15, %v1853_v14 }
 0x227   : > { %1867 = vst [vmem:[%s2973_s1] sm:$0xff] %v2190_v16  ;;  %1868 = vst [vmem:[%s2973_s1 + $0x8] sm:$0xff] %v2191_v17 }
 0x228 PF: > { %1875 = sbr.rel (!%p2677_p12) target bundleno = 560 (0x230), region = 105  ;;  %s2192_s16 = sshll.u32 (%p2677_p12), %s2548_s19, 3 }
 0x229   : > { %s1881_s5 = scalar_lea.vmem (%p2677_p12), %s3180_s3, %s2192_s16 }
 0x22e   : > { %v1912_v18 = vld [vmem:[%s2973_s1] sm:$0xff]  ;;  %v1914_v19 = vld [vmem:[%s2973_s1 + $0x8] sm:$0xff] }
 0x22f   : > { %1913 = vst [vmem:[%s1881_s5] sm:$0xff] %v1912_v18  ;;  %1915 = vst [vmem:[%s1881_s5 + $0x80] sm:$0xff] %v1914_v19 }
 0x230 PF: > { %s13_s22 = sadd.s32 1, %s2560_s22   ;;  %s3190_s1 = sld [smem:[#allocation6_spill]] }
 0x231   : > { %p10_p6 = scmp.ge.s32.totalorder %s13_s22, 66   ;;  %s3191_s12 = smov %s2524_s13 }
 0x232   : > { %s3192_s13 = smov %s2675_s9  ;;  %s3193_s14 = smov %s2532_s15 }
 0x233   : > { %s3194_s15 = smov %s2672_s8  ;;  %s3195_s16 = smov %s2540_s17 }
 0x234   : > { %s3196_s17 = smov %s2658_s30  ;;  %s3197_s18 = smov %s2552_s20 }
 0x235   : > { %s3198_s19 = smov %s2556_s21  ;;  %s3199_s20 = smov %s3202_s24 }
 0x236   : > { %s3200_s21 = smov %s3190_s1  ;;  %12 = sbr.rel (!%p10_p6) target bundleno = 9 (0x9), region = 185 }

// kernel: _lambda_.23
= control target key start
LH: loop header
LB: loop body
LE: loop exit
PB: predicated region body
PF: predicated region fallthrough
CT: control target
= control target key end

     0   :  { %s1497_s12 = smov 0   ;;  %s1499_s13 = smov 0   ;;  %s1649_s0 = inlined_call_operand.vmem [shape: bf16[16,4096], index: 0, kind: input, shape index: {}]   ;;  %s1650_s1 = inlined_call_operand.vmem [shape: bf16[4096,128], index: 1, kind: input, shape index: {}]   ;;  %s1651_s2 = inlined_call_operand.vmem [shape: f32[1,128], index: 2, kind: input, shape index: {}]   ;;  %s1652_s3 = inlined_call_operand.vmem [shape: f32[16,128], index: 3, kind: output, shape index: {}]  }
   0x1   :  { %s1501_s14 = smov 0   ;;  %s1503_s15 = smov 0  }
   0x2   :  { %s1505_s16 = smov 0  }
   0x3 LB: > { %s25_s17 = sadd.s32 1, %s1470_s15  ;;  %p48_p1 = scmp.ne.s32.totalorder %s1462_s13, %s1458_s12  ;;  %s1474_s16 = sphi %s1505_s16, %s13_s16   ;;  %s1470_s15 = sphi %s1503_s15, %s1656_s15   ;;  %s1466_s14 = sphi %s1501_s14, %s1655_s14   ;;  %s1462_s13 = sphi %s1499_s13, %s1654_s13   ;;  %s1458_s12 = sphi %s1497_s12, %s1653_s12  }
   0x4   : > { %p26_p0 = scmp.ge.s32.totalorder %s25_s17, 4  ;;  %p49_p2 = scmp.eq.s32.totalorder %s1474_s16, 0 }
   0x5   : > { %s41_s19 = sadd.s32 1, %s1462_s13  ;;  %p1155_p5 = scmp.ge.s32.totalorder %s1474_s16, 4 }
   0x6   : > { %s1658_s17 = smov (%p26_p0, %s25_s17), 0  ;;  %p50_p3 = por %p49_p2, %p48_p1 }
   0x7   : > { %s37_s18 = ssub.s32 %s1470_s15, %s1658_s17  ;;  %162 = sbr.rel (%p1155_p5) target bundleno = 20 (0x14), region = 20 }
   0x8   : > { %p39_p4 = scmp.eq.s32.totalorder %s37_s18, 0 }
   0xa   : > { %s1532_s20 = scalar_select %p39_p4, %s1462_s13, %s41_s19  }
   0xc   : > { %165 = sbr.rel (!%p50_p3) target bundleno = 20 (0x14), region = 24  ;;  %s167_s21 = sand.u32 (%p50_p3), 1, %s1462_s13  }
   0xd   : > { %s1242_s22 = sshll.u32 (%p50_p3), %s1470_s15, 5  ;;  %s1156_s23 = sshll.u32 (%p50_p3), %s167_s21, 6 }
   0xe   : > { %s175_s26 = scalar_lea.vmem (%p50_p3), %s1649_s0, %s1242_s22  ;;  %s169_s27 = scalar_lea.vmem (%p50_p3), [#allocation3], %s1156_s23 }
   0xf   : > { %v188_v0 = vld [vmem:[%s175_s26] sm:$0xff] (%p50_p3)  ;;  %v190_v1 = vld [vmem:[%s175_s26 + $0x8] sm:$0xff] (%p50_p3)  ;;  %v192_v2 = vld [vmem:[%s175_s26 + $0x10] sm:$0xff] (%p50_p3) }
  0x10   : > { %189 = vst [vmem:[%s169_s27] sm:$0xff] (%p50_p3), %v188_v0  ;;  %191 = vst [vmem:[%s169_s27 + $0x8] sm:$0xff] (%p50_p3), %v190_v1  ;;  %v194_v3 = vld [vmem:[%s175_s26 + $0x18] sm:$0xff] (%p50_p3)  ;;  %v196_v4 = vld [vmem:[%s175_s26 + $0x80] sm:$0xff] (%p50_p3) }
  0x11   : > { %193 = vst [vmem:[%s169_s27 + $0x10] sm:$0xff] %v192_v2  ;;  %v198_v5 = vld [vmem:[%s175_s26 + $0x88] sm:$0xff]  ;;  %195 = vst [vmem:[%s169_s27 + $0x18] sm:$0xff] %v194_v3  ;;  %v200_v6 = vld [vmem:[%s175_s26 + $0x90] sm:$0xff] }
  0x12   : > { %197 = vst [vmem:[%s169_s27 + $0x20] sm:$0xff] %v196_v4  ;;  %199 = vst [vmem:[%s169_s27 + $0x28] sm:$0xff] %v198_v5  ;;  %v202_v7 = vld [vmem:[%s175_s26 + $0x98] sm:$0xff] }
  0x13   : > { %201 = vst [vmem:[%s169_s27 + $0x30] sm:$0xff] %v200_v6  ;;  %203 = vst [vmem:[%s169_s27 + $0x38] sm:$0xff] %v202_v7 }
  0x14 PF: > { %p1159_p6 = scmp.ge.s32.totalorder %s1474_s16, 1  ;;  %p220_p7 = scmp.lt.s32.totalorder %s1474_s16, 5 }
  0x16   : > { %p221_p8 = pnand %p1159_p6, %p220_p7 }
  0x17   : > { %s227_s28 = sand.u32 (!%p221_p8), 1, %s1458_s12   ;;  %s1161_s29 = sshll.u32 (!%p221_p8), %s1466_s14, 7 }
  0x18   : > { %224 = sbr.rel (%p221_p8) target bundleno = 320 (0x140), region = 51  ;;  %s1160_s30 = sshll.u32 (!%p221_p8), %s227_s28, 6 }
  0x19   : > { %p267_p9 = scmp.lt.s32.totalorder (!%p221_p8), %s1161_s29, 511  ;;  %s1549_s8 = scalar_lea.vmem (!%p221_p8), [#allocation3], %s1160_s30 }
  0x1a   : > { %p1163_p10 = scmp.ne.s32.totalorder (!%p221_p8), %s1466_s14, 0 }
  0x1d   : > { %s1660_s29 = smov (!%p267_p9, %s1161_s29), 511  ;;  %291 = sbr.rel (%p1163_p10) target bundleno = 36 (0x24), region = 59 }
  0x1e   : > { %s1162_s4 = sshll.u32 %s1660_s29, 2 }
  0x1f   : > { %s1547_s7 = scalar_lea.vmem %s1650_s1, %s1162_s4 }
  0x22   : > { %v1476_v8 = vmov 0.0  }
  0x23   : > { %292 = vst [vmem:[#allocation2] sm:$0xff] %v1476_v8  ;;  %293 = vst [vmem:[#allocation2 + $0x8] sm:$0xff] %v1476_v8 }
  0x24 PF: > { %v1372_v9 = vld [vmem:[%s1547_s7 + $0x78] sm:$0xff]   ;;  %v1376_v13 = vld [vmem:[%s1547_s7 + $0x70] sm:$0xff]   ;;  %v1380_v17 = vld [vmem:[%s1547_s7 + $0x68] sm:$0xff]   ;;  %p1236_p11 = scmp.ne.s32.totalorder %s1466_s14, 3 }
  0x25   : > { %v1373_v10 = vld [vmem:[%s1547_s7 + $0xf8] sm:$0xff]   ;;  %1243 = vmatprep.subr.bf16.mxu0 %v1372_v9  ;;  %v1377_v14 = vld [vmem:[%s1547_s7 + $0xf0] sm:$0xff]   ;;  %v1381_v18 = vld [vmem:[%s1547_s7 + $0xe8] sm:$0xff]  }
  0x26   : > { %v1374_v11 = vld [vmem:[%s1547_s7 + $0x38] sm:$0xff]   ;;  %1265 = vmatprep.subr.bf16.mxu1 %v1373_v10  ;;  %v1378_v15 = vld [vmem:[%s1547_s7 + $0x30] sm:$0xff]   ;;  %v1382_v19 = vld [vmem:[%s1547_s7 + $0x28] sm:$0xff]  }
  0x27   : > { %v1375_v12 = vld [vmem:[%s1547_s7 + $0xb8] sm:$0xff]   ;;  %1244 = vmatpush3.bf16.msra.mxu0 %v1374_v11  ;;  %v1379_v16 = vld [vmem:[%s1547_s7 + $0xb0] sm:$0xff]   ;;  %v1383_v20 = vld [vmem:[%s1547_s7 + $0xa8] sm:$0xff]  }
  0x28   : > { %1266 = vmatpush3.bf16.msra.mxu1 %v1375_v12  ;;  %1245 = vmatprep.subr.bf16.mxu0 %v1376_v13  ;;  %v1384_v21 = vld [vmem:[%s1547_s7 + $0x60] sm:$0xff]   ;;  %v1388_v25 = vld [vmem:[%s1547_s7 + $0x58] sm:$0xff]   ;;  %v1392_v29 = vld [vmem:[%s1547_s7 + $0x50] sm:$0xff]  }
  0x29   : > { %1267 = vmatprep.subr.bf16.mxu1 %v1377_v14  ;;  %v1385_v22 = vld [vmem:[%s1547_s7 + $0xe0] sm:$0xff]   ;;  %v1389_v26 = vld [vmem:[%s1547_s7 + $0xd8] sm:$0xff]   ;;  %v1393_v30 = vld [vmem:[%s1547_s7 + $0xd0] sm:$0xff]  }
  0x2a   : > { %v1386_v23 = vld [vmem:[%s1547_s7 + $0x20] sm:$0xff]   ;;  %v1390_v27 = vld [vmem:[%s1547_s7 + $0x18] sm:$0xff]   ;;  %v1394_v31 = vld [vmem:[%s1547_s7 + $0x10] sm:$0xff]  }
  0x2b   : > { %1246 = vmatpush3.bf16.msra.mxu0 %v1378_v15  ;;  %v1387_v24 = vld [vmem:[%s1547_s7 + $0xa0] sm:$0xff]   ;;  %v1391_v28 = vld [vmem:[%s1547_s7 + $0x98] sm:$0xff]   ;;  %v1395_v32 = vld [vmem:[%s1547_s7 + $0x90] sm:$0xff]  }
  0x2c   : > { %1268 = vmatpush3.bf16.msra.mxu1 %v1379_v16  ;;  %1247 = vmatprep.subr.bf16.mxu0 %v1380_v17  ;;  %v1396_v33 = vld [vmem:[%s1547_s7 + $0x48] sm:$0xff]   ;;  %v1400_v37 = vld [vmem:[%s1547_s7 + $0x40] sm:$0xff]   ;;  %v296_v41 = vld [vmem:[%s1549_s8] sm:$0xff] }
  0x2d   : > { %1269 = vmatprep.subr.bf16.mxu1 %v1381_v18  ;;  %v1397_v34 = vld [vmem:[%s1547_s7 + $0xc8] sm:$0xff]   ;;  %v1401_v38 = vld [vmem:[%s1547_s7 + $0xc0] sm:$0xff]   ;;  %v300_v42 = vld [vmem:[%s1549_s8 + $0x20] sm:$0xff] }
  0x2e   : > { %v1398_v35 = vld [vmem:[%s1547_s7 + $0x8] sm:$0xff]   ;;  %v1402_v39 = vld [vmem:[%s1547_s7] sm:$0xff]   ;;  %v297_v43 = vld [vmem:[%s1549_s8 + $0x8] sm:$0xff]  ;;  %v1164_v44 = vcombine.low %v296_v41, %v300_v42  ;;  %v1165_v45 = vcombine.high %v296_v41, %v300_v42 }
  0x2f   : > { %1248 = vmatpush3.bf16.msra.mxu0 %v1382_v19  ;;  %v1399_v36 = vld [vmem:[%s1547_s7 + $0x88] sm:$0xff]   ;;  %v1403_v40 = vld [vmem:[%s1547_s7 + $0x80] sm:$0xff]   ;;  %v301_v46 = vld [vmem:[%s1549_s8 + $0x28] sm:$0xff] }
  0x30   : > { %1270 = vmatpush3.bf16.msra.mxu1 %v1383_v20  ;;  %1249 = vmatprep.subr.bf16.mxu0 %v1384_v21  ;;  %v1166_v47 = vcombine.low %v297_v43, %v301_v46  ;;  %v1167_v48 = vcombine.high %v297_v43, %v301_v46  ;;  %v1404_v49 = vld [vmem:[%s1547_s7 + $0x178] sm:$0xff]   ;;  %v1408_v53 = vld [vmem:[%s1547_s7 + $0x170] sm:$0xff]   ;;  %v1412_v57 = vld [vmem:[%s1547_s7 + $0x168] sm:$0xff]  }
  0x31   : > { %1271 = vmatprep.subr.bf16.mxu1 %v1385_v22  ;;  %888 = vmatprep.mubr.bf16.mxu0 %v1165_v45  ;;  %v1405_v50 = vld [vmem:[%s1547_s7 + $0x1f8] sm:$0xff]   ;;  %v1409_v54 = vld [vmem:[%s1547_s7 + $0x1f0] sm:$0xff]   ;;  %v1413_v58 = vld [vmem:[%s1547_s7 + $0x1e8] sm:$0xff]  }
  0x32   : > { %929 = vmatprep.mubr.bf16.mxu1 %v1167_v48  ;;  %v1406_v51 = vld [vmem:[%s1547_s7 + $0x138] sm:$0xff]   ;;  %v1410_v55 = vld [vmem:[%s1547_s7 + $0x130] sm:$0xff]   ;;  %v1414_v59 = vld [vmem:[%s1547_s7 + $0x128] sm:$0xff]  }
  0x33   : > { %1250 = vmatpush3.bf16.msra.mxu0 %v1386_v23  ;;  %v1407_v52 = vld [vmem:[%s1547_s7 + $0x1b8] sm:$0xff]   ;;  %v1411_v56 = vld [vmem:[%s1547_s7 + $0x1b0] sm:$0xff]   ;;  %v1415_v60 = vld [vmem:[%s1547_s7 + $0x1a8] sm:$0xff]  }
  0x34   : > { %1272 = vmatpush3.bf16.msra.mxu1 %v1387_v24  ;;  %1251 = vmatprep.subr.bf16.mxu0 %v1388_v25  ;;  %v1416_v61 = vld [vmem:[%s1547_s7 + $0x160] sm:$0xff]   ;;  %v1420_v1 = vld [vmem:[%s1547_s7 + $0x158] sm:$0xff]   ;;  %v1424_v5 = vld [vmem:[%s1547_s7 + $0x150] sm:$0xff]  }
  0x35   : > { %1273 = vmatprep.subr.bf16.mxu1 %v1389_v26  ;;  %v1417_v62 = vld [vmem:[%s1547_s7 + $0x1e0] sm:$0xff]   ;;  %v1421_v2 = vld [vmem:[%s1547_s7 + $0x1d8] sm:$0xff]   ;;  %v1425_v6 = vld [vmem:[%s1547_s7 + $0x1d0] sm:$0xff]  }
  0x36   : > { %v1418_v63 = vld [vmem:[%s1547_s7 + $0x120] sm:$0xff]   ;;  %v1422_v3 = vld [vmem:[%s1547_s7 + $0x118] sm:$0xff]   ;;  %v1426_v7 = vld [vmem:[%s1547_s7 + $0x110] sm:$0xff]  }
  0x37   : > { %1252 = vmatpush3.bf16.msra.mxu0 %v1390_v27  ;;  %v1419_v0 = vld [vmem:[%s1547_s7 + $0x1a0] sm:$0xff]   ;;  %v1423_v4 = vld [vmem:[%s1547_s7 + $0x198] sm:$0xff]   ;;  %v1427_v8 = vld [vmem:[%s1547_s7 + $0x190] sm:$0xff]  }
  0x38   : > { %1274 = vmatpush3.bf16.msra.mxu1 %v1391_v28  ;;  %1253 = vmatprep.subr.bf16.mxu0 %v1392_v29  ;;  %v1428_v9 = vld [vmem:[%s1547_s7 + $0x148] sm:$0xff]   ;;  %v1432_v13 = vld [vmem:[%s1547_s7 + $0x140] sm:$0xff]  }
  0x39   : > { %1275 = vmatprep.subr.bf16.mxu1 %v1393_v30  ;;  %v1429_v10 = vld [vmem:[%s1547_s7 + $0x1c8] sm:$0xff]   ;;  %v1433_v14 = vld [vmem:[%s1547_s7 + $0x1c0] sm:$0xff]  }
  0x3a   : > { %v1430_v11 = vld [vmem:[%s1547_s7 + $0x108] sm:$0xff]   ;;  %v1434_v15 = vld [vmem:[%s1547_s7 + $0x100] sm:$0xff]  }
  0x3b   : > { %1254 = vmatpush3.bf16.msra.mxu0 %v1394_v31  ;;  %v1431_v12 = vld [vmem:[%s1547_s7 + $0x188] sm:$0xff]   ;;  %v1435_v16 = vld [vmem:[%s1547_s7 + $0x180] sm:$0xff]  }
  0x3c   : > { %1276 = vmatpush3.bf16.msra.mxu1 %v1395_v32  ;;  %1255 = vmatprep.subr.bf16.mxu0 %v1396_v33  ;;  %v298_v17 = vld [vmem:[%s1549_s8 + $0x10] sm:$0xff]  ;;  %v299_v21 = vld [vmem:[%s1549_s8 + $0x18] sm:$0xff] }
  0x3d   : > { %1277 = vmatprep.subr.bf16.mxu1 %v1397_v34  ;;  %v302_v18 = vld [vmem:[%s1549_s8 + $0x30] sm:$0xff]  ;;  %v303_v22 = vld [vmem:[%s1549_s8 + $0x38] sm:$0xff] }
  0x3e   : > { %v1168_v19 = vcombine.low %v298_v17, %v302_v18  ;;  %v1169_v20 = vcombine.high %v298_v17, %v302_v18  ;;  %v1170_v23 = vcombine.low %v299_v21, %v303_v22  ;;  %v1171_v24 = vcombine.high %v299_v21, %v303_v22 }
  0x3f   : > { %1256 = vmatpush3.bf16.msra.mxu0 %v1398_v35 }
  0x40   : > { %1278 = vmatpush3.bf16.msra.mxu1 %v1399_v36  ;;  %1257 = vmatprep.subr.bf16.mxu0 %v1400_v37 }
  0x41   : > { %1279 = vmatprep.subr.bf16.mxu1 %v1401_v38 }
  0x43   : > { %1258 = vmatpush3.bf16.msra.mxu0 %v1402_v39 }
  0x44   : > { %1280 = vmatpush3.bf16.msra.mxu1 %v1403_v40  ;;  %1287 = vmatprep.subr.bf16.mxu0 %v1404_v49 }
  0x45   : > { %1309 = vmatprep.subr.bf16.mxu1 %v1405_v50 }
  0x46   : > { %889 = vmatmul.mubr.bf16.vlgmr.msra.gmra.mxu0 %v1164_v44 }
  0x47   : > { %930 = vmatmul.mubr.bf16.vlgmr.msra.gmra.mxu1 %v1166_v47  ;;  %1288 = vmatpush3.bf16.msra.mxu0 %v1406_v51  ;;  %v294_v47 = vld [vmem:[#allocation2] sm:$0xff] }
  0x48   : > { %1310 = vmatpush3.bf16.msra.mxu1 %v1407_v52  ;;  %1289 = vmatprep.subr.bf16.mxu0 %v1408_v53 }
  0x49   : > { %1311 = vmatprep.subr.bf16.mxu1 %v1409_v54  ;;  %970 = vmatprep.mubr.bf16.mxu0 %v1169_v20 }
  0x4a   : > { %1011 = vmatprep.mubr.bf16.mxu1 %v1171_v24 }
  0x4b   : > { %1290 = vmatpush3.bf16.msra.mxu0 %v1410_v55 }
  0x4c   : > { %1312 = vmatpush3.bf16.msra.mxu1 %v1411_v56  ;;  %1291 = vmatprep.subr.bf16.mxu0 %v1412_v57  ;;  %v295_v56 = vld [vmem:[#allocation2 + $0x8] sm:$0xff] }
  0x4d   : > { %1313 = vmatprep.subr.bf16.mxu1 %v1413_v58 }
  0x4f   : > { %1292 = vmatpush3.bf16.msra.mxu0 %v1414_v59 }
  0x50   : > { %1314 = vmatpush3.bf16.msra.mxu1 %v1415_v60  ;;  %1293 = vmatprep.subr.bf16.mxu0 %v1416_v61 }
  0x51   : > { %1315 = vmatprep.subr.bf16.mxu1 %v1417_v62 }
  0x53   : > { %1294 = vmatpush3.bf16.msra.mxu0 %v1418_v63 }
  0x54   : > { %1316 = vmatpush3.bf16.msra.mxu1 %v1419_v0  ;;  %1295 = vmatprep.subr.bf16.mxu0 %v1420_v1 }
  0x55   : > { %1317 = vmatprep.subr.bf16.mxu1 %v1421_v2 }
  0x57   : > { %1296 = vmatpush3.bf16.msra.mxu0 %v1422_v3 }
  0x58   : > { %1318 = vmatpush3.bf16.msra.mxu1 %v1423_v4  ;;  %1297 = vmatprep.subr.bf16.mxu0 %v1424_v5 }
  0x59   : > { %1319 = vmatprep.subr.bf16.mxu1 %v1425_v6 }
  0x5b   : > { %1298 = vmatpush3.bf16.msra.mxu0 %v1426_v7 }
  0x5c   : > { %1320 = vmatpush3.bf16.msra.mxu1 %v1427_v8  ;;  %1299 = vmatprep.subr.bf16.mxu0 %v1428_v9 }
  0x5d   : > { %1321 = vmatprep.subr.bf16.mxu1 %v1429_v10 }
  0x5f   : > { %1300 = vmatpush3.bf16.msra.mxu0 %v1430_v11 }
  0x60   : > { %1322 = vmatpush3.bf16.msra.mxu1 %v1431_v12  ;;  %1301 = vmatprep.subr.bf16.mxu0 %v1432_v13 }
  0x61   : > { %1323 = vmatprep.subr.bf16.mxu1 %v1433_v14 }
  0x63   : > { %1302 = vmatpush3.bf16.msra.mxu0 %v1434_v15 }
  0x64   : > { %1324 = vmatpush3.bf16.msra.mxu1 %v1435_v16 }
  0x66   : > { %971 = vmatmul.mubr.bf16.vlgmr.msra.gmra.mxu0 %v1168_v19 }
  0x67   : > { %1012 = vmatmul.mubr.bf16.vlgmr.msra.gmra.mxu1 %v1170_v23 }
 0x106   : > { %v1259_v25 = vpop.f32.mrf.mxu0 }
 0x107   : > { %v1281_v26 = vpop.f32.mrf.mxu1 }
 0x108   : > { %v1260_v27 = vpop.f32.mrf.mxu0 }
 0x109   : > { %v1282_v28 = vpop.f32.mrf.mxu1  ;;  %v1261_v32 = vadd.f32 %v1260_v27, %v1259_v25 }
 0x10a   : > { %v1262_v29 = vpop.f32.mrf.mxu0  ;;  %v1283_v33 = vadd.f32 %v1282_v28, %v1281_v26 }
 0x10b   : > { %v1284_v30 = vpop.f32.mrf.mxu1 }
 0x10c   : > { %v1263_v31 = vpop.f32.mrf.mxu0  ;;  %v932_v38 = vadd.f32 %v1283_v33, %v1261_v32 }
 0x10d   : > { %v1285_v34 = vpop.f32.mrf.mxu1  ;;  %v1264_v39 = vadd.f32 %v1263_v31, %v1262_v29 }
 0x10e   : > { %v1286_v40 = vadd.f32 %v1285_v34, %v1284_v30 }
 0x110   : > { %v935_v49 = vadd.f32 %v1286_v40, %v1264_v39 }
 0x126   : > { %v1303_v35 = vpop.f32.mrf.mxu0 }
 0x127   : > { %v1325_v36 = vpop.f32.mrf.mxu1 }
 0x128   : > { %v1304_v37 = vpop.f32.mrf.mxu0 }
 0x129   : > { %v1305_v41 = vadd.f32 %v1304_v37, %v1303_v35  ;;  %v1326_v42 = vpop.f32.mrf.mxu1 }
 0x12a   : > { %v1306_v43 = vpop.f32.mrf.mxu0  ;;  %v1327_v45 = vadd.f32 %v1326_v42, %v1325_v36 }
 0x12b   : > { %v973_v44 = vadd.f32 %v1305_v41, %v932_v38  ;;  %v1328_v46 = vpop.f32.mrf.mxu1 }
 0x12c   : > { %v1307_v48 = vpop.f32.mrf.mxu0 }
 0x12d   : > { %v1014_v50 = vadd.f32 %v1327_v45, %v973_v44  ;;  %v1308_v51 = vadd.f32 %v1307_v48, %v1306_v43  ;;  %v1329_v52 = vpop.f32.mrf.mxu1 }
 0x12e   : > { %v1330_v55 = vadd.f32 %v1329_v52, %v1328_v46 }
 0x12f   : > { %v1020_v53 = vadd.f32 %v1014_v50, %v294_v47  ;;  %v976_v54 = vadd.f32 %v1308_v51, %v935_v49 }
 0x131   : > { %1022 = vst [vmem:[#allocation2] sm:$0xff] %v1020_v53  ;;  %v1017_v57 = vadd.f32 %v1330_v55, %v976_v54  ;;  %1027 = sbr.rel (%p1236_p11) target bundleno = 320 (0x140), region = 63 }
 0x133   : > { %v1021_v58 = vadd.f32 %v1017_v57, %v295_v56 }
 0x135   : > { %1023 = vst [vmem:[#allocation2 + $0x8] sm:$0xff] %v1021_v58 }
 0x136   : > { %v1237_v60 = vld [vmem:[%s1651_s2] ss:$0 sm:$0xff] }
 0x138   : > { %v1028_v59 = vld [vmem:[#allocation2] sm:$0xff] }
 0x139   : > { %v1037_v62 = vadd.f32 %v1237_v60, %v1028_v59 }
 0x13b   : > { %1039 = vst [vmem:[%s1652_s3] sm:$0xff] %v1037_v62 }
 0x13c   : > { %v1029_v61 = vld [vmem:[#allocation2 + $0x8] sm:$0xff] }
 0x13d   : > { %v1038_v63 = vadd.f32 %v1237_v60, %v1029_v61 }
 0x13f   : > { %1040 = vst [vmem:[%s1652_s3 + $0x8] sm:$0xff] %v1038_v63 }
 0x140 PF: > { %s13_s16 = sadd.s32 1, %s1474_s16   ;;  %s1653_s12 = smov %s1462_s13 }
 0x141   : > { %p10_p12 = scmp.ge.s32.totalorder %s13_s16, 6   ;;  %s1654_s13 = smov %s1532_s20 }
 0x142   : > { %s1655_s14 = smov %s1470_s15  ;;  %s1656_s15 = smov %s1658_s17 }
 0x143   :  { %12 = sbr.rel (!%p10_p12) target bundleno = 3 (0x3), region = 104 }

</bundles_post_ra>
